<compile_context>
chip_gen: v7x
topology: tpu7x:2x2x1
jax: 0.10.0
libtpu: 0.0.40
codegen_flags: <defaults>
</compile_context>

<pallas_src>
import jax
import jax.numpy as jnp
from jax.experimental import pallas as pl
from jax.experimental.pallas import tpu as pltpu

EPS = 1e-5


def _mish(x):
    # mish(x) = x * tanh(softplus(x)); with t = e^x:
    #   tanh(log1p(t)) = t*(t+2) / (t*(t+2) + 2)
    # -> one transcendental (exp) + an EUP approximate reciprocal.
    t = jnp.exp(jnp.minimum(x, 20.0))
    u = t * (t + 2.0)
    y = x * u * pl.reciprocal(u + 2.0, approx=True)
    return jnp.where(x > 20.0, x, y)  # for large x, mish(x) ~= x


# ----------------------------------------------------------------------------
# Single fused kernel: conv1 -> pool -> conv2 -> pool -> fc1 -> fc2
# ----------------------------------------------------------------------------
def tuned_cnn_kernel(x_ref, w1_ref, s1_ref, t1_ref,
                     w2_ref, s2_ref, t2_ref,
                     wf1_ref, sf1_ref, tf1_ref,
                     wf2_ref, sf2_ref, tf2_ref,
                     o_ref,
                     xp1_ref, buf1_ref, xp2_ref, buf2_ref):
    N, H, W, _ = x_ref.shape
    C1 = w1_ref.shape[1]          # 64
    C2 = w2_ref.shape[1]          # 128
    H2, W2 = H // 2, W // 2
    H4, W4 = H2 // 2, W2 // 2

    # ---------------- conv1 (3x3, pad=1) + BN + mish ----------------
    # halo padding directly in VMEM scratch (no padded HBM copy in the wrapper)
    xp1_ref[...] = jnp.zeros_like(xp1_ref)
    xp1_ref[:, 1:H + 1, 1:W + 1, :] = x_ref[...]
    xp1 = xp1_ref[...]                                      # (N, H+2, W+2, 1)

    # im2col: one (N*H*W, 9) x (9, C1) MXU matmul instead of 9 rank-1 updates
    cols = [xp1[:, dy:dy + H, dx:dx + W, :].reshape(N * H * W, 1)
            for dy in range(3) for dx in range(3)]
    col1 = jnp.concatenate(cols, axis=1)                    # (N*H*W, 9)
    y1 = jnp.dot(col1, w1_ref[...], preferred_element_type=jnp.float32)
    y1 = _mish(y1 * s1_ref[0] + t1_ref[0])                  # (N*H*W, C1)

    # ---------------- avg-pool 2x2 (VPU adds, no pooling matmul) -------------
    # rows of y1 are (n, h, w): even/odd rows <=> even/odd w.
    buf1_ref[...] = y1
    half1 = (N * H * W) // 2
    wsum = (buf1_ref[pl.ds(0, half1, stride=2), :] +
            buf1_ref[pl.ds(1, half1, stride=2), :])         # rows (n, h, w2)
    a1 = wsum.reshape(N * H2, 2 * W2, C1)                   # sublane = (h%2, w2)
    p1 = 0.25 * (a1[:, 0:W2, :] + a1[:, W2:2 * W2, :])      # (N*H2, W2, C1)

    # ---------------- conv2 (3x3, pad=1) + BN + mish ----------------
    xp2_ref[...] = jnp.zeros_like(xp2_ref)
    xp2_ref[:, 1:H2 + 1, 1:W2 + 1, :] = p1.reshape(N, H2, W2, C1)
    xp2 = xp2_ref[...]                                      # (N, H2+2, W2+2, C1)

    cols2 = [xp2[:, dy:dy + H2, dx:dx + W2, :].reshape(N * H2 * W2, C1)
             for dy in range(3) for dx in range(3)]
    col2 = jnp.concatenate(cols2, axis=1)                   # (N*H2*W2, 9*C1)
    y2 = jnp.dot(col2, w2_ref[...], preferred_element_type=jnp.float32)
    y2 = _mish(y2 * s2_ref[0] + t2_ref[0])                  # (N*H2*W2, C2)

    # ---------------- avg-pool 2x2 ----------------
    buf2_ref[...] = y2
    half2 = (N * H2 * W2) // 2
    wsum2 = (buf2_ref[pl.ds(0, half2, stride=2), :] +
             buf2_ref[pl.ds(1, half2, stride=2), :])        # rows (n, h, w4)
    a2 = wsum2.reshape(N * H4, 2 * W4, C2)
    p2 = 0.25 * (a2[:, 0:W4, :] + a2[:, W4:2 * W4, :])      # (N*H4, W4, C2)

    # ---------------- flatten (NHWC order) + fc1 + BN + mish ----------------
    # fc1 weights are (H4*W4, C2, 256) in NHWC order, so the contraction is
    # accumulated over the spatial positions (no sublane->lane flatten relayout
    # and no NCHW transpose needed).
    act4 = p2.reshape(N, H4, W4, C2)
    z1 = jnp.zeros((N, wf1_ref.shape[2]), jnp.float32)
    for h4 in range(H4):
        for w4 in range(W4):
            z1 = z1 + jnp.dot(act4[:, h4, w4, :], wf1_ref[h4 * W4 + w4],
                              preferred_element_type=jnp.float32)
    z1 = _mish(z1 * sf1_ref[0] + tf1_ref[0])                # (N, 256)
    # dropout_fc: identity in eval mode

    # ---------------- fc2 + BN + mish ----------------
    z2 = jnp.dot(z1, wf2_ref[...], preferred_element_type=jnp.float32)
    o_ref[...] = _mish(z2 * sf2_ref[0] + tf2_ref[0]).astype(o_ref.dtype)
    # dropout_fc: identity in eval mode


def _pallas_forward(x_nhwc, w1, s1, t1, w2, s2, t2,
                    wf1, sf1, tf1, wf2, sf2, tf2):
    N, H, W, _ = x_nhwc.shape
    C1 = w1.shape[1]
    C2 = w2.shape[1]
    n_out = wf2.shape[1]
    H2, W2 = H // 2, W // 2
    return pl.pallas_call(
        tuned_cnn_kernel,
        out_shape=jax.ShapeDtypeStruct((N, n_out), jnp.float32),
        scratch_shapes=[
            pltpu.VMEM((N, H + 2, W + 2, 1), jnp.float32),     # padded conv1 in
            pltpu.VMEM((N * H * W, C1), jnp.float32),          # conv1 activation
            pltpu.VMEM((N, H2 + 2, W2 + 2, C1), jnp.float32),  # padded conv2 in
            pltpu.VMEM((N * H2 * W2, C2), jnp.float32),        # conv2 activation
        ],
    )(x_nhwc, w1, s1, t1, w2, s2, t2, wf1, sf1, tf1, wf2, sf2, tf2)


@jax.jit
def tuned_cnn_forward(x_nchw, params):
    N, C, H, W = x_nchw.shape
    assert C == 1, "TunedCNN takes single-channel input"
    # Cin == 1: NCHW -> NHWC is a pure reshape (no data movement).
    x = x_nchw.reshape(N, H, W, C).astype(jnp.float32)
    return _pallas_forward(
        x,
        params["w1"], params["s1"], params["t1"],
        params["w2"], params["s2"], params["t2"],
        params["wf1"], params["sf1"], params["tf1"],
        params["wf2"], params["sf2"], params["tf2"])


# ----------------------------------------------------------------------------
# Parameter setup / BatchNorm folding
# ----------------------------------------------------------------------------
def fold_bn(gamma, beta, mean, var, bias):
    """Eval-mode BatchNorm(y + bias) == scale * y + shift (per channel)."""
    scale = gamma / jnp.sqrt(var + EPS)
    shift = beta + scale * (bias - mean)
    return scale.reshape(1, -1), shift.reshape(1, -1)


def init_params(key, H, W):
    """Random parameters in the layouts the fused kernel consumes.

    Correspondence to PyTorch weights (if porting a checkpoint):
      w1 [ky*3+kx, cout]            = conv1.weight[cout, 0, ky, kx]
      w2 [(ky*3+kx)*64+cin, cout]   = conv2.weight[cout, cin, ky, kx]
      wf1[h4*W4+w4, cin, o]         = fc1.weight[o, cin*H4*W4 + h4*W4 + w4]
      wf2[i, o]                     = fc2.weight[o, i]
    """
    ks = jax.random.split(key, 24)

    def nrm(k, shape, s=0.05):
        return s * jax.random.normal(k, shape, jnp.float32)

    H4, W4 = H // 4, W // 4
    p = {}

    # conv1: 1 -> 64
    w1, b1 = nrm(ks[0], (9, 64)), nrm(ks[1], (64,))
    g1, be1 = 1.0 + nrm(ks[2], (64,)), nrm(ks[3], (64,))
    m1, v1 = nrm(ks[4], (64,)), 1.0 + jnp.abs(nrm(ks[5], (64,)))
    p["w1"] = w1
    p["s1"], p["t1"] = fold_bn(g1, be1, m1, v1, b1)

    # conv2: 64 -> 128
    w2, b2 = nrm(ks[6], (9 * 64, 128), 0.02), nrm(ks[7], (128,))
    g2, be2 = 1.0 + nrm(ks[8], (128,)), nrm(ks[9], (128,))
    m2, v2 = nrm(ks[10], (128,)), 1.0 + jnp.abs(nrm(ks[11], (128,)))
    p["w2"] = w2
    p["s2"], p["t2"] = fold_bn(g2, be2, m2, v2, b2)

    # fc1: 128*(H//4)*(W//4) -> 256   (128*56*56 in the original 224x224 model)
    wf1, bf1 = nrm(ks[12], (H4 * W4, 128, 256), 0.01), nrm(ks[13], (256,))
    gf1, bef1 = 1.0 + nrm(ks[14], (256,)), nrm(ks[15], (256,))
    mf1, vf1 = nrm(ks[16], (256,)), 1.0 + jnp.abs(nrm(ks[17], (256,)))
    p["wf1"] = wf1
    p["sf1"], p["tf1"] = fold_bn(gf1, bef1, mf1, vf1, bf1)

    # fc2: 256 -> 4
    wf2, bf2 = nrm(ks[18], (256, 4)), nrm(ks[19], (4,))
    gf2, bef2 = 1.0 + nrm(ks[20], (4,)), nrm(ks[21], (4,))
    mf2, vf2 = nrm(ks[22], (4,)), 1.0 + jnp.abs(nrm(ks[23], (4,)))
    p["wf2"] = wf2
    p["sf2"], p["tf2"] = fold_bn(gf2, bef2, mf2, vf2, bf2)
    return p


if __name__ == "__main__":
    key = jax.random.PRNGKey(0)
    k_x, k_p = jax.random.split(key)

    N, H, W = 2, 16, 16
    x = jax.random.normal(k_x, (N, 1, H, W), jnp.float32)   # NCHW like PyTorch
    params = init_params(k_p, H, W)

    out = tuned_cnn_forward(x, params)
    out = jax.block_until_ready(out)
    assert out.shape == (N, 4) and out.dtype == jnp.float32
    print("KERNEL_OK")
</pallas_src>

<mosaic_0001>
module attributes {stable_mosaic.version = 11 : i64} {
  func.func @tuned_cnn_kernel(%arg0: memref<2x16x16x1xf32, #tpu.memory_space<vmem>>, %arg1: memref<9x64xf32, #tpu.memory_space<vmem>>, %arg2: memref<1x64xf32, #tpu.memory_space<vmem>>, %arg3: memref<1x64xf32, #tpu.memory_space<vmem>>, %arg4: memref<576x128xf32, #tpu.memory_space<vmem>>, %arg5: memref<1x128xf32, #tpu.memory_space<vmem>>, %arg6: memref<1x128xf32, #tpu.memory_space<vmem>>, %arg7: memref<16x128x256xf32, #tpu.memory_space<vmem>>, %arg8: memref<1x256xf32, #tpu.memory_space<vmem>>, %arg9: memref<1x256xf32, #tpu.memory_space<vmem>>, %arg10: memref<256x4xf32, #tpu.memory_space<vmem>>, %arg11: memref<1x4xf32, #tpu.memory_space<vmem>>, %arg12: memref<1x4xf32, #tpu.memory_space<vmem>>, %arg13: memref<2x4xf32, #tpu.memory_space<vmem>>, %arg14: memref<2x18x18x1xf32, #tpu.memory_space<vmem>>, %arg15: memref<512x64xf32, #tpu.memory_space<vmem>>, %arg16: memref<2x10x10x64xf32, #tpu.memory_space<vmem>>, %arg17: memref<128x128xf32, #tpu.memory_space<vmem>>) attributes {dimension_semantics = [], scalar_prefetch = 0 : i64, scratch_operands = 4 : i64, tpu.core_type = #tpu.core_type<tc>} {
    %cst = arith.constant 0.000000e+00 : f32
    %0 = vector.broadcast %cst : f32 to vector<2x18x18x1xf32>
    %c0 = arith.constant 0 : index
    %c0_0 = arith.constant 0 : index
    %c0_1 = arith.constant 0 : index
    %c0_2 = arith.constant 0 : index
    %1 = vector.load %arg14[%c0, %c0_0, %c0_1, %c0_2] : memref<2x18x18x1xf32, #tpu.memory_space<vmem>>, vector<2x18x18x1xf32>
    tpu.vector_store %arg14[%c0, %c0_0, %c0_1, %c0_2], %0 {strides = array<i32>} : memref<2x18x18x1xf32, #tpu.memory_space<vmem>>, vector<2x18x18x1xf32>,
    %c0_3 = arith.constant 0 : index
    %c0_4 = arith.constant 0 : index
    %c0_5 = arith.constant 0 : index
    %c0_6 = arith.constant 0 : index
    %2 = vector.load %arg0[%c0_3, %c0_4, %c0_5, %c0_6] : memref<2x16x16x1xf32, #tpu.memory_space<vmem>>, vector<2x16x16x1xf32>
    %c0_7 = arith.constant 0 : index
    %c1 = arith.constant 1 : index
    %c1_8 = arith.constant 1 : index
    %c0_9 = arith.constant 0 : index
    %3 = vector.load %arg14[%c0_7, %c1, %c1_8, %c0_9] : memref<2x18x18x1xf32, #tpu.memory_space<vmem>>, vector<2x16x16x1xf32>
    tpu.vector_store %arg14[%c0_7, %c1, %c1_8, %c0_9], %2 {strides = array<i32>} : memref<2x18x18x1xf32, #tpu.memory_space<vmem>>, vector<2x16x16x1xf32>,
    %c0_10 = arith.constant 0 : index
    %c0_11 = arith.constant 0 : index
    %c0_12 = arith.constant 0 : index
    %c0_13 = arith.constant 0 : index
    %4 = vector.load %arg14[%c0_10, %c0_11, %c0_12, %c0_13] : memref<2x18x18x1xf32, #tpu.memory_space<vmem>>, vector<2x18x18x1xf32>
    %5 = vector.extract_strided_slice %4 {offsets = [0, 0, 0, 0], sizes = [2, 16, 16, 1], strides = [1, 1, 1, 1]} : vector<2x18x18x1xf32> to vector<2x16x16x1xf32>
    %6 = vector.shape_cast %5 : vector<2x16x16x1xf32> to vector<512x1xf32>
    %7 = vector.extract_strided_slice %4 {offsets = [0, 0, 1, 0], sizes = [2, 16, 16, 1], strides = [1, 1, 1, 1]} : vector<2x18x18x1xf32> to vector<2x16x16x1xf32>
    %8 = vector.shape_cast %7 : vector<2x16x16x1xf32> to vector<512x1xf32>
    %9 = vector.extract_strided_slice %4 {offsets = [0, 0, 2, 0], sizes = [2, 16, 16, 1], strides = [1, 1, 1, 1]} : vector<2x18x18x1xf32> to vector<2x16x16x1xf32>
    %10 = vector.shape_cast %9 : vector<2x16x16x1xf32> to vector<512x1xf32>
    %11 = vector.extract_strided_slice %4 {offsets = [0, 1, 0, 0], sizes = [2, 16, 16, 1], strides = [1, 1, 1, 1]} : vector<2x18x18x1xf32> to vector<2x16x16x1xf32>
    %12 = vector.shape_cast %11 : vector<2x16x16x1xf32> to vector<512x1xf32>
    %13 = vector.extract_strided_slice %4 {offsets = [0, 1, 1, 0], sizes = [2, 16, 16, 1], strides = [1, 1, 1, 1]} : vector<2x18x18x1xf32> to vector<2x16x16x1xf32>
    %14 = vector.shape_cast %13 : vector<2x16x16x1xf32> to vector<512x1xf32>
    %15 = vector.extract_strided_slice %4 {offsets = [0, 1, 2, 0], sizes = [2, 16, 16, 1], strides = [1, 1, 1, 1]} : vector<2x18x18x1xf32> to vector<2x16x16x1xf32>
    %16 = vector.shape_cast %15 : vector<2x16x16x1xf32> to vector<512x1xf32>
    %17 = vector.extract_strided_slice %4 {offsets = [0, 2, 0, 0], sizes = [2, 16, 16, 1], strides = [1, 1, 1, 1]} : vector<2x18x18x1xf32> to vector<2x16x16x1xf32>
    %18 = vector.shape_cast %17 : vector<2x16x16x1xf32> to vector<512x1xf32>
    %19 = vector.extract_strided_slice %4 {offsets = [0, 2, 1, 0], sizes = [2, 16, 16, 1], strides = [1, 1, 1, 1]} : vector<2x18x18x1xf32> to vector<2x16x16x1xf32>
    %20 = vector.shape_cast %19 : vector<2x16x16x1xf32> to vector<512x1xf32>
    %21 = vector.extract_strided_slice %4 {offsets = [0, 2, 2, 0], sizes = [2, 16, 16, 1], strides = [1, 1, 1, 1]} : vector<2x18x18x1xf32> to vector<2x16x16x1xf32>
    %22 = vector.shape_cast %21 : vector<2x16x16x1xf32> to vector<512x1xf32>
    %23 = tpu.concatenate %6, %8, %10, %12, %14, %16, %18, %20, %22 in 1 : vector<512x1xf32>, vector<512x1xf32>, vector<512x1xf32>, vector<512x1xf32>, vector<512x1xf32>, vector<512x1xf32>, vector<512x1xf32>, vector<512x1xf32>, vector<512x1xf32> -> vector<512x9xf32>
    %c0_14 = arith.constant 0 : index
    %c0_15 = arith.constant 0 : index
    %24 = vector.load %arg1[%c0_14, %c0_15] : memref<9x64xf32, #tpu.memory_space<vmem>>, vector<9x64xf32>
    %cst_16 = arith.constant dense<0.000000e+00> : vector<512x64xf32>
    %25 = tpu.matmul %23, %24, %cst_16 {dimension_numbers = #tpu.dot_dimension_numbers<[1], [0], [0], [1], [0, 0, 1, 1], [], []>} : vector<512x9xf32>, vector<9x64xf32>, vector<512x64xf32> -> vector<512x64xf32>
    %c0_17 = arith.constant 0 : index
    %c0_18 = arith.constant 0 : index
    %26 = vector.load %arg2[%c0_17, %c0_18] : memref<1x64xf32, #tpu.memory_space<vmem>>, vector<1x64xf32>
    %27 = vector.shape_cast %26 : vector<1x64xf32> to vector<64xf32>
    %28 = vector.shape_cast %27 : vector<64xf32> to vector<1x64xf32>
    %29 = vector.broadcast %28 : vector<1x64xf32> to vector<512x64xf32>
    %30 = arith.mulf %25, %29 : vector<512x64xf32>
    %c0_19 = arith.constant 0 : index
    %c0_20 = arith.constant 0 : index
    %31 = vector.load %arg3[%c0_19, %c0_20] : memref<1x64xf32, #tpu.memory_space<vmem>>, vector<1x64xf32>
    %32 = vector.shape_cast %31 : vector<1x64xf32> to vector<64xf32>
    %33 = vector.shape_cast %32 : vector<64xf32> to vector<1x64xf32>
    %34 = vector.broadcast %33 : vector<1x64xf32> to vector<512x64xf32>
    %35 = arith.addf %30, %34 : vector<512x64xf32>
    %cst_21 = arith.constant 2.000000e+01 : f32
    %36 = vector.broadcast %cst_21 : f32 to vector<512x64xf32>
    %37 = arith.minimumf %35, %36 : vector<512x64xf32>
    %38 = math.exp %37 : vector<512x64xf32>
    %cst_22 = arith.constant 2.000000e+00 : f32
    %39 = vector.broadcast %cst_22 : f32 to vector<512x64xf32>
    %40 = arith.addf %38, %39 : vector<512x64xf32>
    %41 = arith.mulf %38, %40 : vector<512x64xf32>
    %42 = arith.mulf %35, %41 : vector<512x64xf32>
    %cst_23 = arith.constant 2.000000e+00 : f32
    %43 = vector.broadcast %cst_23 : f32 to vector<512x64xf32>
    %44 = arith.addf %41, %43 : vector<512x64xf32>
    %45 = tpu.reciprocal %44 {approx = true} : vector<512x64xf32> -> vector<512x64xf32>
    %46 = arith.mulf %42, %45 : vector<512x64xf32>
    %cst_24 = arith.constant 2.000000e+01 : f32
    %47 = vector.broadcast %cst_24 : f32 to vector<512x64xf32>
    %48 = arith.cmpf ogt, %35, %47 : vector<512x64xf32>
    %49 = arith.select %48, %35, %46 : vector<512x64xi1>, vector<512x64xf32>
    %c0_25 = arith.constant 0 : index
    %c0_26 = arith.constant 0 : index
    %50 = vector.load %arg15[%c0_25, %c0_26] : memref<512x64xf32, #tpu.memory_space<vmem>>, vector<512x64xf32>
    tpu.vector_store %arg15[%c0_25, %c0_26], %49 {strides = array<i32>} : memref<512x64xf32, #tpu.memory_space<vmem>>, vector<512x64xf32>,
    %c0_27 = arith.constant 0 : index
    %c0_28 = arith.constant 0 : index
    %51 = tpu.strided_load %arg15[%c0_27, %c0_28] {strides = array<i32: 2, 1>} : memref<512x64xf32, #tpu.memory_space<vmem>>, vector<256x64xf32>
    %c1_29 = arith.constant 1 : index
    %c0_30 = arith.constant 0 : index
    %52 = tpu.strided_load %arg15[%c1_29, %c0_30] {strides = array<i32: 2, 1>} : memref<512x64xf32, #tpu.memory_space<vmem>>, vector<256x64xf32>
    %53 = arith.addf %51, %52 : vector<256x64xf32>
    %54 = vector.shape_cast %53 : vector<256x64xf32> to vector<16x16x64xf32>
    %55 = vector.extract_strided_slice %54 {offsets = [0, 0, 0], sizes = [16, 8, 64], strides = [1, 1, 1]} : vector<16x16x64xf32> to vector<16x8x64xf32>
    %56 = vector.extract_strided_slice %54 {offsets = [0, 8, 0], sizes = [16, 8, 64], strides = [1, 1, 1]} : vector<16x16x64xf32> to vector<16x8x64xf32>
    %57 = arith.addf %55, %56 : vector<16x8x64xf32>
    %cst_31 = arith.constant 2.500000e-01 : f32
    %58 = vector.broadcast %cst_31 : f32 to vector<16x8x64xf32>
    %59 = arith.mulf %58, %57 : vector<16x8x64xf32>
    %cst_32 = arith.constant 0.000000e+00 : f32
    %60 = vector.broadcast %cst_32 : f32 to vector<2x10x10x64xf32>
    %c0_33 = arith.constant 0 : index
    %c0_34 = arith.constant 0 : index
    %c0_35 = arith.constant 0 : index
    %c0_36 = arith.constant 0 : index
    %61 = vector.load %arg16[%c0_33, %c0_34, %c0_35, %c0_36] : memref<2x10x10x64xf32, #tpu.memory_space<vmem>>, vector<2x10x10x64xf32>
    tpu.vector_store %arg16[%c0_33, %c0_34, %c0_35, %c0_36], %60 {strides = array<i32>} : memref<2x10x10x64xf32, #tpu.memory_space<vmem>>, vector<2x10x10x64xf32>,
    %62 = vector.shape_cast %59 : vector<16x8x64xf32> to vector<2x8x8x64xf32>
    %c0_37 = arith.constant 0 : index
    %c1_38 = arith.constant 1 : index
    %c1_39 = arith.constant 1 : index
    %c0_40 = arith.constant 0 : index
    %63 = vector.load %arg16[%c0_37, %c1_38, %c1_39, %c0_40] : memref<2x10x10x64xf32, #tpu.memory_space<vmem>>, vector<2x8x8x64xf32>
    tpu.vector_store %arg16[%c0_37, %c1_38, %c1_39, %c0_40], %62 {strides = array<i32>} : memref<2x10x10x64xf32, #tpu.memory_space<vmem>>, vector<2x8x8x64xf32>,
    %c0_41 = arith.constant 0 : index
    %c0_42 = arith.constant 0 : index
    %c0_43 = arith.constant 0 : index
    %c0_44 = arith.constant 0 : index
    %64 = vector.load %arg16[%c0_41, %c0_42, %c0_43, %c0_44] : memref<2x10x10x64xf32, #tpu.memory_space<vmem>>, vector<2x10x10x64xf32>
    %65 = vector.extract_strided_slice %64 {offsets = [0, 0, 0, 0], sizes = [2, 8, 8, 64], strides = [1, 1, 1, 1]} : vector<2x10x10x64xf32> to vector<2x8x8x64xf32>
    %66 = vector.shape_cast %65 : vector<2x8x8x64xf32> to vector<128x64xf32>
    %67 = vector.extract_strided_slice %64 {offsets = [0, 0, 1, 0], sizes = [2, 8, 8, 64], strides = [1, 1, 1, 1]} : vector<2x10x10x64xf32> to vector<2x8x8x64xf32>
    %68 = vector.shape_cast %67 : vector<2x8x8x64xf32> to vector<128x64xf32>
    %69 = vector.extract_strided_slice %64 {offsets = [0, 0, 2, 0], sizes = [2, 8, 8, 64], strides = [1, 1, 1, 1]} : vector<2x10x10x64xf32> to vector<2x8x8x64xf32>
    %70 = vector.shape_cast %69 : vector<2x8x8x64xf32> to vector<128x64xf32>
    %71 = vector.extract_strided_slice %64 {offsets = [0, 1, 0, 0], sizes = [2, 8, 8, 64], strides = [1, 1, 1, 1]} : vector<2x10x10x64xf32> to vector<2x8x8x64xf32>
    %72 = vector.shape_cast %71 : vector<2x8x8x64xf32> to vector<128x64xf32>
    %73 = vector.extract_strided_slice %64 {offsets = [0, 1, 1, 0], sizes = [2, 8, 8, 64], strides = [1, 1, 1, 1]} : vector<2x10x10x64xf32> to vector<2x8x8x64xf32>
    %74 = vector.shape_cast %73 : vector<2x8x8x64xf32> to vector<128x64xf32>
    %75 = vector.extract_strided_slice %64 {offsets = [0, 1, 2, 0], sizes = [2, 8, 8, 64], strides = [1, 1, 1, 1]} : vector<2x10x10x64xf32> to vector<2x8x8x64xf32>
    %76 = vector.shape_cast %75 : vector<2x8x8x64xf32> to vector<128x64xf32>
    %77 = vector.extract_strided_slice %64 {offsets = [0, 2, 0, 0], sizes = [2, 8, 8, 64], strides = [1, 1, 1, 1]} : vector<2x10x10x64xf32> to vector<2x8x8x64xf32>
    %78 = vector.shape_cast %77 : vector<2x8x8x64xf32> to vector<128x64xf32>
    %79 = vector.extract_strided_slice %64 {offsets = [0, 2, 1, 0], sizes = [2, 8, 8, 64], strides = [1, 1, 1, 1]} : vector<2x10x10x64xf32> to vector<2x8x8x64xf32>
    %80 = vector.shape_cast %79 : vector<2x8x8x64xf32> to vector<128x64xf32>
    %81 = vector.extract_strided_slice %64 {offsets = [0, 2, 2, 0], sizes = [2, 8, 8, 64], strides = [1, 1, 1, 1]} : vector<2x10x10x64xf32> to vector<2x8x8x64xf32>
    %82 = vector.shape_cast %81 : vector<2x8x8x64xf32> to vector<128x64xf32>
    %83 = tpu.concatenate %66, %68, %70, %72, %74, %76, %78, %80, %82 in 1 : vector<128x64xf32>, vector<128x64xf32>, vector<128x64xf32>, vector<128x64xf32>, vector<128x64xf32>, vector<128x64xf32>, vector<128x64xf32>, vector<128x64xf32>, vector<128x64xf32> -> vector<128x576xf32>
    %c0_45 = arith.constant 0 : index
    %c0_46 = arith.constant 0 : index
    %84 = vector.load %arg4[%c0_45, %c0_46] : memref<576x128xf32, #tpu.memory_space<vmem>>, vector<576x128xf32>
    %cst_47 = arith.constant dense<0.000000e+00> : vector<128x128xf32>
    %85 = tpu.matmul %83, %84, %cst_47 {dimension_numbers = #tpu.dot_dimension_numbers<[1], [0], [0], [1], [0, 0, 1, 1], [], []>} : vector<128x576xf32>, vector<576x128xf32>, vector<128x128xf32> -> vector<128x128xf32>
    %c0_48 = arith.constant 0 : index
    %c0_49 = arith.constant 0 : index
    %86 = vector.load %arg5[%c0_48, %c0_49] : memref<1x128xf32, #tpu.memory_space<vmem>>, vector<1x128xf32>
    %87 = vector.shape_cast %86 : vector<1x128xf32> to vector<128xf32>
    %88 = vector.shape_cast %87 : vector<128xf32> to vector<1x128xf32>
    %89 = vector.broadcast %88 : vector<1x128xf32> to vector<128x128xf32>
    %90 = arith.mulf %85, %89 : vector<128x128xf32>
    %c0_50 = arith.constant 0 : index
    %c0_51 = arith.constant 0 : index
    %91 = vector.load %arg6[%c0_50, %c0_51] : memref<1x128xf32, #tpu.memory_space<vmem>>, vector<1x128xf32>
    %92 = vector.shape_cast %91 : vector<1x128xf32> to vector<128xf32>
    %93 = vector.shape_cast %92 : vector<128xf32> to vector<1x128xf32>
    %94 = vector.broadcast %93 : vector<1x128xf32> to vector<128x128xf32>
    %95 = arith.addf %90, %94 : vector<128x128xf32>
    %cst_52 = arith.constant 2.000000e+01 : f32
    %96 = vector.broadcast %cst_52 : f32 to vector<128x128xf32>
    %97 = arith.minimumf %95, %96 : vector<128x128xf32>
    %98 = math.exp %97 : vector<128x128xf32>
    %cst_53 = arith.constant 2.000000e+00 : f32
    %99 = vector.broadcast %cst_53 : f32 to vector<128x128xf32>
    %100 = arith.addf %98, %99 : vector<128x128xf32>
    %101 = arith.mulf %98, %100 : vector<128x128xf32>
    %102 = arith.mulf %95, %101 : vector<128x128xf32>
    %cst_54 = arith.constant 2.000000e+00 : f32
    %103 = vector.broadcast %cst_54 : f32 to vector<128x128xf32>
    %104 = arith.addf %101, %103 : vector<128x128xf32>
    %105 = tpu.reciprocal %104 {approx = true} : vector<128x128xf32> -> vector<128x128xf32>
    %106 = arith.mulf %102, %105 : vector<128x128xf32>
    %cst_55 = arith.constant 2.000000e+01 : f32
    %107 = vector.broadcast %cst_55 : f32 to vector<128x128xf32>
    %108 = arith.cmpf ogt, %95, %107 : vector<128x128xf32>
    %109 = arith.select %108, %95, %106 : vector<128x128xi1>, vector<128x128xf32>
    %c0_56 = arith.constant 0 : index
    %c0_57 = arith.constant 0 : index
    %110 = vector.load %arg17[%c0_56, %c0_57] : memref<128x128xf32, #tpu.memory_space<vmem>>, vector<128x128xf32>
    tpu.vector_store %arg17[%c0_56, %c0_57], %109 {strides = array<i32>} : memref<128x128xf32, #tpu.memory_space<vmem>>, vector<128x128xf32>,
    %c0_58 = arith.constant 0 : index
    %c0_59 = arith.constant 0 : index
    %111 = tpu.strided_load %arg17[%c0_58, %c0_59] {strides = array<i32: 2, 1>} : memref<128x128xf32, #tpu.memory_space<vmem>>, vector<64x128xf32>
    %c1_60 = arith.constant 1 : index
    %c0_61 = arith.constant 0 : index
    %112 = tpu.strided_load %arg17[%c1_60, %c0_61] {strides = array<i32: 2, 1>} : memref<128x128xf32, #tpu.memory_space<vmem>>, vector<64x128xf32>
    %113 = arith.addf %111, %112 : vector<64x128xf32>
    %114 = vector.shape_cast %113 : vector<64x128xf32> to vector<8x8x128xf32>
    %115 = vector.extract_strided_slice %114 {offsets = [0, 0, 0], sizes = [8, 4, 128], strides = [1, 1, 1]} : vector<8x8x128xf32> to vector<8x4x128xf32>
    %116 = vector.extract_strided_slice %114 {offsets = [0, 4, 0], sizes = [8, 4, 128], strides = [1, 1, 1]} : vector<8x8x128xf32> to vector<8x4x128xf32>
    %117 = arith.addf %115, %116 : vector<8x4x128xf32>
    %cst_62 = arith.constant 2.500000e-01 : f32
    %118 = vector.broadcast %cst_62 : f32 to vector<8x4x128xf32>
    %119 = arith.mulf %118, %117 : vector<8x4x128xf32>
    %120 = vector.shape_cast %119 : vector<8x4x128xf32> to vector<2x4x4x128xf32>
    %cst_63 = arith.constant 0.000000e+00 : f32
    %121 = vector.broadcast %cst_63 : f32 to vector<2x256xf32>
    %122 = vector.extract_strided_slice %120 {offsets = [0, 0, 0, 0], sizes = [2, 1, 1, 128], strides = [1, 1, 1, 1]} : vector<2x4x4x128xf32> to vector<2x1x1x128xf32>
    %123 = vector.shape_cast %122 : vector<2x1x1x128xf32> to vector<2x128xf32>
    %c0_64 = arith.constant 0 : index
    %c0_65 = arith.constant 0 : index
    %c0_66 = arith.constant 0 : index
    %124 = vector.load %arg7[%c0_64, %c0_65, %c0_66] : memref<16x128x256xf32, #tpu.memory_space<vmem>>, vector<1x128x256xf32>
    %125 = vector.shape_cast %124 : vector<1x128x256xf32> to vector<128x256xf32>
    %cst_67 = arith.constant dense<0.000000e+00> : vector<2x256xf32>
    %126 = tpu.matmul %123, %125, %cst_67 {dimension_numbers = #tpu.dot_dimension_numbers<[1], [0], [0], [1], [0, 0, 1, 1], [], []>} : vector<2x128xf32>, vector<128x256xf32>, vector<2x256xf32> -> vector<2x256xf32>
    %127 = arith.addf %121, %126 : vector<2x256xf32>
    %128 = vector.extract_strided_slice %120 {offsets = [0, 0, 1, 0], sizes = [2, 1, 1, 128], strides = [1, 1, 1, 1]} : vector<2x4x4x128xf32> to vector<2x1x1x128xf32>
    %129 = vector.shape_cast %128 : vector<2x1x1x128xf32> to vector<2x128xf32>
    %c1_68 = arith.constant 1 : index
    %c0_69 = arith.constant 0 : index
    %c0_70 = arith.constant 0 : index
    %130 = vector.load %arg7[%c1_68, %c0_69, %c0_70] : memref<16x128x256xf32, #tpu.memory_space<vmem>>, vector<1x128x256xf32>
    %131 = vector.shape_cast %130 : vector<1x128x256xf32> to vector<128x256xf32>
    %cst_71 = arith.constant dense<0.000000e+00> : vector<2x256xf32>
    %132 = tpu.matmul %129, %131, %cst_71 {dimension_numbers = #tpu.dot_dimension_numbers<[1], [0], [0], [1], [0, 0, 1, 1], [], []>} : vector<2x128xf32>, vector<128x256xf32>, vector<2x256xf32> -> vector<2x256xf32>
    %133 = arith.addf %127, %132 : vector<2x256xf32>
    %134 = vector.extract_strided_slice %120 {offsets = [0, 0, 2, 0], sizes = [2, 1, 1, 128], strides = [1, 1, 1, 1]} : vector<2x4x4x128xf32> to vector<2x1x1x128xf32>
    %135 = vector.shape_cast %134 : vector<2x1x1x128xf32> to vector<2x128xf32>
    %c2 = arith.constant 2 : index
    %c0_72 = arith.constant 0 : index
    %c0_73 = arith.constant 0 : index
    %136 = vector.load %arg7[%c2, %c0_72, %c0_73] : memref<16x128x256xf32, #tpu.memory_space<vmem>>, vector<1x128x256xf32>
    %137 = vector.shape_cast %136 : vector<1x128x256xf32> to vector<128x256xf32>
    %cst_74 = arith.constant dense<0.000000e+00> : vector<2x256xf32>
    %138 = tpu.matmul %135, %137, %cst_74 {dimension_numbers = #tpu.dot_dimension_numbers<[1], [0], [0], [1], [0, 0, 1, 1], [], []>} : vector<2x128xf32>, vector<128x256xf32>, vector<2x256xf32> -> vector<2x256xf32>
    %139 = arith.addf %133, %138 : vector<2x256xf32>
    %140 = vector.extract_strided_slice %120 {offsets = [0, 0, 3, 0], sizes = [2, 1, 1, 128], strides = [1, 1, 1, 1]} : vector<2x4x4x128xf32> to vector<2x1x1x128xf32>
    %141 = vector.shape_cast %140 : vector<2x1x1x128xf32> to vector<2x128xf32>
    %c3 = arith.constant 3 : index
    %c0_75 = arith.constant 0 : index
    %c0_76 = arith.constant 0 : index
    %142 = vector.load %arg7[%c3, %c0_75, %c0_76] : memref<16x128x256xf32, #tpu.memory_space<vmem>>, vector<1x128x256xf32>
    %143 = vector.shape_cast %142 : vector<1x128x256xf32> to vector<128x256xf32>
    %cst_77 = arith.constant dense<0.000000e+00> : vector<2x256xf32>
    %144 = tpu.matmul %141, %143, %cst_77 {dimension_numbers = #tpu.dot_dimension_numbers<[1], [0], [0], [1], [0, 0, 1, 1], [], []>} : vector<2x128xf32>, vector<128x256xf32>, vector<2x256xf32> -> vector<2x256xf32>
    %145 = arith.addf %139, %144 : vector<2x256xf32>
    %146 = vector.extract_strided_slice %120 {offsets = [0, 1, 0, 0], sizes = [2, 1, 1, 128], strides = [1, 1, 1, 1]} : vector<2x4x4x128xf32> to vector<2x1x1x128xf32>
    %147 = vector.shape_cast %146 : vector<2x1x1x128xf32> to vector<2x128xf32>
    %c4 = arith.constant 4 : index
    %c0_78 = arith.constant 0 : index
    %c0_79 = arith.constant 0 : index
    %148 = vector.load %arg7[%c4, %c0_78, %c0_79] : memref<16x128x256xf32, #tpu.memory_space<vmem>>, vector<1x128x256xf32>
    %149 = vector.shape_cast %148 : vector<1x128x256xf32> to vector<128x256xf32>
    %cst_80 = arith.constant dense<0.000000e+00> : vector<2x256xf32>
    %150 = tpu.matmul %147, %149, %cst_80 {dimension_numbers = #tpu.dot_dimension_numbers<[1], [0], [0], [1], [0, 0, 1, 1], [], []>} : vector<2x128xf32>, vector<128x256xf32>, vector<2x256xf32> -> vector<2x256xf32>
    %151 = arith.addf %145, %150 : vector<2x256xf32>
    %152 = vector.extract_strided_slice %120 {offsets = [0, 1, 1, 0], sizes = [2, 1, 1, 128], strides = [1, 1, 1, 1]} : vector<2x4x4x128xf32> to vector<2x1x1x128xf32>
    %153 = vector.shape_cast %152 : vector<2x1x1x128xf32> to vector<2x128xf32>
    %c5 = arith.constant 5 : index
    %c0_81 = arith.constant 0 : index
    %c0_82 = arith.constant 0 : index
    %154 = vector.load %arg7[%c5, %c0_81, %c0_82] : memref<16x128x256xf32, #tpu.memory_space<vmem>>, vector<1x128x256xf32>
    %155 = vector.shape_cast %154 : vector<1x128x256xf32> to vector<128x256xf32>
    %cst_83 = arith.constant dense<0.000000e+00> : vector<2x256xf32>
    %156 = tpu.matmul %153, %155, %cst_83 {dimension_numbers = #tpu.dot_dimension_numbers<[1], [0], [0], [1], [0, 0, 1, 1], [], []>} : vector<2x128xf32>, vector<128x256xf32>, vector<2x256xf32> -> vector<2x256xf32>
    %157 = arith.addf %151, %156 : vector<2x256xf32>
    %158 = vector.extract_strided_slice %120 {offsets = [0, 1, 2, 0], sizes = [2, 1, 1, 128], strides = [1, 1, 1, 1]} : vector<2x4x4x128xf32> to vector<2x1x1x128xf32>
    %159 = vector.shape_cast %158 : vector<2x1x1x128xf32> to vector<2x128xf32>
    %c6 = arith.constant 6 : index
    %c0_84 = arith.constant 0 : index
    %c0_85 = arith.constant 0 : index
    %160 = vector.load %arg7[%c6, %c0_84, %c0_85] : memref<16x128x256xf32, #tpu.memory_space<vmem>>, vector<1x128x256xf32>
    %161 = vector.shape_cast %160 : vector<1x128x256xf32> to vector<128x256xf32>
    %cst_86 = arith.constant dense<0.000000e+00> : vector<2x256xf32>
    %162 = tpu.matmul %159, %161, %cst_86 {dimension_numbers = #tpu.dot_dimension_numbers<[1], [0], [0], [1], [0, 0, 1, 1], [], []>} : vector<2x128xf32>, vector<128x256xf32>, vector<2x256xf32> -> vector<2x256xf32>
    %163 = arith.addf %157, %162 : vector<2x256xf32>
    %164 = vector.extract_strided_slice %120 {offsets = [0, 1, 3, 0], sizes = [2, 1, 1, 128], strides = [1, 1, 1, 1]} : vector<2x4x4x128xf32> to vector<2x1x1x128xf32>
    %165 = vector.shape_cast %164 : vector<2x1x1x128xf32> to vector<2x128xf32>
    %c7 = arith.constant 7 : index
    %c0_87 = arith.constant 0 : index
    %c0_88 = arith.constant 0 : index
    %166 = vector.load %arg7[%c7, %c0_87, %c0_88] : memref<16x128x256xf32, #tpu.memory_space<vmem>>, vector<1x128x256xf32>
    %167 = vector.shape_cast %166 : vector<1x128x256xf32> to vector<128x256xf32>
    %cst_89 = arith.constant dense<0.000000e+00> : vector<2x256xf32>
    %168 = tpu.matmul %165, %167, %cst_89 {dimension_numbers = #tpu.dot_dimension_numbers<[1], [0], [0], [1], [0, 0, 1, 1], [], []>} : vector<2x128xf32>, vector<128x256xf32>, vector<2x256xf32> -> vector<2x256xf32>
    %169 = arith.addf %163, %168 : vector<2x256xf32>
    %170 = vector.extract_strided_slice %120 {offsets = [0, 2, 0, 0], sizes = [2, 1, 1, 128], strides = [1, 1, 1, 1]} : vector<2x4x4x128xf32> to vector<2x1x1x128xf32>
    %171 = vector.shape_cast %170 : vector<2x1x1x128xf32> to vector<2x128xf32>
    %c8 = arith.constant 8 : index
    %c0_90 = arith.constant 0 : index
    %c0_91 = arith.constant 0 : index
    %172 = vector.load %arg7[%c8, %c0_90, %c0_91] : memref<16x128x256xf32, #tpu.memory_space<vmem>>, vector<1x128x256xf32>
    %173 = vector.shape_cast %172 : vector<1x128x256xf32> to vector<128x256xf32>
    %cst_92 = arith.constant dense<0.000000e+00> : vector<2x256xf32>
    %174 = tpu.matmul %171, %173, %cst_92 {dimension_numbers = #tpu.dot_dimension_numbers<[1], [0], [0], [1], [0, 0, 1, 1], [], []>} : vector<2x128xf32>, vector<128x256xf32>, vector<2x256xf32> -> vector<2x256xf32>
    %175 = arith.addf %169, %174 : vector<2x256xf32>
    %176 = vector.extract_strided_slice %120 {offsets = [0, 2, 1, 0], sizes = [2, 1, 1, 128], strides = [1, 1, 1, 1]} : vector<2x4x4x128xf32> to vector<2x1x1x128xf32>
    %177 = vector.shape_cast %176 : vector<2x1x1x128xf32> to vector<2x128xf32>
    %c9 = arith.constant 9 : index
    %c0_93 = arith.constant 0 : index
    %c0_94 = arith.constant 0 : index
    %178 = vector.load %arg7[%c9, %c0_93, %c0_94] : memref<16x128x256xf32, #tpu.memory_space<vmem>>, vector<1x128x256xf32>
    %179 = vector.shape_cast %178 : vector<1x128x256xf32> to vector<128x256xf32>
    %cst_95 = arith.constant dense<0.000000e+00> : vector<2x256xf32>
    %180 = tpu.matmul %177, %179, %cst_95 {dimension_numbers = #tpu.dot_dimension_numbers<[1], [0], [0], [1], [0, 0, 1, 1], [], []>} : vector<2x128xf32>, vector<128x256xf32>, vector<2x256xf32> -> vector<2x256xf32>
    %181 = arith.addf %175, %180 : vector<2x256xf32>
    %182 = vector.extract_strided_slice %120 {offsets = [0, 2, 2, 0], sizes = [2, 1, 1, 128], strides = [1, 1, 1, 1]} : vector<2x4x4x128xf32> to vector<2x1x1x128xf32>
    %183 = vector.shape_cast %182 : vector<2x1x1x128xf32> to vector<2x128xf32>
    %c10 = arith.constant 10 : index
    %c0_96 = arith.constant 0 : index
    %c0_97 = arith.constant 0 : index
    %184 = vector.load %arg7[%c10, %c0_96, %c0_97] : memref<16x128x256xf32, #tpu.memory_space<vmem>>, vector<1x128x256xf32>
    %185 = vector.shape_cast %184 : vector<1x128x256xf32> to vector<128x256xf32>
    %cst_98 = arith.constant dense<0.000000e+00> : vector<2x256xf32>
    %186 = tpu.matmul %183, %185, %cst_98 {dimension_numbers = #tpu.dot_dimension_numbers<[1], [0], [0], [1], [0, 0, 1, 1], [], []>} : vector<2x128xf32>, vector<128x256xf32>, vector<2x256xf32> -> vector<2x256xf32>
    %187 = arith.addf %181, %186 : vector<2x256xf32>
    %188 = vector.extract_strided_slice %120 {offsets = [0, 2, 3, 0], sizes = [2, 1, 1, 128], strides = [1, 1, 1, 1]} : vector<2x4x4x128xf32> to vector<2x1x1x128xf32>
    %189 = vector.shape_cast %188 : vector<2x1x1x128xf32> to vector<2x128xf32>
    %c11 = arith.constant 11 : index
    %c0_99 = arith.constant 0 : index
    %c0_100 = arith.constant 0 : index
    %190 = vector.load %arg7[%c11, %c0_99, %c0_100] : memref<16x128x256xf32, #tpu.memory_space<vmem>>, vector<1x128x256xf32>
    %191 = vector.shape_cast %190 : vector<1x128x256xf32> to vector<128x256xf32>
    %cst_101 = arith.constant dense<0.000000e+00> : vector<2x256xf32>
    %192 = tpu.matmul %189, %191, %cst_101 {dimension_numbers = #tpu.dot_dimension_numbers<[1], [0], [0], [1], [0, 0, 1, 1], [], []>} : vector<2x128xf32>, vector<128x256xf32>, vector<2x256xf32> -> vector<2x256xf32>
    %193 = arith.addf %187, %192 : vector<2x256xf32>
    %194 = vector.extract_strided_slice %120 {offsets = [0, 3, 0, 0], sizes = [2, 1, 1, 128], strides = [1, 1, 1, 1]} : vector<2x4x4x128xf32> to vector<2x1x1x128xf32>
    %195 = vector.shape_cast %194 : vector<2x1x1x128xf32> to vector<2x128xf32>
    %c12 = arith.constant 12 : index
    %c0_102 = arith.constant 0 : index
    %c0_103 = arith.constant 0 : index
    %196 = vector.load %arg7[%c12, %c0_102, %c0_103] : memref<16x128x256xf32, #tpu.memory_space<vmem>>, vector<1x128x256xf32>
    %197 = vector.shape_cast %196 : vector<1x128x256xf32> to vector<128x256xf32>
    %cst_104 = arith.constant dense<0.000000e+00> : vector<2x256xf32>
    %198 = tpu.matmul %195, %197, %cst_104 {dimension_numbers = #tpu.dot_dimension_numbers<[1], [0], [0], [1], [0, 0, 1, 1], [], []>} : vector<2x128xf32>, vector<128x256xf32>, vector<2x256xf32> -> vector<2x256xf32>
    %199 = arith.addf %193, %198 : vector<2x256xf32>
    %200 = vector.extract_strided_slice %120 {offsets = [0, 3, 1, 0], sizes = [2, 1, 1, 128], strides = [1, 1, 1, 1]} : vector<2x4x4x128xf32> to vector<2x1x1x128xf32>
    %201 = vector.shape_cast %200 : vector<2x1x1x128xf32> to vector<2x128xf32>
    %c13 = arith.constant 13 : index
    %c0_105 = arith.constant 0 : index
    %c0_106 = arith.constant 0 : index
    %202 = vector.load %arg7[%c13, %c0_105, %c0_106] : memref<16x128x256xf32, #tpu.memory_space<vmem>>, vector<1x128x256xf32>
    %203 = vector.shape_cast %202 : vector<1x128x256xf32> to vector<128x256xf32>
    %cst_107 = arith.constant dense<0.000000e+00> : vector<2x256xf32>
    %204 = tpu.matmul %201, %203, %cst_107 {dimension_numbers = #tpu.dot_dimension_numbers<[1], [0], [0], [1], [0, 0, 1, 1], [], []>} : vector<2x128xf32>, vector<128x256xf32>, vector<2x256xf32> -> vector<2x256xf32>
    %205 = arith.addf %199, %204 : vector<2x256xf32>
    %206 = vector.extract_strided_slice %120 {offsets = [0, 3, 2, 0], sizes = [2, 1, 1, 128], strides = [1, 1, 1, 1]} : vector<2x4x4x128xf32> to vector<2x1x1x128xf32>
    %207 = vector.shape_cast %206 : vector<2x1x1x128xf32> to vector<2x128xf32>
    %c14 = arith.constant 14 : index
    %c0_108 = arith.constant 0 : index
    %c0_109 = arith.constant 0 : index
    %208 = vector.load %arg7[%c14, %c0_108, %c0_109] : memref<16x128x256xf32, #tpu.memory_space<vmem>>, vector<1x128x256xf32>
    %209 = vector.shape_cast %208 : vector<1x128x256xf32> to vector<128x256xf32>
    %cst_110 = arith.constant dense<0.000000e+00> : vector<2x256xf32>
    %210 = tpu.matmul %207, %209, %cst_110 {dimension_numbers = #tpu.dot_dimension_numbers<[1], [0], [0], [1], [0, 0, 1, 1], [], []>} : vector<2x128xf32>, vector<128x256xf32>, vector<2x256xf32> -> vector<2x256xf32>
    %211 = arith.addf %205, %210 : vector<2x256xf32>
    %212 = vector.extract_strided_slice %120 {offsets = [0, 3, 3, 0], sizes = [2, 1, 1, 128], strides = [1, 1, 1, 1]} : vector<2x4x4x128xf32> to vector<2x1x1x128xf32>
    %213 = vector.shape_cast %212 : vector<2x1x1x128xf32> to vector<2x128xf32>
    %c15 = arith.constant 15 : index
    %c0_111 = arith.constant 0 : index
    %c0_112 = arith.constant 0 : index
    %214 = vector.load %arg7[%c15, %c0_111, %c0_112] : memref<16x128x256xf32, #tpu.memory_space<vmem>>, vector<1x128x256xf32>
    %215 = vector.shape_cast %214 : vector<1x128x256xf32> to vector<128x256xf32>
    %cst_113 = arith.constant dense<0.000000e+00> : vector<2x256xf32>
    %216 = tpu.matmul %213, %215, %cst_113 {dimension_numbers = #tpu.dot_dimension_numbers<[1], [0], [0], [1], [0, 0, 1, 1], [], []>} : vector<2x128xf32>, vector<128x256xf32>, vector<2x256xf32> -> vector<2x256xf32>
    %217 = arith.addf %211, %216 : vector<2x256xf32>
    %c0_114 = arith.constant 0 : index
    %c0_115 = arith.constant 0 : index
    %218 = vector.load %arg8[%c0_114, %c0_115] : memref<1x256xf32, #tpu.memory_space<vmem>>, vector<1x256xf32>
    %219 = vector.shape_cast %218 : vector<1x256xf32> to vector<256xf32>
    %220 = vector.shape_cast %219 : vector<256xf32> to vector<1x256xf32>
    %221 = vector.broadcast %220 : vector<1x256xf32> to vector<2x256xf32>
    %222 = arith.mulf %217, %221 : vector<2x256xf32>
    %c0_116 = arith.constant 0 : index
    %c0_117 = arith.constant 0 : index
    %223 = vector.load %arg9[%c0_116, %c0_117] : memref<1x256xf32, #tpu.memory_space<vmem>>, vector<1x256xf32>
    %224 = vector.shape_cast %223 : vector<1x256xf32> to vector<256xf32>
    %225 = vector.shape_cast %224 : vector<256xf32> to vector<1x256xf32>
    %226 = vector.broadcast %225 : vector<1x256xf32> to vector<2x256xf32>
    %227 = arith.addf %222, %226 : vector<2x256xf32>
    %cst_118 = arith.constant 2.000000e+01 : f32
    %228 = vector.broadcast %cst_118 : f32 to vector<2x256xf32>
    %229 = arith.minimumf %227, %228 : vector<2x256xf32>
    %230 = math.exp %229 : vector<2x256xf32>
    %cst_119 = arith.constant 2.000000e+00 : f32
    %231 = vector.broadcast %cst_119 : f32 to vector<2x256xf32>
    %232 = arith.addf %230, %231 : vector<2x256xf32>
    %233 = arith.mulf %230, %232 : vector<2x256xf32>
    %234 = arith.mulf %227, %233 : vector<2x256xf32>
    %cst_120 = arith.constant 2.000000e+00 : f32
    %235 = vector.broadcast %cst_120 : f32 to vector<2x256xf32>
    %236 = arith.addf %233, %235 : vector<2x256xf32>
    %237 = tpu.reciprocal %236 {approx = true} : vector<2x256xf32> -> vector<2x256xf32>
    %238 = arith.mulf %234, %237 : vector<2x256xf32>
    %cst_121 = arith.constant 2.000000e+01 : f32
    %239 = vector.broadcast %cst_121 : f32 to vector<2x256xf32>
    %240 = arith.cmpf ogt, %227, %239 : vector<2x256xf32>
    %241 = arith.select %240, %227, %238 : vector<2x256xi1>, vector<2x256xf32>
    %c0_122 = arith.constant 0 : index
    %c0_123 = arith.constant 0 : index
    %242 = vector.load %arg10[%c0_122, %c0_123] : memref<256x4xf32, #tpu.memory_space<vmem>>, vector<256x4xf32>
    %cst_124 = arith.constant dense<0.000000e+00> : vector<2x4xf32>
    %243 = tpu.matmul %241, %242, %cst_124 {dimension_numbers = #tpu.dot_dimension_numbers<[1], [0], [0], [1], [0, 0, 1, 1], [], []>} : vector<2x256xf32>, vector<256x4xf32>, vector<2x4xf32> -> vector<2x4xf32>
    %c0_125 = arith.constant 0 : index
    %c0_126 = arith.constant 0 : index
    %244 = vector.load %arg11[%c0_125, %c0_126] : memref<1x4xf32, #tpu.memory_space<vmem>>, vector<1x4xf32>
    %245 = vector.shape_cast %244 : vector<1x4xf32> to vector<4xf32>
    %246 = vector.shape_cast %245 : vector<4xf32> to vector<1x4xf32>
    %247 = vector.broadcast %246 : vector<1x4xf32> to vector<2x4xf32>
    %248 = arith.mulf %243, %247 : vector<2x4xf32>
    %c0_127 = arith.constant 0 : index
    %c0_128 = arith.constant 0 : index
    %249 = vector.load %arg12[%c0_127, %c0_128] : memref<1x4xf32, #tpu.memory_space<vmem>>, vector<1x4xf32>
    %250 = vector.shape_cast %249 : vector<1x4xf32> to vector<4xf32>
    %251 = vector.shape_cast %250 : vector<4xf32> to vector<1x4xf32>
    %252 = vector.broadcast %251 : vector<1x4xf32> to vector<2x4xf32>
    %253 = arith.addf %248, %252 : vector<2x4xf32>
    %cst_129 = arith.constant 2.000000e+01 : f32
    %254 = vector.broadcast %cst_129 : f32 to vector<2x4xf32>
    %255 = arith.minimumf %253, %254 : vector<2x4xf32>
    %256 = math.exp %255 : vector<2x4xf32>
    %cst_130 = arith.constant 2.000000e+00 : f32
    %257 = vector.broadcast %cst_130 : f32 to vector<2x4xf32>
    %258 = arith.addf %256, %257 : vector<2x4xf32>
    %259 = arith.mulf %256, %258 : vector<2x4xf32>
    %260 = arith.mulf %253, %259 : vector<2x4xf32>
    %cst_131 = arith.constant 2.000000e+00 : f32
    %261 = vector.broadcast %cst_131 : f32 to vector<2x4xf32>
    %262 = arith.addf %259, %261 : vector<2x4xf32>
    %263 = tpu.reciprocal %262 {approx = true} : vector<2x4xf32> -> vector<2x4xf32>
    %264 = arith.mulf %260, %263 : vector<2x4xf32>
    %cst_132 = arith.constant 2.000000e+01 : f32
    %265 = vector.broadcast %cst_132 : f32 to vector<2x4xf32>
    %266 = arith.cmpf ogt, %253, %265 : vector<2x4xf32>
    %267 = arith.select %266, %253, %264 : vector<2x4xi1>, vector<2x4xf32>
    %c0_133 = arith.constant 0 : index
    %c0_134 = arith.constant 0 : index
    %268 = vector.load %arg13[%c0_133, %c0_134] : memref<2x4xf32, #tpu.memory_space<vmem>>, vector<2x4xf32>
    tpu.vector_store %arg13[%c0_133, %c0_134], %267 {strides = array<i32>} : memref<2x4xf32, #tpu.memory_space<vmem>>, vector<2x4xf32>,
    return
  }
}

</mosaic_0001>

<bundles_post_ra>
// kernel: tuned_cnn_forward.1
= control target key start
LH: loop header
LB: loop body
LE: loop exit
PB: predicated region body
PF: predicated region fallthrough
CT: control target
= control target key end

     0   :  { %18 = vsyncpa [#allocation7], 0  ;;  %s14931_s0 = inlined_call_operand.vmem [shape: f32[2,16,16,1], index: 0, kind: input, shape index: {}]   ;;  %s14932_s1 = inlined_call_operand.hbm [shape: f32[9,64], index: 1, kind: input, shape index: {}]   ;;  %s14933_s2 = inlined_call_operand.hbm [shape: f32[1,64], index: 2, kind: input, shape index: {}]   ;;  %s14934_s3 = inlined_call_operand.hbm [shape: f32[1,64], index: 3, kind: input, shape index: {}]   ;;  %s14935_s4 = inlined_call_operand.hbm [shape: f32[576,128], index: 4, kind: input, shape index: {}]   ;;  %s14936_s5 = inlined_call_operand.hbm [shape: f32[1,128], index: 5, kind: input, shape index: {}]   ;;  %s14937_s6 = inlined_call_operand.hbm [shape: f32[1,128], index: 6, kind: input, shape index: {}]   ;;  %s14938_s7 = inlined_call_operand.hbm [shape: f32[16,128,256], index: 7, kind: input, shape index: {}]   ;;  %s14939_s8 = inlined_call_operand.hbm [shape: f32[1,256], index: 8, kind: input, shape index: {}]   ;;  %s14940_s9 = inlined_call_operand.hbm [shape: f32[1,256], index: 9, kind: input, shape index: {}]   ;;  %s14941_s10 = inlined_call_operand.vmem [shape: f32[256,4], index: 10, kind: input, shape index: {}]   ;;  %s14942_s11 = inlined_call_operand.hbm [shape: f32[1,4], index: 11, kind: input, shape index: {}]   ;;  %s14943_s12 = inlined_call_operand.hbm [shape: f32[1,4], index: 12, kind: input, shape index: {}]   ;;  %s14944_s13 = inlined_call_operand.hbm [shape: f32[2,4], index: 13, kind: output, shape index: {}]  }
   0x1   :  { %19 = vsyncpa [#allocation10], 0 }
   0x2   :  { %20 = vsyncpa [#allocation13], 0 }
   0x3   :  { %21 = vsyncpa [#allocation16], 0 }
   0x4   :  { %22 = vsyncpa [#allocation19], 0 }
   0x5   :  { %23 = vsyncpa [#allocation22], 0 }
   0x6   :  { %24 = vsyncpa [#allocation8], 0  ;;  %s10011_s25 = smov [#allocation9]   ;;  %s9733_s29 = scalar_lea.hbm %s14933_s2, 16 }
   0x7   :  { %s45_s26 = sshll.u32 %s10011_s25, 4  ;;  %p9734_p0 = scmp.ne.s32.totalorder %s14933_s2, %s9733_s29  ;;  %s46_s26 = int_to_ptr.vmem [resolvable:$true] %s45_s26 }
   0x8   :  { %p9737_p1 = scmp.lt.u32.totalorder %s9733_s29, %s14933_s2 }
   0xa   :  { %p9739_p2 = pnand %p9737_p1, %p9734_p0 }
   0xc   :  { %9742 = shalt.err (!%p9739_p2)
}
   0xd   :  { %s9743_s17 = scalar_lea.vmem %s46_s26, 16  ;;  %s9747_s18 = scalar_lea.vmem %s46_s26, 32 }
   0xe   :  { %p9744_p3 = scmp.ne.s32.totalorder %s46_s26, %s9743_s17  ;;  %p9748_p4 = scmp.lt.s32.totalorder %s46_s26, %s46_s26 }
   0xf   :  { %p9749_p5 = scmp.lt.s32.totalorder %s9747_s18, %s9743_s17 }
  0x11   :  { %p9750_p6 = por %p9749_p5, %p9748_p4 }
  0x13   :  { %p9751_p7 = pnand %p9750_p6, %p9744_p3 }
  0x15   :  { %9754 = shalt.err (!%p9751_p7)
}
  0x16   :  { %48 = dma.hbm_to_vmem [thread:$0]  %s14933_s2, 16, %s46_s26, [#allocation10]  }
  0x17   :  { %s10012_s21 = smov [#allocation12]   ;;  %s10013_s23 = smov [#allocation15]  }
  0x18   :  { %s64_s22 = sshll.u32 %s10012_s21, 4  ;;  %s87_s24 = sshll.u32 %s10013_s23, 4  ;;  %s65_s22 = int_to_ptr.vmem [resolvable:$true] %s64_s22  ;;  %s88_s24 = int_to_ptr.vmem [resolvable:$true] %s87_s24 }
  0x19   :  { %s9755_s28 = scalar_lea.hbm %s14935_s4, 9216 }
  0x1a   :  { %p9756_p8 = scmp.ne.s32.totalorder %s14935_s4, %s9755_s28  ;;  %p9759_p9 = scmp.lt.u32.totalorder %s9755_s28, %s14935_s4 }
  0x1c   :  { %p9761_p10 = pnand %p9759_p9, %p9756_p8 }
  0x1e   :  { %9764 = shalt.err (!%p9761_p10)
}
  0x1f   :  { %s9765_s2 = scalar_lea.vmem %s65_s22, 9216  ;;  %p9770_p12 = scmp.lt.s32.totalorder %s65_s22, %s65_s22 }
  0x20   :  { %p9766_p11 = scmp.ne.s32.totalorder %s65_s22, %s9765_s2  ;;  %p9771_p13 = scmp.lt.s32.totalorder %s9765_s2, %s9765_s2 }
  0x22   :  { %p9772_p0 = por %p9771_p13, %p9770_p12 }
  0x24   :  { %p9773_p1 = pnand %p9772_p0, %p9766_p11 }
  0x26   :  { %9776 = shalt.err (!%p9773_p1)
}
  0x27   :  { %s10014_s26 = smov 128   ;;  %s10015_s16 = smov 8  }
  0x28   :  { %70 = dma.hbm_to_vmem [thread:$0]  %s14935_s4, 9216, %s65_s22, [#allocation13], %s10014_s26, %s10014_s26, %s10015_s16  }
  0x29   :  { %s9777_s21 = scalar_lea.hbm %s14937_s6, 16 }
  0x2a   :  { %p9778_p2 = scmp.ne.s32.totalorder %s14937_s6, %s9777_s21  ;;  %p9781_p3 = scmp.lt.u32.totalorder %s9777_s21, %s14937_s6 }
  0x2c   :  { %p9783_p4 = pnand %p9781_p3, %p9778_p2 }
  0x2e   :  { %9786 = shalt.err (!%p9783_p4)
}
  0x2f   :  { %s9787_s29 = scalar_lea.vmem %s88_s24, 16  ;;  %s9791_s30 = scalar_lea.vmem %s88_s24, 32 }
  0x30   :  { %p9788_p5 = scmp.ne.s32.totalorder %s88_s24, %s9787_s29  ;;  %p9792_p6 = scmp.lt.s32.totalorder %s88_s24, %s88_s24 }
  0x31   :  { %p9793_p7 = scmp.lt.s32.totalorder %s9791_s30, %s9787_s29 }
  0x33   :  { %p9794_p8 = por %p9793_p7, %p9792_p6 }
  0x35   :  { %p9795_p9 = pnand %p9794_p8, %p9788_p5 }
  0x37   :  { %9798 = shalt.err (!%p9795_p9)
}
  0x38   :  { %90 = dma.hbm_to_vmem [thread:$0]  %s14937_s6, 16, %s88_s24, [#allocation16]  }
  0x39   :  { %s10016_s14 = smov [#allocation18]   ;;  %s10017_s2 = smov [#allocation21]  }
  0x3a   :  { %s109_s15 = sshll.u32 %s10016_s14, 4  ;;  %s131_s17 = sshll.u32 %s10017_s2, 4  ;;  %s110_s15 = int_to_ptr.vmem [resolvable:$true] %s109_s15  ;;  %s132_s17 = int_to_ptr.vmem [resolvable:$true] %s131_s17 }
  0x3b   :  { %s9799_s20 = scalar_lea.hbm %s14939_s8, 32 }
  0x3c   :  { %p9800_p10 = scmp.ne.s32.totalorder %s14939_s8, %s9799_s20  ;;  %p9803_p11 = scmp.lt.u32.totalorder %s9799_s20, %s14939_s8 }
  0x3e   :  { %p9805_p12 = pnand %p9803_p11, %p9800_p10 }
  0x40   :  { %9808 = shalt.err (!%p9805_p12)
}
  0x41   :  { %s9809_s6 = scalar_lea.vmem %s110_s15, 32  ;;  %p9814_p0 = scmp.lt.s32.totalorder %s110_s15, %s110_s15 }
  0x42   :  { %p9810_p13 = scmp.ne.s32.totalorder %s110_s15, %s9809_s6  ;;  %p9815_p1 = scmp.lt.s32.totalorder %s9809_s6, %s9809_s6 }
  0x44   :  { %p9816_p2 = por %p9815_p1, %p9814_p0 }
  0x46   :  { %p9817_p3 = pnand %p9816_p2, %p9810_p13 }
  0x48   :  { %9820 = shalt.err (!%p9817_p3)
}
  0x49   :  { %112 = dma.hbm_to_vmem [thread:$0]  %s14939_s8, 32, %s110_s15, [#allocation19]  }
  0x4a   :  { %s9821_s4 = scalar_lea.hbm %s14942_s11, 16 }
  0x4b   :  { %p9822_p4 = scmp.ne.s32.totalorder %s14942_s11, %s9821_s4  ;;  %p9825_p5 = scmp.lt.u32.totalorder %s9821_s4, %s14942_s11 }
  0x4d   :  { %p9827_p6 = pnand %p9825_p5, %p9822_p4 }
  0x4f   :  { %9830 = shalt.err (!%p9827_p6)
}
  0x50   :  { %s9831_s19 = scalar_lea.vmem %s132_s17, 16  ;;  %s9835_s20 = scalar_lea.vmem %s132_s17, 32 }
  0x51   :  { %p9832_p7 = scmp.ne.s32.totalorder %s132_s17, %s9831_s19  ;;  %p9836_p8 = scmp.lt.s32.totalorder %s132_s17, %s132_s17 }
  0x52   :  { %p9837_p9 = scmp.lt.s32.totalorder %s9835_s20, %s9831_s19 }
  0x54   :  { %p9838_p10 = por %p9837_p9, %p9836_p8 }
  0x56   :  { %p9839_p11 = pnand %p9838_p10, %p9832_p7 }
  0x58   :  { %9842 = shalt.err (!%p9839_p11)
}
  0x59   :  { %134 = dma.hbm_to_vmem [thread:$0]  %s14942_s11, 16, %s132_s17, [#allocation22]  }
  0x5a   :  { %s10018_s21 = smov [#allocation6]   ;;  %s10019_s25 = smov [#allocation11]  }
  0x5b   :  { %s32_s23 = sshll.u32 %s10018_s21, 4  ;;  %s55_s27 = sshll.u32 %s10019_s25, 4  ;;  %s33_s23 = int_to_ptr.vmem [resolvable:$true] %s32_s23  ;;  %s56_s27 = int_to_ptr.vmem [resolvable:$true] %s55_s27 }
  0x5c   :  { %s9843_s28 = scalar_lea.hbm %s14932_s1, 256 }
  0x5d   :  { %p9844_p12 = scmp.ne.s32.totalorder %s14932_s1, %s9843_s28  ;;  %p9847_p13 = scmp.lt.u32.totalorder %s9843_s28, %s14932_s1 }
  0x5f   :  { %p9849_p0 = pnand %p9847_p13, %p9844_p12 }
  0x61   :  { %9852 = shalt.err (!%p9849_p0)
}
  0x62   :  { %s9853_s11 = scalar_lea.vmem %s33_s23, 256  ;;  %p9858_p2 = scmp.lt.s32.totalorder %s33_s23, %s33_s23 }
  0x63   :  { %p9854_p1 = scmp.ne.s32.totalorder %s33_s23, %s9853_s11  ;;  %p9859_p3 = scmp.lt.s32.totalorder %s9853_s11, %s9853_s11 }
  0x65   :  { %p9860_p4 = por %p9859_p3, %p9858_p2 }
  0x67   :  { %p9861_p5 = pnand %p9860_p4, %p9854_p1 }
  0x69   :  { %9864 = shalt.err (!%p9861_p5)
}
  0x6a   :  { %38 = dma.hbm_to_vmem [thread:$0]  %s14932_s1, 256, %s33_s23, [#allocation7], %s10014_s26, %s10014_s26, %s10015_s16  }
  0x6b   :  { %s9865_s19 = scalar_lea.hbm %s14934_s3, 16 }
  0x6c   :  { %p9866_p6 = scmp.ne.s32.totalorder %s14934_s3, %s9865_s19  ;;  %p9869_p7 = scmp.lt.u32.totalorder %s9865_s19, %s14934_s3 }
  0x6e   :  { %p9871_p8 = pnand %p9869_p7, %p9866_p6 }
  0x70   :  { %9874 = shalt.err (!%p9871_p8)
}
  0x71   :  { %s9875_s25 = scalar_lea.vmem %s56_s27, 16  ;;  %s9879_s6 = scalar_lea.vmem %s56_s27, 32 }
  0x72   :  { %p9876_p9 = scmp.ne.s32.totalorder %s56_s27, %s9875_s25  ;;  %p9880_p10 = scmp.lt.s32.totalorder %s56_s27, %s56_s27 }
  0x73   :  { %p9881_p11 = scmp.lt.s32.totalorder %s9879_s6, %s9875_s25 }
  0x75   :  { %p9882_p12 = por %p9881_p11, %p9880_p10 }
  0x77   :  { %p9883_p13 = pnand %p9882_p12, %p9876_p9 }
  0x79   :  { %9886 = shalt.err (!%p9883_p13)
}
  0x7a   :  { %58 = dma.hbm_to_vmem [thread:$0]  %s14934_s3, 16, %s56_s27, [#allocation10]  }
  0x7b   :  { %s10020_s23 = smov [#allocation14]   ;;  %s10021_s28 = smov [#allocation17]  }
  0x7c   :  { %s77_s24 = sshll.u32 %s10020_s23, 4  ;;  %s96_s29 = sshll.u32 %s10021_s28, 4  ;;  %s78_s24 = int_to_ptr.vmem [resolvable:$true] %s77_s24  ;;  %s97_s29 = int_to_ptr.vmem [resolvable:$true] %s96_s29 }
  0x7d   :  { %s9887_s22 = scalar_lea.hbm %s14936_s5, 16 }
  0x7e   :  { %p9888_p0 = scmp.ne.s32.totalorder %s14936_s5, %s9887_s22  ;;  %p9891_p1 = scmp.lt.u32.totalorder %s9887_s22, %s14936_s5 }
  0x80   :  { %p9893_p2 = pnand %p9891_p1, %p9888_p0 }
  0x82   :  { %9896 = shalt.err (!%p9893_p2)
}
  0x83   :  { %s9897_s3 = scalar_lea.vmem %s78_s24, 16  ;;  %s9901_s27 = scalar_lea.vmem %s78_s24, 32 }
  0x84   :  { %p9898_p3 = scmp.ne.s32.totalorder %s78_s24, %s9897_s3  ;;  %p9902_p4 = scmp.lt.s32.totalorder %s78_s24, %s78_s24 }
  0x85   :  { %p9903_p5 = scmp.lt.s32.totalorder %s9901_s27, %s9897_s3 }
  0x87   :  { %p9904_p6 = por %p9903_p5, %p9902_p4 }
  0x89   :  { %p9905_p7 = pnand %p9904_p6, %p9898_p3 }
  0x8b   :  { %9908 = shalt.err (!%p9905_p7)
}
  0x8c   :  { %80 = dma.hbm_to_vmem [thread:$0]  %s14936_s5, 16, %s78_s24, [#allocation13]  }
  0x8d   :  { %s9909_s15 = scalar_lea.hbm %s14938_s7, 65536 }
  0x8e   :  { %p9910_p8 = scmp.ne.s32.totalorder %s14938_s7, %s9909_s15  ;;  %p9913_p9 = scmp.lt.u32.totalorder %s9909_s15, %s14938_s7 }
  0x90   :  { %p9915_p10 = pnand %p9913_p9, %p9910_p8 }
  0x92   :  { %9918 = shalt.err (!%p9915_p10)
}
  0x93   :  { %s9919_s26 = scalar_lea.vmem %s97_s29, 65536  ;;  %p9924_p12 = scmp.lt.s32.totalorder %s97_s29, %s97_s29 }
  0x94   :  { %p9920_p11 = scmp.ne.s32.totalorder %s97_s29, %s9919_s26  ;;  %p9925_p13 = scmp.lt.s32.totalorder %s9919_s26, %s9919_s26 }
  0x96   :  { %p9926_p0 = por %p9925_p13, %p9924_p12 }
  0x98   :  { %p9927_p1 = pnand %p9926_p0, %p9920_p11 }
  0x9a   :  { %9930 = shalt.err (!%p9927_p1)
}
  0x9b   :  { %s10022_s5 = smov 256   ;;  %s10023_s23 = smov 16  }
  0x9c   :  { %102 = dma.hbm_to_vmem [thread:$0]  %s14938_s7, 65536, %s97_s29, [#allocation16], %s10022_s5, %s10022_s5, %s10023_s23  }
  0x9d   :  { %s10024_s30 = smov [#allocation20]   ;;  %s10025_s22 = smov [#allocation23]  }
  0x9e   :  { %s119_s4 = sshll.u32 %s10024_s30, 4  ;;  %s141_s11 = sshll.u32 %s10025_s22, 4  ;;  %s120_s4 = int_to_ptr.vmem [resolvable:$true] %s119_s4  ;;  %s142_s11 = int_to_ptr.vmem [resolvable:$true] %s141_s11 }
  0x9f   :  { %s9931_s2 = scalar_lea.hbm %s14940_s9, 32 }
  0xa0   :  { %p9932_p2 = scmp.ne.s32.totalorder %s14940_s9, %s9931_s2  ;;  %p9935_p3 = scmp.lt.u32.totalorder %s9931_s2, %s14940_s9 }
  0xa2   :  { %p9937_p4 = pnand %p9935_p3, %p9932_p2 }
  0xa4   :  { %9940 = shalt.err (!%p9937_p4)
}
  0xa5   :  { %s9941_s7 = scalar_lea.vmem %s120_s4, 32  ;;  %p9946_p6 = scmp.lt.s32.totalorder %s120_s4, %s120_s4 }
  0xa6   :  { %p9942_p5 = scmp.ne.s32.totalorder %s120_s4, %s9941_s7  ;;  %p9947_p7 = scmp.lt.s32.totalorder %s9941_s7, %s9941_s7 }
  0xa8   :  { %p9948_p8 = por %p9947_p7, %p9946_p6 }
  0xaa   :  { %p9949_p9 = pnand %p9948_p8, %p9942_p5 }
  0xac   :  { %9952 = shalt.err (!%p9949_p9)
}
  0xad   :  { %122 = dma.hbm_to_vmem [thread:$0]  %s14940_s9, 32, %s120_s4, [#allocation19]  }
  0xae   :  { %s9953_s21 = scalar_lea.hbm %s14943_s12, 16 }
  0xaf   :  { %p9954_p10 = scmp.ne.s32.totalorder %s14943_s12, %s9953_s21  ;;  %p9957_p11 = scmp.lt.u32.totalorder %s9953_s21, %s14943_s12 }
  0xb1   :  { %p9959_p12 = pnand %p9957_p11, %p9954_p10 }
  0xb3   :  { %9962 = shalt.err (!%p9959_p12)
}
  0xb4   :  { %s9963_s5 = scalar_lea.vmem %s142_s11, 16  ;;  %s9967_s23 = scalar_lea.vmem %s142_s11, 32 }
  0xb5   :  { %p9964_p13 = scmp.ne.s32.totalorder %s142_s11, %s9963_s5  ;;  %p9968_p0 = scmp.lt.s32.totalorder %s142_s11, %s142_s11 }
  0xb6   :  { %p9969_p1 = scmp.lt.s32.totalorder %s9967_s23, %s9963_s5 }
  0xb8   :  { %p9970_p2 = por %p9969_p1, %p9968_p0 }
  0xba   :  { %p9971_p3 = pnand %p9970_p2, %p9964_p13 }
  0xbc   :  { %9974 = shalt.err (!%p9971_p3)
}
  0xbd   :  { %144 = dma.hbm_to_vmem [thread:$0]  %s14943_s12, 16, %s142_s11, [#allocation22]  }
  0xbe   :  { %9997 = dma.done.wait [#allocation7], 256  }
  0xbf   :  { %9998 = vsyncadd [#allocation7], 4294967040 }
  0xc0   :  { %9999 = dma.done.wait [#allocation10], 32  }
  0xc1   :  { %10000 = vsyncadd [#allocation10], 4294967264 }
  0xc2   :  { %10001 = dma.done.wait [#allocation13], 9232  }
  0xc3   :  { %10002 = vsyncadd [#allocation13], 4294958064 }
  0xc4   :  { %10003 = dma.done.wait [#allocation16], 65552  }
  0xc5   :  { %10004 = vsyncadd [#allocation16], 4294901744 }
  0xc6   :  { %10005 = dma.done.wait [#allocation19], 64  }
  0xc7   :  { %10006 = vsyncadd [#allocation19], 4294967232 }
  0xc8   :  { %10007 = dma.done.wait [#allocation22], 32  }
  0xc9   :  { %10008 = vsyncadd [#allocation22], 4294967264  ;;  %vm178_vm0 = vcmask 7168   ;;  %v14945_v0 = vmov 0.0   ;;  %vm181_vm1 = vcmask 1024   ;;  %vm782_vm2 = vcmask 1045504  }
  0xca   :  { %179 = vst.msk [vmem:[#allocation2] sm:$0xff] %vm178_vm0, %v14945_v0  ;;  %180 = vst.msk [vmem:[#allocation2 + $0x8] sm:$0xff] %vm178_vm0, %v14945_v0  ;;  %6517 = vmatprep.mubr.f32.mxu1 %v14945_v0  ;;  %v288_v1 = vld [vmem:[%s14931_s0] sm:$0xff]  ;;  %v289_v2 = vld [vmem:[%s14931_s0 + $0x8] sm:$0xff]  ;;  %vm621_vm3 = vcmask 1046528   ;;  %s10027_s6 = smov 2  }
  0xcb   :  { %183 = vst.msk [vmem:[#allocation2 + $0x18] sm:$0xff] %vm178_vm0, %v14945_v0  ;;  %184 = vst.msk [vmem:[#allocation2 + $0x20] sm:$0xff] %vm178_vm0, %v14945_v0  ;;  %v290_v3 = vld [vmem:[%s14931_s0 + $0x10] sm:$0xff]  ;;  %v291_v6 = vld [vmem:[%s14931_s0 + $0x18] sm:$0xff]  ;;  %s10028_s1 = smov 1   ;;  %s10029_s26 = smov 3  }
  0xcc   :  { %186 = vst.msk [vmem:[#allocation2 + $0x30] sm:$0xff] %vm178_vm0, %v14945_v0  ;;  %187 = vst.msk [vmem:[#allocation2 + $0x38] sm:$0xff] %vm178_vm0, %v14945_v0  ;;  %v292_v14 = vld [vmem:[%s14931_s0 + $0x20] sm:$0xff]  ;;  %v293_v15 = vld [vmem:[%s14931_s0 + $0x28] sm:$0xff]  ;;  %s10030_s5 = smov 4   ;;  %s10031_s24 = smov 5  }
  0xcd   :  { %189 = vst.msk [vmem:[#allocation2 + $0x48] sm:$0xff] %vm178_vm0, %v14945_v0  ;;  %190 = vst.msk [vmem:[#allocation2 + $0x50] sm:$0xff] %vm178_vm0, %v14945_v0  ;;  %v294_v16 = vld [vmem:[%s14931_s0 + $0x30] sm:$0xff]  ;;  %v295_v19 = vld [vmem:[%s14931_s0 + $0x38] sm:$0xff]  ;;  %s10032_s30 = smov 6   ;;  %vm3245_vm4 = vcmask 1040384  }
  0xce   :  { %192 = vst.msk [vmem:[#allocation2 + $0x60] sm:$0xff] %vm178_vm0, %v14945_v0  ;;  %193 = vst.msk [vmem:[#allocation2 + $0x68] sm:$0xff] %vm178_vm0, %v14945_v0  ;;  %v296_v20 = vld [vmem:[%s14931_s0 + $0x40] sm:$0xff]  ;;  %v297_v21 = vld [vmem:[%s14931_s0 + $0x48] sm:$0xff]  ;;  %s10033_s4 = smov 7   ;;  %vm10034_vm5 = vmmov 1  }
  0xcf   :  { %195 = vst.msk [vmem:[#allocation2 + $0x78] sm:$0xff] %vm178_vm0, %v14945_v0  ;;  %196 = vst.msk [vmem:[#allocation2 + $0x80] sm:$0xff] %vm178_vm0, %v14945_v0  ;;  %v298_v35 = vld [vmem:[%s14931_s0 + $0x50] sm:$0xff]  ;;  %v299_v39 = vld [vmem:[%s14931_s0 + $0x58] sm:$0xff]  ;;  %vm2595_vm7 = vcmask 15360   ;;  %vm2660_vm8 = vcmask 23552  }
  0xd0   :  { %198 = vst.msk [vmem:[#allocation2 + $0x90] sm:$0xff] %vm178_vm0, %v14945_v0  ;;  %199 = vst.msk [vmem:[#allocation2 + $0x98] sm:$0xff] %vm178_vm0, %v14945_v0  ;;  %v3050_v45 = vld [vmem:[#allocation6] sm:$0xff]  ;;  %v3051_v46 = vld [vmem:[#allocation6 + $0x8] sm:$0x1]  ;;  %vm2725_vm9 = vcmask 31744  }
  0xd1   :  { %201 = vst.msk [vmem:[#allocation2 + $0xa8] sm:$0xff] %vm178_vm0, %v14945_v0  ;;  %202 = vst.msk [vmem:[#allocation2 + $0xb0] sm:$0xff] %vm178_vm0, %v14945_v0  ;;  %v10471_v4 = vld [vmem:[#allocation2] sm:$0xff]  ;;  %v10473_v5 = vld [vmem:[#allocation2 + $0x8] sm:$0xff]  ;;  %v8559_v47 = vpack.c.bf16 %v3051_v46, %v3050_v45  ;;  %vm2790_vm10 = vcmask 39936   ;;  %vm2855_vm11 = vcmask 48128  }
  0xd2   :  { %204 = vst.msk [vmem:[#allocation2 + $0xc0] sm:$0xff] %vm178_vm0, %v14945_v0  ;;  %205 = vst.msk [vmem:[#allocation2 + $0xc8] sm:$0xff] %vm178_vm0, %v14945_v0  ;;  %v783_v7 = vrot.slane %v10471_v4, 2  ;;  %v784_v8 = vrot.slane %v10473_v5, 2  ;;  %v622_v9 = vrot.slane %v10471_v4, 1  ;;  %v623_v10 = vrot.slane %v10473_v5, 1 }
  0xd3   :  { %207 = vst.msk [vmem:[#allocation2 + $0xd8] sm:$0xff] %vm178_vm0, %v14945_v0  ;;  %208 = vst.msk [vmem:[#allocation2 + $0xe0] sm:$0xff] %vm178_vm0, %v14945_v0  ;;  %v300_v55 = vld [vmem:[%s14931_s0 + $0x60] sm:$0xff]  ;;  %v301_v57 = vld [vmem:[%s14931_s0 + $0x68] sm:$0xff]  ;;  %vm2920_vm12 = vcmask 56320   ;;  %vm2985_vm13 = vcmask 64512  }
  0xd4   :  { %210 = vst.msk [vmem:[#allocation2 + $0xf0] sm:$0xff] %vm178_vm0, %v14945_v0  ;;  %211 = vst.msk [vmem:[#allocation2 + $0xf8] sm:$0xff] %vm178_vm0, %v14945_v0  ;;  %v785_v17 = vsel %vm782_vm2, %v783_v7, %v784_v8  ;;  %v624_v18 = vsel %vm621_vm3, %v622_v9, %v623_v10  ;;  %v302_v9 = vld [vmem:[%s14931_s0 + $0x70] sm:$0xff]  ;;  %vm3052_vm14 = vcmask 72704   ;;  %vm4480_vm15 = vcmask 523264  }
  0xd5   :  { %213 = vst.msk [vmem:[#allocation2 + $0x108] sm:$0xff] %vm178_vm0, %v14945_v0  ;;  %214 = vst.msk [vmem:[#allocation2 + $0x110] sm:$0xff] %vm178_vm0, %v14945_v0  ;;  %1187 = vrot.lane.b32.xlu1 %v785_v17, %s10027_s6  ;;  %995 = vrot.lane.b32.xlu0 %v624_v18, %s10028_s1 }
  0xd6   :  { %216 = vst.msk [vmem:[#allocation2 + $0x120] sm:$0xff] %vm178_vm0, %v14945_v0  ;;  %217 = vst.msk [vmem:[#allocation2 + $0x128] sm:$0xff] %vm178_vm0, %v14945_v0 }
  0xd7   :  { %219 = vst.msk [vmem:[#allocation2 + $0x138] sm:$0xff] %vm178_vm0, %v14945_v0  ;;  %220 = vst.msk [vmem:[#allocation2 + $0x140] sm:$0xff] %vm178_vm0, %v14945_v0 }
  0xd8   :  { %222 = vst.msk [vmem:[#allocation2 + $0x150] sm:$0xff] %vm178_vm0, %v14945_v0  ;;  %223 = vst.msk [vmem:[#allocation2 + $0x158] sm:$0xff] %vm178_vm0, %v14945_v0 }
  0xd9   :  { %225 = vst.msk [vmem:[#allocation2 + $0x168] sm:$0xff] %vm178_vm0, %v14945_v0  ;;  %226 = vst.msk [vmem:[#allocation2 + $0x170] sm:$0xff] %vm178_vm0, %v14945_v0 }
  0xda   :  { %228 = vst.msk [vmem:[#allocation2 + $0x180] sm:$0xff] %vm178_vm0, %v14945_v0  ;;  %229 = vst.msk [vmem:[#allocation2 + $0x188] sm:$0xff] %vm178_vm0, %v14945_v0 }
  0xdb   :  { %231 = vst.msk [vmem:[#allocation2 + $0x198] sm:$0xff] %vm178_vm0, %v14945_v0  ;;  %232 = vst.msk [vmem:[#allocation2 + $0x1a0] sm:$0xff] %vm178_vm0, %v14945_v0 }
  0xdc   :  { %234 = vst.msk [vmem:[#allocation2 + $0x1b0] sm:$0xff] %vm178_vm0, %v14945_v0  ;;  %235 = vst.msk [vmem:[#allocation2 + $0x1b8] sm:$0xff] %vm178_vm0, %v14945_v0 }
  0xdd   :  { %237 = vst.msk [vmem:[#allocation2 + $0x1c8] sm:$0xff] %vm178_vm0, %v14945_v0  ;;  %238 = vst.msk [vmem:[#allocation2 + $0x1d0] sm:$0xff] %vm178_vm0, %v14945_v0 }
  0xde   :  { %240 = vst.msk [vmem:[#allocation2 + $0x1e0] sm:$0xff] %vm178_vm0, %v14945_v0  ;;  %241 = vst.msk [vmem:[#allocation2 + $0x1e8] sm:$0xff] %vm178_vm0, %v14945_v0 }
  0xdf   :  { %243 = vst.msk [vmem:[#allocation2 + $0x1f8] sm:$0xff] %vm178_vm0, %v14945_v0  ;;  %244 = vst.msk [vmem:[#allocation2 + $0x200] sm:$0xff] %vm178_vm0, %v14945_v0 }
  0xe0   :  { %246 = vst.msk [vmem:[#allocation2 + $0x210] sm:$0xff] %vm178_vm0, %v14945_v0  ;;  %247 = vst.msk [vmem:[#allocation2 + $0x218] sm:$0xff] %vm178_vm0, %v14945_v0 }
  0xe1   :  { %249 = vst.msk [vmem:[#allocation2 + $0x228] sm:$0xff] %vm178_vm0, %v14945_v0  ;;  %250 = vst.msk [vmem:[#allocation2 + $0x230] sm:$0xff] %vm178_vm0, %v14945_v0 }
  0xe2   :  { %252 = vst.msk [vmem:[#allocation2 + $0x240] sm:$0xff] %vm178_vm0, %v14945_v0  ;;  %253 = vst.msk [vmem:[#allocation2 + $0x248] sm:$0xff] %vm178_vm0, %v14945_v0 }
  0xe3   :  { %255 = vst.msk [vmem:[#allocation2 + $0x258] sm:$0xff] %vm178_vm0, %v14945_v0  ;;  %256 = vst.msk [vmem:[#allocation2 + $0x260] sm:$0xff] %vm178_vm0, %v14945_v0 }
  0xe4   :  { %258 = vst.msk [vmem:[#allocation2 + $0x270] sm:$0xff] %vm178_vm0, %v14945_v0  ;;  %259 = vst.msk [vmem:[#allocation2 + $0x278] sm:$0xff] %vm178_vm0, %v14945_v0 }
  0xe5   :  { %261 = vst.msk [vmem:[#allocation2 + $0x288] sm:$0xff] %vm178_vm0, %v14945_v0  ;;  %262 = vst.msk [vmem:[#allocation2 + $0x290] sm:$0xff] %vm178_vm0, %v14945_v0 }
  0xe6   :  { %264 = vst.msk [vmem:[#allocation2 + $0x2a0] sm:$0xff] %vm178_vm0, %v14945_v0  ;;  %265 = vst.msk [vmem:[#allocation2 + $0x2a8] sm:$0xff] %vm178_vm0, %v14945_v0 }
  0xe7   :  { %267 = vst.msk [vmem:[#allocation2 + $0x2b8] sm:$0xff] %vm178_vm0, %v14945_v0  ;;  %268 = vst.msk [vmem:[#allocation2 + $0x2c0] sm:$0xff] %vm178_vm0, %v14945_v0 }
  0xe8   :  { %270 = vst.msk [vmem:[#allocation2 + $0x2d0] sm:$0xff] %vm178_vm0, %v14945_v0  ;;  %271 = vst.msk [vmem:[#allocation2 + $0x2d8] sm:$0xff] %vm178_vm0, %v14945_v0 }
  0xe9   :  { %273 = vst.msk [vmem:[#allocation2 + $0x2e8] sm:$0xff] %vm178_vm0, %v14945_v0  ;;  %274 = vst.msk [vmem:[#allocation2 + $0x2f0] sm:$0xff] %vm178_vm0, %v14945_v0 }
  0xea   :  { %276 = vst.msk [vmem:[#allocation2 + $0x300] sm:$0xff] %vm178_vm0, %v14945_v0  ;;  %277 = vst.msk [vmem:[#allocation2 + $0x308] sm:$0xff] %vm178_vm0, %v14945_v0 }
  0xeb   :  { %279 = vst.msk [vmem:[#allocation2 + $0x318] sm:$0xff] %vm178_vm0, %v14945_v0  ;;  %280 = vst.msk [vmem:[#allocation2 + $0x320] sm:$0xff] %vm178_vm0, %v14945_v0 }
  0xec   :  { %282 = vst.msk [vmem:[#allocation2 + $0x330] sm:$0xff] %vm178_vm0, %v14945_v0  ;;  %283 = vst.msk [vmem:[#allocation2 + $0x338] sm:$0xff] %vm178_vm0, %v14945_v0 }
  0xed   :  { %285 = vst.msk [vmem:[#allocation2 + $0x348] sm:$0xff] %vm178_vm0, %v14945_v0  ;;  %286 = vst.msk [vmem:[#allocation2 + $0x350] sm:$0xff] %vm178_vm0, %v14945_v0 }
  0xee   :  { %182 = vst.msk [vmem:[#allocation2 + $0x10] sm:$0x3] %vm181_vm1, %v14945_v0  ;;  %185 = vst.msk [vmem:[#allocation2 + $0x28] sm:$0x3] %vm181_vm1, %v14945_v0 }
  0xef   :  { %188 = vst.msk [vmem:[#allocation2 + $0x40] sm:$0x3] %vm181_vm1, %v14945_v0  ;;  %191 = vst.msk [vmem:[#allocation2 + $0x58] sm:$0x3] %vm181_vm1, %v14945_v0 }
  0xf0   :  { %194 = vst.msk [vmem:[#allocation2 + $0x70] sm:$0x3] %vm181_vm1, %v14945_v0  ;;  %197 = vst.msk [vmem:[#allocation2 + $0x88] sm:$0x3] %vm181_vm1, %v14945_v0 }
  0xf1   :  { %200 = vst.msk [vmem:[#allocation2 + $0xa0] sm:$0x3] %vm181_vm1, %v14945_v0  ;;  %203 = vst.msk [vmem:[#allocation2 + $0xb8] sm:$0x3] %vm181_vm1, %v14945_v0 }
  0xf2   :  { %206 = vst.msk [vmem:[#allocation2 + $0xd0] sm:$0x3] %vm181_vm1, %v14945_v0  ;;  %209 = vst.msk [vmem:[#allocation2 + $0xe8] sm:$0x3] %vm181_vm1, %v14945_v0 }
  0xf3   :  { %212 = vst.msk [vmem:[#allocation2 + $0x100] sm:$0x3] %vm181_vm1, %v14945_v0  ;;  %215 = vst.msk [vmem:[#allocation2 + $0x118] sm:$0x3] %vm181_vm1, %v14945_v0 }
  0xf4   :  { %218 = vst.msk [vmem:[#allocation2 + $0x130] sm:$0x3] %vm181_vm1, %v14945_v0  ;;  %221 = vst.msk [vmem:[#allocation2 + $0x148] sm:$0x3] %vm181_vm1, %v14945_v0 }
  0xf5   :  { %224 = vst.msk [vmem:[#allocation2 + $0x160] sm:$0x3] %vm181_vm1, %v14945_v0  ;;  %227 = vst.msk [vmem:[#allocation2 + $0x178] sm:$0x3] %vm181_vm1, %v14945_v0  ;;  %v419_v11 = vld [vmem:[#allocation2 + $0x10] sm:$0x3] }
  0xf6   :  { %230 = vst.msk [vmem:[#allocation2 + $0x190] sm:$0x3] %vm181_vm1, %v14945_v0  ;;  %233 = vst.msk [vmem:[#allocation2 + $0x1a8] sm:$0x3] %vm181_vm1, %v14945_v0  ;;  %v786_v12 = vrot.slane %v419_v11, 2  ;;  %v625_v13 = vrot.slane %v419_v11, 1 }
  0xf7   :  { %236 = vst.msk [vmem:[#allocation2 + $0x1c0] sm:$0x3] %vm181_vm1, %v14945_v0  ;;  %239 = vst.msk [vmem:[#allocation2 + $0x1d8] sm:$0x3] %vm181_vm1, %v14945_v0  ;;  %v303_v11 = vld [vmem:[%s14931_s0 + $0x78] sm:$0xff] }
  0xf8   :  { %242 = vst.msk [vmem:[#allocation2 + $0x1f0] sm:$0x3] %vm181_vm1, %v14945_v0  ;;  %245 = vst.msk [vmem:[#allocation2 + $0x208] sm:$0x3] %vm181_vm1, %v14945_v0  ;;  %v787_v22 = vsel %vm782_vm2, %v784_v8, %v786_v12  ;;  %v626_v23 = vsel %vm621_vm3, %v623_v10, %v625_v13 }
  0xf9   :  { %248 = vst.msk [vmem:[#allocation2 + $0x220] sm:$0x3] %vm181_vm1, %v14945_v0  ;;  %251 = vst.msk [vmem:[#allocation2 + $0x238] sm:$0x3] %vm181_vm1, %v14945_v0  ;;  %1189 = vrot.lane.b32.xlu1 %v787_v22, %s10027_s6  ;;  %997 = vrot.lane.b32.xlu0 %v626_v23, %s10028_s1 }
  0xfa   :  { %254 = vst.msk [vmem:[#allocation2 + $0x250] sm:$0x3] %vm181_vm1, %v14945_v0  ;;  %257 = vst.msk [vmem:[#allocation2 + $0x268] sm:$0x3] %vm181_vm1, %v14945_v0 }
  0xfb   :  { %260 = vst.msk [vmem:[#allocation2 + $0x280] sm:$0x3] %vm181_vm1, %v14945_v0  ;;  %263 = vst.msk [vmem:[#allocation2 + $0x298] sm:$0x3] %vm181_vm1, %v14945_v0 }
  0xfc   :  { %266 = vst.msk [vmem:[#allocation2 + $0x2b0] sm:$0x3] %vm181_vm1, %v14945_v0  ;;  %269 = vst.msk [vmem:[#allocation2 + $0x2c8] sm:$0x3] %vm181_vm1, %v14945_v0 }
  0xfd   :  { %272 = vst.msk [vmem:[#allocation2 + $0x2e0] sm:$0x3] %vm181_vm1, %v14945_v0  ;;  %275 = vst.msk [vmem:[#allocation2 + $0x2f8] sm:$0x3] %vm181_vm1, %v14945_v0 }
  0xfe   :  { %278 = vst.msk [vmem:[#allocation2 + $0x310] sm:$0x3] %vm181_vm1, %v14945_v0  ;;  %281 = vst.msk [vmem:[#allocation2 + $0x328] sm:$0x3] %vm181_vm1, %v14945_v0 }
  0xff   :  { %284 = vst.msk [vmem:[#allocation2 + $0x340] sm:$0x3] %vm181_vm1, %v14945_v0  ;;  %287 = vst.msk [vmem:[#allocation2 + $0x358] sm:$0x3] %vm181_vm1, %v14945_v0  ;;  %vm4737_vm1 = vcmask 517120  }
 0x100   :  { %353 = vst.msk [vmem:[#allocation2 + $0x19] sm:$0xff] %vm178_vm0, %v288_v1  ;;  %354 = vst.msk [vmem:[#allocation2 + $0x21] sm:$0xff] %vm178_vm0, %v289_v2 }
 0x101   :  { %355 = vst.msk [vmem:[#allocation2 + $0x31] sm:$0xff] %vm178_vm0, %v290_v3  ;;  %356 = vst.msk [vmem:[#allocation2 + $0x39] sm:$0xff] %vm178_vm0, %v291_v6 }
 0x102   :  { %357 = vst.msk [vmem:[#allocation2 + $0x49] sm:$0xff] %vm178_vm0, %v292_v14  ;;  %358 = vst.msk [vmem:[#allocation2 + $0x51] sm:$0xff] %vm178_vm0, %v293_v15 }
 0x103   :  { %359 = vst.msk [vmem:[#allocation2 + $0x61] sm:$0xff] %vm178_vm0, %v294_v16  ;;  %360 = vst.msk [vmem:[#allocation2 + $0x69] sm:$0xff] %vm178_vm0, %v295_v19 }
 0x104   :  { %361 = vst.msk [vmem:[#allocation2 + $0x79] sm:$0xff] %vm178_vm0, %v296_v20  ;;  %362 = vst.msk [vmem:[#allocation2 + $0x81] sm:$0xff] %vm178_vm0, %v297_v21 }
 0x105   :  { %363 = vst.msk [vmem:[#allocation2 + $0x91] sm:$0xff] %vm178_vm0, %v298_v35  ;;  %364 = vst.msk [vmem:[#allocation2 + $0x99] sm:$0xff] %vm178_vm0, %v299_v39 }
 0x106   :  { %vm8560_vm6 = vmpackc.low %vm3245_vm4, %vm10034_vm5  ;;  %365 = vst.msk [vmem:[#allocation2 + $0xa9] sm:$0xff] %vm178_vm0, %v300_v55 }
 0x107   :  { %v10516_v24 = vld [vmem:[#allocation2 + $0x20] sm:$0xff]  ;;  %v10518_v25 = vld [vmem:[#allocation2 + $0x18] sm:$0xff]  ;;  %v422_v28 = vld [vmem:[#allocation2 + $0x28] sm:$0x3]  ;;  %8561 = vmatprep.subr.msk.bf16.mxu0 %vm8560_vm6, %v8559_v47  ;;  %366 = vst.msk [vmem:[#allocation2 + $0xb1] sm:$0xff] %vm178_vm0, %v301_v57 }
 0x108   :  { %v627_v26 = vrot.slane %v10518_v25, 1  ;;  %v628_v27 = vrot.slane %v10516_v24, 1  ;;  %1381 = vrot.lane.b32.xlu1 %v10516_v24, %s10029_s26  ;;  %1379 = vrot.lane.b32.xlu0 %v10518_v25, %s10029_s26  ;;  %v788_v30 = vrot.slane %v10518_v25, 2  ;;  %v789_v31 = vrot.slane %v10516_v24, 2  ;;  %v10543_v37 = vld [vmem:[#allocation2 + $0x30] sm:$0xff]  ;;  %v10549_v40 = vld [vmem:[#allocation2 + $0x38] sm:$0xff] }
 0x109   :  { %v630_v32 = vrot.slane %v422_v28, 1  ;;  %v791_v36 = vrot.slane %v422_v28, 2  ;;  %v632_v41 = vrot.slane %v10543_v37, 1  ;;  %v633_v42 = vrot.slane %v10549_v40, 1  ;;  %v425_v44 = vld [vmem:[#allocation2 + $0x40] sm:$0x3]  ;;  %8564 = vmatpush3.bf16.msk.msra.mxu0 %vm8560_vm6, %v8559_v47 }
 0x10a   :  { %v629_v29 = vsel %vm621_vm3, %v627_v26, %v628_v27  ;;  %v790_v33 = vsel %vm782_vm2, %v788_v30, %v789_v31  ;;  %v793_v48 = vrot.slane %v10543_v37, 2  ;;  %v794_v49 = vrot.slane %v10549_v40, 2  ;;  %v10584_v56 = vld [vmem:[#allocation2 + $0x48] sm:$0xff]  ;;  %v10589_v58 = vld [vmem:[#allocation2 + $0x50] sm:$0xff]  ;;  %v428_v62 = vld [vmem:[#allocation2 + $0x58] sm:$0x3] }
 0x10b   :  { %v631_v34 = vsel %vm621_vm3, %v628_v27, %v630_v32  ;;  %v792_v38 = vsel %vm782_vm2, %v789_v31, %v791_v36  ;;  %v634_v43 = vsel %vm621_vm3, %v632_v41, %v633_v42  ;;  %v635_v50 = vrot.slane %v425_v44, 1  ;;  %367 = vst.msk [vmem:[#allocation2 + $0xc1] sm:$0xff] %vm178_vm0, %v302_v9  ;;  %v10624_v10 = vld [vmem:[#allocation2 + $0x60] sm:$0xff]  ;;  %v10629_v12 = vld [vmem:[#allocation2 + $0x68] sm:$0xff]  ;;  %368 = vst.msk [vmem:[#allocation2 + $0xc9] sm:$0xff] %vm178_vm0, %v303_v11 }
 0x10c   :  { %999 = vrot.lane.b32.xlu1 %v629_v29, %s10028_s1  ;;  %1571 = vrot.lane.b32.xlu0 %v629_v29, %s10030_s5  ;;  %v795_v51 = vsel %vm782_vm2, %v793_v48, %v794_v49  ;;  %v796_v53 = vrot.slane %v425_v44, 2  ;;  %v637_v59 = vrot.slane %v10584_v56, 1  ;;  %v638_v60 = vrot.slane %v10589_v58, 1  ;;  %v431_v16 = vld [vmem:[#allocation2 + $0x70] sm:$0x3]  ;;  %v304_v26 = vld [vmem:[%s14931_s0 + $0x80] sm:$0xff] }
 0x10d   :  { %v636_v52 = vsel %vm621_vm3, %v633_v42, %v635_v50  ;;  %v798_v63 = vrot.slane %v10584_v56, 2  ;;  %v799_v1 = vrot.slane %v10589_v58, 2  ;;  %v640_v2 = vrot.slane %v428_v62, 1  ;;  %369 = vst.msk [vmem:[#allocation2 + $0xd9] sm:$0xff] %vm178_vm0, %v304_v26  ;;  %v10664_v29 = vld [vmem:[#allocation2 + $0x78] sm:$0xff]  ;;  %v305_v30 = vld [vmem:[%s14931_s0 + $0x88] sm:$0xff] }
 0x10e   :  { %v797_v54 = vsel %vm782_vm2, %v794_v49, %v796_v53  ;;  %v639_v61 = vsel %vm621_vm3, %v637_v59, %v638_v60  ;;  %v801_v7 = vrot.slane %v428_v62, 2  ;;  %v642_v13 = vrot.slane %v10624_v10, 1  ;;  %370 = vst.msk [vmem:[#allocation2 + $0xe1] sm:$0xff] %vm178_vm0, %v305_v30  ;;  %v10735_v9 = vld [vmem:[#allocation2 + $0x98] sm:$0xff] }
 0x10f   :  { %v800_v3 = vsel %vm782_vm2, %v798_v63, %v799_v1  ;;  %v641_v6 = vsel %vm621_vm3, %v638_v60, %v640_v2  ;;  %v643_v14 = vrot.slane %v10629_v12, 1  ;;  %v803_v17 = vrot.slane %v10624_v10, 2  ;;  %4736 = vst.msk [vmem:[#allocation4] sm:$0xff] %vm4480_vm15, %v14945_v0  ;;  %4739 = vst.msk [vmem:[#allocation4 + $0x10] sm:$0xff] %vm4480_vm15, %v14945_v0 }
 0x110   :  { %1763 = vrot.lane.b32.xlu1 %v790_v33, %s10031_s24  ;;  %1573 = vrot.lane.b32.xlu0 %v631_v34, %s10030_s5  ;;  %v802_v8 = vsel %vm782_vm2, %v799_v1, %v801_v7  ;;  %v804_v18 = vrot.slane %v10629_v12, 2  ;;  %v645_v19 = vrot.slane %v431_v16, 1  ;;  %v806_v22 = vrot.slane %v431_v16, 2  ;;  %4741 = vst.msk [vmem:[#allocation4 + $0x20] sm:$0xff] %vm4480_vm15, %v14945_v0  ;;  %4743 = vst.msk [vmem:[#allocation4 + $0x30] sm:$0xff] %vm4480_vm15, %v14945_v0 }
 0x111   :  { %v644_v15 = vsel %vm621_vm3, %v642_v13, %v643_v14  ;;  %v808_v44 = vrot.slane %v10664_v29, 2  ;;  %v653_v16 = vrot.slane %v10735_v9, 1  ;;  %4745 = vst.msk [vmem:[#allocation4 + $0x40] sm:$0xff] %vm4480_vm15, %v14945_v0  ;;  %4747 = vst.msk [vmem:[#allocation4 + $0x50] sm:$0xff] %vm4480_vm15, %v14945_v0 }
 0x112   :  { %v805_v20 = vsel %vm782_vm2, %v803_v17, %v804_v18  ;;  %v646_v21 = vsel %vm621_vm3, %v643_v14, %v645_v19  ;;  %v807_v23 = vsel %vm782_vm2, %v804_v18, %v806_v22  ;;  %4749 = vst.msk [vmem:[#allocation4 + $0x60] sm:$0xff] %vm4480_vm15, %v14945_v0  ;;  %4751 = vst.msk [vmem:[#allocation4 + $0x70] sm:$0xff] %vm4480_vm15, %v14945_v0 }
 0x113   :  { %4753 = vst.msk [vmem:[#allocation4 + $0x80] sm:$0xff] %vm4480_vm15, %v14945_v0  ;;  %4755 = vst.msk [vmem:[#allocation4 + $0x90] sm:$0xff] %vm4480_vm15, %v14945_v0 }
 0x114   :  { %1191 = vrot.lane.b32.xlu1 %v790_v33, %s10027_s6  ;;  %1001 = vrot.lane.b32.xlu0 %v631_v34, %s10028_s1  ;;  %v10673_v33 = vld [vmem:[#allocation2 + $0x80] sm:$0xff]  ;;  %v647_v34 = vrot.slane %v10664_v29, 1  ;;  %4757 = vst.msk [vmem:[#allocation4 + $0xa0] sm:$0xff] %vm4480_vm15, %v14945_v0  ;;  %4759 = vst.msk [vmem:[#allocation4 + $0xb0] sm:$0xff] %vm4480_vm15, %v14945_v0 }
 0x115   :  { %v648_v35 = vrot.slane %v10673_v33, 1  ;;  %v809_v45 = vrot.slane %v10673_v33, 2  ;;  %4761 = vst.msk [vmem:[#allocation4 + $0xc0] sm:$0xff] %vm4480_vm15, %v14945_v0  ;;  %4763 = vst.msk [vmem:[#allocation4 + $0xd0] sm:$0xff] %vm4480_vm15, %v14945_v0 }
 0x116   :  { %4765 = vst.msk [vmem:[#allocation4 + $0xe0] sm:$0xff] %vm4480_vm15, %v14945_v0  ;;  %4767 = vst.msk [vmem:[#allocation4 + $0xf0] sm:$0xff] %vm4480_vm15, %v14945_v0 }
 0x117   :  { %v649_v39 = vsel %vm621_vm3, %v647_v34, %v648_v35  ;;  %v810_v49 = vsel %vm782_vm2, %v808_v44, %v809_v45  ;;  %4769 = vst.msk [vmem:[#allocation4 + $0x100] sm:$0xff] %vm4480_vm15, %v14945_v0  ;;  %4771 = vst.msk [vmem:[#allocation4 + $0x110] sm:$0xff] %vm4480_vm15, %v14945_v0 }
 0x118   :  { %1955 = vrot.lane.b32.xlu1 %v10543_v37, %s10032_s30  ;;  %1765 = vrot.lane.b32.xlu0 %v792_v38, %s10031_s24  ;;  %4773 = vst.msk [vmem:[#allocation4 + $0x120] sm:$0xff] %vm4480_vm15, %v14945_v0  ;;  %4775 = vst.msk [vmem:[#allocation4 + $0x130] sm:$0xff] %vm4480_vm15, %v14945_v0 }
 0x119   :  { %4740 = vst.msk [vmem:[#allocation4 + $0x18] sm:$0x3] %vm4737_vm1, %v14945_v0  ;;  %4742 = vst.msk [vmem:[#allocation4 + $0x28] sm:$0x3] %vm4737_vm1, %v14945_v0 }
 0x11a   :  { %4738 = vst.msk [vmem:[#allocation4 + $0x8] sm:$0x3] %vm4737_vm1, %v14945_v0  ;;  %4744 = vst.msk [vmem:[#allocation4 + $0x38] sm:$0x3] %vm4737_vm1, %v14945_v0 }
 0x11b   :  { %4746 = vst.msk [vmem:[#allocation4 + $0x48] sm:$0x3] %vm4737_vm1, %v14945_v0  ;;  %4748 = vst.msk [vmem:[#allocation4 + $0x58] sm:$0x3] %vm4737_vm1, %v14945_v0 }
 0x11c   :  { %1383 = vrot.lane.b32.xlu1 %v10543_v37, %s10029_s26  ;;  %1193 = vrot.lane.b32.xlu0 %v792_v38, %s10027_s6  ;;  %4750 = vst.msk [vmem:[#allocation4 + $0x68] sm:$0x3] %vm4737_vm1, %v14945_v0  ;;  %4752 = vst.msk [vmem:[#allocation4 + $0x78] sm:$0x3] %vm4737_vm1, %v14945_v0 }
 0x11d   :  { %4754 = vst.msk [vmem:[#allocation4 + $0x88] sm:$0x3] %vm4737_vm1, %v14945_v0  ;;  %4756 = vst.msk [vmem:[#allocation4 + $0x98] sm:$0x3] %vm4737_vm1, %v14945_v0 }
 0x11e   :  { %4758 = vst.msk [vmem:[#allocation4 + $0xa8] sm:$0x3] %vm4737_vm1, %v14945_v0  ;;  %4760 = vst.msk [vmem:[#allocation4 + $0xb8] sm:$0x3] %vm4737_vm1, %v14945_v0 }
 0x11f   :  { %4762 = vst.msk [vmem:[#allocation4 + $0xc8] sm:$0x3] %vm4737_vm1, %v14945_v0  ;;  %4764 = vst.msk [vmem:[#allocation4 + $0xd8] sm:$0x3] %vm4737_vm1, %v14945_v0 }
 0x120   :  { %2147 = vrot.lane.b32.xlu1 %v634_v43, %s10033_s4  ;;  %1957 = vrot.lane.b32.xlu0 %v10549_v40, %s10032_s30  ;;  %4766 = vst.msk [vmem:[#allocation4 + $0xe8] sm:$0x3] %vm4737_vm1, %v14945_v0  ;;  %4768 = vst.msk [vmem:[#allocation4 + $0xf8] sm:$0x3] %vm4737_vm1, %v14945_v0 }
 0x121   :  { %4770 = vst.msk [vmem:[#allocation4 + $0x108] sm:$0x3] %vm4737_vm1, %v14945_v0  ;;  %4772 = vst.msk [vmem:[#allocation4 + $0x118] sm:$0x3] %vm4737_vm1, %v14945_v0 }
 0x122   :  { %4774 = vst.msk [vmem:[#allocation4 + $0x128] sm:$0x3] %vm4737_vm1, %v14945_v0  ;;  %4776 = vst.msk [vmem:[#allocation4 + $0x138] sm:$0x3] %vm4737_vm1, %v14945_v0 }
 0x124   :  { %1575 = vrot.lane.b32.xlu1 %v634_v43, %s10030_s5  ;;  %1385 = vrot.lane.b32.xlu0 %v10549_v40, %s10029_s26 }
 0x128   :  { %2339 = vrot.lane.b32.xlu1 %v795_v51, %s10015_s16  ;;  %2149 = vrot.lane.b32.xlu0 %v636_v52, %s10033_s4 }
 0x12c   :  { %1577 = vrot.lane.b32.xlu1 %v636_v52, %s10030_s5  ;;  %1003 = vrot.lane.b32.xlu0 %v634_v43, %s10028_s1  ;;  %v434_v43 = vld [vmem:[#allocation2 + $0x88] sm:$0x3] }
 0x12d   :  { %v650_v46 = vrot.slane %v434_v43, 1  ;;  %v811_v53 = vrot.slane %v434_v43, 2 }
 0x12f   :  { %v651_v50 = vsel %vm621_vm3, %v648_v35, %v650_v46  ;;  %v812_v57 = vsel %vm782_vm2, %v809_v45, %v811_v53  ;;  %v814_v35 = vrot.slane %v10735_v9, 2 }
 0x130   :  { %2341 = vrot.lane.b32.xlu1 %v797_v54, %s10015_s16  ;;  %1767 = vrot.lane.b32.xlu0 %v795_v51, %s10031_s24 }
 0x134   :  { %1195 = vrot.lane.b32.xlu1 %v795_v51, %s10027_s6  ;;  %1005 = vrot.lane.b32.xlu0 %v636_v52, %s10028_s1 }
 0x138   :  { %1959 = vrot.lane.b32.xlu1 %v10584_v56, %s10032_s30  ;;  %1769 = vrot.lane.b32.xlu0 %v797_v54, %s10031_s24 }
 0x13c   :  { %1387 = vrot.lane.b32.xlu1 %v10584_v56, %s10029_s26  ;;  %1197 = vrot.lane.b32.xlu0 %v797_v54, %s10027_s6 }
 0x140   :  { %2151 = vrot.lane.b32.xlu1 %v639_v61, %s10033_s4  ;;  %1961 = vrot.lane.b32.xlu0 %v10589_v58, %s10032_s30 }
 0x144   :  { %1579 = vrot.lane.b32.xlu1 %v639_v61, %s10030_s5  ;;  %1389 = vrot.lane.b32.xlu0 %v10589_v58, %s10029_s26 }
 0x147   :  { %v1188_v27 = vpop.permute.xlu1 %1187  ;;  %v996_v28 = vpop.permute.xlu0 %995 }
 0x148   :  { %2343 = vrot.lane.b32.xlu1 %v800_v3, %s10015_s16  ;;  %2153 = vrot.lane.b32.xlu0 %v641_v6, %s10033_s4  ;;  %v2531_v62 = vsel %vm178_vm0, %v10471_v4, %v996_v28  ;;  %v437_v28 = vld [vmem:[#allocation2 + $0xa0] sm:$0x3] }
 0x149   :  { %v2596_v2 = vsel %vm2595_vm7, %v2531_v62, %v1188_v27 }
 0x14c   :  { %1581 = vrot.lane.b32.xlu1 %v641_v6, %s10030_s5  ;;  %1007 = vrot.lane.b32.xlu0 %v639_v61, %s10028_s1  ;;  %v306_v61 = vld [vmem:[%s14931_s0 + $0x90] sm:$0xff] }
 0x14d   :  { %371 = vst.msk [vmem:[#allocation2 + $0xf1] sm:$0xff] %vm178_vm0, %v306_v61 }
 0x150   :  { %2345 = vrot.lane.b32.xlu1 %v802_v8, %s10015_s16  ;;  %1771 = vrot.lane.b32.xlu0 %v800_v3, %s10031_s24 }
 0x154   :  { %1199 = vrot.lane.b32.xlu1 %v800_v3, %s10027_s6  ;;  %1009 = vrot.lane.b32.xlu0 %v641_v6, %s10028_s1  ;;  %v10725_v3 = vld [vmem:[#allocation2 + $0x90] sm:$0xff]  ;;  %v307_v6 = vld [vmem:[%s14931_s0 + $0x98] sm:$0xff] }
 0x155   :  { %372 = vst.msk [vmem:[#allocation2 + $0xf9] sm:$0xff] %vm178_vm0, %v307_v6  ;;  %v813_v34 = vrot.slane %v10725_v3, 2  ;;  %v309_v6 = vld [vmem:[%s14931_s0 + $0xa8] sm:$0xff] }
 0x156   :  { %374 = vst.msk [vmem:[#allocation2 + $0x111] sm:$0xff] %vm178_vm0, %v309_v6  ;;  %v311_v6 = vld [vmem:[%s14931_s0 + $0xb8] sm:$0xff] }
 0x157   :  { %v815_v44 = vsel %vm782_vm2, %v813_v34, %v814_v35  ;;  %376 = vst.msk [vmem:[#allocation2 + $0x129] sm:$0xff] %vm178_vm0, %v311_v6  ;;  %v313_v6 = vld [vmem:[%s14931_s0 + $0xc8] sm:$0xff] }
 0x158   :  { %1963 = vrot.lane.b32.xlu1 %v10624_v10, %s10032_s30  ;;  %1773 = vrot.lane.b32.xlu0 %v802_v8, %s10031_s24  ;;  %378 = vst.msk [vmem:[#allocation2 + $0x141] sm:$0xff] %vm178_vm0, %v313_v6  ;;  %v315_v6 = vld [vmem:[%s14931_s0 + $0xd8] sm:$0xff] }
 0x159   :  { %380 = vst.msk [vmem:[#allocation2 + $0x159] sm:$0xff] %vm178_vm0, %v315_v6 }
 0x15c   :  { %1391 = vrot.lane.b32.xlu1 %v10624_v10, %s10029_s26  ;;  %1201 = vrot.lane.b32.xlu0 %v802_v8, %s10027_s6 }
 0x160   :  { %2155 = vrot.lane.b32.xlu1 %v644_v15, %s10033_s4  ;;  %1965 = vrot.lane.b32.xlu0 %v10629_v12, %s10032_s30 }
 0x164   :  { %1583 = vrot.lane.b32.xlu1 %v644_v15, %s10030_s5  ;;  %1393 = vrot.lane.b32.xlu0 %v10629_v12, %s10029_s26 }
 0x168   :  { %2347 = vrot.lane.b32.xlu1 %v805_v20, %s10015_s16  ;;  %2157 = vrot.lane.b32.xlu0 %v646_v21, %s10033_s4 }
 0x16b   :  { %v10669_v31 = vpop.permute.xlu1 %1189  ;;  %v10671_v32 = vpop.permute.xlu0 %997 }
 0x16c   :  { %1585 = vrot.lane.b32.xlu1 %v646_v21, %s10030_s5  ;;  %1011 = vrot.lane.b32.xlu0 %v644_v15, %s10028_s1  ;;  %v652_v15 = vrot.slane %v10725_v3, 1  ;;  %v2532_v17 = vsel %vm178_vm0, %v10473_v5, %v10671_v32 }
 0x16d   :  { %v2597_v22 = vsel %vm2595_vm7, %v2532_v17, %v10669_v31 }
 0x170   :  { %2349 = vrot.lane.b32.xlu1 %v807_v23, %s10015_s16  ;;  %1775 = vrot.lane.b32.xlu0 %v805_v20, %s10031_s24 }
 0x174   :  { %1203 = vrot.lane.b32.xlu1 %v805_v20, %s10027_s6  ;;  %1013 = vrot.lane.b32.xlu0 %v646_v21, %s10028_s1 }
 0x178   :  { %1967 = vrot.lane.b32.xlu1 %v10664_v29, %s10032_s30  ;;  %1777 = vrot.lane.b32.xlu0 %v807_v23, %s10031_s24 }
 0x17a   :  { %v10681_v36 = vpop.permute.xlu1 %1381  ;;  %v1380_v38 = vpop.permute.xlu0 %1379 }
 0x17b   :  { %v2661_v4 = vsel %vm2660_vm8, %v2596_v2, %v1380_v38  ;;  %v2662_v5 = vsel %vm2660_vm8, %v2597_v22, %v10681_v36  ;;  %v655_v36 = vrot.slane %v437_v28, 1  ;;  %v10807_v2 = vld [vmem:[#allocation2 + $0xa8] sm:$0xff] }
 0x17c   :  { %1395 = vrot.lane.b32.xlu1 %v10664_v29, %s10029_s26  ;;  %1205 = vrot.lane.b32.xlu0 %v807_v23, %s10027_s6  ;;  %v654_v23 = vsel %vm621_vm3, %v652_v15, %v653_v16 }
 0x17d   :  { %v656_v45 = vsel %vm621_vm3, %v653_v16, %v655_v36 }
 0x17e   :  { %v10687_v41 = vpop.permute.xlu1 %999  ;;  %v1572_v42 = vpop.permute.xlu0 %1571 }
 0x17f   :  { %v2726_v11 = vsel %vm2725_vm9, %v2661_v4, %v1572_v42 }
 0x180   :  { %2159 = vrot.lane.b32.xlu1 %v649_v39, %s10033_s4  ;;  %1969 = vrot.lane.b32.xlu0 %v10673_v33, %s10032_s30 }
 0x182   :  { %v1764_v47 = vpop.permute.xlu1 %1763  ;;  %v10694_v48 = vpop.permute.xlu0 %1573 }
 0x183   :  { %v2791_v13 = vsel %vm2790_vm10, %v2726_v11, %v1764_v47  ;;  %v2727_v30 = vsel %vm2725_vm9, %v2662_v5, %v10694_v48  ;;  %v816_v48 = vrot.slane %v437_v28, 2 }
 0x184   :  { %1587 = vrot.lane.b32.xlu1 %v649_v39, %s10030_s5  ;;  %1397 = vrot.lane.b32.xlu0 %v10673_v33, %s10029_s26 }
 0x185   :  { %v817_v53 = vsel %vm782_vm2, %v814_v35, %v816_v48 }
 0x186   :  { %v10701_v51 = vpop.permute.xlu1 %1191  ;;  %v10703_v52 = vpop.permute.xlu0 %1001 }
 0x188   :  { %2351 = vrot.lane.b32.xlu1 %v810_v49, %s10015_s16  ;;  %2161 = vrot.lane.b32.xlu0 %v651_v50, %s10033_s4 }
 0x18a   :  { %v1956_v54 = vpop.permute.xlu1 %1955  ;;  %v1766_v55 = vpop.permute.xlu0 %1765 }
 0x18b   :  { %v2856_v14 = vsel %vm2855_vm11, %v2791_v13, %v1956_v54  ;;  %v2792_v32 = vsel %vm2790_vm10, %v2727_v30, %v1766_v55  ;;  %v818_v30 = vrot.slane %v10807_v2, 2 }
 0x18c   :  { %1589 = vrot.lane.b32.xlu1 %v651_v50, %s10030_s5  ;;  %1015 = vrot.lane.b32.xlu0 %v649_v39, %s10028_s1 }
 0x18e   :  { %v10710_v59 = vpop.permute.xlu1 %1383  ;;  %v10712_v60 = vpop.permute.xlu0 %1193 }
 0x190   :  { %2353 = vrot.lane.b32.xlu1 %v812_v57, %s10015_s16  ;;  %1779 = vrot.lane.b32.xlu0 %v810_v49, %s10031_s24 }
 0x192   :  { %v2148_v63 = vpop.permute.xlu1 %2147  ;;  %v1958_v1 = vpop.permute.xlu0 %1957 }
 0x193   :  { %v2921_v18 = vsel %vm2920_vm12, %v2856_v14, %v2148_v63  ;;  %v2857_v31 = vsel %vm2855_vm11, %v2792_v32, %v1958_v1  ;;  %v2533_v63 = vsel %vm178_vm0, %v10518_v25, %v10687_v41  ;;  %v10818_v25 = vld [vmem:[#allocation2 + $0xb0] sm:$0xff]  ;;  %v657_v14 = vrot.slane %v10807_v2, 1 }
 0x194   :  { %1207 = vrot.lane.b32.xlu1 %v810_v49, %s10027_s6  ;;  %1017 = vrot.lane.b32.xlu0 %v651_v50, %s10028_s1  ;;  %v2598_v1 = vsel %vm2595_vm7, %v2533_v63, %v10701_v51  ;;  %v658_v15 = vrot.slane %v10818_v25, 1 }
 0x195   :  { %v2663_v4 = vsel %vm2660_vm8, %v2598_v1, %v10710_v59  ;;  %v10891_v1 = vld [vmem:[#allocation2 + $0xc0] sm:$0xff] }
 0x196   :  { %v10731_v7 = vpop.permute.xlu1 %1575  ;;  %v10733_v8 = vpop.permute.xlu0 %1385 }
 0x197   :  { %v2728_v41 = vsel %vm2725_vm9, %v2663_v4, %v10731_v7  ;;  %v2534_v7 = vsel %vm178_vm0, %v10516_v24, %v10703_v52  ;;  %v440_v24 = vld [vmem:[#allocation2 + $0xb8] sm:$0x3] }
 0x198   :  { %1971 = vrot.lane.b32.xlu1 %v10725_v3, %s10032_s30  ;;  %1781 = vrot.lane.b32.xlu0 %v812_v57, %s10031_s24  ;;  %v660_v32 = vrot.slane %v440_v24, 1 }
 0x19a   :  { %v2340_v19 = vpop.permute.xlu1 %2339  ;;  %v2150_v20 = vpop.permute.xlu0 %2149 }
 0x19b   :  { %v2986_v21 = vsel %vm2985_vm13, %v2921_v18, %v2340_v19  ;;  %v2922_v38 = vsel %vm2920_vm12, %v2857_v31, %v2150_v20  ;;  %v2599_v20 = vsel %vm2595_vm7, %v2534_v7, %v10712_v60 }
 0x19c   :  { %1399 = vrot.lane.b32.xlu1 %v10725_v3, %s10029_s26  ;;  %1209 = vrot.lane.b32.xlu0 %v812_v57, %s10027_s6  ;;  %v308_v57 = vld [vmem:[%s14931_s0 + $0xa0] sm:$0xff]  ;;  %v2664_v22 = vsel %vm2660_vm8, %v2599_v20, %v10733_v8  ;;  %v819_v8 = vrot.slane %v10818_v25, 2 }
 0x19d   :  { %8423 = vmatprep.mubr.msk.f32.mxu0 %vm3052_vm14, %v2986_v21  ;;  %373 = vst.msk [vmem:[#allocation2 + $0x109] sm:$0xff] %vm178_vm0, %v308_v57  ;;  %v659_v21 = vsel %vm621_vm3, %v657_v14, %v658_v15 }
 0x19e   :  { %v10760_v26 = vpop.permute.xlu1 %1577  ;;  %v10762_v27 = vpop.permute.xlu0 %1003  ;;  %v820_v36 = vsel %vm782_vm2, %v818_v30, %v819_v8 }
 0x19f   :  { %v2729_v52 = vsel %vm2725_vm9, %v2664_v22, %v10760_v26 }
 0x1a0   :  { %2163 = vrot.lane.b32.xlu1 %v654_v23, %s10033_s4  ;;  %1973 = vrot.lane.b32.xlu0 %v10735_v9, %s10032_s30 }
 0x1a2   :  { %v2342_v39 = vpop.permute.xlu1 %2341  ;;  %v1768_v42 = vpop.permute.xlu0 %1767 }
 0x1a3   :  { %v2987_v43 = vsel %vm2985_vm13, %v2922_v38, %v2342_v39  ;;  %v2793_v51 = vsel %vm2790_vm10, %v2728_v41, %v1768_v42  ;;  %v661_v38 = vsel %vm621_vm3, %v658_v15, %v660_v32 }
 0x1a4   :  { %1591 = vrot.lane.b32.xlu1 %v654_v23, %s10030_s5  ;;  %1401 = vrot.lane.b32.xlu0 %v10735_v9, %s10029_s26 }
 0x1a5   :  { %8424 = vmatmul.mubr.msk.f32.vlgmr.msra.gmra.mrb[0].mxu0 %vm3052_vm14, %v2987_v43  ;;  %v821_v43 = vrot.slane %v440_v24, 2 }
 0x1a6   :  { %v10781_v46 = vpop.permute.xlu1 %1195  ;;  %v10783_v47 = vpop.permute.xlu0 %1005 }
 0x1a7   :  { %v822_v48 = vsel %vm782_vm2, %v819_v8, %v821_v43 }
 0x1a8   :  { %2355 = vrot.lane.b32.xlu1 %v815_v44, %s10015_s16  ;;  %2165 = vrot.lane.b32.xlu0 %v656_v45, %s10033_s4 }
 0x1aa   :  { %v1960_v49 = vpop.permute.xlu1 %1959  ;;  %v1770_v50 = vpop.permute.xlu0 %1769 }
 0x1ab   :  { %v2858_v59 = vsel %vm2855_vm11, %v2793_v51, %v1960_v49  ;;  %v2794_v28 = vsel %vm2790_vm10, %v2729_v52, %v1770_v50  ;;  %v823_v52 = vrot.slane %v10891_v1, 2 }
 0x1ac   :  { %1593 = vrot.lane.b32.xlu1 %v656_v45, %s10030_s5  ;;  %1019 = vrot.lane.b32.xlu0 %v654_v23, %s10028_s1 }
 0x1ae   :  { %v10790_v54 = vpop.permute.xlu1 %1387  ;;  %v10792_v55 = vpop.permute.xlu0 %1197 }
 0x1b0   :  { %2357 = vrot.lane.b32.xlu1 %v817_v53, %s10015_s16  ;;  %1783 = vrot.lane.b32.xlu0 %v815_v44, %s10031_s24 }
 0x1b2   :  { %v2152_v61 = vpop.permute.xlu1 %2151  ;;  %v1962_v62 = vpop.permute.xlu0 %1961 }
 0x1b3   :  { %v2923_v16 = vsel %vm2920_vm12, %v2858_v59, %v2152_v61  ;;  %v2859_v60 = vsel %vm2855_vm11, %v2794_v28, %v1962_v62  ;;  %v2535_v62 = vsel %vm178_vm0, %v10543_v37, %v10762_v27  ;;  %v10902_v37 = vld [vmem:[#allocation2 + $0xc8] sm:$0xff]  ;;  %v662_v59 = vrot.slane %v10891_v1, 1 }
 0x1b4   :  { %1211 = vrot.lane.b32.xlu1 %v815_v44, %s10027_s6  ;;  %1021 = vrot.lane.b32.xlu0 %v656_v45, %s10028_s1  ;;  %v2600_v63 = vsel %vm2595_vm7, %v2535_v62, %v10781_v46  ;;  %v663_v14 = vrot.slane %v10902_v37, 1 }
 0x1b5   :  { %v2665_v4 = vsel %vm2660_vm8, %v2600_v63, %v10790_v54  ;;  %v10975_v63 = vld [vmem:[#allocation2 + $0xd8] sm:$0xff] }
 0x1b6   :  { %v10814_v11 = vpop.permute.xlu1 %1579  ;;  %v10816_v13 = vpop.permute.xlu0 %1389  ;;  %v664_v7 = vsel %vm621_vm3, %v662_v59, %v663_v14 }
 0x1b7   :  { %v2730_v27 = vsel %vm2725_vm9, %v2665_v4, %v10814_v11  ;;  %v2536_v11 = vsel %vm178_vm0, %v10549_v40, %v10783_v47  ;;  %v443_v40 = vld [vmem:[#allocation2 + $0xd0] sm:$0x3] }
 0x1b8   :  { %1975 = vrot.lane.b32.xlu1 %v10807_v2, %s10032_s30  ;;  %1785 = vrot.lane.b32.xlu0 %v817_v53, %s10031_s24  ;;  %v665_v28 = vrot.slane %v443_v40, 1 }
 0x1ba   :  { %v2344_v17 = vpop.permute.xlu1 %2343  ;;  %v2154_v18 = vpop.permute.xlu0 %2153 }
 0x1bb   :  { %v2988_v19 = vsel %vm2985_vm13, %v2923_v16, %v2344_v17  ;;  %v2924_v31 = vsel %vm2920_vm12, %v2859_v60, %v2154_v18 }
 0x1bc   :  { %1403 = vrot.lane.b32.xlu1 %v10807_v2, %s10029_s26  ;;  %1213 = vrot.lane.b32.xlu0 %v817_v53, %s10027_s6  ;;  %v310_v53 = vld [vmem:[%s14931_s0 + $0xb0] sm:$0xff] }
 0x1bd   :  { %8426 = vmatprep.mubr.msk.f32.mxu0 %vm3052_vm14, %v2988_v19  ;;  %375 = vst.msk [vmem:[#allocation2 + $0x121] sm:$0xff] %vm178_vm0, %v310_v53  ;;  %v2601_v19 = vsel %vm2595_vm7, %v2536_v11, %v10792_v55 }
 0x1be   :  { %v10844_v23 = vpop.permute.xlu1 %1581  ;;  %v10846_v5 = vpop.permute.xlu0 %1007  ;;  %v2666_v20 = vsel %vm2660_vm8, %v2601_v19, %v10816_v13  ;;  %v824_v13 = vrot.slane %v10902_v37, 2 }
 0x1bf   :  { %v2731_v47 = vsel %vm2725_vm9, %v2666_v20, %v10844_v23 }
 0x1c0   :  { %2167 = vrot.lane.b32.xlu1 %v659_v21, %s10033_s4  ;;  %1977 = vrot.lane.b32.xlu0 %v10818_v25, %s10032_s30  ;;  %v825_v32 = vsel %vm782_vm2, %v823_v52, %v824_v13 }
 0x1c2   :  { %v2346_v34 = vpop.permute.xlu1 %2345  ;;  %v1772_v35 = vpop.permute.xlu0 %1771 }
 0x1c3   :  { %v2989_v26 = vsel %vm2985_vm13, %v2924_v31, %v2346_v34  ;;  %v2795_v46 = vsel %vm2790_vm10, %v2730_v27, %v1772_v35  ;;  %v666_v31 = vsel %vm621_vm3, %v663_v14, %v665_v28 }
 0x1c4   :  { %1595 = vrot.lane.b32.xlu1 %v659_v21, %s10030_s5  ;;  %1405 = vrot.lane.b32.xlu0 %v10818_v25, %s10029_s26 }
 0x1c5   :  { %8427 = vmatmul.mubr.msk.f32.gmra.mrb[2].mxu0 %vm3052_vm14, %v2989_v26  ;;  %v826_v26 = vrot.slane %v443_v40, 2 }
 0x1c6   :  { %v10865_v39 = vpop.permute.xlu1 %1199  ;;  %v10867_v42 = vpop.permute.xlu0 %1009 }
 0x1c7   :  { %v827_v43 = vsel %vm782_vm2, %v824_v13, %v826_v26 }
 0x1c8   :  { %2359 = vrot.lane.b32.xlu1 %v820_v36, %s10015_s16  ;;  %2169 = vrot.lane.b32.xlu0 %v661_v38, %s10033_s4 }
 0x1ca   :  { %v1964_v44 = vpop.permute.xlu1 %1963  ;;  %v1774_v45 = vpop.permute.xlu0 %1773 }
 0x1cb   :  { %v2860_v54 = vsel %vm2855_vm11, %v2795_v46, %v1964_v44  ;;  %v2796_v24 = vsel %vm2790_vm10, %v2731_v47, %v1774_v45  ;;  %v828_v47 = vrot.slane %v10975_v63, 2 }
 0x1cc   :  { %1597 = vrot.lane.b32.xlu1 %v661_v38, %s10030_s5  ;;  %1023 = vrot.lane.b32.xlu0 %v659_v21, %s10028_s1 }
 0x1ce   :  { %v10874_v49 = vpop.permute.xlu1 %1391  ;;  %v10876_v50 = vpop.permute.xlu0 %1201 }
 0x1d0   :  { %2361 = vrot.lane.b32.xlu1 %v822_v48, %s10015_s16  ;;  %1787 = vrot.lane.b32.xlu0 %v820_v36, %s10031_s24 }
 0x1d2   :  { %v2156_v57 = vpop.permute.xlu1 %2155  ;;  %v1966_v61 = vpop.permute.xlu0 %1965 }
 0x1d3   :  { %v2925_v15 = vsel %vm2920_vm12, %v2860_v54, %v2156_v57  ;;  %v2861_v55 = vsel %vm2855_vm11, %v2796_v24, %v1966_v61  ;;  %v2537_v61 = vsel %vm178_vm0, %v10584_v56, %v10846_v5  ;;  %v445_v56 = vld [vmem:[#allocation2 + $0xe0] sm:$0xff] }
 0x1d4   :  { %1215 = vrot.lane.b32.xlu1 %v820_v36, %s10027_s6  ;;  %1025 = vrot.lane.b32.xlu0 %v661_v38, %s10028_s1  ;;  %v2602_v62 = vsel %vm2595_vm7, %v2537_v61, %v10865_v39  ;;  %v668_v59 = vrot.slane %v445_v56, 1  ;;  %v829_v24 = vrot.slane %v445_v56, 2 }
 0x1d5   :  { %v2667_v4 = vsel %vm2660_vm8, %v2602_v62, %v10874_v49  ;;  %v667_v49 = vrot.slane %v10975_v63, 1  ;;  %v11053_v62 = vld [vmem:[#allocation2 + $0xf0] sm:$0xff] }
 0x1d6   :  { %v10898_v41 = vpop.permute.xlu1 %1583  ;;  %v10900_v51 = vpop.permute.xlu0 %1393 }
 0x1d7   :  { %v2732_v5 = vsel %vm2725_vm9, %v2667_v4, %v10898_v41  ;;  %v2538_v41 = vsel %vm178_vm0, %v10589_v58, %v10867_v42  ;;  %v669_v11 = vsel %vm621_vm3, %v667_v49, %v668_v59  ;;  %v446_v58 = vld [vmem:[#allocation2 + $0xe8] sm:$0x3] }
 0x1d8   :  { %1979 = vrot.lane.b32.xlu1 %v10891_v1, %s10032_s30  ;;  %1789 = vrot.lane.b32.xlu0 %v822_v48, %s10031_s24 }
 0x1da   :  { %v2348_v16 = vpop.permute.xlu1 %2347  ;;  %v2158_v17 = vpop.permute.xlu0 %2157 }
 0x1db   :  { %v2990_v18 = vsel %vm2985_vm13, %v2925_v15, %v2348_v16  ;;  %v2926_v60 = vsel %vm2920_vm12, %v2861_v55, %v2158_v17 }
 0x1dc   :  { %1407 = vrot.lane.b32.xlu1 %v10891_v1, %s10029_s26  ;;  %1217 = vrot.lane.b32.xlu0 %v822_v48, %s10027_s6  ;;  %v312_v48 = vld [vmem:[%s14931_s0 + $0xc0] sm:$0xff] }
 0x1dd   :  { %8429 = vmatprep.mubr.msk.f32.mxu0 %vm3052_vm14, %v2990_v18  ;;  %377 = vst.msk [vmem:[#allocation2 + $0x139] sm:$0xff] %vm178_vm0, %v312_v48  ;;  %v2603_v18 = vsel %vm2595_vm7, %v2538_v41, %v10876_v50 }
 0x1de   :  { %v10928_v21 = vpop.permute.xlu1 %1585  ;;  %v10930_v22 = vpop.permute.xlu0 %1011  ;;  %v2668_v19 = vsel %vm2660_vm8, %v2603_v18, %v10900_v51  ;;  %v670_v51 = vrot.slane %v446_v58, 1 }
 0x1df   :  { %v2733_v42 = vsel %vm2725_vm9, %v2668_v19, %v10928_v21  ;;  %v830_v21 = vsel %vm782_vm2, %v828_v47, %v829_v24 }
 0x1e0   :  { %2171 = vrot.lane.b32.xlu1 %v664_v7, %s10033_s4  ;;  %1981 = vrot.lane.b32.xlu0 %v10902_v37, %s10032_s30 }
 0x1e2   :  { %v2350_v30 = vpop.permute.xlu1 %2349  ;;  %v1776_v8 = vpop.permute.xlu0 %1775 }
 0x1e3   :  { %v2991_v23 = vsel %vm2985_vm13, %v2926_v60, %v2350_v30  ;;  %v2797_v39 = vsel %vm2790_vm10, %v2732_v5, %v1776_v8  ;;  %v671_v60 = vsel %vm621_vm3, %v668_v59, %v670_v51 }
 0x1e4   :  { %1599 = vrot.lane.b32.xlu1 %v664_v7, %s10030_s5  ;;  %1409 = vrot.lane.b32.xlu0 %v10902_v37, %s10029_s26 }
 0x1e5   :  { %8430 = vmatmul.mubr.msk.f32.gmra.mrb[4].mxu0 %vm3052_vm14, %v2991_v23  ;;  %v831_v23 = vrot.slane %v446_v58, 2 }
 0x1e6   :  { %v10949_v34 = vpop.permute.xlu1 %1203  ;;  %v10951_v35 = vpop.permute.xlu0 %1013 }
 0x1e7   :  { %v832_v26 = vsel %vm782_vm2, %v829_v24, %v831_v23 }
 0x1e8   :  { %2363 = vrot.lane.b32.xlu1 %v825_v32, %s10015_s16  ;;  %2173 = vrot.lane.b32.xlu0 %v666_v31, %s10033_s4 }
 0x1ea   :  { %v1968_v36 = vpop.permute.xlu1 %1967  ;;  %v1778_v38 = vpop.permute.xlu0 %1777 }
 0x1eb   :  { %v2862_v54 = vsel %vm2855_vm11, %v2797_v39, %v1968_v36  ;;  %v2798_v40 = vsel %vm2790_vm10, %v2733_v42, %v1778_v38  ;;  %v672_v39 = vrot.slane %v11053_v62, 1 }
 0x1ec   :  { %1601 = vrot.lane.b32.xlu1 %v666_v31, %s10030_s5  ;;  %1027 = vrot.lane.b32.xlu0 %v664_v7, %s10028_s1 }
 0x1ee   :  { %v10958_v44 = vpop.permute.xlu1 %1395  ;;  %v10960_v45 = vpop.permute.xlu0 %1205 }
 0x1f0   :  { %2365 = vrot.lane.b32.xlu1 %v827_v43, %s10015_s16  ;;  %1791 = vrot.lane.b32.xlu0 %v825_v32, %s10031_s24 }
 0x1f2   :  { %v2160_v53 = vpop.permute.xlu1 %2159  ;;  %v1970_v57 = vpop.permute.xlu0 %1969 }
 0x1f3   :  { %v2927_v14 = vsel %vm2920_vm12, %v2862_v54, %v2160_v53  ;;  %v2863_v50 = vsel %vm2855_vm11, %v2798_v40, %v1970_v57  ;;  %v2539_v57 = vsel %vm178_vm0, %v10624_v10, %v10930_v22  ;;  %v11064_v10 = vld [vmem:[#allocation2 + $0xf8] sm:$0xff] }
 0x1f4   :  { %1219 = vrot.lane.b32.xlu1 %v825_v32, %s10027_s6  ;;  %1029 = vrot.lane.b32.xlu0 %v666_v31, %s10028_s1  ;;  %v2604_v61 = vsel %vm2595_vm7, %v2539_v57, %v10949_v34  ;;  %v673_v54 = vrot.slane %v11064_v10, 1  ;;  %v450_v57 = vld [vmem:[#allocation2 + $0x108] sm:$0xff] }
 0x1f5   :  { %v2669_v4 = vsel %vm2660_vm8, %v2604_v61, %v10958_v44  ;;  %v317_v61 = vld [vmem:[%s14931_s0 + $0xe8] sm:$0xff] }
 0x1f6   :  { %v10982_v27 = vpop.permute.xlu1 %1587  ;;  %v10984_v46 = vpop.permute.xlu0 %1397  ;;  %382 = vst.msk [vmem:[#allocation2 + $0x171] sm:$0xff] %vm178_vm0, %v317_v61 }
 0x1f7   :  { %v2734_v22 = vsel %vm2725_vm9, %v2669_v4, %v10982_v27  ;;  %v2540_v27 = vsel %vm178_vm0, %v10629_v12, %v10951_v35  ;;  %v449_v12 = vld [vmem:[#allocation2 + $0x100] sm:$0x3] }
 0x1f8   :  { %1983 = vrot.lane.b32.xlu1 %v10975_v63, %s10032_s30  ;;  %1793 = vrot.lane.b32.xlu0 %v827_v43, %s10031_s24  ;;  %v675_v58 = vrot.slane %v449_v12, 1 }
 0x1fa   :  { %v2352_v15 = vpop.permute.xlu1 %2351  ;;  %v2162_v16 = vpop.permute.xlu0 %2161  ;;  %v676_v51 = vsel %vm621_vm3, %v673_v54, %v675_v58 }
 0x1fb   :  { %v2992_v17 = vsel %vm2985_vm13, %v2927_v14, %v2352_v15  ;;  %v2928_v55 = vsel %vm2920_vm12, %v2863_v50, %v2162_v16  ;;  %v2605_v16 = vsel %vm2595_vm7, %v2540_v27, %v10960_v45 }
 0x1fc   :  { %1411 = vrot.lane.b32.xlu1 %v10975_v63, %s10029_s26  ;;  %1221 = vrot.lane.b32.xlu0 %v827_v43, %s10027_s6  ;;  %v314_v43 = vld [vmem:[%s14931_s0 + $0xd0] sm:$0xff]  ;;  %v2670_v41 = vsel %vm2660_vm8, %v2605_v16, %v10984_v46  ;;  %v833_v46 = vrot.slane %v11053_v62, 2  ;;  %v452_v16 = vld [vmem:[#allocation2 + $0x118] sm:$0x3] }
 0x1fd   :  { %8432 = vmatprep.mubr.msk.f32.mxu0 %vm3052_vm14, %v2992_v17  ;;  %379 = vst.msk [vmem:[#allocation2 + $0x151] sm:$0xff] %vm178_vm0, %v314_v43  ;;  %v674_v17 = vsel %vm621_vm3, %v672_v39, %v673_v54 }
 0x1fe   :  { %v11009_v7 = vpop.permute.xlu1 %1589  ;;  %v11011_v20 = vpop.permute.xlu0 %1015 }
 0x1ff   :  { %v2735_v35 = vsel %vm2725_vm9, %v2670_v41, %v11009_v7  ;;  %v834_v7 = vrot.slane %v11064_v10, 2  ;;  %v680_v41 = vrot.slane %v452_v16, 1 }
 0x200   :  { %2175 = vrot.lane.b32.xlu1 %v669_v11, %s10033_s4  ;;  %1985 = vrot.lane.b32.xlu0 %v445_v56, %s10032_s30 }
 0x201   :  { %v835_v24 = vsel %vm782_vm2, %v833_v46, %v834_v7 }
 0x202   :  { %v2354_v52 = vpop.permute.xlu1 %2353  ;;  %v1780_v13 = vpop.permute.xlu0 %1779 }
 0x203   :  { %v2993_v28 = vsel %vm2985_vm13, %v2928_v55, %v2354_v52  ;;  %v2799_v34 = vsel %vm2790_vm10, %v2734_v22, %v1780_v13  ;;  %v836_v13 = vrot.slane %v449_v12, 2 }
 0x204   :  { %1603 = vrot.lane.b32.xlu1 %v669_v11, %s10030_s5  ;;  %1413 = vrot.lane.b32.xlu0 %v445_v56, %s10029_s26 }
 0x205   :  { %8433 = vmatmul.mubr.msk.f32.gmra.mrb[6].mxu0 %vm3052_vm14, %v2993_v28 }
 0x206   :  { %v11027_v30 = vpop.permute.xlu1 %1207  ;;  %v11029_v8 = vpop.permute.xlu0 %1017 }
 0x208   :  { %2367 = vrot.lane.b32.xlu1 %v830_v21, %s10015_s16  ;;  %2177 = vrot.lane.b32.xlu0 %v671_v60, %s10033_s4 }
 0x20a   :  { %v1972_v32 = vpop.permute.xlu1 %1971  ;;  %v1782_v31 = vpop.permute.xlu0 %1781 }
 0x20b   :  { %v2864_v44 = vsel %vm2855_vm11, %v2799_v34, %v1972_v32  ;;  %v2800_v19 = vsel %vm2790_vm10, %v2735_v35, %v1782_v31  ;;  %v316_v31 = vld [vmem:[%s14931_s0 + $0xe0] sm:$0xff] }
 0x20c   :  { %1605 = vrot.lane.b32.xlu1 %v671_v60, %s10030_s5  ;;  %1031 = vrot.lane.b32.xlu0 %v669_v11, %s10028_s1  ;;  %381 = vst.msk [vmem:[#allocation2 + $0x169] sm:$0xff] %vm178_vm0, %v316_v31 }
 0x20e   :  { %v11036_v36 = vpop.permute.xlu1 %1399  ;;  %v11038_v38 = vpop.permute.xlu0 %1209 }
 0x210   :  { %2369 = vrot.lane.b32.xlu1 %v832_v26, %s10015_s16  ;;  %1795 = vrot.lane.b32.xlu0 %v830_v21, %s10031_s24 }
 0x212   :  { %v2164_v48 = vpop.permute.xlu1 %2163  ;;  %v1974_v53 = vpop.permute.xlu0 %1973 }
 0x213   :  { %v2929_v49 = vsel %vm2920_vm12, %v2864_v44, %v2164_v48  ;;  %v2865_v45 = vsel %vm2855_vm11, %v2800_v19, %v1974_v53  ;;  %v2541_v48 = vsel %vm178_vm0, %v10664_v29, %v11011_v20  ;;  %v11186_v29 = vld [vmem:[#allocation2 + $0x110] sm:$0xff] }
 0x214   :  { %1223 = vrot.lane.b32.xlu1 %v830_v21, %s10027_s6  ;;  %1033 = vrot.lane.b32.xlu0 %v671_v60, %s10028_s1  ;;  %v837_v60 = vsel %vm782_vm2, %v834_v7, %v836_v13  ;;  %v2606_v53 = vsel %vm2595_vm7, %v2541_v48, %v11027_v30  ;;  %v678_v22 = vrot.slane %v11186_v29, 1  ;;  %v318_v13 = vld [vmem:[%s14931_s0 + $0xf0] sm:$0xff] }
 0x215   :  { %383 = vst.msk [vmem:[#allocation2 + $0x181] sm:$0xff] %vm178_vm0, %v318_v13 }
 0x216   :  { %v11060_v56 = vpop.permute.xlu1 %1591  ;;  %v11062_v5 = vpop.permute.xlu0 %1401  ;;  %v681_v46 = vsel %vm621_vm3, %v678_v22, %v680_v41 }
 0x218   :  { %1987 = vrot.lane.b32.xlu1 %v11053_v62, %s10032_s30  ;;  %1797 = vrot.lane.b32.xlu0 %v832_v26, %s10031_s24 }
 0x21a   :  { %v2356_v59 = vpop.permute.xlu1 %2355  ;;  %v2166_v14 = vpop.permute.xlu0 %2165 }
 0x21b   :  { %v2994_v15 = vsel %vm2985_vm13, %v2929_v49, %v2356_v59  ;;  %v2930_v42 = vsel %vm2920_vm12, %v2865_v45, %v2166_v14 }
 0x21c   :  { %1415 = vrot.lane.b32.xlu1 %v11053_v62, %s10029_s26  ;;  %1225 = vrot.lane.b32.xlu0 %v832_v26, %s10027_s6  ;;  %v2671_v62 = vsel %vm2660_vm8, %v2606_v53, %v11036_v36  ;;  %v677_v36 = vrot.slane %v450_v57, 1 }
 0x21d   :  { %8435 = vmatprep.mubr.msk.f32.mxu0 %vm3052_vm14, %v2994_v15  ;;  %v2736_v20 = vsel %vm2725_vm9, %v2671_v62, %v11060_v56  ;;  %v2542_v56 = vsel %vm178_vm0, %v10673_v33, %v11029_v8 }
 0x21e   :  { %v11090_v18 = vpop.permute.xlu1 %1593  ;;  %v11092_v11 = vpop.permute.xlu0 %1019  ;;  %v2607_v49 = vsel %vm2595_vm7, %v2542_v56, %v11038_v38  ;;  %v679_v59 = vsel %vm621_vm3, %v677_v36, %v678_v22 }
 0x21f   :  { %v2672_v14 = vsel %vm2660_vm8, %v2607_v49, %v11062_v5  ;;  %v839_v5 = vrot.slane %v11186_v29, 2 }
 0x220   :  { %2179 = vrot.lane.b32.xlu1 %v674_v17, %s10033_s4  ;;  %1989 = vrot.lane.b32.xlu0 %v11064_v10, %s10032_s30  ;;  %v2737_v33 = vsel %vm2725_vm9, %v2672_v14, %v11090_v18 }
 0x222   :  { %v2358_v40 = vpop.permute.xlu1 %2357  ;;  %v1784_v50 = vpop.permute.xlu0 %1783 }
 0x223   :  { %v2995_v47 = vsel %vm2985_vm13, %v2930_v42, %v2358_v40  ;;  %v2801_v30 = vsel %vm2790_vm10, %v2736_v20, %v1784_v50  ;;  %v841_v42 = vrot.slane %v452_v16, 2 }
 0x224   :  { %1607 = vrot.lane.b32.xlu1 %v674_v17, %s10030_s5  ;;  %1417 = vrot.lane.b32.xlu0 %v11064_v10, %s10029_s26 }
 0x225   :  { %8436 = vmatmul.mubr.msk.f32.gmra.mrb[8].mxu0 %vm3052_vm14, %v2995_v47  ;;  %v842_v47 = vsel %vm782_vm2, %v839_v5, %v841_v42 }
 0x226   :  { %v11151_v55 = vpop.permute.xlu1 %1211  ;;  %v11153_v52 = vpop.permute.xlu0 %1021 }
 0x228   :  { %2371 = vrot.lane.b32.xlu1 %v835_v24, %s10015_s16  ;;  %2181 = vrot.lane.b32.xlu0 %v676_v51, %s10033_s4 }
 0x22a   :  { %v1976_v28 = vpop.permute.xlu1 %1975  ;;  %v1786_v21 = vpop.permute.xlu0 %1785 }
 0x22b   :  { %v2866_v10 = vsel %vm2855_vm11, %v2801_v30, %v1976_v28  ;;  %v2802_v8 = vsel %vm2790_vm10, %v2737_v33, %v1786_v21 }
 0x22c   :  { %1609 = vrot.lane.b32.xlu1 %v676_v51, %s10030_s5  ;;  %1035 = vrot.lane.b32.xlu0 %v674_v17, %s10028_s1  ;;  %v838_v17 = vrot.slane %v450_v57, 2 }
 0x22e   :  { %v11160_v23 = vpop.permute.xlu1 %1403  ;;  %v11162_v32 = vpop.permute.xlu0 %1213  ;;  %v840_v18 = vsel %vm782_vm2, %v838_v17, %v839_v5 }
 0x230   :  { %2373 = vrot.lane.b32.xlu1 %v837_v60, %s10015_s16  ;;  %1799 = vrot.lane.b32.xlu0 %v835_v24, %s10031_s24 }
 0x232   :  { %v2168_v26 = vpop.permute.xlu1 %2167  ;;  %v1978_v43 = vpop.permute.xlu0 %1977 }
 0x233   :  { %v2931_v34 = vsel %vm2920_vm12, %v2866_v10, %v2168_v26  ;;  %v2867_v38 = vsel %vm2855_vm11, %v2802_v8, %v1978_v43  ;;  %v453_v26 = vld [vmem:[#allocation2 + $0x120] sm:$0xff]  ;;  %v319_v43 = vld [vmem:[%s14931_s0 + $0xf8] sm:$0xff] }
 0x234   :  { %1227 = vrot.lane.b32.xlu1 %v835_v24, %s10027_s6  ;;  %1037 = vrot.lane.b32.xlu0 %v676_v51, %s10028_s1  ;;  %384 = vst.msk [vmem:[#allocation2 + $0x189] sm:$0xff] %vm178_vm0, %v319_v43  ;;  %v682_v62 = vrot.slane %v453_v26, 1  ;;  %v843_v56 = vrot.slane %v453_v26, 2 }
 0x236   :  { %v11182_v6 = vpop.permute.xlu1 %1595  ;;  %v11184_v4 = vpop.permute.xlu0 %1405 }
 0x238   :  { %1991 = vrot.lane.b32.xlu1 %v450_v57, %s10032_s30  ;;  %1801 = vrot.lane.b32.xlu0 %v837_v60, %s10031_s24 }
 0x23a   :  { %v2360_v44 = vpop.permute.xlu1 %2359  ;;  %v2170_v39 = vpop.permute.xlu0 %2169 }
 0x23b   :  { %v2996_v54 = vsel %vm2985_vm13, %v2931_v34, %v2360_v44  ;;  %v2932_v12 = vsel %vm2920_vm12, %v2867_v38, %v2170_v39 }
 0x23c   :  { %1419 = vrot.lane.b32.xlu1 %v450_v57, %s10029_s26  ;;  %1229 = vrot.lane.b32.xlu0 %v837_v60, %s10027_s6  ;;  %v2543_v60 = vsel %vm178_vm0, %v10725_v3, %v11092_v11  ;;  %v454_v3 = vld [vmem:[#allocation2 + $0x128] sm:$0xff] }
 0x23d   :  { %8438 = vmatprep.mubr.msk.f32.mxu0 %vm3052_vm14, %v2996_v54  ;;  %v2608_v31 = vsel %vm2595_vm7, %v2543_v60, %v11151_v55  ;;  %v455_v54 = vld [vmem:[#allocation2 + $0x130] sm:$0x3]  ;;  %v844_v49 = vrot.slane %v454_v3, 2 }
 0x23e   :  { %v11209_v15 = vpop.permute.xlu1 %1597  ;;  %v11211_v27 = vpop.permute.xlu0 %1023  ;;  %v2673_v48 = vsel %vm2660_vm8, %v2608_v31, %v11160_v23  ;;  %v683_v23 = vrot.slane %v454_v3, 1  ;;  %v846_v5 = vrot.slane %v455_v54, 2 }
 0x23f   :  { %v2738_v11 = vsel %vm2725_vm9, %v2673_v48, %v11182_v6  ;;  %v2544_v6 = vsel %vm178_vm0, %v10735_v9, %v11153_v52  ;;  %v2545_v42 = vsel %vm178_vm0, %v10807_v2, %v11211_v27  ;;  %v11376_v27 = vld [vmem:[#allocation9] ss:$0 sm:$0xff] }
 0x240   :  { %2183 = vrot.lane.b32.xlu1 %v679_v59, %s10033_s4  ;;  %1993 = vrot.lane.b32.xlu0 %v11186_v29, %s10032_s30  ;;  %v2609_v36 = vsel %vm2595_vm7, %v2544_v6, %v11162_v32  ;;  %v684_v22 = vsel %vm621_vm3, %v682_v62, %v683_v23 }
 0x241   :  { %v2674_v34 = vsel %vm2660_vm8, %v2609_v36, %v11184_v4  ;;  %v685_v4 = vrot.slane %v455_v54, 1 }
 0x242   :  { %v2362_v35 = vpop.permute.xlu1 %2361  ;;  %v1788_v19 = vpop.permute.xlu0 %1787  ;;  %v2739_v9 = vsel %vm2725_vm9, %v2674_v34, %v11209_v15  ;;  %v845_v15 = vsel %vm782_vm2, %v843_v56, %v844_v49 }
 0x243   :  { %v2997_v45 = vsel %vm2985_vm13, %v2932_v12, %v2362_v35  ;;  %v2803_v55 = vsel %vm2790_vm10, %v2738_v11, %v1788_v19  ;;  %v686_v8 = vsel %vm621_vm3, %v683_v23, %v685_v4  ;;  %v847_v35 = vsel %vm782_vm2, %v844_v49, %v846_v5 }
 0x244   :  { %1611 = vrot.lane.b32.xlu1 %v679_v59, %s10030_s5  ;;  %1421 = vrot.lane.b32.xlu0 %v11186_v29, %s10029_s26 }
 0x245   :  { %8439 = vmatmul.mubr.msk.f32.gmra.mrb[10].mxu0 %vm3052_vm14, %v2997_v45 }
 0x246   :  { %v11229_v7 = vpop.permute.xlu1 %1215  ;;  %v11231_v58 = vpop.permute.xlu0 %1025 }
 0x248   :  { %2375 = vrot.lane.b32.xlu1 %v840_v18, %s10015_s16  ;;  %2185 = vrot.lane.b32.xlu0 %v681_v46, %s10033_s4 }
 0x24a   :  { %v1980_v40 = vpop.permute.xlu1 %1979  ;;  %v11235_v50 = vpop.permute.xlu0 %1789 }
 0x24b   :  { %v2868_v61 = vsel %vm2855_vm11, %v2803_v55, %v1980_v40  ;;  %v2804_v52 = vsel %vm2790_vm10, %v2739_v9, %v11235_v50  ;;  %v320_v40 = vld [vmem:[%s14931_s0 + $0x100] sm:$0xff]  ;;  %v2610_v50 = vsel %vm2595_vm7, %v2545_v42, %v11229_v7  ;;  %v458_v9 = vld [vmem:[#allocation2 + $0x148] sm:$0x3] }
 0x24c   :  { %1613 = vrot.lane.b32.xlu1 %v681_v46, %s10030_s5  ;;  %1039 = vrot.lane.b32.xlu0 %v679_v59, %s10028_s1  ;;  %385 = vst.msk [vmem:[#allocation2 + $0x1c9] sm:$0xff] %vm178_vm0, %v320_v40 }
 0x24e   :  { %v11280_v24 = vpop.permute.xlu1 %1407  ;;  %v11282_v51 = vpop.permute.xlu0 %1217 }
 0x24f   :  { %v2675_v13 = vsel %vm2660_vm8, %v2610_v50, %v11280_v24 }
 0x250   :  { %2377 = vrot.lane.b32.xlu1 %v842_v47, %s10015_s16  ;;  %1803 = vrot.lane.b32.xlu0 %v840_v18, %s10031_s24 }
 0x252   :  { %v2172_v28 = vpop.permute.xlu1 %2171  ;;  %v1982_v21 = vpop.permute.xlu0 %1981 }
 0x253   :  { %v2933_v29 = vsel %vm2920_vm12, %v2868_v61, %v2172_v28  ;;  %v2869_v32 = vsel %vm2855_vm11, %v2804_v52, %v1982_v21  ;;  %v11378_v21 = vld [vmem:[#allocation2 + $0x140] sm:$0xff] }
 0x254   :  { %1231 = vrot.lane.b32.xlu1 %v840_v18, %s10027_s6  ;;  %1041 = vrot.lane.b32.xlu0 %v681_v46, %s10028_s1  ;;  %v688_v11 = vrot.slane %v11378_v21, 1  ;;  %v849_v4 = vrot.slane %v11378_v21, 2 }
 0x256   :  { %v11302_v53 = vpop.permute.xlu1 %1599  ;;  %v11304_v57 = vpop.permute.xlu0 %1409 }
 0x257   :  { %v2740_v60 = vsel %vm2725_vm9, %v2675_v13, %v11302_v53  ;;  %v321_v53 = vld [vmem:[%s14931_s0 + $0x108] sm:$0xff] }
 0x258   :  { %1995 = vrot.lane.b32.xlu1 %v453_v26, %s10032_s30  ;;  %1805 = vrot.lane.b32.xlu0 %v842_v47, %s10031_s24  ;;  %386 = vst.msk [vmem:[#allocation2 + $0x1d1] sm:$0xff] %vm178_vm0, %v321_v53 }
 0x25a   :  { %v2364_v20 = vpop.permute.xlu1 %2363  ;;  %v2174_v30 = vpop.permute.xlu0 %2173 }
 0x25b   :  { %v2998_v10 = vsel %vm2985_vm13, %v2933_v29, %v2364_v20  ;;  %v2934_v59 = vsel %vm2920_vm12, %v2869_v32, %v2174_v30  ;;  %v2546_v30 = vsel %vm178_vm0, %v10818_v25, %v11231_v58 }
 0x25c   :  { %1423 = vrot.lane.b32.xlu1 %v453_v26, %s10029_s26  ;;  %1233 = vrot.lane.b32.xlu0 %v842_v47, %s10027_s6  ;;  %v456_v47 = vld [vmem:[#allocation2 + $0x138] sm:$0xff]  ;;  %v11383_v26 = vld [vmem:[#allocation11] ss:$0 sm:$0xff]  ;;  %v2611_v6 = vsel %vm2595_vm7, %v2546_v30, %v11282_v51 }
 0x25d   :  { %8441 = vmatprep.mubr.msk.f32.mxu0 %vm3052_vm14, %v2998_v10  ;;  %v2676_v34 = vsel %vm2660_vm8, %v2611_v6, %v11304_v57  ;;  %v848_v57 = vrot.slane %v456_v47, 2 }
 0x25e   :  { %v11326_v44 = vpop.permute.xlu1 %1601  ;;  %v11328_v39 = vpop.permute.xlu0 %1027 }
 0x25f   :  { %v2741_v52 = vsel %vm2725_vm9, %v2676_v34, %v11326_v44 }
 0x260   :  { %2187 = vrot.lane.b32.xlu1 %v684_v22, %s10033_s4  ;;  %1997 = vrot.lane.b32.xlu0 %v454_v3, %s10032_s30 }
 0x262   :  { %v2366_v14 = vpop.permute.xlu1 %2365  ;;  %v1792_v16 = vpop.permute.xlu0 %1791 }
 0x263   :  { %v2999_v33 = vsel %vm2985_vm13, %v2934_v59, %v2366_v14  ;;  %v2805_v31 = vsel %vm2790_vm10, %v2740_v60, %v1792_v16  ;;  %v690_v59 = vrot.slane %v458_v9, 1 }
 0x264   :  { %1615 = vrot.lane.b32.xlu1 %v684_v22, %s10030_s5  ;;  %1425 = vrot.lane.b32.xlu0 %v454_v3, %s10029_s26  ;;  %v687_v3 = vrot.slane %v456_v47, 1 }
 0x265   :  { %8442 = vmatmul.mubr.msk.f32.gmra.mrb[12].mxu0 %vm3052_vm14, %v2999_v33 }
 0x266   :  { %v11344_v38 = vpop.permute.xlu1 %1219  ;;  %v11346_v17 = vpop.permute.xlu0 %1029 }
 0x268   :  { %2379 = vrot.lane.b32.xlu1 %v845_v15, %s10015_s16  ;;  %2189 = vrot.lane.b32.xlu0 %v686_v8, %s10033_s4 }
 0x26a   :  { %v1984_v41 = vpop.permute.xlu1 %1983  ;;  %v1794_v12 = vpop.permute.xlu0 %1793 }
 0x26b   :  { %v2870_v24 = vsel %vm2855_vm11, %v2805_v31, %v1984_v41  ;;  %v2806_v32 = vsel %vm2790_vm10, %v2741_v52, %v1794_v12  ;;  %v851_v12 = vrot.slane %v458_v9, 2 }
 0x26c   :  { %1617 = vrot.lane.b32.xlu1 %v686_v8, %s10030_s5  ;;  %1043 = vrot.lane.b32.xlu0 %v684_v22, %s10028_s1  ;;  %v689_v22 = vsel %vm621_vm3, %v687_v3, %v688_v11 }
 0x26e   :  { %v11353_v19 = vpop.permute.xlu1 %1411  ;;  %v11355_v45 = vpop.permute.xlu0 %1221 }
 0x270   :  { %2381 = vrot.lane.b32.xlu1 %v847_v35, %s10015_s16  ;;  %1807 = vrot.lane.b32.xlu0 %v845_v15, %s10031_s24 }
 0x272   :  { %v2176_v18 = vpop.permute.xlu1 %2175  ;;  %v1986_v46 = vpop.permute.xlu0 %1985 }
 0x273   :  { %v2935_v55 = vsel %vm2920_vm12, %v2870_v24, %v2176_v18  ;;  %v2871_v49 = vsel %vm2855_vm11, %v2806_v32, %v1986_v46  ;;  %v322_v24 = vld [vmem:[%s14931_s0 + $0x110] sm:$0xff] }
 0x274   :  { %1235 = vrot.lane.b32.xlu1 %v845_v15, %s10027_s6  ;;  %1045 = vrot.lane.b32.xlu0 %v686_v8, %s10028_s1  ;;  %v850_v15 = vsel %vm782_vm2, %v848_v57, %v849_v4  ;;  %v691_v8 = vsel %vm621_vm3, %v688_v11, %v690_v59  ;;  %387 = vst.msk [vmem:[#allocation2 + $0x1e1] sm:$0xff] %vm178_vm0, %v322_v24 }
 0x275   :  { %v2547_v11 = vsel %vm178_vm0, %v10891_v1, %v11328_v39  ;;  %v11475_v1 = vld [vmem:[#allocation2 + $0x158] sm:$0xff] }
 0x276   :  { %v11372_v28 = vpop.permute.xlu1 %1603  ;;  %v11374_v2 = vpop.permute.xlu0 %1413  ;;  %v2612_v53 = vsel %vm2595_vm7, %v2547_v11, %v11344_v38  ;;  %v693_v34 = vrot.slane %v11475_v1, 1 }
 0x278   :  { %v8425_v7 = vpop.f32.mrb[0].mxu0  ;;  %1999 = vrot.lane.b32.xlu1 %v456_v47, %s10032_s30  ;;  %1809 = vrot.lane.b32.xlu0 %v847_v35, %s10031_s24 }
 0x279   :  { %v3642_v43 = vmul.f32 %v8425_v7, %v11376_v27  ;;  %v3315_v48 = vpop.f32.mrb[1].mxu0 }
 0x27a   :  { %v3641_v61 = vmul.f32 %v11376_v27, %v3315_v48  ;;  %v2368_v62 = vpop.permute.xlu1 %2367  ;;  %v2178_v23 = vpop.permute.xlu0 %2177 }
 0x27b   :  { %v11397_v29 = vadd.f32 %v11383_v26, %v3642_v43  ;;  %v3000_v20 = vsel %vm2985_vm13, %v2935_v55, %v2368_v62  ;;  %v2936_v14 = vsel %vm2920_vm12, %v2871_v49, %v2178_v23  ;;  %v11464_v55 = vld [vmem:[#allocation2 + $0x150] sm:$0xff]  ;;  %v2677_v62 = vsel %vm2660_vm8, %v2612_v53, %v11353_v19 }
 0x27c   :  { %v11404_v10 = vadd.f32 %v11383_v26, %v3641_v61  ;;  %1427 = vrot.lane.b32.xlu1 %v456_v47, %s10029_s26  ;;  %1237 = vrot.lane.b32.xlu0 %v847_v35, %s10027_s6  ;;  %v852_v47 = vsel %vm782_vm2, %v849_v4, %v851_v12  ;;  %v323_v61 = vld [vmem:[%s14931_s0 + $0x118] sm:$0xff]  ;;  %v2742_v39 = vsel %vm2725_vm9, %v2677_v62, %v11372_v28 }
 0x27d   :  { %v3777_v36 = vmin.f32 %v11397_v29, 20.0  ;;  %8444 = vmatprep.mubr.msk.f32.mxu0 %vm3052_vm14, %v3000_v20  ;;  %388 = vst.msk [vmem:[#allocation2 + $0x1e9] sm:$0xff] %vm178_vm0, %v323_v61  ;;  %v2548_v49 = vsel %vm178_vm0, %v10902_v37, %v11346_v17  ;;  %vm4353_vm4 = vcmp.gt.f32.partialorder %v11397_v29, 20.0 }
 0x27e   :  { %v3776_v25 = vmin.f32 %v11404_v10, 20.0  ;;  %v11416_v58 = vpop.permute.xlu1 %1605  ;;  %v11418_v54 = vpop.permute.xlu0 %1031  ;;  %vm4352_vm5 = vcmp.gt.f32.partialorder %v11404_v10, 20.0 }
 0x27f   :  { %v3842_v51 = vmul.f32 1.442695, %v3777_v36 }
 0x280   :  { %v3840_v56 = vmul.f32 1.442695, %v3776_v25  ;;  %2191 = vrot.lane.b32.xlu1 %v689_v22, %s10033_s4  ;;  %2001 = vrot.lane.b32.xlu0 %v11378_v21, %s10032_s30 }
 0x281   :  { %9345 = vpow2.f32 %v3842_v51 }
 0x282   :  { %9347 = vpow2.f32 %v3840_v56  ;;  %v2370_v44 = vpop.permute.xlu1 %2369  ;;  %v1796_v16 = vpop.permute.xlu0 %1795 }
 0x283   :  { %v3001_v33 = vsel %vm2985_vm13, %v2936_v14, %v2370_v44  ;;  %v2807_v38 = vsel %vm2790_vm10, %v2742_v39, %v1796_v16  ;;  %v2613_v44 = vsel %vm2595_vm7, %v2548_v49, %v11355_v45  ;;  %v461_v45 = vld [vmem:[#allocation2 + $0x160] sm:$0x3]  ;;  %v325_v49 = vld [vmem:[%s14931_s0 + $0x128] sm:$0xff] }
 0x284   :  { %1619 = vrot.lane.b32.xlu1 %v689_v22, %s10030_s5  ;;  %1429 = vrot.lane.b32.xlu0 %v11378_v21, %s10029_s26  ;;  %v2678_v17 = vsel %vm2660_vm8, %v2613_v44, %v11374_v2  ;;  %v856_v53 = vrot.slane %v461_v45, 2  ;;  %390 = vst.msk [vmem:[#allocation2 + $0x201] sm:$0xff] %vm178_vm0, %v325_v49 }
 0x285   :  { %8445 = vmatmul.mubr.msk.f32.gmra.mrb[14].mxu0 %vm3052_vm14, %v3001_v33 }
 0x286   :  { %v11436_v5 = vpop.permute.xlu1 %1223  ;;  %v11438_v41 = vpop.permute.xlu0 %1033 }
 0x288   :  { %2383 = vrot.lane.b32.xlu1 %v850_v15, %s10015_s16  ;;  %2193 = vrot.lane.b32.xlu0 %v691_v8, %s10033_s4 }
 0x28a   :  { %v1988_v35 = vpop.permute.xlu1 %1987  ;;  %v11442_v18 = vpop.permute.xlu0 %1797 }
 0x28b   :  { %v9346_v46 = vpop.eup %9345  ;;  %v2872_v19 = vsel %vm2855_vm11, %v2807_v38, %v1988_v35 }
 0x28c   :  { %v9348_v42 = vpop.eup %9347  ;;  %v3969_v40 = vadd.f32 2.0, %v9346_v46  ;;  %1621 = vrot.lane.b32.xlu1 %v691_v8, %s10030_s5  ;;  %1047 = vrot.lane.b32.xlu0 %v689_v22, %s10028_s1  ;;  %v692_v22 = vrot.slane %v11464_v55, 1 }
 0x28d   :  { %v3968_v50 = vadd.f32 2.0, %v9348_v42 }
 0x28e   :  { %v4033_v13 = vmul.f32 %v9346_v46, %v3969_v40  ;;  %v11447_v21 = vpop.permute.xlu1 %1415  ;;  %v11449_v60 = vpop.permute.xlu0 %1225  ;;  %v694_v37 = vsel %vm621_vm3, %v692_v22, %v693_v34 }
 0x28f   :  { %v4032_v31 = vmul.f32 %v9348_v42, %v3968_v50  ;;  %v2743_v42 = vsel %vm2725_vm9, %v2678_v17, %v11416_v58 }
 0x290   :  { %v4161_v7 = vadd.f32 2.0, %v4033_v13  ;;  %2385 = vrot.lane.b32.xlu1 %v852_v47, %s10015_s16  ;;  %1811 = vrot.lane.b32.xlu0 %v850_v15, %s10031_s24  ;;  %v4097_v51 = vmul.f32 %v4033_v13, %v11397_v29  ;;  %v2808_v50 = vsel %vm2790_vm10, %v2743_v42, %v11442_v18  ;;  %v854_v13 = vrot.slane %v11475_v1, 2 }
 0x291   :  { %v4160_v43 = vadd.f32 2.0, %v4032_v31  ;;  %v4096_v4 = vmul.f32 %v4032_v31, %v11404_v10  ;;  %v695_v31 = vrot.slane %v461_v45, 1 }
 0x292   :  { %9349 = vrcp.f32 %v4161_v7  ;;  %v2180_v48 = vpop.permute.xlu1 %2179  ;;  %v1990_v3 = vpop.permute.xlu0 %1989 }
 0x293   :  { %9351 = vrcp.f32 %v4160_v43  ;;  %v2937_v25 = vsel %vm2920_vm12, %v2872_v19, %v2180_v48  ;;  %v2873_v58 = vsel %vm2855_vm11, %v2808_v50, %v1990_v3  ;;  %v696_v48 = vsel %vm621_vm3, %v693_v34, %v695_v31 }
 0x294   :  { %1239 = vrot.lane.b32.xlu1 %v850_v15, %s10027_s6  ;;  %1049 = vrot.lane.b32.xlu0 %v691_v8, %s10028_s1 }
 0x296   :  { %v11471_v23 = vpop.permute.xlu1 %1607  ;;  %v11473_v20 = vpop.permute.xlu0 %1417 }
 0x298   :  { %v8428_v30 = vpop.f32.mrb[2].mxu0  ;;  %2003 = vrot.lane.b32.xlu1 %v11464_v55, %s10032_s30  ;;  %1813 = vrot.lane.b32.xlu0 %v852_v47, %s10031_s24 }
 0x299   :  { %v3644_v6 = vmul.f32 %v8428_v30, %v11376_v27  ;;  %v3325_v36 = vpop.f32.mrb[3].mxu0  ;;  %v857_v30 = vsel %vm782_vm2, %v854_v13, %v856_v53 }
 0x29a   :  { %v3643_v28 = vmul.f32 %v11376_v27, %v3325_v36  ;;  %v2372_v9 = vpop.permute.xlu1 %2371  ;;  %v2182_v52 = vpop.permute.xlu0 %2181 }
 0x29b   :  { %v11492_v32 = vadd.f32 %v11383_v26, %v3644_v6  ;;  %v3002_v56 = vsel %vm2985_vm13, %v2937_v25, %v2372_v9  ;;  %v324_v25 = vld [vmem:[%s14931_s0 + $0x120] sm:$0xff] }
 0x29c   :  { %v9350_v57 = vpop.eup %9349  ;;  %v11500_v59 = vadd.f32 %v11383_v26, %v3643_v28  ;;  %1431 = vrot.lane.b32.xlu1 %v11464_v55, %s10029_s26  ;;  %1241 = vrot.lane.b32.xlu0 %v852_v47, %s10027_s6  ;;  %389 = vst.msk [vmem:[#allocation2 + $0x1f9] sm:$0xff] %vm178_vm0, %v324_v25 }
 0x29d   :  { %v9352_v14 = vpop.eup %9351  ;;  %v4289_v16 = vmul.f32 %v9350_v57, %v4097_v51  ;;  %v3779_v33 = vmin.f32 %v11492_v32, 20.0  ;;  %8447 = vmatprep.mubr.msk.f32.mxu0 %vm3052_vm14, %v3002_v56  ;;  %v2549_v51 = vsel %vm178_vm0, %v10975_v63, %v11418_v54  ;;  %v11571_v57 = vld [vmem:[#allocation2 + $0x168] sm:$0xff]  ;;  %v11582_v63 = vld [vmem:[#allocation2 + $0x170] sm:$0xff]  ;;  %vm4355_vm6 = vcmp.gt.f32.partialorder %v11492_v32, 20.0 }
 0x29e   :  { %v4288_v15 = vmul.f32 %v9352_v14, %v4096_v4  ;;  %v3778_v8 = vmin.f32 %v11500_v59, 20.0  ;;  %v11514_v12 = vpop.permute.xlu1 %1609  ;;  %v11516_v35 = vpop.permute.xlu0 %1035  ;;  %v2614_v56 = vsel %vm2595_vm7, %v2549_v51, %v11436_v5  ;;  %v697_v17 = vrot.slane %v11571_v57, 1 }
 0x29f   :  { %v4417_v46 = vsel %vm4353_vm4, %v11397_v29, %v4289_v16  ;;  %v3846_v40 = vmul.f32 1.442695, %v3779_v33  ;;  %v853_v29 = vrot.slane %v11464_v55, 2  ;;  %v2679_v4 = vsel %vm2660_vm8, %v2614_v56, %v11447_v21 }
 0x2a0   :  { %4482 = vst.msk [vmem:[#allocation3 + $0x8] sm:$0xff] %vm4480_vm15, %v4417_v46  ;;  %v4416_v2 = vsel %vm4352_vm5, %v11404_v10, %v4288_v15  ;;  %v3844_v47 = vmul.f32 1.442695, %v3778_v8  ;;  %2195 = vrot.lane.b32.xlu1 %v694_v37, %s10033_s4  ;;  %2005 = vrot.lane.b32.xlu0 %v11475_v1, %s10032_s30  ;;  %v2938_v10 = vsel %vm2920_vm12, %v2873_v58, %v2182_v52  ;;  %v698_v15 = vrot.slane %v11582_v63, 1 }
 0x2a1   :  { %4481 = vst.msk [vmem:[#allocation3] sm:$0xff] %vm4480_vm15, %v4416_v2  ;;  %9353 = vpow2.f32 %v3846_v40  ;;  %v855_v43 = vsel %vm782_vm2, %v853_v29, %v854_v13  ;;  %v2744_v54 = vsel %vm2725_vm9, %v2679_v4, %v11471_v23  ;;  %vm4354_vm1 = vcmp.gt.f32.partialorder %v11500_v59, 20.0 }
 0x2a2   :  { %9355 = vpow2.f32 %v3844_v47  ;;  %v2374_v18 = vpop.permute.xlu1 %2373  ;;  %v1800_v7 = vpop.permute.xlu0 %1799  ;;  %v9677_v47 = vld [vmem:[#allocation2 + $0xe0] sm:$0xff] }
 0x2a3   :  { %v3003_v24 = vsel %vm2985_vm13, %v2938_v10, %v2374_v18  ;;  %v2809_v5 = vsel %vm2790_vm10, %v2744_v54, %v1800_v7  ;;  %v2550_v29 = vsel %vm178_vm0, %v9677_v47, %v11438_v41  ;;  %v699_v41 = vsel %vm621_vm3, %v697_v17, %v698_v15 }
 0x2a4   :  { %1623 = vrot.lane.b32.xlu1 %v694_v37, %s10030_s5  ;;  %1433 = vrot.lane.b32.xlu0 %v11475_v1, %s10029_s26  ;;  %v2615_v10 = vsel %vm2595_vm7, %v2550_v29, %v11449_v60  ;;  %v464_v60 = vld [vmem:[#allocation2 + $0x178] sm:$0x3]  ;;  %v326_v29 = vld [vmem:[%s14931_s0 + $0x130] sm:$0xff] }
 0x2a5   :  { %8448 = vmatmul.mubr.msk.f32.gmra.mrb[16].mxu0 %vm3052_vm14, %v3003_v24  ;;  %v2680_v24 = vsel %vm2660_vm8, %v2615_v10, %v11473_v20  ;;  %391 = vst.msk [vmem:[#allocation2 + $0x211] sm:$0xff] %vm178_vm0, %v326_v29 }
 0x2a6   :  { %v11541_v3 = vpop.permute.xlu1 %1227  ;;  %v11543_v11 = vpop.permute.xlu0 %1037 }
 0x2a8   :  { %2387 = vrot.lane.b32.xlu1 %v855_v43, %s10015_s16  ;;  %2197 = vrot.lane.b32.xlu0 %v696_v48, %s10033_s4  ;;  %v4609_v51 = vld [vmem:[#allocation3 + $0x1] ss:$2 sm:$0xff] }
 0x2aa   :  { %v1992_v55 = vpop.permute.xlu1 %1991  ;;  %v11547_v61 = vpop.permute.xlu0 %1801 }
 0x2ab   :  { %v9354_v62 = vpop.eup %9353  ;;  %v2874_v21 = vsel %vm2855_vm11, %v2809_v5, %v1992_v55  ;;  %v861_v5 = vrot.slane %v464_v60, 2 }
 0x2ac   :  { %v9356_v1 = vpop.eup %9355  ;;  %v3971_v39 = vadd.f32 2.0, %v9354_v62  ;;  %1625 = vrot.lane.b32.xlu1 %v696_v48, %s10030_s5  ;;  %1051 = vrot.lane.b32.xlu0 %v694_v37, %s10028_s1 }
 0x2ad   :  { %v3970_v38 = vadd.f32 2.0, %v9356_v1 }
 0x2ae   :  { %v4035_v19 = vmul.f32 %v9354_v62, %v3971_v39  ;;  %v11552_v6 = vpop.permute.xlu1 %1419  ;;  %v11554_v36 = vpop.permute.xlu0 %1229 }
 0x2af   :  { %v4034_v22 = vmul.f32 %v9356_v1, %v3970_v38  ;;  %v2745_v1 = vsel %vm2725_vm9, %v2680_v24, %v11514_v12  ;;  %v11678_v24 = vld [vmem:[#allocation2 + $0x180] sm:$0xff] }
 0x2b0   :  { %v4163_v34 = vadd.f32 2.0, %v4035_v19  ;;  %2389 = vrot.lane.b32.xlu1 %v857_v30, %s10015_s16  ;;  %1815 = vrot.lane.b32.xlu0 %v855_v43, %s10031_s24  ;;  %v4099_v42 = vmul.f32 %v4035_v19, %v11492_v32  ;;  %v2810_v38 = vsel %vm2790_vm10, %v2745_v1, %v11547_v61  ;;  %v859_v19 = vrot.slane %v11582_v63, 2 }
 0x2b1   :  { %v4162_v28 = vadd.f32 2.0, %v4034_v22  ;;  %v4098_v58 = vmul.f32 %v4034_v22, %v11500_v59 }
 0x2b2   :  { %9357 = vrcp.f32 %v4163_v34  ;;  %v2184_v9 = vpop.permute.xlu1 %2183  ;;  %v11562_v52 = vpop.permute.xlu0 %1993 }
 0x2b3   :  { %9359 = vrcp.f32 %v4162_v28  ;;  %v2939_v8 = vsel %vm2920_vm12, %v2874_v21, %v2184_v9  ;;  %v2875_v12 = vsel %vm2855_vm11, %v2810_v38, %v11562_v52  ;;  %v4545_v52 = vld [vmem:[#allocation3] ss:$2 sm:$0xff]  ;;  %v949_v38 = vrot.slane %v11678_v24, 1 }
 0x2b4   :  { %1243 = vrot.lane.b32.xlu1 %v855_v43, %s10027_s6  ;;  %1053 = vrot.lane.b32.xlu0 %v696_v48, %s10028_s1  ;;  %v4672_v54 = vadd.f32 %v4609_v51, %v4545_v52 }
 0x2b6   :  { %v11578_v14 = vpop.permute.xlu1 %1611  ;;  %v11580_v44 = vpop.permute.xlu0 %1421 }
 0x2b8   :  { %v8431_v16 = vpop.f32.mrb[4].mxu0  ;;  %2007 = vrot.lane.b32.xlu1 %v11571_v57, %s10032_s30  ;;  %1817 = vrot.lane.b32.xlu0 %v857_v30, %s10031_s24 }
 0x2b9   :  { %v3646_v33 = vmul.f32 %v8431_v16, %v11376_v27  ;;  %v3335_v37 = vpop.f32.mrb[5].mxu0 }
 0x2ba   :  { %v3645_v23 = vmul.f32 %v11376_v27, %v3335_v37  ;;  %v2376_v45 = vpop.permute.xlu1 %2375  ;;  %v2186_v46 = vpop.permute.xlu0 %2185 }
 0x2bb   :  { %v11599_v40 = vadd.f32 %v11383_v26, %v3646_v33  ;;  %v3004_v2 = vsel %vm2985_vm13, %v2939_v8, %v2376_v45  ;;  %v2940_v61 = vsel %vm2920_vm12, %v2875_v12, %v2186_v46  ;;  %v862_v45 = vsel %vm782_vm2, %v859_v19, %v861_v5 }
 0x2bc   :  { %v9358_v50 = vpop.eup %9357  ;;  %v11606_v13 = vadd.f32 %v11383_v26, %v3645_v23  ;;  %1435 = vrot.lane.b32.xlu1 %v11571_v57, %s10029_s26  ;;  %1245 = vrot.lane.b32.xlu0 %v857_v30, %s10027_s6 }
 0x2bd   :  { %v9360_v31 = vpop.eup %9359  ;;  %v4291_v18 = vmul.f32 %v9358_v50, %v4099_v42  ;;  %v3781_v7 = vmin.f32 %v11599_v40, 20.0  ;;  %8450 = vmatprep.mubr.msk.f32.mxu0 %vm3052_vm14, %v3004_v2  ;;  %vm4357_vm4 = vcmp.gt.f32.partialorder %v11599_v40, 20.0 }
 0x2be   :  { %v4290_v43 = vmul.f32 %v9360_v31, %v4098_v58  ;;  %v3780_v48 = vmin.f32 %v11606_v13, 20.0  ;;  %v11620_v53 = vpop.permute.xlu1 %1613  ;;  %v11622_v55 = vpop.permute.xlu0 %1039  ;;  %vm4356_vm5 = vcmp.gt.f32.partialorder %v11606_v13, 20.0 }
 0x2bf   :  { %v4419_v62 = vsel %vm4355_vm6, %v11492_v32, %v4291_v18  ;;  %v3850_v39 = vmul.f32 1.442695, %v3781_v7  ;;  %v858_v32 = vrot.slane %v11571_v57, 2  ;;  %v9678_v18 = vld [vmem:[#allocation2 + $0xf0] sm:$0xff] }
 0x2c0   :  { %4484 = vst.msk [vmem:[#allocation3 + $0x18] sm:$0xff] %vm4480_vm15, %v4419_v62  ;;  %v4418_v20 = vsel %vm4354_vm1, %v11500_v59, %v4290_v43  ;;  %v3848_v30 = vmul.f32 1.442695, %v3780_v48  ;;  %2199 = vrot.lane.b32.xlu1 %v699_v41, %s10033_s4  ;;  %2009 = vrot.lane.b32.xlu0 %v11582_v63, %s10032_s30  ;;  %v700_v59 = vrot.slane %v464_v60, 1  ;;  %v2551_v7 = vsel %vm178_vm0, %v9678_v18, %v11516_v35  ;;  %v327_v43 = vld [vmem:[%s14931_s0 + $0x138] sm:$0xff]  ;;  %v11689_v35 = vld [vmem:[#allocation2 + $0x188] sm:$0xff] }
 0x2c1   :  { %4483 = vst.msk [vmem:[#allocation3 + $0x10] sm:$0xff] %vm4480_vm15, %v4418_v20  ;;  %9361 = vpow2.f32 %v3850_v39  ;;  %v860_v28 = vsel %vm782_vm2, %v858_v32, %v859_v19  ;;  %v950_v32 = vrot.slane %v11689_v35, 1 }
 0x2c2   :  { %9363 = vpow2.f32 %v3848_v30  ;;  %v2378_v22 = vpop.permute.xlu1 %2377  ;;  %v1804_v34 = vpop.permute.xlu0 %1803  ;;  %v701_v9 = vsel %vm621_vm3, %v698_v15, %v700_v59  ;;  %392 = vst.msk [vmem:[#allocation2 + $0x219] sm:$0xff] %vm178_vm0, %v327_v43 }
 0x2c3   :  { %v3005_v25 = vsel %vm2985_vm13, %v2940_v61, %v2378_v22 }
 0x2c4   :  { %1627 = vrot.lane.b32.xlu1 %v699_v41, %s10030_s5  ;;  %1437 = vrot.lane.b32.xlu0 %v11582_v63, %s10029_s26 }
 0x2c5   :  { %8451 = vmatmul.mubr.msk.f32.gmra.mrb[18].mxu0 %vm3052_vm14, %v3005_v25 }
 0x2c6   :  { %v11648_v56 = vpop.permute.xlu1 %1231  ;;  %v11650_v57 = vpop.permute.xlu0 %1041 }
 0x2c8   :  { %v4547_v49 = vld [vmem:[#allocation3 + $0x10] ss:$2 sm:$0xff]  ;;  %v4611_v4 = vld [vmem:[#allocation3 + $0x11] ss:$2 sm:$0xff]  ;;  %2391 = vrot.lane.b32.xlu1 %v860_v28, %s10015_s16  ;;  %2201 = vrot.lane.b32.xlu0 %v701_v9, %s10033_s4 }
 0x2c9   :  { %v4673_v63 = vadd.f32 %v4611_v4, %v4547_v49 }
 0x2ca   :  { %v1996_v16 = vpop.permute.xlu1 %1995  ;;  %v11654_v21 = vpop.permute.xlu0 %1805 }
 0x2cb   :  { %v9362_v33 = vpop.eup %9361  ;;  %v4704_v37 = vadd.f32 %v4673_v63, %v4672_v54 }
 0x2cc   :  { %v9364_v17 = vpop.eup %9363  ;;  %v3973_v15 = vadd.f32 2.0, %v9362_v33  ;;  %1629 = vrot.lane.b32.xlu1 %v701_v9, %s10030_s5  ;;  %1055 = vrot.lane.b32.xlu0 %v699_v41, %s10028_s1  ;;  %v2616_v41 = vsel %vm2595_vm7, %v2551_v7, %v11541_v3 }
 0x2cd   :  { %v4720_v8 = vmul.f32 0.25, %v4704_v37  ;;  %v3972_v23 = vadd.f32 2.0, %v9364_v17  ;;  %v2681_v48 = vsel %vm2660_vm8, %v2616_v41, %v11552_v6 }
 0x2ce   :  { %v4037_v46 = vmul.f32 %v9362_v33, %v3973_v15  ;;  %v11659_v42 = vpop.permute.xlu1 %1423  ;;  %v11661_v2 = vpop.permute.xlu0 %1233  ;;  %v2746_v3 = vsel %vm2725_vm9, %v2681_v48, %v11578_v14 }
 0x2cf   :  { %v4036_v50 = vmul.f32 %v9364_v17, %v3972_v23  ;;  %4778 = vst.msk [vmem:[#allocation4 + $0x11] sm:$0xff] %vm4480_vm15, %v4720_v8  ;;  %v2811_v1 = vsel %vm2790_vm10, %v2746_v3, %v1804_v34 }
 0x2d0   :  { %v4165_v47 = vadd.f32 2.0, %v4037_v46  ;;  %2393 = vrot.lane.b32.xlu1 %v862_v45, %s10015_s16  ;;  %1819 = vrot.lane.b32.xlu0 %v860_v28, %s10031_s24  ;;  %v2876_v6 = vsel %vm2855_vm11, %v2811_v1, %v1996_v16  ;;  %v4101_v61 = vmul.f32 %v4037_v46, %v11599_v40 }
 0x2d1   :  { %v4164_v58 = vadd.f32 2.0, %v4036_v50  ;;  %v4100_v52 = vmul.f32 %v4036_v50, %v11606_v13  ;;  %v960_v50 = vrot.slane %v11689_v35, 2 }
 0x2d2   :  { %9365 = vrcp.f32 %v4165_v47  ;;  %v2188_v31 = vpop.permute.xlu1 %2187  ;;  %v11670_v10 = vpop.permute.xlu0 %1997 }
 0x2d3   :  { %9367 = vrcp.f32 %v4164_v58  ;;  %v2941_v12 = vsel %vm2920_vm12, %v2876_v6, %v2188_v31  ;;  %v471_v58 = vld [vmem:[#allocation2 + $0x1b0] sm:$0xff]  ;;  %v11750_v31 = vld [vmem:[#allocation2 + $0x1b8] sm:$0xff]  ;;  %v473_v6 = vld [vmem:[#allocation2 + $0x1c0] sm:$0x3] }
 0x2d4   :  { %1247 = vrot.lane.b32.xlu1 %v860_v28, %s10027_s6  ;;  %1057 = vrot.lane.b32.xlu0 %v701_v9, %s10028_s1  ;;  %v9679_v28 = vld [vmem:[#allocation2 + $0xf8] sm:$0xff]  ;;  %v702_v41 = vrot.slane %v471_v58, 1 }
 0x2d5   :  { %v2552_v9 = vsel %vm178_vm0, %v9679_v28, %v11543_v11  ;;  %v951_v11 = vsel %vm621_vm3, %v949_v38, %v950_v32 }
 0x2d6   :  { %v11685_v60 = vpop.permute.xlu1 %1615  ;;  %v11687_v62 = vpop.permute.xlu0 %1425  ;;  %v2617_v4 = vsel %vm2595_vm7, %v2552_v9, %v11554_v36  ;;  %v467_v36 = vld [vmem:[#allocation2 + $0x190] sm:$0x3] }
 0x2d7   :  { %v2682_v5 = vsel %vm2660_vm8, %v2617_v4, %v11580_v44  ;;  %v962_v3 = vrot.slane %v467_v36, 2 }
 0x2d8   :  { %v8434_v39 = vpop.f32.mrb[6].mxu0  ;;  %2011 = vrot.lane.b32.xlu1 %v11678_v24, %s10032_s30  ;;  %1821 = vrot.lane.b32.xlu0 %v862_v45, %s10031_s24  ;;  %v2747_v8 = vsel %vm2725_vm9, %v2682_v5, %v11620_v53  ;;  %v9680_v5 = vld [vmem:[#allocation2 + $0x108] sm:$0xff] }
 0x2d9   :  { %v3648_v20 = vmul.f32 %v8434_v39, %v11376_v27  ;;  %v3345_v30 = vpop.f32.mrb[7].mxu0 }
 0x2da   :  { %v3647_v14 = vmul.f32 %v11376_v27, %v3345_v30  ;;  %v2380_v19 = vpop.permute.xlu1 %2379  ;;  %v2190_v59 = vpop.permute.xlu0 %2189 }
 0x2db   :  { %v11706_v22 = vadd.f32 %v11383_v26, %v3648_v20  ;;  %v3006_v34 = vsel %vm2985_vm13, %v2941_v12, %v2380_v19  ;;  %v864_v19 = vrot.slane %v11750_v31, 2 }
 0x2dc   :  { %v9366_v25 = vpop.eup %9365  ;;  %v11713_v51 = vadd.f32 %v11383_v26, %v3647_v14  ;;  %1439 = vrot.lane.b32.xlu1 %v11678_v24, %s10029_s26  ;;  %1249 = vrot.lane.b32.xlu0 %v862_v45, %s10027_s6  ;;  %v2812_v45 = vsel %vm2790_vm10, %v2747_v8, %v11654_v21  ;;  %v863_v14 = vrot.slane %v471_v58, 2  ;;  %v11795_v8 = vld [vmem:[#allocation2 + $0x198] sm:$0xff] }
 0x2dd   :  { %v9368_v49 = vpop.eup %9367  ;;  %v4293_v54 = vmul.f32 %v9366_v25, %v4101_v61  ;;  %v3783_v63 = vmin.f32 %v11706_v22, 20.0  ;;  %8453 = vmatprep.mubr.msk.f32.mxu0 %vm3052_vm14, %v3006_v34  ;;  %v2877_v53 = vsel %vm2855_vm11, %v2812_v45, %v11670_v10  ;;  %vm4359_vm6 = vcmp.gt.f32.partialorder %v11706_v22, 20.0 }
 0x2de   :  { %v4292_v16 = vmul.f32 %v9368_v49, %v4100_v52  ;;  %v3782_v33 = vmin.f32 %v11713_v51, 20.0  ;;  %v11727_v37 = vpop.permute.xlu1 %1617  ;;  %v11729_v17 = vpop.permute.xlu0 %1043  ;;  %v2942_v21 = vsel %vm2920_vm12, %v2877_v53, %v2190_v59  ;;  %v705_v59 = vrot.slane %v473_v6, 1  ;;  %v328_v52 = vld [vmem:[%s14931_s0 + $0x140] sm:$0xff] }
 0x2df   :  { %v4421_v15 = vsel %vm4357_vm4, %v11599_v40, %v4293_v54  ;;  %v3854_v23 = vmul.f32 1.442695, %v3783_v63  ;;  %v959_v40 = vrot.slane %v11678_v24, 2  ;;  %v703_v24 = vrot.slane %v11750_v31, 1  ;;  %393 = vst.msk [vmem:[#allocation2 + $0x229] sm:$0xff] %vm178_vm0, %v328_v52 }
 0x2e0   :  { %4486 = vst.msk [vmem:[#allocation3 + $0x28] sm:$0xff] %vm4480_vm15, %v4421_v15  ;;  %v4420_v44 = vsel %vm4356_vm5, %v11606_v13, %v4292_v16  ;;  %v3852_v46 = vmul.f32 1.442695, %v3782_v33  ;;  %2203 = vrot.lane.b32.xlu1 %v951_v11, %s10033_s4  ;;  %2013 = vrot.lane.b32.xlu0 %v11689_v35, %s10032_s30  ;;  %v952_v13 = vrot.slane %v467_v36, 1  ;;  %v865_v4 = vsel %vm782_vm2, %v863_v14, %v864_v19  ;;  %v11791_v36 = vld [vmem:[#allocation2 + $0x1a0] sm:$0xff] }
 0x2e1   :  { %4485 = vst.msk [vmem:[#allocation3 + $0x20] sm:$0xff] %vm4480_vm15, %v4420_v44  ;;  %9369 = vpow2.f32 %v3854_v23  ;;  %v961_v10 = vsel %vm782_vm2, %v959_v40, %v960_v50  ;;  %v706_v54 = vsel %vm621_vm3, %v703_v24, %v705_v59  ;;  %v2553_v16 = vsel %vm178_vm0, %v9680_v5, %v11622_v55  ;;  %v329_v23 = vld [vmem:[%s14931_s0 + $0x148] sm:$0xff] }
 0x2e2   :  { %9371 = vpow2.f32 %v3852_v46  ;;  %v2382_v47 = vpop.permute.xlu1 %2381  ;;  %v11748_v29 = vpop.permute.xlu0 %1807  ;;  %v953_v7 = vsel %vm621_vm3, %v950_v32, %v952_v13  ;;  %v963_v32 = vsel %vm782_vm2, %v960_v50, %v962_v3  ;;  %v866_v33 = vrot.slane %v473_v6, 2  ;;  %v11806_v46 = vld [vmem:[#allocation2 + $0x1d0] sm:$0xff]  ;;  %394 = vst.msk [vmem:[#allocation2 + $0x231] sm:$0xff] %vm178_vm0, %v329_v23 }
 0x2e3   :  { %v3007_v18 = vsel %vm2985_vm13, %v2942_v21, %v2382_v47  ;;  %v2618_v15 = vsel %vm2595_vm7, %v2553_v16, %v11648_v56  ;;  %v975_v40 = vrot.slane %v11795_v8, 1  ;;  %v976_v53 = vrot.slane %v11791_v36, 1  ;;  %v476_v16 = vld [vmem:[#allocation2 + $0x1d8] sm:$0x3] }
 0x2e4   :  { %1631 = vrot.lane.b32.xlu1 %v951_v11, %s10030_s5  ;;  %1441 = vrot.lane.b32.xlu0 %v11689_v35, %s10029_s26  ;;  %v704_v35 = vsel %vm621_vm3, %v702_v41, %v703_v24  ;;  %v2683_v44 = vsel %vm2660_vm8, %v2618_v15, %v11659_v42  ;;  %v11818_v42 = vld [vmem:[#allocation2 + $0x1c8] sm:$0xff]  ;;  %v867_v21 = vsel %vm782_vm2, %v864_v19, %v866_v33  ;;  %vm4358_vm1 = vcmp.gt.f32.partialorder %v11713_v51, 20.0 }
 0x2e5   :  { %8454 = vmatmul.mubr.msk.f32.gmra.mrb[20].mxu0 %vm3052_vm14, %v3007_v18  ;;  %v2748_v56 = vsel %vm2725_vm9, %v2683_v44, %v11685_v60  ;;  %v707_v31 = vrot.slane %v11818_v42, 1  ;;  %v708_v18 = vrot.slane %v11806_v46, 1  ;;  %v710_v23 = vrot.slane %v476_v16, 1 }
 0x2e6   :  { %v11760_v43 = vpop.permute.xlu1 %1235  ;;  %v11762_v48 = vpop.permute.xlu0 %1045  ;;  %v2813_v50 = vsel %vm2790_vm10, %v2748_v56, %v11748_v29 }
 0x2e8   :  { %2395 = vrot.lane.b32.xlu1 %v961_v10, %s10015_s16  ;;  %2205 = vrot.lane.b32.xlu0 %v953_v7, %s10033_s4  ;;  %v4549_v56 = vld [vmem:[#allocation3 + $0x20] ss:$2 sm:$0xff] }
 0x2ea   :  { %v2000_v1 = vpop.permute.xlu1 %1999  ;;  %v11767_v39 = vpop.permute.xlu0 %1809 }
 0x2eb   :  { %v9370_v20 = vpop.eup %9369  ;;  %v2878_v47 = vsel %vm2855_vm11, %v2813_v50, %v2000_v1  ;;  %v977_v1 = vsel %vm621_vm3, %v975_v40, %v976_v53  ;;  %v4613_v40 = vld [vmem:[#allocation3 + $0x21] ss:$2 sm:$0xff] }
 0x2ec   :  { %v9372_v38 = vpop.eup %9371  ;;  %v3975_v30 = vadd.f32 2.0, %v9370_v20  ;;  %1633 = vrot.lane.b32.xlu1 %v953_v7, %s10030_s5  ;;  %1059 = vrot.lane.b32.xlu0 %v704_v35, %s10028_s1 }
 0x2ed   :  { %v3974_v12 = vadd.f32 2.0, %v9372_v38 }
 0x2ee   :  { %v4039_v61 = vmul.f32 %v9370_v20, %v3975_v30  ;;  %v11773_v34 = vpop.permute.xlu1 %1427  ;;  %v11775_v25 = vpop.permute.xlu0 %1237  ;;  %v9681_v20 = vld [vmem:[#allocation2 + $0x110] sm:$0xff] }
 0x2ef   :  { %v4038_v28 = vmul.f32 %v9372_v38, %v3974_v12  ;;  %v2554_v38 = vsel %vm178_vm0, %v9681_v20, %v11650_v57  ;;  %v709_v57 = vsel %vm621_vm3, %v707_v31, %v708_v18 }
 0x2f0   :  { %v4167_v9 = vadd.f32 2.0, %v4039_v61  ;;  %2397 = vrot.lane.b32.xlu1 %v963_v32, %s10015_s16  ;;  %1823 = vrot.lane.b32.xlu0 %v961_v10, %s10031_s24  ;;  %v4103_v24 = vmul.f32 %v4039_v61, %v11706_v22  ;;  %v2619_v12 = vsel %vm2595_vm7, %v2554_v38, %v11661_v2 }
 0x2f1   :  { %v4166_v49 = vadd.f32 2.0, %v4038_v28 }
 0x2f2   :  { %9373 = vrcp.f32 %v4167_v9  ;;  %v2192_v63 = vpop.permute.xlu1 %2191  ;;  %v11785_v11 = vpop.permute.xlu0 %2001  ;;  %v470_v9 = vld [vmem:[#allocation2 + $0x1a8] sm:$0x3] }
 0x2f3   :  { %9375 = vrcp.f32 %v4166_v49  ;;  %v2943_v29 = vsel %vm2920_vm12, %v2878_v47, %v2192_v63  ;;  %v985_v63 = vrot.slane %v11795_v8, 2  ;;  %v988_v31 = vrot.slane %v470_v9, 2 }
 0x2f4   :  { %1251 = vrot.lane.b32.xlu1 %v865_v4, %s10027_s6  ;;  %1061 = vrot.lane.b32.xlu0 %v706_v54, %s10028_s1 }
 0x2f6   :  { %v11802_v55 = vpop.permute.xlu1 %1619  ;;  %v11804_v45 = vpop.permute.xlu0 %1429 }
 0x2f8   :  { %v8437_v13 = vpop.f32.mrb[8].mxu0  ;;  %2015 = vrot.lane.b32.xlu1 %v11795_v8, %s10032_s30  ;;  %1825 = vrot.lane.b32.xlu0 %v963_v32, %s10031_s24 }
 0x2f9   :  { %v3650_v60 = vmul.f32 %v8437_v13, %v11376_v27  ;;  %v3355_v58 = vpop.f32.mrb[9].mxu0 }
 0x2fa   :  { %v3649_v10 = vmul.f32 %v11376_v27, %v3355_v58  ;;  %v2384_v7 = vpop.permute.xlu1 %2383  ;;  %v2194_v41 = vpop.permute.xlu0 %2193  ;;  %v4102_v27 = vmul.f32 %v4038_v28, %v11713_v51  ;;  %v4674_v58 = vadd.f32 %v4613_v40, %v4549_v56  ;;  %v11954_v56 = vld [vmem:[#allocation11] ss:$0 sm:$0xff] }
 0x2fb   :  { %v11829_v3 = vadd.f32 %v11383_v26, %v3650_v60  ;;  %v3008_v35 = vsel %vm2985_vm13, %v2943_v29, %v2384_v7  ;;  %v868_v60 = vrot.slane %v11818_v42, 2  ;;  %v869_v29 = vrot.slane %v11806_v46, 2 }
 0x2fc   :  { %v9374_v6 = vpop.eup %9373  ;;  %v11839_v30 = vadd.f32 %v11383_v26, %v3649_v10  ;;  %1443 = vrot.lane.b32.xlu1 %v11818_v42, %s10029_s26  ;;  %1253 = vrot.lane.b32.xlu0 %v867_v21, %s10027_s6  ;;  %v2684_v26 = vsel %vm2660_vm8, %v2619_v12, %v11687_v62 }
 0x2fd   :  { %v9376_v32 = vpop.eup %9375  ;;  %v4295_v14 = vmul.f32 %v9374_v6, %v4103_v24  ;;  %v3785_v19 = vmin.f32 %v11829_v3, 20.0  ;;  %8456 = vmatprep.mubr.msk.f32.mxu0 %vm3052_vm14, %v3008_v35  ;;  %v2749_v49 = vsel %vm2725_vm9, %v2684_v26, %v11727_v37  ;;  %v986_v37 = vrot.slane %v11791_v36, 2 }
 0x2fe   :  { %v4294_v59 = vmul.f32 %v9376_v32, %v4102_v27  ;;  %v3784_v61 = vmin.f32 %v11839_v30, 20.0  ;;  %v11855_v28 = vpop.permute.xlu1 %1621  ;;  %v11857_v2 = vpop.permute.xlu0 %1047  ;;  %v2814_v54 = vsel %vm2790_vm10, %v2749_v49, %v11767_v39  ;;  %v870_v20 = vsel %vm782_vm2, %v868_v60, %v869_v29  ;;  %v11923_v49 = vld [vmem:[#allocation2 + $0x1e0] sm:$0xff]  ;;  %v9685_v60 = vld [vmem:[#allocation2 + $0x128] sm:$0xff] }
 0x2ff   :  { %v4423_v52 = vsel %vm4359_vm6, %v11706_v22, %v4295_v14  ;;  %v3858_v4 = vmul.f32 1.442695, %v3785_v19  ;;  %v2879_v22 = vsel %vm2855_vm11, %v2814_v54, %v11785_v11  ;;  %v987_v11 = vsel %vm782_vm2, %v985_v63, %v986_v37  ;;  %v330_v14 = vld [vmem:[%s14931_s0 + $0x150] sm:$0xff] }
 0x300   :  { %4488 = vst.msk [vmem:[#allocation3 + $0x38] sm:$0xff] %vm4480_vm15, %v4423_v52  ;;  %v4422_v62 = vsel %vm4358_vm1, %v11713_v51, %v4294_v59  ;;  %v3856_v5 = vmul.f32 1.442695, %v3784_v61  ;;  %2207 = vrot.lane.b32.xlu1 %v977_v1, %s10033_s4  ;;  %2017 = vrot.lane.b32.xlu0 %v11791_v36, %s10032_s30  ;;  %v978_v51 = vrot.slane %v470_v9, 1  ;;  %v2944_v39 = vsel %vm2920_vm12, %v2879_v22, %v2194_v41  ;;  %v9682_v61 = vld [vmem:[#allocation2 + $0x120] sm:$0xff] }
 0x301   :  { %4487 = vst.msk [vmem:[#allocation3 + $0x30] sm:$0xff] %vm4480_vm15, %v4422_v62  ;;  %9377 = vpow2.f32 %v3858_v4  ;;  %v711_v36 = vsel %vm621_vm3, %v708_v18, %v710_v23  ;;  %v989_v18 = vsel %vm782_vm2, %v986_v37, %v988_v31  ;;  %v2555_v9 = vsel %vm178_vm0, %v9682_v61, %v11729_v17  ;;  %v331_v62 = vld [vmem:[%s14931_s0 + $0x158] sm:$0xff] }
 0x302   :  { %9379 = vpow2.f32 %v3856_v5  ;;  %v2386_v33 = vpop.permute.xlu1 %2385  ;;  %v11876_v15 = vpop.permute.xlu0 %1811  ;;  %v979_v44 = vsel %vm621_vm3, %v976_v53, %v978_v51  ;;  %395 = vst.msk [vmem:[#allocation2 + $0x241] sm:$0xff] %vm178_vm0, %v330_v14  ;;  %v2620_v52 = vsel %vm2595_vm7, %v2555_v9, %v11760_v43  ;;  %v11935_v5 = vld [vmem:[#allocation2 + $0x1e8] sm:$0xff]  ;;  %396 = vst.msk [vmem:[#allocation2 + $0x249] sm:$0xff] %vm178_vm0, %v331_v62  ;;  %v11946_v51 = vld [vmem:[#allocation9] ss:$0 sm:$0xff]  ;;  %vm4361_vm4 = vcmp.gt.f32.partialorder %v11829_v3, 20.0 }
 0x303   :  { %v3009_v8 = vsel %vm2985_vm13, %v2944_v39, %v2386_v33  ;;  %v2685_v54 = vsel %vm2660_vm8, %v2620_v52, %v11773_v34  ;;  %v712_v33 = vrot.slane %v11923_v49, 1  ;;  %vm4360_vm5 = vcmp.gt.f32.partialorder %v11839_v30, 20.0 }
 0x304   :  { %1635 = vrot.lane.b32.xlu1 %v709_v57, %s10030_s5  ;;  %1445 = vrot.lane.b32.xlu0 %v11806_v46, %s10029_s26  ;;  %v2750_v43 = vsel %vm2725_vm9, %v2685_v54, %v11802_v55  ;;  %v713_v55 = vrot.slane %v11935_v5, 1  ;;  %v874_v14 = vrot.slane %v11935_v5, 2 }
 0x305   :  { %8457 = vmatmul.mubr.msk.f32.gmra.mrb[22].mxu0 %vm3052_vm14, %v3009_v8  ;;  %v2815_v22 = vsel %vm2790_vm10, %v2750_v43, %v11876_v15 }
 0x306   :  { %v11887_v50 = vpop.permute.xlu1 %1239  ;;  %v11889_v13 = vpop.permute.xlu0 %1049 }
 0x308   :  { %v4551_v21 = vld [vmem:[#allocation3 + $0x30] ss:$2 sm:$0xff]  ;;  %v4615_v47 = vld [vmem:[#allocation3 + $0x31] ss:$2 sm:$0xff]  ;;  %2399 = vrot.lane.b32.xlu1 %v987_v11, %s10015_s16  ;;  %2209 = vrot.lane.b32.xlu0 %v979_v44, %s10033_s4 }
 0x309   :  { %v4675_v53 = vadd.f32 %v4615_v47, %v4551_v21 }
 0x30a   :  { %v2004_v10 = vpop.permute.xlu1 %2003  ;;  %v11898_v7 = vpop.permute.xlu0 %1813 }
 0x30b   :  { %v9378_v41 = vpop.eup %9377  ;;  %v4705_v24 = vadd.f32 %v4675_v53, %v4674_v58  ;;  %v2880_v34 = vsel %vm2855_vm11, %v2815_v22, %v2004_v10 }
 0x30c   :  { %v9380_v35 = vpop.eup %9379  ;;  %v3977_v42 = vadd.f32 2.0, %v9378_v41  ;;  %1637 = vrot.lane.b32.xlu1 %v711_v36, %s10030_s5  ;;  %1063 = vrot.lane.b32.xlu0 %v709_v57, %s10028_s1  ;;  %v871_v57 = vrot.slane %v476_v16, 2 }
 0x30d   :  { %v4721_v1 = vmul.f32 0.25, %v4705_v24  ;;  %v3976_v6 = vadd.f32 2.0, %v9380_v35 }
 0x30e   :  { %v4041_v38 = vmul.f32 %v9378_v41, %v3977_v42  ;;  %v11904_v27 = vpop.permute.xlu1 %1431  ;;  %v11906_v46 = vpop.permute.xlu0 %1241  ;;  %v872_v4 = vsel %vm782_vm2, %v869_v29, %v871_v57 }
 0x30f   :  { %v4040_v32 = vmul.f32 %v9380_v35, %v3976_v6  ;;  %4779 = vst.msk [vmem:[#allocation4 + $0x21] sm:$0xff] %vm4480_vm15, %v4721_v1 }
 0x310   :  { %v4169_v12 = vadd.f32 2.0, %v4041_v38  ;;  %2401 = vrot.lane.b32.xlu1 %v989_v18, %s10015_s16  ;;  %1827 = vrot.lane.b32.xlu0 %v870_v20, %s10031_s24  ;;  %v4105_v44 = vmul.f32 %v4041_v38, %v11829_v3 }
 0x311   :  { %v4168_v19 = vadd.f32 2.0, %v4040_v32  ;;  %v4104_v58 = vmul.f32 %v4040_v32, %v11839_v30 }
 0x312   :  { %9381 = vrcp.f32 %v4169_v12  ;;  %v2196_v26 = vpop.permute.xlu1 %2195  ;;  %v11915_v59 = vpop.permute.xlu0 %2005 }
 0x313   :  { %9383 = vrcp.f32 %v4168_v19  ;;  %v2945_v8 = vsel %vm2920_vm12, %v2880_v34, %v2196_v26 }
 0x314   :  { %1255 = vrot.lane.b32.xlu1 %v870_v20, %s10027_s6  ;;  %1065 = vrot.lane.b32.xlu0 %v711_v36, %s10028_s1  ;;  %v2556_v36 = vsel %vm178_vm0, %v9685_v60, %v11762_v48  ;;  %v714_v48 = vsel %vm621_vm3, %v712_v33, %v713_v55  ;;  %v12035_v60 = vld [vmem:[#allocation2 + $0x1f8] sm:$0xff] }
 0x315   :  { %v2621_v29 = vsel %vm2595_vm7, %v2556_v36, %v11775_v25  ;;  %v479_v25 = vld [vmem:[#allocation2 + $0x1f0] sm:$0x3]  ;;  %v333_v36 = vld [vmem:[%s14931_s0 + $0x168] sm:$0xff] }
 0x316   :  { %v11931_v63 = vpop.permute.xlu1 %1623  ;;  %v11933_v17 = vpop.permute.xlu0 %1433  ;;  %v2686_v24 = vsel %vm2660_vm8, %v2621_v29, %v11804_v45  ;;  %398 = vst.msk [vmem:[#allocation2 + $0x261] sm:$0xff] %vm178_vm0, %v333_v36 }
 0x317   :  { %v2751_v20 = vsel %vm2725_vm9, %v2686_v24, %v11855_v28 }
 0x318   :  { %v8440_v37 = vpop.f32.mrb[10].mxu0  ;;  %2019 = vrot.lane.b32.xlu1 %v11923_v49, %s10032_s30  ;;  %1829 = vrot.lane.b32.xlu0 %v872_v4, %s10031_s24  ;;  %v2816_v32 = vsel %vm2790_vm10, %v2751_v20, %v11898_v7 }
 0x319   :  { %v3652_v16 = vmul.f32 %v11946_v51, %v8440_v37  ;;  %v3365_v39 = vpop.f32.mrb[11].mxu0  ;;  %v2881_v28 = vsel %vm2855_vm11, %v2816_v32, %v11915_v59 }
 0x31a   :  { %v3651_v15 = vmul.f32 %v11946_v51, %v3365_v39  ;;  %v2388_v23 = vpop.permute.xlu1 %2387  ;;  %v2198_v11 = vpop.permute.xlu0 %2197 }
 0x31b   :  { %v11957_v40 = vadd.f32 %v11954_v56, %v3652_v16  ;;  %v3010_v21 = vsel %vm2985_vm13, %v2945_v8, %v2388_v23  ;;  %v2946_v7 = vsel %vm2920_vm12, %v2881_v28, %v2198_v11  ;;  %v332_v8 = vld [vmem:[%s14931_s0 + $0x160] sm:$0xff] }
 0x31c   :  { %v9382_v47 = vpop.eup %9381  ;;  %v11964_v53 = vadd.f32 %v11954_v56, %v3651_v15  ;;  %1447 = vrot.lane.b32.xlu1 %v11923_v49, %s10029_s26  ;;  %1257 = vrot.lane.b32.xlu0 %v872_v4, %s10027_s6  ;;  %397 = vst.msk [vmem:[#allocation2 + $0x259] sm:$0xff] %vm178_vm0, %v332_v8 }
 0x31d   :  { %v9384_v31 = vpop.eup %9383  ;;  %v4297_v10 = vmul.f32 %v9382_v47, %v4105_v44  ;;  %v3787_v41 = vmin.f32 %v11957_v40, 20.0  ;;  %8459 = vmatprep.mubr.msk.f32.mxu0 %vm3052_vm14, %v3010_v21  ;;  %v9686_v44 = vld [vmem:[#allocation2 + $0x138] sm:$0xff]  ;;  %vm4363_vm6 = vcmp.gt.f32.partialorder %v11957_v40, 20.0 }
 0x31e   :  { %v4296_v35 = vmul.f32 %v9384_v31, %v4104_v58  ;;  %v3786_v42 = vmin.f32 %v11964_v53, 20.0  ;;  %v11978_v1 = vpop.permute.xlu1 %1625  ;;  %v11980_v6 = vpop.permute.xlu0 %1051  ;;  %v2557_v21 = vsel %vm178_vm0, %v9686_v44, %v11857_v2  ;;  %v12046_v2 = vld [vmem:[#allocation2 + $0x200] sm:$0xff]  ;;  %vm4362_vm1 = vcmp.gt.f32.partialorder %v11964_v53, 20.0 }
 0x31f   :  { %v4425_v18 = vsel %vm4361_vm4, %v11829_v3, %v4297_v10  ;;  %v3862_v38 = vmul.f32 1.442695, %v3787_v41  ;;  %v873_v3 = vrot.slane %v11923_v49, 2  ;;  %v876_v49 = vrot.slane %v479_v25, 2 }
 0x320   :  { %4490 = vst.msk [vmem:[#allocation3 + $0x48] sm:$0xff] %vm4480_vm15, %v4425_v18  ;;  %v4424_v45 = vsel %vm4360_vm5, %v11839_v30, %v4296_v35  ;;  %v3860_v12 = vmul.f32 1.442695, %v3786_v42  ;;  %2211 = vrot.lane.b32.xlu1 %v714_v48, %s10033_s4  ;;  %2021 = vrot.lane.b32.xlu0 %v11935_v5, %s10032_s30  ;;  %v715_v30 = vrot.slane %v479_v25, 1  ;;  %v2622_v47 = vsel %vm2595_vm7, %v2557_v21, %v11887_v50 }
 0x321   :  { %4489 = vst.msk [vmem:[#allocation3 + $0x40] sm:$0xff] %vm4480_vm15, %v4424_v45  ;;  %9385 = vpow2.f32 %v3862_v38  ;;  %v875_v59 = vsel %vm782_vm2, %v873_v3, %v874_v14  ;;  %v877_v37 = vsel %vm782_vm2, %v874_v14, %v876_v49  ;;  %v2687_v58 = vsel %vm2660_vm8, %v2622_v47, %v11904_v27  ;;  %v9687_v3 = vld [vmem:[#allocation2 + $0x140] sm:$0xff] }
 0x322   :  { %9387 = vpow2.f32 %v3860_v12  ;;  %v2390_v19 = vpop.permute.xlu1 %2389  ;;  %v1816_v57 = vpop.permute.xlu0 %1815  ;;  %v716_v61 = vsel %vm621_vm3, %v713_v55, %v715_v30  ;;  %v2752_v50 = vsel %vm2725_vm9, %v2687_v58, %v11931_v63  ;;  %v717_v35 = vrot.slane %v12035_v60, 1 }
 0x323   :  { %v3011_v26 = vsel %vm2985_vm13, %v2946_v7, %v2390_v19  ;;  %v2817_v10 = vsel %vm2790_vm10, %v2752_v50, %v1816_v57  ;;  %v718_v42 = vrot.slane %v12046_v2, 1  ;;  %v2558_v28 = vsel %vm178_vm0, %v9687_v3, %v11889_v13 }
 0x324   :  { %1639 = vrot.lane.b32.xlu1 %v714_v48, %s10030_s5  ;;  %1449 = vrot.lane.b32.xlu0 %v11935_v5, %s10029_s26  ;;  %v2623_v19 = vsel %vm2595_vm7, %v2558_v28, %v11906_v46  ;;  %v482_v46 = vld [vmem:[#allocation2 + $0x208] sm:$0x3]  ;;  %v334_v28 = vld [vmem:[%s14931_s0 + $0x170] sm:$0xff] }
 0x325   :  { %8460 = vmatmul.mubr.msk.f32.gmra.mrb[24].mxu0 %vm3052_vm14, %v3011_v26  ;;  %v719_v13 = vsel %vm621_vm3, %v717_v35, %v718_v42  ;;  %399 = vst.msk [vmem:[#allocation2 + $0x271] sm:$0xff] %vm178_vm0, %v334_v28 }
 0x326   :  { %v12006_v9 = vpop.permute.xlu1 %1243  ;;  %v12008_v52 = vpop.permute.xlu0 %1053 }
 0x328   :  { %2403 = vrot.lane.b32.xlu1 %v875_v59, %s10015_s16  ;;  %2213 = vrot.lane.b32.xlu0 %v716_v61, %s10033_s4  ;;  %v4553_v44 = vld [vmem:[#allocation3 + $0x40] ss:$2 sm:$0xff]  ;;  %v4617_v21 = vld [vmem:[#allocation3 + $0x41] ss:$2 sm:$0xff] }
 0x329   :  { %v4676_v50 = vadd.f32 %v4617_v21, %v4553_v44 }
 0x32a   :  { %v2008_v4 = vpop.permute.xlu1 %2007  ;;  %v12012_v62 = vpop.permute.xlu0 %1817 }
 0x32b   :  { %v9386_v54 = vpop.eup %9385  ;;  %v2882_v27 = vsel %vm2855_vm11, %v2817_v10, %v2008_v4  ;;  %v881_v10 = vrot.slane %v482_v46, 2 }
 0x32c   :  { %v9388_v5 = vpop.eup %9387  ;;  %v3979_v43 = vadd.f32 2.0, %v9386_v54  ;;  %1641 = vrot.lane.b32.xlu1 %v716_v61, %s10030_s5  ;;  %1067 = vrot.lane.b32.xlu0 %v714_v48, %s10028_s1 }
 0x32d   :  { %v3978_v22 = vadd.f32 2.0, %v9388_v5 }
 0x32e   :  { %v4043_v34 = vmul.f32 %v9386_v54, %v3979_v43  ;;  %v12017_v16 = vpop.permute.xlu1 %1435  ;;  %v12019_v39 = vpop.permute.xlu0 %1245 }
 0x32f   :  { %v4042_v33 = vmul.f32 %v9388_v5, %v3978_v22 }
 0x330   :  { %v4171_v55 = vadd.f32 2.0, %v4043_v34  ;;  %2405 = vrot.lane.b32.xlu1 %v877_v37, %s10015_s16  ;;  %1831 = vrot.lane.b32.xlu0 %v875_v59, %s10031_s24  ;;  %v4107_v38 = vmul.f32 %v4043_v34, %v11957_v40 }
 0x331   :  { %v4170_v15 = vadd.f32 2.0, %v4042_v33  ;;  %v4106_v14 = vmul.f32 %v4042_v33, %v11964_v53  ;;  %v879_v33 = vrot.slane %v12046_v2, 2 }
 0x332   :  { %9389 = vrcp.f32 %v4171_v55  ;;  %v2200_v23 = vpop.permute.xlu1 %2199  ;;  %v12027_v11 = vpop.permute.xlu0 %2009 }
 0x333   :  { %9391 = vrcp.f32 %v4170_v15  ;;  %v2947_v25 = vsel %vm2920_vm12, %v2882_v27, %v2200_v23 }
 0x334   :  { %1259 = vrot.lane.b32.xlu1 %v875_v59, %s10027_s6  ;;  %1069 = vrot.lane.b32.xlu0 %v716_v61, %s10028_s1  ;;  %v2688_v59 = vsel %vm2660_vm8, %v2623_v19, %v11933_v17 }
 0x335   :  { %v2753_v43 = vsel %vm2725_vm9, %v2688_v59, %v11978_v1  ;;  %v12142_v59 = vld [vmem:[#allocation2 + $0x210] sm:$0xff] }
 0x336   :  { %v12042_v31 = vpop.permute.xlu1 %1627  ;;  %v12044_v29 = vpop.permute.xlu0 %1437 }
 0x338   :  { %v8443_v41 = vpop.f32.mrb[12].mxu0  ;;  %2023 = vrot.lane.b32.xlu1 %v12035_v60, %s10032_s30  ;;  %1833 = vrot.lane.b32.xlu0 %v877_v37, %s10031_s24 }
 0x339   :  { %v3654_v48 = vmul.f32 %v11946_v51, %v8443_v41  ;;  %v3375_v24 = vpop.f32.mrb[13].mxu0 }
 0x33a   :  { %v3653_v63 = vmul.f32 %v11946_v51, %v3375_v24  ;;  %v2392_v18 = vpop.permute.xlu1 %2391  ;;  %v2202_v20 = vpop.permute.xlu0 %2201 }
 0x33b   :  { %v12063_v45 = vadd.f32 %v11954_v56, %v3654_v48  ;;  %v3012_v32 = vsel %vm2985_vm13, %v2947_v25, %v2392_v18  ;;  %v882_v18 = vsel %vm782_vm2, %v879_v33, %v881_v10 }
 0x33c   :  { %v9390_v12 = vpop.eup %9389  ;;  %v12070_v30 = vadd.f32 %v11954_v56, %v3653_v63  ;;  %1451 = vrot.lane.b32.xlu1 %v12035_v60, %s10029_s26  ;;  %1261 = vrot.lane.b32.xlu0 %v877_v37, %s10027_s6  ;;  %v2818_v37 = vsel %vm2790_vm10, %v2753_v43, %v12012_v62 }
 0x33d   :  { %v9392_v7 = vpop.eup %9391  ;;  %v4299_v57 = vmul.f32 %v9390_v12, %v4107_v38  ;;  %v3789_v26 = vmin.f32 %v12063_v45, 20.0  ;;  %8462 = vmatprep.mubr.msk.f32.mxu0 %vm3052_vm14, %v3012_v32  ;;  %v2883_v1 = vsel %vm2855_vm11, %v2818_v37, %v12027_v11  ;;  %vm4365_vm4 = vcmp.gt.f32.partialorder %v12063_v45, 20.0 }
 0x33e   :  { %v4298_v61 = vmul.f32 %v9392_v7, %v4106_v14  ;;  %v3788_v49 = vmin.f32 %v12070_v30, 20.0  ;;  %v12084_v4 = vpop.permute.xlu1 %1629  ;;  %v12086_v54 = vpop.permute.xlu0 %1055  ;;  %v2948_v62 = vsel %vm2920_vm12, %v2883_v1, %v2202_v20  ;;  %vm4364_vm5 = vcmp.gt.f32.partialorder %v12070_v30, 20.0 }
 0x33f   :  { %v4427_v5 = vsel %vm4363_vm6, %v11957_v40, %v4299_v57  ;;  %v3866_v22 = vmul.f32 1.442695, %v3789_v26  ;;  %v878_v40 = vrot.slane %v12035_v60, 2  ;;  %v9688_v57 = vld [vmem:[#allocation2 + $0x150] sm:$0xff] }
 0x340   :  { %4492 = vst.msk [vmem:[#allocation3 + $0x58] sm:$0xff] %vm4480_vm15, %v4427_v5  ;;  %v4426_v17 = vsel %vm4362_vm1, %v11964_v53, %v4298_v61  ;;  %v3864_v34 = vmul.f32 1.442695, %v3788_v49  ;;  %2215 = vrot.lane.b32.xlu1 %v719_v13, %s10033_s4  ;;  %2025 = vrot.lane.b32.xlu0 %v12046_v2, %s10032_s30  ;;  %v720_v53 = vrot.slane %v482_v46, 1  ;;  %v2559_v26 = vsel %vm178_vm0, %v9688_v57, %v11980_v6  ;;  %v335_v61 = vld [vmem:[%s14931_s0 + $0x178] sm:$0xff] }
 0x341   :  { %4491 = vst.msk [vmem:[#allocation3 + $0x50] sm:$0xff] %vm4480_vm15, %v4426_v17  ;;  %9393 = vpow2.f32 %v3866_v22  ;;  %v880_v23 = vsel %vm782_vm2, %v878_v40, %v879_v33  ;;  %v12153_v6 = vld [vmem:[#allocation2 + $0x218] sm:$0xff] }
 0x342   :  { %9395 = vpow2.f32 %v3864_v34  ;;  %v2394_v55 = vpop.permute.xlu1 %2393  ;;  %v1820_v8 = vpop.permute.xlu0 %1819  ;;  %v721_v11 = vsel %vm621_vm3, %v718_v42, %v720_v53  ;;  %400 = vst.msk [vmem:[#allocation2 + $0x279] sm:$0xff] %vm178_vm0, %v335_v61  ;;  %v722_v34 = vrot.slane %v12142_v59, 1  ;;  %v723_v40 = vrot.slane %v12153_v6, 1 }
 0x343   :  { %v3013_v15 = vsel %vm2985_vm13, %v2948_v62, %v2394_v55 }
 0x344   :  { %1643 = vrot.lane.b32.xlu1 %v719_v13, %s10030_s5  ;;  %1453 = vrot.lane.b32.xlu0 %v12046_v2, %s10029_s26 }
 0x345   :  { %8463 = vmatmul.mubr.msk.f32.gmra.mrb[26].mxu0 %vm3052_vm14, %v3013_v15 }
 0x346   :  { %v12112_v47 = vpop.permute.xlu1 %1247  ;;  %v12114_v60 = vpop.permute.xlu0 %1057 }
 0x348   :  { %v4555_v36 = vld [vmem:[#allocation3 + $0x50] ss:$2 sm:$0xff]  ;;  %v4619_v58 = vld [vmem:[#allocation3 + $0x51] ss:$2 sm:$0xff]  ;;  %2407 = vrot.lane.b32.xlu1 %v880_v23, %s10015_s16  ;;  %2217 = vrot.lane.b32.xlu0 %v721_v11, %s10033_s4 }
 0x349   :  { %v4677_v2 = vadd.f32 %v4619_v58, %v4555_v36 }
 0x34a   :  { %v2012_v41 = vpop.permute.xlu1 %2011  ;;  %v12118_v27 = vpop.permute.xlu0 %1821 }
 0x34b   :  { %v9394_v48 = vpop.eup %9393  ;;  %v4706_v24 = vadd.f32 %v4677_v2, %v4676_v50 }
 0x34c   :  { %v9396_v35 = vpop.eup %9395  ;;  %v3981_v42 = vadd.f32 2.0, %v9394_v48  ;;  %1645 = vrot.lane.b32.xlu1 %v721_v11, %s10030_s5  ;;  %1071 = vrot.lane.b32.xlu0 %v719_v13, %s10028_s1  ;;  %v2624_v13 = vsel %vm2595_vm7, %v2559_v26, %v12006_v9 }
 0x34d   :  { %v4722_v25 = vmul.f32 0.25, %v4706_v24  ;;  %v3980_v63 = vadd.f32 2.0, %v9396_v35  ;;  %v2689_v49 = vsel %vm2660_vm8, %v2624_v13, %v12017_v16 }
 0x34e   :  { %v4045_v20 = vmul.f32 %v9394_v48, %v3981_v42  ;;  %v12123_v38 = vpop.permute.xlu1 %1439  ;;  %v12125_v32 = vpop.permute.xlu0 %1249  ;;  %v2754_v9 = vsel %vm2725_vm9, %v2689_v49, %v12042_v31 }
 0x34f   :  { %v4044_v12 = vmul.f32 %v9396_v35, %v3980_v63  ;;  %4780 = vst.msk [vmem:[#allocation4 + $0x31] sm:$0xff] %vm4480_vm15, %v4722_v25  ;;  %v2819_v43 = vsel %vm2790_vm10, %v2754_v9, %v1820_v8 }
 0x350   :  { %v4173_v3 = vadd.f32 2.0, %v4045_v20  ;;  %2409 = vrot.lane.b32.xlu1 %v882_v18, %s10015_s16  ;;  %1835 = vrot.lane.b32.xlu0 %v880_v23, %s10031_s24  ;;  %v2884_v16 = vsel %vm2855_vm11, %v2819_v43, %v2012_v41  ;;  %v4109_v62 = vmul.f32 %v4045_v20, %v12063_v45 }
 0x351   :  { %v4172_v14 = vadd.f32 2.0, %v4044_v12  ;;  %v4108_v44 = vmul.f32 %v4044_v12, %v12070_v30  ;;  %v884_v12 = vrot.slane %v12153_v6, 2 }
 0x352   :  { %9397 = vrcp.f32 %v4173_v3  ;;  %v2204_v7 = vpop.permute.xlu1 %2203  ;;  %v12134_v19 = vpop.permute.xlu0 %2013 }
 0x353   :  { %9399 = vrcp.f32 %v4172_v14  ;;  %v2949_v1 = vsel %vm2920_vm12, %v2884_v16, %v2204_v7 }
 0x354   :  { %1263 = vrot.lane.b32.xlu1 %v880_v23, %s10027_s6  ;;  %1073 = vrot.lane.b32.xlu0 %v721_v11, %s10028_s1  ;;  %v9689_v23 = vld [vmem:[#allocation2 + $0x158] sm:$0xff] }
 0x355   :  { %v2560_v11 = vsel %vm178_vm0, %v9689_v23, %v12008_v52  ;;  %v724_v52 = vsel %vm621_vm3, %v722_v34, %v723_v40  ;;  %v12248_v23 = vld [vmem:[#allocation2 + $0x228] sm:$0xff] }
 0x356   :  { %v12149_v46 = vpop.permute.xlu1 %1631  ;;  %v12151_v5 = vpop.permute.xlu0 %1441  ;;  %v2625_v58 = vsel %vm2595_vm7, %v2560_v11, %v12019_v39  ;;  %v485_v39 = vld [vmem:[#allocation2 + $0x220] sm:$0x3]  ;;  %v337_v11 = vld [vmem:[%s14931_s0 + $0x188] sm:$0xff] }
 0x357   :  { %v2690_v10 = vsel %vm2660_vm8, %v2625_v58, %v12044_v29  ;;  %v886_v13 = vrot.slane %v485_v39, 2  ;;  %402 = vst.msk [vmem:[#allocation2 + $0x291] sm:$0xff] %vm178_vm0, %v337_v11 }
 0x358   :  { %v8446_v22 = vpop.f32.mrb[14].mxu0  ;;  %2027 = vrot.lane.b32.xlu1 %v12142_v59, %s10032_s30  ;;  %1837 = vrot.lane.b32.xlu0 %v882_v18, %s10031_s24  ;;  %v2755_v25 = vsel %vm2725_vm9, %v2690_v10, %v12084_v4 }
 0x359   :  { %v3656_v17 = vmul.f32 %v11946_v51, %v8446_v22  ;;  %v3385_v37 = vpop.f32.mrb[15].mxu0  ;;  %v887_v22 = vsel %vm782_vm2, %v884_v12, %v886_v13 }
 0x35a   :  { %v3655_v31 = vmul.f32 %v11946_v51, %v3385_v37  ;;  %v2396_v33 = vpop.permute.xlu1 %2395  ;;  %v2206_v53 = vpop.permute.xlu0 %2205 }
 0x35b   :  { %v12170_v55 = vadd.f32 %v11954_v56, %v3656_v17  ;;  %v3014_v8 = vsel %vm2985_vm13, %v2949_v1, %v2396_v33  ;;  %v336_v1 = vld [vmem:[%s14931_s0 + $0x180] sm:$0xff] }
 0x35c   :  { %v9398_v15 = vpop.eup %9397  ;;  %v12177_v21 = vadd.f32 %v11954_v56, %v3655_v31  ;;  %1455 = vrot.lane.b32.xlu1 %v12142_v59, %s10029_s26  ;;  %1265 = vrot.lane.b32.xlu0 %v882_v18, %s10027_s6  ;;  %v2820_v18 = vsel %vm2790_vm10, %v2755_v25, %v12118_v27  ;;  %401 = vst.msk [vmem:[#allocation2 + $0x289] sm:$0xff] %vm178_vm0, %v336_v1 }
 0x35d   :  { %v9400_v36 = vpop.eup %9399  ;;  %v4301_v50 = vmul.f32 %v9398_v15, %v4109_v62  ;;  %v3791_v2 = vmin.f32 %v12170_v55, 20.0  ;;  %8465 = vmatprep.mubr.msk.f32.mxu0 %vm3052_vm14, %v3014_v8  ;;  %v2885_v4 = vsel %vm2855_vm11, %v2820_v18, %v12134_v19  ;;  %v9690_v62 = vld [vmem:[#allocation2 + $0x168] sm:$0xff]  ;;  %vm4367_vm6 = vcmp.gt.f32.partialorder %v12170_v55, 20.0 }
 0x35e   :  { %v4300_v41 = vmul.f32 %v9400_v36, %v4108_v44  ;;  %v3790_v48 = vmin.f32 %v12177_v21, 20.0  ;;  %v12191_v24 = vpop.permute.xlu1 %1633  ;;  %v12193_v35 = vpop.permute.xlu0 %1059  ;;  %v2950_v27 = vsel %vm2920_vm12, %v2885_v4, %v2206_v53  ;;  %v2561_v8 = vsel %vm178_vm0, %v9690_v62, %v12086_v54  ;;  %v12259_v54 = vld [vmem:[#allocation2 + $0x230] sm:$0xff] }
 0x35f   :  { %v4429_v42 = vsel %vm4365_vm4, %v12063_v45, %v4301_v50  ;;  %v3870_v63 = vmul.f32 1.442695, %v3791_v2  ;;  %v883_v45 = vrot.slane %v12142_v59, 2  ;;  %v2626_v15 = vsel %vm2595_vm7, %v2561_v8, %v12112_v47 }
 0x360   :  { %4494 = vst.msk [vmem:[#allocation3 + $0x68] sm:$0xff] %vm4480_vm15, %v4429_v42  ;;  %v4428_v29 = vsel %vm4364_vm5, %v12070_v30, %v4300_v41  ;;  %v3868_v20 = vmul.f32 1.442695, %v3790_v48  ;;  %2219 = vrot.lane.b32.xlu1 %v724_v52, %s10033_s4  ;;  %2029 = vrot.lane.b32.xlu0 %v12153_v6, %s10032_s30  ;;  %v725_v30 = vrot.slane %v485_v39, 1  ;;  %v2691_v44 = vsel %vm2660_vm8, %v2626_v15, %v12123_v38 }
 0x361   :  { %4493 = vst.msk [vmem:[#allocation3 + $0x60] sm:$0xff] %vm4480_vm15, %v4428_v29  ;;  %9401 = vpow2.f32 %v3870_v63  ;;  %v885_v7 = vsel %vm782_vm2, %v883_v45, %v884_v12  ;;  %v2756_v47 = vsel %vm2725_vm9, %v2691_v44, %v12149_v46  ;;  %v727_v41 = vrot.slane %v12248_v23, 1  ;;  %v9691_v45 = vld [vmem:[#allocation2 + $0x170] sm:$0xff] }
 0x362   :  { %9403 = vpow2.f32 %v3868_v20  ;;  %v2398_v3 = vpop.permute.xlu1 %2397  ;;  %v1824_v28 = vpop.permute.xlu0 %1823  ;;  %v726_v19 = vsel %vm621_vm3, %v723_v40, %v725_v30  ;;  %v728_v48 = vrot.slane %v12259_v54, 1  ;;  %v2562_v4 = vsel %vm178_vm0, %v9691_v45, %v12114_v60 }
 0x363   :  { %v3015_v14 = vsel %vm2985_vm13, %v2950_v27, %v2398_v3  ;;  %v2821_v50 = vsel %vm2790_vm10, %v2756_v47, %v1824_v28  ;;  %v2627_v3 = vsel %vm2595_vm7, %v2562_v4, %v12125_v32  ;;  %v488_v32 = vld [vmem:[#allocation2 + $0x238] sm:$0x3]  ;;  %vm4366_vm1 = vcmp.gt.f32.partialorder %v12177_v21, 20.0  ;;  %v338_v4 = vld [vmem:[%s14931_s0 + $0x190] sm:$0xff] }
 0x364   :  { %1647 = vrot.lane.b32.xlu1 %v724_v52, %s10030_s5  ;;  %1457 = vrot.lane.b32.xlu0 %v12153_v6, %s10029_s26  ;;  %v729_v60 = vsel %vm621_vm3, %v727_v41, %v728_v48  ;;  %403 = vst.msk [vmem:[#allocation2 + $0x2a1] sm:$0xff] %vm178_vm0, %v338_v4 }
 0x365   :  { %8466 = vmatmul.mubr.msk.f32.gmra.mrb[28].mxu0 %vm3052_vm14, %v3015_v14 }
 0x366   :  { %v12219_v57 = vpop.permute.xlu1 %1251  ;;  %v12221_v26 = vpop.permute.xlu0 %1061 }
 0x368   :  { %2411 = vrot.lane.b32.xlu1 %v885_v7, %s10015_s16  ;;  %2221 = vrot.lane.b32.xlu0 %v726_v19, %s10033_s4  ;;  %v4557_v62 = vld [vmem:[#allocation3 + $0x60] ss:$2 sm:$0xff]  ;;  %v4621_v8 = vld [vmem:[#allocation3 + $0x61] ss:$2 sm:$0xff] }
 0x369   :  { %v4678_v47 = vadd.f32 %v4621_v8, %v4557_v62 }
 0x36a   :  { %v2016_v59 = vpop.permute.xlu1 %2015  ;;  %v12225_v61 = vpop.permute.xlu0 %1825 }
 0x36b   :  { %v9402_v49 = vpop.eup %9401  ;;  %v2886_v38 = vsel %vm2855_vm11, %v2821_v50, %v2016_v59  ;;  %v891_v50 = vrot.slane %v488_v32, 2 }
 0x36c   :  { %v9404_v6 = vpop.eup %9403  ;;  %v3983_v9 = vadd.f32 2.0, %v9402_v49  ;;  %1649 = vrot.lane.b32.xlu1 %v726_v19, %s10030_s5  ;;  %1075 = vrot.lane.b32.xlu0 %v724_v52, %s10028_s1 }
 0x36d   :  { %v3982_v43 = vadd.f32 2.0, %v9404_v6 }
 0x36e   :  { %v4047_v16 = vmul.f32 %v9402_v49, %v3983_v9  ;;  %v12230_v17 = vpop.permute.xlu1 %1443  ;;  %v12232_v37 = vpop.permute.xlu0 %1253 }
 0x36f   :  { %v4046_v34 = vmul.f32 %v9404_v6, %v3982_v43 }
 0x370   :  { %v4175_v40 = vadd.f32 2.0, %v4047_v16  ;;  %2413 = vrot.lane.b32.xlu1 %v887_v22, %s10015_s16  ;;  %1839 = vrot.lane.b32.xlu0 %v885_v7, %s10031_s24  ;;  %v4111_v63 = vmul.f32 %v4047_v16, %v12170_v55 }
 0x371   :  { %v4174_v31 = vadd.f32 2.0, %v4046_v34  ;;  %v4110_v12 = vmul.f32 %v4046_v34, %v12177_v21  ;;  %v889_v34 = vrot.slane %v12259_v54, 2 }
 0x372   :  { %9405 = vrcp.f32 %v4175_v40  ;;  %v2208_v33 = vpop.permute.xlu1 %2207  ;;  %v12240_v53 = vpop.permute.xlu0 %2017 }
 0x373   :  { %9407 = vrcp.f32 %v4174_v31  ;;  %v2951_v39 = vsel %vm2920_vm12, %v2886_v38, %v2208_v33 }
 0x374   :  { %1267 = vrot.lane.b32.xlu1 %v885_v7, %s10027_s6  ;;  %1077 = vrot.lane.b32.xlu0 %v726_v19, %s10028_s1  ;;  %v2692_v7 = vsel %vm2660_vm8, %v2627_v3, %v12151_v5 }
 0x375   :  { %v2757_v9 = vsel %vm2725_vm9, %v2692_v7, %v12191_v24  ;;  %v12355_v7 = vld [vmem:[#allocation2 + $0x240] sm:$0xff] }
 0x376   :  { %v12255_v36 = vpop.permute.xlu1 %1635  ;;  %v12257_v58 = vpop.permute.xlu0 %1445 }
 0x378   :  { %v8449_v2 = vpop.f32.mrb[16].mxu0  ;;  %2031 = vrot.lane.b32.xlu1 %v12248_v23, %s10032_s30  ;;  %1841 = vrot.lane.b32.xlu0 %v887_v22, %s10031_s24 }
 0x379   :  { %v3658_v52 = vmul.f32 %v11946_v51, %v8449_v2  ;;  %v3395_v10 = vpop.f32.mrb[17].mxu0 }
 0x37a   :  { %v3657_v46 = vmul.f32 %v11946_v51, %v3395_v10  ;;  %v2400_v42 = vpop.permute.xlu1 %2399  ;;  %v2210_v25 = vpop.permute.xlu0 %2209 }
 0x37b   :  { %v12276_v29 = vadd.f32 %v11954_v56, %v3658_v52  ;;  %v3016_v18 = vsel %vm2985_vm13, %v2951_v39, %v2400_v42  ;;  %v892_v42 = vsel %vm782_vm2, %v889_v34, %v891_v50 }
 0x37c   :  { %v9406_v20 = vpop.eup %9405  ;;  %v12283_v30 = vadd.f32 %v11954_v56, %v3657_v46  ;;  %1459 = vrot.lane.b32.xlu1 %v12248_v23, %s10029_s26  ;;  %1269 = vrot.lane.b32.xlu0 %v887_v22, %s10027_s6  ;;  %v2822_v22 = vsel %vm2790_vm10, %v2757_v9, %v12225_v61 }
 0x37d   :  { %v9408_v27 = vpop.eup %9407  ;;  %v4303_v28 = vmul.f32 %v9406_v20, %v4111_v63  ;;  %v3793_v14 = vmin.f32 %v12276_v29, 20.0  ;;  %8468 = vmatprep.mubr.msk.f32.mxu0 %vm3052_vm14, %v3016_v18  ;;  %v2887_v24 = vsel %vm2855_vm11, %v2822_v22, %v12240_v53  ;;  %vm4369_vm4 = vcmp.gt.f32.partialorder %v12276_v29, 20.0 }
 0x37e   :  { %v4302_v19 = vmul.f32 %v9408_v27, %v4110_v12  ;;  %v3792_v13 = vmin.f32 %v12283_v30, 20.0  ;;  %v12297_v59 = vpop.permute.xlu1 %1637  ;;  %v12299_v49 = vpop.permute.xlu0 %1063  ;;  %v2952_v61 = vsel %vm2920_vm12, %v2887_v24, %v2210_v25  ;;  %vm4368_vm5 = vcmp.gt.f32.partialorder %v12283_v30, 20.0 }
 0x37f   :  { %v4431_v6 = vsel %vm4367_vm6, %v12170_v55, %v4303_v28  ;;  %v3874_v43 = vmul.f32 1.442695, %v3793_v14  ;;  %v888_v55 = vrot.slane %v12248_v23, 2  ;;  %v9692_v28 = vld [vmem:[#allocation2 + $0x1b0] sm:$0xff] }
 0x380   :  { %4496 = vst.msk [vmem:[#allocation3 + $0x78] sm:$0xff] %vm4480_vm15, %v4431_v6  ;;  %v4430_v5 = vsel %vm4366_vm1, %v12177_v21, %v4302_v19  ;;  %v3872_v16 = vmul.f32 1.442695, %v3792_v13  ;;  %2223 = vrot.lane.b32.xlu1 %v729_v60, %s10033_s4  ;;  %2033 = vrot.lane.b32.xlu0 %v12259_v54, %s10032_s30  ;;  %v730_v21 = vrot.slane %v488_v32, 1  ;;  %v2563_v14 = vsel %vm178_vm0, %v9692_v28, %v12193_v35  ;;  %v339_v19 = vld [vmem:[%s14931_s0 + $0x198] sm:$0xff]  ;;  %v12366_v35 = vld [vmem:[#allocation2 + $0x248] sm:$0xff] }
 0x381   :  { %4495 = vst.msk [vmem:[#allocation3 + $0x70] sm:$0xff] %vm4480_vm15, %v4430_v5  ;;  %9409 = vpow2.f32 %v3874_v43  ;;  %v890_v33 = vsel %vm782_vm2, %v888_v55, %v889_v34  ;;  %v733_v55 = vrot.slane %v12366_v35, 1 }
 0x382   :  { %9411 = vpow2.f32 %v3872_v16  ;;  %v2402_v40 = vpop.permute.xlu1 %2401  ;;  %v1828_v1 = vpop.permute.xlu0 %1827  ;;  %v731_v53 = vsel %vm621_vm3, %v728_v48, %v730_v21  ;;  %404 = vst.msk [vmem:[#allocation2 + $0x2a9] sm:$0xff] %vm178_vm0, %v339_v19  ;;  %v732_v16 = vrot.slane %v12355_v7, 1 }
 0x383   :  { %v3017_v31 = vsel %vm2985_vm13, %v2952_v61, %v2402_v40 }
 0x384   :  { %1651 = vrot.lane.b32.xlu1 %v729_v60, %s10030_s5  ;;  %1461 = vrot.lane.b32.xlu0 %v12259_v54, %s10029_s26 }
 0x385   :  { %8469 = vmatmul.mubr.msk.f32.gmra.mrb[30].mxu0 %vm3052_vm14, %v3017_v31 }
 0x386   :  { %v12325_v15 = vpop.permute.xlu1 %1255  ;;  %v12327_v23 = vpop.permute.xlu0 %1065 }
 0x388   :  { %v4559_v11 = vld [vmem:[#allocation3 + $0x70] ss:$2 sm:$0xff]  ;;  %v4623_v44 = vld [vmem:[#allocation3 + $0x71] ss:$2 sm:$0xff]  ;;  %2415 = vrot.lane.b32.xlu1 %v890_v33, %s10015_s16  ;;  %2225 = vrot.lane.b32.xlu0 %v731_v53, %s10033_s4 }
 0x389   :  { %v4679_v54 = vadd.f32 %v4623_v44, %v4559_v11 }
 0x38a   :  { %v2020_v2 = vpop.permute.xlu1 %2019  ;;  %v12331_v38 = vpop.permute.xlu0 %1829 }
 0x38b   :  { %v9410_v52 = vpop.eup %9409  ;;  %v4707_v10 = vadd.f32 %v4679_v54, %v4678_v47 }
 0x38c   :  { %v9412_v41 = vpop.eup %9411  ;;  %v3985_v48 = vadd.f32 2.0, %v9410_v52  ;;  %1653 = vrot.lane.b32.xlu1 %v731_v53, %s10030_s5  ;;  %1079 = vrot.lane.b32.xlu0 %v729_v60, %s10028_s1  ;;  %v2628_v60 = vsel %vm2595_vm7, %v2563_v14, %v12219_v57 }
 0x38d   :  { %v4723_v39 = vmul.f32 0.25, %v4707_v10  ;;  %v3984_v46 = vadd.f32 2.0, %v9412_v41  ;;  %v2693_v13 = vsel %vm2660_vm8, %v2628_v60, %v12230_v17 }
 0x38e   :  { %v4049_v25 = vmul.f32 %v9410_v52, %v3985_v48  ;;  %v12336_v63 = vpop.permute.xlu1 %1447  ;;  %v12338_v18 = vpop.permute.xlu0 %1257  ;;  %v2758_v57 = vsel %vm2725_vm9, %v2693_v13, %v12255_v36 }
 0x38f   :  { %v4048_v20 = vmul.f32 %v9412_v41, %v3984_v46  ;;  %4781 = vst.msk [vmem:[#allocation4 + $0x41] sm:$0xff] %vm4480_vm15, %v4723_v39  ;;  %v2823_v9 = vsel %vm2790_vm10, %v2758_v57, %v1828_v1 }
 0x390   :  { %v4177_v45 = vadd.f32 2.0, %v4049_v25  ;;  %2417 = vrot.lane.b32.xlu1 %v892_v42, %s10015_s16  ;;  %1843 = vrot.lane.b32.xlu0 %v890_v33, %s10031_s24  ;;  %v2888_v17 = vsel %vm2855_vm11, %v2823_v9, %v2020_v2  ;;  %v4113_v61 = vmul.f32 %v4049_v25, %v12276_v29 }
 0x391   :  { %v4176_v12 = vadd.f32 2.0, %v4048_v20  ;;  %v4112_v62 = vmul.f32 %v4048_v20, %v12283_v30 }
 0x392   :  { %9413 = vrcp.f32 %v4177_v45  ;;  %v2212_v27 = vpop.permute.xlu1 %2211  ;;  %v12347_v3 = vpop.permute.xlu0 %2021 }
 0x393   :  { %9415 = vrcp.f32 %v4176_v12  ;;  %v2953_v24 = vsel %vm2920_vm12, %v2888_v17, %v2212_v27 }
 0x394   :  { %1271 = vrot.lane.b32.xlu1 %v890_v33, %s10027_s6  ;;  %1081 = vrot.lane.b32.xlu0 %v731_v53, %s10028_s1  ;;  %v9693_v33 = vld [vmem:[#allocation2 + $0x1b8] sm:$0xff] }
 0x395   :  { %v2564_v53 = vsel %vm178_vm0, %v9693_v33, %v12221_v26  ;;  %v734_v26 = vsel %vm621_vm3, %v732_v16, %v733_v55  ;;  %v340_v16 = vld [vmem:[%s14931_s0 + $0x1a0] sm:$0xff] }
 0x396   :  { %v12362_v32 = vpop.permute.xlu1 %1639  ;;  %v12364_v6 = vpop.permute.xlu0 %1449  ;;  %v2629_v11 = vsel %vm2595_vm7, %v2564_v53, %v12232_v37  ;;  %v491_v37 = vld [vmem:[#allocation2 + $0x250] sm:$0x3]  ;;  %405 = vst.msk [vmem:[#allocation2 + $0x2b9] sm:$0xff] %vm178_vm0, %v340_v16 }
 0x397   :  { %v896_v28 = vrot.slane %v491_v37, 2 }
 0x398   :  { %v8452_v43 = vpop.f32.mrb[18].mxu0  ;;  %2035 = vrot.lane.b32.xlu1 %v12355_v7, %s10032_s30  ;;  %1845 = vrot.lane.b32.xlu0 %v892_v42, %s10031_s24 }
 0x399   :  { %v3660_v5 = vmul.f32 %v11946_v51, %v8452_v43  ;;  %v3405_v22 = vpop.f32.mrb[19].mxu0 }
 0x39a   :  { %v3659_v36 = vmul.f32 %v11946_v51, %v3405_v22  ;;  %v2404_v34 = vpop.permute.xlu1 %2403  ;;  %v2214_v21 = vpop.permute.xlu0 %2213 }
 0x39b   :  { %v12383_v40 = vadd.f32 %v11954_v56, %v3660_v5  ;;  %v3018_v1 = vsel %vm2985_vm13, %v2953_v24, %v2404_v34  ;;  %v9694_v34 = vld [vmem:[#allocation2 + $0x1c8] sm:$0xff] }
 0x39c   :  { %v9414_v31 = vpop.eup %9413  ;;  %v12390_v8 = vadd.f32 %v11954_v56, %v3659_v36  ;;  %1463 = vrot.lane.b32.xlu1 %v12355_v7, %s10029_s26  ;;  %1273 = vrot.lane.b32.xlu0 %v892_v42, %s10027_s6  ;;  %v2694_v56 = vsel %vm2660_vm8, %v2629_v11, %v12257_v58  ;;  %v894_v42 = vrot.slane %v12366_v35, 2 }
 0x39d   :  { %v9416_v51 = vpop.eup %9415  ;;  %v4305_v44 = vmul.f32 %v9414_v31, %v4113_v61  ;;  %v3795_v47 = vmin.f32 %v12383_v40, 20.0  ;;  %8471 = vmatprep.mubr.msk.f32.mxu0 %vm3052_vm14, %v3018_v1  ;;  %v2759_v41 = vsel %vm2725_vm9, %v2694_v56, %v12297_v59  ;;  %v12461_v1 = vld [vmem:[#allocation2 + $0x258] sm:$0xff]  ;;  %v341_v31 = vld [vmem:[%s14931_s0 + $0x1a8] sm:$0xff]  ;;  %vm4371_vm6 = vcmp.gt.f32.partialorder %v12383_v40, 20.0 }
 0x39e   :  { %v4304_v54 = vmul.f32 %v9416_v51, %v4112_v62  ;;  %v3794_v50 = vmin.f32 %v12390_v8, 20.0  ;;  %v12404_v2 = vpop.permute.xlu1 %1641  ;;  %v12406_v52 = vpop.permute.xlu0 %1067  ;;  %v2824_v39 = vsel %vm2790_vm10, %v2759_v41, %v12331_v38  ;;  %v897_v57 = vsel %vm782_vm2, %v894_v42, %v896_v28  ;;  %406 = vst.msk [vmem:[#allocation2 + $0x2c1] sm:$0xff] %vm178_vm0, %v341_v31 }
 0x39f   :  { %v4433_v10 = vsel %vm4369_vm4, %v12276_v29, %v4305_v44  ;;  %v3878_v48 = vmul.f32 1.442695, %v3795_v47  ;;  %v893_v29 = vrot.slane %v12355_v7, 2  ;;  %v2889_v59 = vsel %vm2855_vm11, %v2824_v39, %v12347_v3  ;;  %v12482_v44 = vld [vmem:[#allocation9] ss:$0 sm:$0xff] }
 0x3a0   :  { %4498 = vst.msk [vmem:[#allocation3 + $0x88] sm:$0xff] %vm4480_vm15, %v4433_v10  ;;  %v4432_v58 = vsel %vm4368_vm5, %v12283_v30, %v4304_v54  ;;  %v3876_v46 = vmul.f32 1.442695, %v3794_v50  ;;  %2227 = vrot.lane.b32.xlu1 %v734_v26, %s10033_s4  ;;  %2037 = vrot.lane.b32.xlu0 %v12366_v35, %s10032_s30  ;;  %v735_v30 = vrot.slane %v491_v37, 1  ;;  %v2954_v38 = vsel %vm2920_vm12, %v2889_v59, %v2214_v21 }
 0x3a1   :  { %4497 = vst.msk [vmem:[#allocation3 + $0x80] sm:$0xff] %vm4480_vm15, %v4432_v58  ;;  %9417 = vpow2.f32 %v3878_v48  ;;  %v895_v4 = vsel %vm782_vm2, %v893_v29, %v894_v42  ;;  %v2565_v21 = vsel %vm178_vm0, %v9694_v34, %v12299_v49  ;;  %v12472_v49 = vld [vmem:[#allocation2 + $0x260] sm:$0xff]  ;;  %v737_v56 = vrot.slane %v12461_v1, 1  ;;  %v12490_v48 = vld [vmem:[#allocation11] ss:$0 sm:$0xff] }
 0x3a2   :  { %9419 = vpow2.f32 %v3876_v46  ;;  %v2406_v25 = vpop.permute.xlu1 %2405  ;;  %v1832_v20 = vpop.permute.xlu0 %1831  ;;  %v736_v12 = vsel %vm621_vm3, %v733_v55, %v735_v30  ;;  %v2630_v61 = vsel %vm2595_vm7, %v2565_v21, %v12325_v15  ;;  %v738_v54 = vrot.slane %v12472_v49, 1  ;;  %v9697_v29 = vld [vmem:[#allocation2 + $0x1d0] sm:$0xff] }
 0x3a3   :  { %v3019_v45 = vsel %vm2985_vm13, %v2954_v38, %v2406_v25  ;;  %v2695_v33 = vsel %vm2660_vm8, %v2630_v61, %v12336_v63  ;;  %v2566_v59 = vsel %vm178_vm0, %v9697_v29, %v12327_v23  ;;  %vm4370_vm1 = vcmp.gt.f32.partialorder %v12390_v8, 20.0 }
 0x3a4   :  { %1655 = vrot.lane.b32.xlu1 %v734_v26, %s10030_s5  ;;  %1465 = vrot.lane.b32.xlu0 %v12366_v35, %s10029_s26  ;;  %v2760_v15 = vsel %vm2725_vm9, %v2695_v33, %v12362_v32  ;;  %v2631_v25 = vsel %vm2595_vm7, %v2566_v59, %v12338_v18  ;;  %v739_v23 = vsel %vm621_vm3, %v737_v56, %v738_v54  ;;  %v494_v18 = vld [vmem:[#allocation2 + $0x268] sm:$0x3]  ;;  %v342_v59 = vld [vmem:[%s14931_s0 + $0x1b0] sm:$0xff] }
 0x3a5   :  { %8472 = vmatmul.mubr.msk.f32.gmra.mrb[32].mxu0 %vm3052_vm14, %v3019_v45  ;;  %v2825_v51 = vsel %vm2790_vm10, %v2760_v15, %v1832_v20  ;;  %407 = vst.msk [vmem:[#allocation2 + $0x2d1] sm:$0xff] %vm178_vm0, %v342_v59 }
 0x3a6   :  { %v12432_v27 = vpop.permute.xlu1 %1259  ;;  %v12434_v3 = vpop.permute.xlu0 %1069 }
 0x3a8   :  { %2419 = vrot.lane.b32.xlu1 %v895_v4, %s10015_s16  ;;  %2229 = vrot.lane.b32.xlu0 %v736_v12, %s10033_s4  ;;  %v4561_v34 = vld [vmem:[#allocation3 + $0x80] ss:$2 sm:$0xff]  ;;  %v4625_v21 = vld [vmem:[#allocation3 + $0x81] ss:$2 sm:$0xff] }
 0x3a9   :  { %v4680_v15 = vadd.f32 %v4625_v21, %v4561_v34 }
 0x3aa   :  { %v2024_v14 = vpop.permute.xlu1 %2023  ;;  %v12438_v60 = vpop.permute.xlu0 %1833 }
 0x3ab   :  { %v9418_v7 = vpop.eup %9417  ;;  %v2890_v63 = vsel %vm2855_vm11, %v2825_v51, %v2024_v14  ;;  %v901_v51 = vrot.slane %v494_v18, 2 }
 0x3ac   :  { %v9420_v19 = vpop.eup %9419  ;;  %v3987_v13 = vadd.f32 2.0, %v9418_v7  ;;  %1657 = vrot.lane.b32.xlu1 %v736_v12, %s10030_s5  ;;  %1083 = vrot.lane.b32.xlu0 %v734_v26, %s10028_s1 }
 0x3ad   :  { %v3986_v35 = vadd.f32 2.0, %v9420_v19 }
 0x3ae   :  { %v4051_v9 = vmul.f32 %v9418_v7, %v3987_v13  ;;  %v12443_v43 = vpop.permute.xlu1 %1451  ;;  %v12445_v17 = vpop.permute.xlu0 %1261 }
 0x3af   :  { %v4050_v5 = vmul.f32 %v9420_v19, %v3986_v35 }
 0x3b0   :  { %v4179_v22 = vadd.f32 2.0, %v4051_v9  ;;  %2421 = vrot.lane.b32.xlu1 %v897_v57, %s10015_s16  ;;  %1847 = vrot.lane.b32.xlu0 %v895_v4, %s10031_s24  ;;  %v4115_v41 = vmul.f32 %v4051_v9, %v12383_v40 }
 0x3b1   :  { %v4178_v55 = vadd.f32 2.0, %v4050_v5  ;;  %v4114_v42 = vmul.f32 %v4050_v5, %v12390_v8  ;;  %v899_v5 = vrot.slane %v12472_v49, 2 }
 0x3b2   :  { %9421 = vrcp.f32 %v4179_v22  ;;  %v2216_v24 = vpop.permute.xlu1 %2215  ;;  %v12453_v36 = vpop.permute.xlu0 %2025 }
 0x3b3   :  { %9423 = vrcp.f32 %v4178_v55  ;;  %v2955_v32 = vsel %vm2920_vm12, %v2890_v63, %v2216_v24 }
 0x3b4   :  { %1275 = vrot.lane.b32.xlu1 %v895_v4, %s10027_s6  ;;  %1085 = vrot.lane.b32.xlu0 %v736_v12, %s10028_s1  ;;  %v2696_v4 = vsel %vm2660_vm8, %v2631_v25, %v12364_v6 }
 0x3b5   :  { %v2761_v13 = vsel %vm2725_vm9, %v2696_v4, %v12404_v2  ;;  %v12572_v4 = vld [vmem:[#allocation2 + $0x270] sm:$0xff] }
 0x3b6   :  { %v12468_v53 = vpop.permute.xlu1 %1643  ;;  %v12470_v62 = vpop.permute.xlu0 %1453 }
 0x3b8   :  { %v8455_v11 = vpop.f32.mrb[20].mxu0  ;;  %2039 = vrot.lane.b32.xlu1 %v12461_v1, %s10032_s30  ;;  %1849 = vrot.lane.b32.xlu0 %v897_v57, %s10031_s24 }
 0x3b9   :  { %v3662_v47 = vmul.f32 %v12482_v44, %v8455_v11  ;;  %v3415_v26 = vpop.f32.mrb[21].mxu0 }
 0x3ba   :  { %v3661_v50 = vmul.f32 %v12482_v44, %v3415_v26  ;;  %v2408_v37 = vpop.permute.xlu1 %2407  ;;  %v2218_v10 = vpop.permute.xlu0 %2217 }
 0x3bb   :  { %v12493_v58 = vadd.f32 %v12490_v48, %v3662_v47  ;;  %v3020_v39 = vsel %vm2985_vm13, %v2955_v32, %v2408_v37  ;;  %v902_v37 = vsel %vm782_vm2, %v899_v5, %v901_v51 }
 0x3bc   :  { %v9422_v46 = vpop.eup %9421  ;;  %v12500_v30 = vadd.f32 %v12490_v48, %v3661_v50  ;;  %1467 = vrot.lane.b32.xlu1 %v12461_v1, %s10029_s26  ;;  %1277 = vrot.lane.b32.xlu0 %v897_v57, %s10027_s6  ;;  %v2826_v57 = vsel %vm2790_vm10, %v2761_v13, %v12438_v60 }
 0x3bd   :  { %v9424_v38 = vpop.eup %9423  ;;  %v4307_v20 = vmul.f32 %v9422_v46, %v4115_v41  ;;  %v3797_v45 = vmin.f32 %v12493_v58, 20.0  ;;  %8474 = vmatprep.mubr.msk.f32.mxu0 %vm3052_vm14, %v3020_v39  ;;  %v2891_v2 = vsel %vm2855_vm11, %v2826_v57, %v12453_v36  ;;  %vm4373_vm4 = vcmp.gt.f32.partialorder %v12493_v58, 20.0 }
 0x3be   :  { %v4306_v12 = vmul.f32 %v9424_v38, %v4114_v42  ;;  %v3796_v28 = vmin.f32 %v12500_v30, 20.0  ;;  %v12514_v14 = vpop.permute.xlu1 %1645  ;;  %v12516_v7 = vpop.permute.xlu0 %1071  ;;  %v2956_v60 = vsel %vm2920_vm12, %v2891_v2, %v2218_v10  ;;  %vm4372_vm5 = vcmp.gt.f32.partialorder %v12500_v30, 20.0 }
 0x3bf   :  { %v4435_v19 = vsel %vm4371_vm6, %v12383_v40, %v4307_v20  ;;  %v3882_v35 = vmul.f32 1.442695, %v3797_v45  ;;  %v898_v40 = vrot.slane %v12461_v1, 2  ;;  %v9698_v20 = vld [vmem:[#allocation2 + $0x1e0] sm:$0xff] }
 0x3c0   :  { %4500 = vst.msk [vmem:[#allocation3 + $0x98] sm:$0xff] %vm4480_vm15, %v4435_v19  ;;  %v4434_v6 = vsel %vm4370_vm1, %v12390_v8, %v4306_v12  ;;  %v3880_v9 = vmul.f32 1.442695, %v3796_v28  ;;  %2231 = vrot.lane.b32.xlu1 %v739_v23, %s10033_s4  ;;  %2041 = vrot.lane.b32.xlu0 %v12472_v49, %s10032_s30  ;;  %v740_v8 = vrot.slane %v494_v18, 1  ;;  %v2567_v45 = vsel %vm178_vm0, %v9698_v20, %v12406_v52  ;;  %v343_v12 = vld [vmem:[%s14931_s0 + $0x1b8] sm:$0xff] }
 0x3c1   :  { %4499 = vst.msk [vmem:[#allocation3 + $0x90] sm:$0xff] %vm4480_vm15, %v4434_v6  ;;  %9425 = vpow2.f32 %v3882_v35  ;;  %v900_v24 = vsel %vm782_vm2, %v898_v40, %v899_v5  ;;  %v12583_v52 = vld [vmem:[#allocation2 + $0x278] sm:$0xff] }
 0x3c2   :  { %9427 = vpow2.f32 %v3880_v9  ;;  %v2410_v22 = vpop.permute.xlu1 %2409  ;;  %v1836_v16 = vpop.permute.xlu0 %1835  ;;  %v741_v36 = vsel %vm621_vm3, %v738_v54, %v740_v8  ;;  %408 = vst.msk [vmem:[#allocation2 + $0x2d9] sm:$0xff] %vm178_vm0, %v343_v12  ;;  %v742_v9 = vrot.slane %v12572_v4, 1  ;;  %v743_v40 = vrot.slane %v12583_v52, 1 }
 0x3c3   :  { %v3021_v55 = vsel %vm2985_vm13, %v2956_v60, %v2410_v22 }
 0x3c4   :  { %1659 = vrot.lane.b32.xlu1 %v739_v23, %s10030_s5  ;;  %1469 = vrot.lane.b32.xlu0 %v12472_v49, %s10029_s26 }
 0x3c5   :  { %8475 = vmatmul.mubr.msk.f32.gmra.mrb[34].mxu0 %vm3052_vm14, %v3021_v55 }
 0x3c6   :  { %v12542_v61 = vpop.permute.xlu1 %1263  ;;  %v12544_v1 = vpop.permute.xlu0 %1073 }
 0x3c8   :  { %v4563_v31 = vld [vmem:[#allocation3 + $0x90] ss:$2 sm:$0xff]  ;;  %v4627_v33 = vld [vmem:[#allocation3 + $0x91] ss:$2 sm:$0xff]  ;;  %2423 = vrot.lane.b32.xlu1 %v900_v24, %s10015_s16  ;;  %2233 = vrot.lane.b32.xlu0 %v741_v36, %s10033_s4 }
 0x3c9   :  { %v4681_v49 = vadd.f32 %v4627_v33, %v4563_v31 }
 0x3ca   :  { %v2028_v11 = vpop.permute.xlu1 %2027  ;;  %v12548_v63 = vpop.permute.xlu0 %1837 }
 0x3cb   :  { %v9426_v47 = vpop.eup %9425  ;;  %v4708_v26 = vadd.f32 %v4681_v49, %v4680_v15 }
 0x3cc   :  { %v9428_v56 = vpop.eup %9427  ;;  %v3989_v54 = vadd.f32 2.0, %v9426_v47  ;;  %1661 = vrot.lane.b32.xlu1 %v741_v36, %s10030_s5  ;;  %1087 = vrot.lane.b32.xlu0 %v739_v23, %s10028_s1  ;;  %v2632_v23 = vsel %vm2595_vm7, %v2567_v45, %v12432_v27 }
 0x3cd   :  { %v4724_v32 = vmul.f32 0.25, %v4708_v26  ;;  %v3988_v50 = vadd.f32 2.0, %v9428_v56  ;;  %v2697_v28 = vsel %vm2660_vm8, %v2632_v23, %v12443_v43 }
 0x3ce   :  { %v4053_v10 = vmul.f32 %v9426_v47, %v3989_v54  ;;  %v12553_v41 = vpop.permute.xlu1 %1455  ;;  %v12555_v39 = vpop.permute.xlu0 %1265  ;;  %v2762_v27 = vsel %vm2725_vm9, %v2697_v28, %v12468_v53 }
 0x3cf   :  { %v4052_v46 = vmul.f32 %v9428_v56, %v3988_v50  ;;  %4782 = vst.msk [vmem:[#allocation4 + $0x51] sm:$0xff] %vm4480_vm15, %v4724_v32  ;;  %v2827_v13 = vsel %vm2790_vm10, %v2762_v27, %v1836_v16 }
 0x3d0   :  { %v4181_v29 = vadd.f32 2.0, %v4053_v10  ;;  %2425 = vrot.lane.b32.xlu1 %v902_v37, %s10015_s16  ;;  %1851 = vrot.lane.b32.xlu0 %v900_v24, %s10031_s24  ;;  %v2892_v43 = vsel %vm2855_vm11, %v2827_v13, %v2028_v11  ;;  %v4117_v60 = vmul.f32 %v4053_v10, %v12493_v58 }
 0x3d1   :  { %v4180_v42 = vadd.f32 2.0, %v4052_v46  ;;  %v4116_v34 = vmul.f32 %v4052_v46, %v12500_v30  ;;  %v904_v46 = vrot.slane %v12583_v52, 2 }
 0x3d2   :  { %9429 = vrcp.f32 %v4181_v29  ;;  %v2220_v38 = vpop.permute.xlu1 %2219  ;;  %v12564_v25 = vpop.permute.xlu0 %2029 }
 0x3d3   :  { %9431 = vrcp.f32 %v4180_v42  ;;  %v2957_v2 = vsel %vm2920_vm12, %v2892_v43, %v2220_v38 }
 0x3d4   :  { %1279 = vrot.lane.b32.xlu1 %v900_v24, %s10027_s6  ;;  %1089 = vrot.lane.b32.xlu0 %v741_v36, %s10028_s1  ;;  %v9699_v24 = vld [vmem:[#allocation2 + $0x1e8] sm:$0xff] }
 0x3d5   :  { %v2568_v36 = vsel %vm178_vm0, %v9699_v24, %v12434_v3  ;;  %v744_v3 = vsel %vm621_vm3, %v742_v9, %v743_v40  ;;  %v12678_v24 = vld [vmem:[#allocation2 + $0x288] sm:$0xff] }
 0x3d6   :  { %v12579_v18 = vpop.permute.xlu1 %1647  ;;  %v12581_v19 = vpop.permute.xlu0 %1457  ;;  %v2633_v33 = vsel %vm2595_vm7, %v2568_v36, %v12445_v17  ;;  %v497_v17 = vld [vmem:[#allocation2 + $0x280] sm:$0x3]  ;;  %v345_v36 = vld [vmem:[%s14931_s0 + $0x1c8] sm:$0xff] }
 0x3d7   :  { %v2698_v51 = vsel %vm2660_vm8, %v2633_v33, %v12470_v62  ;;  %v906_v23 = vrot.slane %v497_v17, 2  ;;  %410 = vst.msk [vmem:[#allocation2 + $0x2f1] sm:$0xff] %vm178_vm0, %v345_v36 }
 0x3d8   :  { %v8458_v35 = vpop.f32.mrb[22].mxu0  ;;  %2043 = vrot.lane.b32.xlu1 %v12572_v4, %s10032_s30  ;;  %1853 = vrot.lane.b32.xlu0 %v902_v37, %s10031_s24  ;;  %v2763_v32 = vsel %vm2725_vm9, %v2698_v51, %v12514_v14 }
 0x3d9   :  { %v3664_v6 = vmul.f32 %v12482_v44, %v8458_v35  ;;  %v3425_v57 = vpop.f32.mrb[23].mxu0  ;;  %v907_v35 = vsel %vm782_vm2, %v904_v46, %v906_v23 }
 0x3da   :  { %v3663_v53 = vmul.f32 %v12482_v44, %v3425_v57  ;;  %v2412_v5 = vpop.permute.xlu1 %2411  ;;  %v2222_v8 = vpop.permute.xlu0 %2221 }
 0x3db   :  { %v12600_v22 = vadd.f32 %v12490_v48, %v3664_v6  ;;  %v3022_v16 = vsel %vm2985_vm13, %v2957_v2, %v2412_v5  ;;  %v344_v2 = vld [vmem:[%s14931_s0 + $0x1c0] sm:$0xff] }
 0x3dc   :  { %v9430_v55 = vpop.eup %9429  ;;  %v12607_v21 = vadd.f32 %v12490_v48, %v3663_v53  ;;  %1471 = vrot.lane.b32.xlu1 %v12572_v4, %s10029_s26  ;;  %1281 = vrot.lane.b32.xlu0 %v902_v37, %s10027_s6  ;;  %v2828_v37 = vsel %vm2790_vm10, %v2763_v32, %v12548_v63  ;;  %409 = vst.msk [vmem:[#allocation2 + $0x2e9] sm:$0xff] %vm178_vm0, %v344_v2 }
 0x3dd   :  { %v9432_v31 = vpop.eup %9431  ;;  %v4309_v15 = vmul.f32 %v9430_v55, %v4117_v60  ;;  %v3799_v49 = vmin.f32 %v12600_v22, 20.0  ;;  %8477 = vmatprep.mubr.msk.f32.mxu0 %vm3052_vm14, %v3022_v16  ;;  %v2893_v14 = vsel %vm2855_vm11, %v2828_v37, %v12564_v25  ;;  %v9700_v60 = vld [vmem:[#allocation2 + $0x1f8] sm:$0xff]  ;;  %vm4375_vm6 = vcmp.gt.f32.partialorder %v12600_v22, 20.0 }
 0x3de   :  { %v4308_v11 = vmul.f32 %v9432_v31, %v4116_v34  ;;  %v3798_v47 = vmin.f32 %v12607_v21, 20.0  ;;  %v12621_v26 = vpop.permute.xlu1 %1649  ;;  %v12623_v56 = vpop.permute.xlu0 %1075  ;;  %v2958_v63 = vsel %vm2920_vm12, %v2893_v14, %v2222_v8  ;;  %v2569_v16 = vsel %vm178_vm0, %v9700_v60, %v12516_v7  ;;  %v12689_v7 = vld [vmem:[#allocation2 + $0x290] sm:$0xff] }
 0x3df   :  { %v4437_v54 = vsel %vm4373_vm4, %v12493_v58, %v4309_v15  ;;  %v3886_v50 = vmul.f32 1.442695, %v3799_v49  ;;  %v903_v58 = vrot.slane %v12572_v4, 2  ;;  %v2634_v55 = vsel %vm2595_vm7, %v2569_v16, %v12542_v61 }
 0x3e0   :  { %4502 = vst.msk [vmem:[#allocation3 + $0xa8] sm:$0xff] %vm4480_vm15, %v4437_v54  ;;  %v4436_v62 = vsel %vm4372_vm5, %v12500_v30, %v4308_v11  ;;  %v3884_v10 = vmul.f32 1.442695, %v3798_v47  ;;  %2235 = vrot.lane.b32.xlu1 %v744_v3, %s10033_s4  ;;  %2045 = vrot.lane.b32.xlu0 %v12583_v52, %s10032_s30  ;;  %v745_v30 = vrot.slane %v497_v17, 1  ;;  %v2699_v34 = vsel %vm2660_vm8, %v2634_v55, %v12553_v41 }
 0x3e1   :  { %4501 = vst.msk [vmem:[#allocation3 + $0xa0] sm:$0xff] %vm4480_vm15, %v4436_v62  ;;  %9433 = vpow2.f32 %v3886_v50  ;;  %v905_v38 = vsel %vm782_vm2, %v903_v58, %v904_v46  ;;  %v2764_v61 = vsel %vm2725_vm9, %v2699_v34, %v12579_v18  ;;  %v747_v11 = vrot.slane %v12678_v24, 1  ;;  %v9701_v58 = vld [vmem:[#allocation2 + $0x200] sm:$0xff] }
 0x3e2   :  { %9435 = vpow2.f32 %v3884_v10  ;;  %v2414_v29 = vpop.permute.xlu1 %2413  ;;  %v1840_v59 = vpop.permute.xlu0 %1839  ;;  %v746_v25 = vsel %vm621_vm3, %v743_v40, %v745_v30  ;;  %v748_v47 = vrot.slane %v12689_v7, 1  ;;  %v2570_v14 = vsel %vm178_vm0, %v9701_v58, %v12544_v1 }
 0x3e3   :  { %v3023_v42 = vsel %vm2985_vm13, %v2958_v63, %v2414_v29  ;;  %v2829_v15 = vsel %vm2790_vm10, %v2764_v61, %v1840_v59  ;;  %v2635_v29 = vsel %vm2595_vm7, %v2570_v14, %v12555_v39  ;;  %v500_v39 = vld [vmem:[#allocation2 + $0x298] sm:$0x3]  ;;  %vm4374_vm1 = vcmp.gt.f32.partialorder %v12607_v21, 20.0  ;;  %v346_v14 = vld [vmem:[%s14931_s0 + $0x1d0] sm:$0xff] }
 0x3e4   :  { %1663 = vrot.lane.b32.xlu1 %v744_v3, %s10030_s5  ;;  %1473 = vrot.lane.b32.xlu0 %v12583_v52, %s10029_s26  ;;  %v749_v1 = vsel %vm621_vm3, %v747_v11, %v748_v47  ;;  %411 = vst.msk [vmem:[#allocation2 + $0x301] sm:$0xff] %vm178_vm0, %v346_v14 }
 0x3e5   :  { %8478 = vmatmul.mubr.msk.f32.gmra.mrb[36].mxu0 %vm3052_vm14, %v3023_v42 }
 0x3e6   :  { %v12649_v20 = vpop.permute.xlu1 %1267  ;;  %v12651_v45 = vpop.permute.xlu0 %1077 }
 0x3e8   :  { %2427 = vrot.lane.b32.xlu1 %v905_v38, %s10015_s16  ;;  %2237 = vrot.lane.b32.xlu0 %v746_v25, %s10033_s4  ;;  %v4565_v60 = vld [vmem:[#allocation3 + $0xa0] ss:$2 sm:$0xff]  ;;  %v4629_v16 = vld [vmem:[#allocation3 + $0xa1] ss:$2 sm:$0xff] }
 0x3e9   :  { %v4682_v61 = vadd.f32 %v4629_v16, %v4565_v60 }
 0x3ea   :  { %v2032_v4 = vpop.permute.xlu1 %2031  ;;  %v12655_v12 = vpop.permute.xlu0 %1841 }
 0x3eb   :  { %v9434_v28 = vpop.eup %9433  ;;  %v2894_v41 = vsel %vm2855_vm11, %v2829_v15, %v2032_v4  ;;  %v911_v15 = vrot.slane %v500_v39, 2 }
 0x3ec   :  { %v9436_v52 = vpop.eup %9435  ;;  %v3991_v27 = vadd.f32 2.0, %v9434_v28  ;;  %1665 = vrot.lane.b32.xlu1 %v746_v25, %s10030_s5  ;;  %1091 = vrot.lane.b32.xlu0 %v744_v3, %s10028_s1 }
 0x3ed   :  { %v3990_v13 = vadd.f32 2.0, %v9436_v52 }
 0x3ee   :  { %v4055_v43 = vmul.f32 %v9434_v28, %v3991_v27  ;;  %v12660_v6 = vpop.permute.xlu1 %1459  ;;  %v12662_v57 = vpop.permute.xlu0 %1269 }
 0x3ef   :  { %v4054_v9 = vmul.f32 %v9436_v52, %v3990_v13 }
 0x3f0   :  { %v4183_v40 = vadd.f32 2.0, %v4055_v43  ;;  %2429 = vrot.lane.b32.xlu1 %v907_v35, %s10015_s16  ;;  %1855 = vrot.lane.b32.xlu0 %v905_v38, %s10031_s24  ;;  %v4119_v50 = vmul.f32 %v4055_v43, %v12600_v22 }
 0x3f1   :  { %v4182_v53 = vadd.f32 2.0, %v4054_v9  ;;  %v4118_v46 = vmul.f32 %v4054_v9, %v12607_v21  ;;  %v909_v9 = vrot.slane %v12689_v7, 2 }
 0x3f2   :  { %9437 = vrcp.f32 %v4183_v40  ;;  %v2224_v5 = vpop.permute.xlu1 %2223  ;;  %v12670_v8 = vpop.permute.xlu0 %2033 }
 0x3f3   :  { %9439 = vrcp.f32 %v4182_v53  ;;  %v2959_v17 = vsel %vm2920_vm12, %v2894_v41, %v2224_v5 }
 0x3f4   :  { %1283 = vrot.lane.b32.xlu1 %v905_v38, %s10027_s6  ;;  %1093 = vrot.lane.b32.xlu0 %v746_v25, %s10028_s1  ;;  %v2700_v38 = vsel %vm2660_vm8, %v2635_v29, %v12581_v19 }
 0x3f5   :  { %v2765_v27 = vsel %vm2725_vm9, %v2700_v38, %v12621_v26  ;;  %v12785_v38 = vld [vmem:[#allocation2 + $0x2a0] sm:$0xff] }
 0x3f6   :  { %v12685_v31 = vpop.permute.xlu1 %1651  ;;  %v12687_v33 = vpop.permute.xlu0 %1461 }
 0x3f8   :  { %v8461_v49 = vpop.f32.mrb[24].mxu0  ;;  %2047 = vrot.lane.b32.xlu1 %v12678_v24, %s10032_s30  ;;  %1857 = vrot.lane.b32.xlu0 %v907_v35, %s10031_s24 }
 0x3f9   :  { %v3666_v3 = vmul.f32 %v12482_v44, %v8461_v49  ;;  %v3435_v51 = vpop.f32.mrb[25].mxu0 }
 0x3fa   :  { %v3665_v18 = vmul.f32 %v12482_v44, %v3435_v51  ;;  %v2416_v54 = vpop.permute.xlu1 %2415  ;;  %v2226_v32 = vpop.permute.xlu0 %2225 }
 0x3fb   :  { %v12706_v62 = vadd.f32 %v12490_v48, %v3666_v3  ;;  %v3024_v37 = vsel %vm2985_vm13, %v2959_v17, %v2416_v54  ;;  %v912_v54 = vsel %vm782_vm2, %v909_v9, %v911_v15 }
 0x3fc   :  { %v9438_v10 = vpop.eup %9437  ;;  %v12713_v30 = vadd.f32 %v12490_v48, %v3665_v18  ;;  %1475 = vrot.lane.b32.xlu1 %v12678_v24, %s10029_s26  ;;  %1285 = vrot.lane.b32.xlu0 %v907_v35, %s10027_s6  ;;  %v2830_v35 = vsel %vm2790_vm10, %v2765_v27, %v12655_v12 }
 0x3fd   :  { %v9440_v63 = vpop.eup %9439  ;;  %v4311_v59 = vmul.f32 %v9438_v10, %v4119_v50  ;;  %v3801_v42 = vmin.f32 %v12706_v62, 20.0  ;;  %8480 = vmatprep.mubr.msk.f32.mxu0 %vm3052_vm14, %v3024_v37  ;;  %v2895_v26 = vsel %vm2855_vm11, %v2830_v35, %v12670_v8  ;;  %vm4377_vm4 = vcmp.gt.f32.partialorder %v12706_v62, 20.0 }
 0x3fe   :  { %v4310_v25 = vmul.f32 %v9440_v63, %v4118_v46  ;;  %v3800_v23 = vmin.f32 %v12713_v30, 20.0  ;;  %v12727_v4 = vpop.permute.xlu1 %1653  ;;  %v12729_v28 = vpop.permute.xlu0 %1079  ;;  %v2960_v12 = vsel %vm2920_vm12, %v2895_v26, %v2226_v32  ;;  %vm4376_vm5 = vcmp.gt.f32.partialorder %v12713_v30, 20.0 }
 0x3ff   :  { %v4439_v52 = vsel %vm4375_vm6, %v12600_v22, %v4311_v59  ;;  %v3890_v13 = vmul.f32 1.442695, %v3801_v42  ;;  %v908_v22 = vrot.slane %v12678_v24, 2  ;;  %v9702_v59 = vld [vmem:[#allocation2 + $0x210] sm:$0xff] }
 0x400   :  { %4504 = vst.msk [vmem:[#allocation3 + $0xb8] sm:$0xff] %vm4480_vm15, %v4439_v52  ;;  %v4438_v19 = vsel %vm4374_vm1, %v12607_v21, %v4310_v25  ;;  %v3888_v43 = vmul.f32 1.442695, %v3800_v23  ;;  %2239 = vrot.lane.b32.xlu1 %v749_v1, %s10033_s4  ;;  %2049 = vrot.lane.b32.xlu0 %v12689_v7, %s10032_s30  ;;  %v750_v21 = vrot.slane %v500_v39, 1  ;;  %v2571_v42 = vsel %vm178_vm0, %v9702_v59, %v12623_v56  ;;  %v347_v25 = vld [vmem:[%s14931_s0 + $0x1d8] sm:$0xff]  ;;  %v12796_v56 = vld [vmem:[#allocation2 + $0x2a8] sm:$0xff] }
 0x401   :  { %4503 = vst.msk [vmem:[#allocation3 + $0xb0] sm:$0xff] %vm4480_vm15, %v4438_v19  ;;  %9441 = vpow2.f32 %v3890_v13  ;;  %v910_v5 = vsel %vm782_vm2, %v908_v22, %v909_v9  ;;  %v753_v22 = vrot.slane %v12796_v56, 1 }
 0x402   :  { %9443 = vpow2.f32 %v3888_v43  ;;  %v2418_v40 = vpop.permute.xlu1 %2417  ;;  %v1844_v2 = vpop.permute.xlu0 %1843  ;;  %v751_v8 = vsel %vm621_vm3, %v748_v47, %v750_v21  ;;  %412 = vst.msk [vmem:[#allocation2 + $0x309] sm:$0xff] %vm178_vm0, %v347_v25  ;;  %v752_v43 = vrot.slane %v12785_v38, 1 }
 0x403   :  { %v3025_v53 = vsel %vm2985_vm13, %v2960_v12, %v2418_v40 }
 0x404   :  { %1667 = vrot.lane.b32.xlu1 %v749_v1, %s10030_s5  ;;  %1477 = vrot.lane.b32.xlu0 %v12689_v7, %s10029_s26 }
 0x405   :  { %8481 = vmatmul.mubr.msk.f32.gmra.mrb[38].mxu0 %vm3052_vm14, %v3025_v53 }
 0x406   :  { %v12755_v55 = vpop.permute.xlu1 %1271  ;;  %v12757_v24 = vpop.permute.xlu0 %1081 }
 0x408   :  { %v4567_v36 = vld [vmem:[#allocation3 + $0xb0] ss:$2 sm:$0xff]  ;;  %v4631_v34 = vld [vmem:[#allocation3 + $0xb1] ss:$2 sm:$0xff]  ;;  %2431 = vrot.lane.b32.xlu1 %v910_v5, %s10015_s16  ;;  %2241 = vrot.lane.b32.xlu0 %v751_v8, %s10033_s4 }
 0x409   :  { %v4683_v7 = vadd.f32 %v4631_v34, %v4567_v36 }
 0x40a   :  { %v2036_v49 = vpop.permute.xlu1 %2035  ;;  %v12761_v41 = vpop.permute.xlu0 %1845 }
 0x40b   :  { %v9442_v3 = vpop.eup %9441  ;;  %v4709_v51 = vadd.f32 %v4683_v7, %v4682_v61 }
 0x40c   :  { %v9444_v11 = vpop.eup %9443  ;;  %v3993_v47 = vadd.f32 2.0, %v9442_v3  ;;  %1669 = vrot.lane.b32.xlu1 %v751_v8, %s10030_s5  ;;  %1095 = vrot.lane.b32.xlu0 %v749_v1, %s10028_s1  ;;  %v2636_v1 = vsel %vm2595_vm7, %v2571_v42, %v12649_v20 }
 0x40d   :  { %v4725_v17 = vmul.f32 0.25, %v4709_v51  ;;  %v3992_v18 = vadd.f32 2.0, %v9444_v11  ;;  %v2701_v23 = vsel %vm2660_vm8, %v2636_v1, %v12660_v6 }
 0x40e   :  { %v4057_v32 = vmul.f32 %v9442_v3, %v3993_v47  ;;  %v12766_v50 = vpop.permute.xlu1 %1463  ;;  %v12768_v37 = vpop.permute.xlu0 %1273  ;;  %v2766_v20 = vsel %vm2725_vm9, %v2701_v23, %v12685_v31 }
 0x40f   :  { %v4056_v10 = vmul.f32 %v9444_v11, %v3992_v18  ;;  %4783 = vst.msk [vmem:[#allocation4 + $0x61] sm:$0xff] %vm4480_vm15, %v4725_v17  ;;  %v2831_v27 = vsel %vm2790_vm10, %v2766_v20, %v1844_v2 }
 0x410   :  { %v4185_v58 = vadd.f32 2.0, %v4057_v32  ;;  %2433 = vrot.lane.b32.xlu1 %v912_v54, %s10015_s16  ;;  %1859 = vrot.lane.b32.xlu0 %v910_v5, %s10031_s24  ;;  %v2896_v6 = vsel %vm2855_vm11, %v2831_v27, %v2036_v49  ;;  %v4121_v12 = vmul.f32 %v4057_v32, %v12706_v62 }
 0x411   :  { %v4184_v46 = vadd.f32 2.0, %v4056_v10  ;;  %v4120_v60 = vmul.f32 %v4056_v10, %v12713_v30  ;;  %v914_v10 = vrot.slane %v12796_v56, 2 }
 0x412   :  { %9445 = vrcp.f32 %v4185_v58  ;;  %v2228_v63 = vpop.permute.xlu1 %2227  ;;  %v12777_v29 = vpop.permute.xlu0 %2037 }
 0x413   :  { %9447 = vrcp.f32 %v4184_v46  ;;  %v2961_v26 = vsel %vm2920_vm12, %v2896_v6, %v2228_v63 }
 0x414   :  { %1287 = vrot.lane.b32.xlu1 %v910_v5, %s10027_s6  ;;  %1097 = vrot.lane.b32.xlu0 %v751_v8, %s10028_s1  ;;  %v9703_v5 = vld [vmem:[#allocation2 + $0x218] sm:$0xff] }
 0x415   :  { %v2572_v8 = vsel %vm178_vm0, %v9703_v5, %v12651_v45  ;;  %v754_v45 = vsel %vm621_vm3, %v752_v43, %v753_v22  ;;  %v12891_v5 = vld [vmem:[#allocation2 + $0x2b8] sm:$0xff] }
 0x416   :  { %v12792_v39 = vpop.permute.xlu1 %1655  ;;  %v12794_v52 = vpop.permute.xlu0 %1465  ;;  %v2637_v34 = vsel %vm2595_vm7, %v2572_v8, %v12662_v57  ;;  %v503_v57 = vld [vmem:[#allocation2 + $0x2b0] sm:$0x3]  ;;  %v349_v8 = vld [vmem:[%s14931_s0 + $0x1e8] sm:$0xff] }
 0x417   :  { %v2702_v15 = vsel %vm2660_vm8, %v2637_v34, %v12687_v33  ;;  %v916_v1 = vrot.slane %v503_v57, 2  ;;  %414 = vst.msk [vmem:[#allocation2 + $0x321] sm:$0xff] %vm178_vm0, %v349_v8 }
 0x418   :  { %v8464_v13 = vpop.f32.mrb[26].mxu0  ;;  %2051 = vrot.lane.b32.xlu1 %v12785_v38, %s10032_s30  ;;  %1861 = vrot.lane.b32.xlu0 %v912_v54, %s10031_s24  ;;  %v2767_v17 = vsel %vm2725_vm9, %v2702_v15, %v12727_v4 }
 0x419   :  { %v3668_v19 = vmul.f32 %v12482_v44, %v8464_v13  ;;  %v3445_v35 = vpop.f32.mrb[27].mxu0  ;;  %v917_v13 = vsel %vm782_vm2, %v914_v10, %v916_v1 }
 0x41a   :  { %v3667_v31 = vmul.f32 %v12482_v44, %v3445_v35  ;;  %v2420_v9 = vpop.permute.xlu1 %2419  ;;  %v2230_v21 = vpop.permute.xlu0 %2229 }
 0x41b   :  { %v12813_v40 = vadd.f32 %v12490_v48, %v3668_v19  ;;  %v3026_v2 = vsel %vm2985_vm13, %v2961_v26, %v2420_v9  ;;  %v348_v26 = vld [vmem:[%s14931_s0 + $0x1e0] sm:$0xff] }
 0x41c   :  { %v9446_v53 = vpop.eup %9445  ;;  %v12820_v16 = vadd.f32 %v12490_v48, %v3667_v31  ;;  %1479 = vrot.lane.b32.xlu1 %v12785_v38, %s10029_s26  ;;  %1289 = vrot.lane.b32.xlu0 %v912_v54, %s10027_s6  ;;  %v2832_v54 = vsel %vm2790_vm10, %v2767_v17, %v12761_v41  ;;  %413 = vst.msk [vmem:[#allocation2 + $0x319] sm:$0xff] %vm178_vm0, %v348_v26 }
 0x41d   :  { %v9448_v36 = vpop.eup %9447  ;;  %v4313_v61 = vmul.f32 %v9446_v53, %v4121_v12  ;;  %v3803_v7 = vmin.f32 %v12813_v40, 20.0  ;;  %8483 = vmatprep.mubr.msk.f32.mxu0 %vm3052_vm14, %v3026_v2  ;;  %v2897_v4 = vsel %vm2855_vm11, %v2832_v54, %v12777_v29  ;;  %v9704_v12 = vld [vmem:[#allocation2 + $0x228] sm:$0xff]  ;;  %vm4379_vm6 = vcmp.gt.f32.partialorder %v12813_v40, 20.0 }
 0x41e   :  { %v4312_v49 = vmul.f32 %v9448_v36, %v4120_v60  ;;  %v3802_v3 = vmin.f32 %v12820_v16, 20.0  ;;  %v12834_v51 = vpop.permute.xlu1 %1657  ;;  %v12836_v11 = vpop.permute.xlu0 %1083  ;;  %v2962_v41 = vsel %vm2920_vm12, %v2897_v4, %v2230_v21  ;;  %v2573_v2 = vsel %vm178_vm0, %v9704_v12, %v12729_v28  ;;  %v12902_v28 = vld [vmem:[#allocation2 + $0x2c0] sm:$0xff] }
 0x41f   :  { %v4441_v47 = vsel %vm4377_vm4, %v12706_v62, %v4313_v61  ;;  %v3894_v18 = vmul.f32 1.442695, %v3803_v7  ;;  %v913_v62 = vrot.slane %v12785_v38, 2  ;;  %v2638_v53 = vsel %vm2595_vm7, %v2573_v2, %v12755_v55 }
 0x420   :  { %4506 = vst.msk [vmem:[#allocation3 + $0xc8] sm:$0xff] %vm4480_vm15, %v4441_v47  ;;  %v4440_v33 = vsel %vm4376_vm5, %v12713_v30, %v4312_v49  ;;  %v3892_v32 = vmul.f32 1.442695, %v3802_v3  ;;  %2243 = vrot.lane.b32.xlu1 %v754_v45, %s10033_s4  ;;  %2053 = vrot.lane.b32.xlu0 %v12796_v56, %s10032_s30  ;;  %v755_v30 = vrot.slane %v503_v57, 1  ;;  %v2703_v60 = vsel %vm2660_vm8, %v2638_v53, %v12766_v50 }
 0x421   :  { %4505 = vst.msk [vmem:[#allocation3 + $0xc0] sm:$0xff] %vm4480_vm15, %v4440_v33  ;;  %9449 = vpow2.f32 %v3894_v18  ;;  %v915_v63 = vsel %vm782_vm2, %v913_v62, %v914_v10  ;;  %v2768_v55 = vsel %vm2725_vm9, %v2703_v60, %v12792_v39  ;;  %v757_v49 = vrot.slane %v12891_v5, 1  ;;  %v9705_v62 = vld [vmem:[#allocation2 + $0x230] sm:$0xff] }
 0x422   :  { %9451 = vpow2.f32 %v3892_v32  ;;  %v2422_v58 = vpop.permute.xlu1 %2421  ;;  %v1848_v14 = vpop.permute.xlu0 %1847  ;;  %v756_v29 = vsel %vm621_vm3, %v753_v22, %v755_v30  ;;  %v758_v3 = vrot.slane %v12902_v28, 1  ;;  %v2574_v4 = vsel %vm178_vm0, %v9705_v62, %v12757_v24 }
 0x423   :  { %v3027_v46 = vsel %vm2985_vm13, %v2962_v41, %v2422_v58  ;;  %v2833_v61 = vsel %vm2790_vm10, %v2768_v55, %v1848_v14  ;;  %v2639_v41 = vsel %vm2595_vm7, %v2574_v4, %v12768_v37  ;;  %v506_v37 = vld [vmem:[#allocation2 + $0x2c8] sm:$0x3]  ;;  %vm4378_vm1 = vcmp.gt.f32.partialorder %v12820_v16, 20.0 }
 0x424   :  { %1671 = vrot.lane.b32.xlu1 %v754_v45, %s10030_s5  ;;  %1481 = vrot.lane.b32.xlu0 %v12796_v56, %s10029_s26  ;;  %v759_v24 = vsel %vm621_vm3, %v757_v49, %v758_v3 }
 0x425   :  { %8484 = vmatmul.mubr.msk.f32.gmra.mrb[40].mxu0 %vm3052_vm14, %v3027_v46 }
 0x426   :  { %v12862_v59 = vpop.permute.xlu1 %1275  ;;  %v12864_v42 = vpop.permute.xlu0 %1085 }
 0x428   :  { %2435 = vrot.lane.b32.xlu1 %v915_v63, %s10015_s16  ;;  %2245 = vrot.lane.b32.xlu0 %v756_v29, %s10033_s4 }
 0x42a   :  { %v2040_v38 = vpop.permute.xlu1 %2039  ;;  %v12868_v25 = vpop.permute.xlu0 %1849 }
 0x42b   :  { %v9450_v23 = vpop.eup %9449  ;;  %v2898_v50 = vsel %vm2855_vm11, %v2833_v61, %v2040_v38 }
 0x42c   :  { %v9452_v56 = vpop.eup %9451  ;;  %v3995_v20 = vadd.f32 2.0, %v9450_v23  ;;  %1673 = vrot.lane.b32.xlu1 %v756_v29, %s10030_s5  ;;  %1099 = vrot.lane.b32.xlu0 %v754_v45, %s10028_s1 }
 0x42d   :  { %v3994_v27 = vadd.f32 2.0, %v9452_v56 }
 0x42e   :  { %v4059_v6 = vmul.f32 %v9450_v23, %v3995_v20  ;;  %v12873_v19 = vpop.permute.xlu1 %1467  ;;  %v12875_v35 = vpop.permute.xlu0 %1277 }
 0x42f   :  { %v4058_v43 = vmul.f32 %v9452_v56, %v3994_v27 }
 0x430   :  { %v4187_v22 = vadd.f32 2.0, %v4059_v6  ;;  %2437 = vrot.lane.b32.xlu1 %v917_v13, %s10015_s16  ;;  %1863 = vrot.lane.b32.xlu0 %v915_v63, %s10031_s24  ;;  %v4123_v18 = vmul.f32 %v4059_v6, %v12813_v40 }
 0x431   :  { %v4186_v31 = vadd.f32 2.0, %v4058_v43  ;;  %v4122_v10 = vmul.f32 %v4058_v43, %v12820_v16 }
 0x432   :  { %9453 = vrcp.f32 %v4187_v22  ;;  %v2232_v9 = vpop.permute.xlu1 %2231  ;;  %v12883_v21 = vpop.permute.xlu0 %2041 }
 0x433   :  { %9455 = vrcp.f32 %v4186_v31  ;;  %v2963_v57 = vsel %vm2920_vm12, %v2898_v50, %v2232_v9  ;;  %v4569_v9 = vld [vmem:[#allocation3 + $0xc0] ss:$2 sm:$0xff] }
 0x434   :  { %1291 = vrot.lane.b32.xlu1 %v915_v63, %s10027_s6  ;;  %1101 = vrot.lane.b32.xlu0 %v756_v29, %s10028_s1 }
 0x436   :  { %v12898_v36 = vpop.permute.xlu1 %1659  ;;  %v12900_v34 = vpop.permute.xlu0 %1469 }
 0x438   :  { %v8467_v7 = vpop.f32.mrb[28].mxu0  ;;  %2055 = vrot.lane.b32.xlu1 %v12891_v5, %s10032_s30  ;;  %1865 = vrot.lane.b32.xlu0 %v917_v13, %s10031_s24 }
 0x439   :  { %v3670_v45 = vmul.f32 %v12482_v44, %v8467_v7  ;;  %v3455_v15 = vpop.f32.mrb[29].mxu0 }
 0x43a   :  { %v3669_v39 = vmul.f32 %v12482_v44, %v3455_v15  ;;  %v2424_v47 = vpop.permute.xlu1 %2423  ;;  %v2234_v17 = vpop.permute.xlu0 %2233 }
 0x43b   :  { %v12919_v33 = vadd.f32 %v12490_v48, %v3670_v45  ;;  %v3028_v54 = vsel %vm2985_vm13, %v2963_v57, %v2424_v47 }
 0x43c   :  { %v9454_v32 = vpop.eup %9453  ;;  %v12926_v30 = vadd.f32 %v12490_v48, %v3669_v39  ;;  %1483 = vrot.lane.b32.xlu1 %v12891_v5, %s10029_s26  ;;  %1293 = vrot.lane.b32.xlu0 %v917_v13, %s10027_s6  ;;  %v2704_v48 = vsel %vm2660_vm8, %v2639_v41, %v12794_v52  ;;  %v919_v13 = vrot.slane %v12902_v28, 2 }
 0x43d   :  { %v9456_v44 = vpop.eup %9455  ;;  %v4315_v58 = vmul.f32 %v9454_v32, %v4123_v18  ;;  %v3805_v14 = vmin.f32 %v12919_v33, 20.0  ;;  %8486 = vmatprep.mubr.msk.f32.mxu0 %vm3052_vm14, %v3028_v54  ;;  %v2769_v23 = vsel %vm2725_vm9, %v2704_v48, %v12834_v51  ;;  %v350_v32 = vld [vmem:[%s14931_s0 + $0x1f0] sm:$0xff]  ;;  %vm4381_vm4 = vcmp.gt.f32.partialorder %v12919_v33, 20.0 }
 0x43e   :  { %v4314_v46 = vmul.f32 %v9456_v44, %v4122_v10  ;;  %v3804_v63 = vmin.f32 %v12926_v30, 20.0  ;;  %v12940_v29 = vpop.permute.xlu1 %1661  ;;  %v12942_v1 = vpop.permute.xlu0 %1087  ;;  %v2834_v20 = vsel %vm2790_vm10, %v2769_v23, %v12868_v25  ;;  %415 = vst.msk [vmem:[#allocation2 + $0x331] sm:$0xff] %vm178_vm0, %v350_v32  ;;  %v9706_v44 = vld [vmem:[#allocation2 + $0x240] sm:$0xff]  ;;  %v13019_v23 = vld [vmem:[#allocation9] ss:$0 sm:$0xff]  ;;  %vm4380_vm5 = vcmp.gt.f32.partialorder %v12926_v30, 20.0 }
 0x43f   :  { %v4443_v38 = vsel %vm4379_vm6, %v12813_v40, %v4315_v58  ;;  %v3898_v56 = vmul.f32 1.442695, %v3805_v14  ;;  %v918_v40 = vrot.slane %v12891_v5, 2  ;;  %v2899_v51 = vsel %vm2855_vm11, %v2834_v20, %v12883_v21  ;;  %v4633_v21 = vld [vmem:[#allocation3 + $0xc1] ss:$2 sm:$0xff]  ;;  %v12998_v14 = vld [vmem:[#allocation2 + $0x2d0] sm:$0xff] }
 0x440   :  { %4508 = vst.msk [vmem:[#allocation3 + $0xd8] sm:$0xff] %vm4480_vm15, %v4443_v38  ;;  %v4442_v52 = vsel %vm4378_vm1, %v12820_v16, %v4314_v46  ;;  %v3896_v27 = vmul.f32 1.442695, %v3804_v63  ;;  %2247 = vrot.lane.b32.xlu1 %v759_v24, %s10033_s4  ;;  %2057 = vrot.lane.b32.xlu0 %v12902_v28, %s10032_s30  ;;  %v760_v16 = vrot.slane %v506_v37, 1  ;;  %v2964_v25 = vsel %vm2920_vm12, %v2899_v51, %v2234_v17 }
 0x441   :  { %4507 = vst.msk [vmem:[#allocation3 + $0xd0] sm:$0xff] %vm4480_vm15, %v4442_v52  ;;  %9457 = vpow2.f32 %v3898_v56  ;;  %v920_v26 = vsel %vm782_vm2, %v918_v40, %v919_v13  ;;  %v4684_v8 = vadd.f32 %v4633_v21, %v4569_v9  ;;  %v2575_v41 = vsel %vm178_vm0, %v9706_v44, %v12836_v11  ;;  %v13009_v11 = vld [vmem:[#allocation2 + $0x2d8] sm:$0xff] }
 0x442   :  { %9459 = vpow2.f32 %v3896_v27  ;;  %v2426_v6 = vpop.permute.xlu1 %2425  ;;  %v1852_v43 = vpop.permute.xlu0 %1851  ;;  %v761_v31 = vsel %vm621_vm3, %v758_v3, %v760_v16  ;;  %v2640_v58 = vsel %vm2595_vm7, %v2575_v41, %v12862_v59  ;;  %v762_v20 = vrot.slane %v12998_v14, 1 }
 0x443   :  { %v3029_v22 = vsel %vm2985_vm13, %v2964_v25, %v2426_v6  ;;  %v2705_v48 = vsel %vm2660_vm8, %v2640_v58, %v12873_v19  ;;  %v763_v27 = vrot.slane %v13009_v11, 1  ;;  %v13027_v25 = vld [vmem:[#allocation11] ss:$0 sm:$0xff] }
 0x444   :  { %1675 = vrot.lane.b32.xlu1 %v759_v24, %s10030_s5  ;;  %1485 = vrot.lane.b32.xlu0 %v12902_v28, %s10029_s26  ;;  %v921_v28 = vrot.slane %v506_v37, 2  ;;  %v2770_v59 = vsel %vm2725_vm9, %v2705_v48, %v12898_v36 }
 0x445   :  { %8487 = vmatmul.mubr.msk.f32.gmra.mrb[42].mxu0 %vm3052_vm14, %v3029_v22  ;;  %v2835_v37 = vsel %vm2790_vm10, %v2770_v59, %v1852_v43 }
 0x446   :  { %v12968_v12 = vpop.permute.xlu1 %1279  ;;  %v12970_v2 = vpop.permute.xlu0 %1089  ;;  %v922_v57 = vsel %vm782_vm2, %v919_v13, %v921_v28 }
 0x448   :  { %v4571_v53 = vld [vmem:[#allocation3 + $0xd0] ss:$2 sm:$0xff]  ;;  %v4635_v5 = vld [vmem:[#allocation3 + $0xd1] ss:$2 sm:$0xff]  ;;  %2439 = vrot.lane.b32.xlu1 %v920_v26, %s10015_s16  ;;  %2249 = vrot.lane.b32.xlu0 %v761_v31, %s10033_s4 }
 0x449   :  { %v4685_v60 = vadd.f32 %v4635_v5, %v4571_v53 }
 0x44a   :  { %v2044_v55 = vpop.permute.xlu1 %2043  ;;  %v12974_v61 = vpop.permute.xlu0 %1853 }
 0x44b   :  { %v9458_v7 = vpop.eup %9457  ;;  %v4710_v50 = vadd.f32 %v4685_v60, %v4684_v8  ;;  %v2900_v19 = vsel %vm2855_vm11, %v2835_v37, %v2044_v55 }
 0x44c   :  { %v9460_v45 = vpop.eup %9459  ;;  %v3997_v15 = vadd.f32 2.0, %v9458_v7  ;;  %1677 = vrot.lane.b32.xlu1 %v761_v31, %s10030_s5  ;;  %1103 = vrot.lane.b32.xlu0 %v759_v24, %s10028_s1  ;;  %v351_v24 = vld [vmem:[%s14931_s0 + $0x1f8] sm:$0xff]  ;;  %s10035_s0 = smov 64  }
 0x44d   :  { %v4726_v49 = vmul.f32 0.25, %v4710_v50  ;;  %v3996_v3 = vadd.f32 2.0, %v9460_v45  ;;  %416 = vst.msk [vmem:[#allocation2 + $0x339] sm:$0xff] %vm178_vm0, %v351_v24 }
 0x44e   :  { %v4061_v39 = vmul.f32 %v9458_v7, %v3997_v15  ;;  %v12979_v47 = vpop.permute.xlu1 %1471  ;;  %v12981_v17 = vpop.permute.xlu0 %1281 }
 0x44f   :  { %v4060_v18 = vmul.f32 %v9460_v45, %v3996_v3  ;;  %4784 = vst.msk [vmem:[#allocation4 + $0x71] sm:$0xff] %vm4480_vm15, %v4726_v49 }
 0x450   :  { %v4189_v54 = vadd.f32 2.0, %v4061_v39  ;;  %2441 = vrot.lane.b32.xlu1 %v922_v57, %s10015_s16  ;;  %1867 = vrot.lane.b32.xlu0 %v920_v26, %s10031_s24  ;;  %v4125_v16 = vmul.f32 %v4061_v39, %v12919_v33 }
 0x451   :  { %v4188_v62 = vadd.f32 2.0, %v4060_v18  ;;  %v4124_v9 = vmul.f32 %v4060_v18, %v12926_v30  ;;  %v924_v18 = vrot.slane %v13009_v11, 2 }
 0x452   :  { %9461 = vrcp.f32 %v4189_v54  ;;  %v2236_v4 = vpop.permute.xlu1 %2235  ;;  %v12990_v10 = vpop.permute.xlu0 %2045 }
 0x453   :  { %9463 = vrcp.f32 %v4188_v62  ;;  %v2965_v36 = vsel %vm2920_vm12, %v2900_v19, %v2236_v4 }
 0x454   :  { %1295 = vrot.lane.b32.xlu1 %v920_v26, %s10027_s6  ;;  %1105 = vrot.lane.b32.xlu0 %v761_v31, %s10028_s1  ;;  %v9709_v26 = vld [vmem:[#allocation2 + $0x248] sm:$0xff] }
 0x455   :  { %v2576_v31 = vsel %vm178_vm0, %v9709_v26, %v12864_v42  ;;  %v764_v42 = vsel %vm621_vm3, %v762_v20, %v763_v27 }
 0x456   :  { %v13005_v46 = vpop.permute.xlu1 %1663  ;;  %v13007_v63 = vpop.permute.xlu0 %1473  ;;  %v2641_v5 = vsel %vm2595_vm7, %v2576_v31, %v12875_v35  ;;  %v509_v35 = vld [vmem:[#allocation2 + $0x2e0] sm:$0x3] }
 0x457   :  { %v2706_v28 = vsel %vm2660_vm8, %v2641_v5, %v12900_v34  ;;  %v926_v58 = vrot.slane %v509_v35, 2 }
 0x458   :  { %v8470_v38 = vpop.f32.mrb[30].mxu0  ;;  %2059 = vrot.lane.b32.xlu1 %v12998_v14, %s10032_s30  ;;  %1869 = vrot.lane.b32.xlu0 %v922_v57, %s10031_s24  ;;  %v2771_v49 = vsel %vm2725_vm9, %v2706_v28, %v12940_v29 }
 0x459   :  { %v3672_v56 = vmul.f32 %v13019_v23, %v8470_v38  ;;  %v3465_v52 = vpop.f32.mrb[31].mxu0  ;;  %v927_v38 = vsel %vm782_vm2, %v924_v18, %v926_v58 }
 0x45a   :  { %v3671_v40 = vmul.f32 %v13019_v23, %v3465_v52  ;;  %v2428_v51 = vpop.permute.xlu1 %2427  ;;  %v2238_v13 = vpop.permute.xlu0 %2237 }
 0x45b   :  { %v13030_v6 = vadd.f32 %v13027_v25, %v3672_v56  ;;  %v3030_v43 = vsel %vm2985_vm13, %v2965_v36, %v2428_v51 }
 0x45c   :  { %v9462_v22 = vpop.eup %9461  ;;  %v13037_v21 = vadd.f32 %v13027_v25, %v3671_v40  ;;  %1487 = vrot.lane.b32.xlu1 %v12998_v14, %s10029_s26  ;;  %1297 = vrot.lane.b32.xlu0 %v922_v57, %s10027_s6  ;;  %v2836_v57 = vsel %vm2790_vm10, %v2771_v49, %v12974_v61 }
 0x45d   :  { %v9464_v53 = vpop.eup %9463  ;;  %v4317_v8 = vmul.f32 %v9462_v22, %v4125_v16  ;;  %v3807_v60 = vmin.f32 %v13030_v6, 20.0  ;;  %8489 = vmatprep.mubr.msk.f32.mxu0 %vm3052_vm14, %v3030_v43  ;;  %v2901_v29 = vsel %vm2855_vm11, %v2836_v57, %v12990_v10  ;;  %v13102_v22 = vld [vmem:[#allocation2 + $0x2e8] sm:$0xff]  ;;  %v9711_v57 = vld [vmem:[#allocation2 + $0x260] sm:$0xff]  ;;  %vm4383_vm6 = vcmp.gt.f32.partialorder %v13030_v6, 20.0 }
 0x45e   :  { %v4316_v55 = vmul.f32 %v9464_v53, %v4124_v9  ;;  %v3806_v7 = vmin.f32 %v13037_v21, 20.0  ;;  %v13051_v50 = vpop.permute.xlu1 %1665  ;;  %v13053_v45 = vpop.permute.xlu0 %1091  ;;  %v2966_v61 = vsel %vm2920_vm12, %v2901_v29, %v2238_v13  ;;  %v9710_v13 = vld [vmem:[#allocation2 + $0x258] sm:$0xff]  ;;  %v13110_v53 = vld [vmem:[#allocation2 + $0x2f0] sm:$0xff]  ;;  %vm4382_vm1 = vcmp.gt.f32.partialorder %v13037_v21, 20.0 }
 0x45f   :  { %v4445_v15 = vsel %vm4381_vm4, %v12919_v33, %v4317_v8  ;;  %v3902_v3 = vmul.f32 1.442695, %v3807_v60  ;;  %v923_v33 = vrot.slane %v12998_v14, 2  ;;  %v2577_v16 = vsel %vm178_vm0, %v9710_v13, %v12942_v1 }
 0x460   :  { %4510 = vst.msk [vmem:[#allocation3 + $0xe8] sm:$0xff] %vm4480_vm15, %v4445_v15  ;;  %v4444_v34 = vsel %vm4380_vm5, %v12926_v30, %v4316_v55  ;;  %v3900_v39 = vmul.f32 1.442695, %v3806_v7  ;;  %2251 = vrot.lane.b32.xlu1 %v764_v42, %s10033_s4  ;;  %2061 = vrot.lane.b32.xlu0 %v13009_v11, %s10032_s30  ;;  %v765_v30 = vrot.slane %v509_v35, 1  ;;  %v2642_v43 = vsel %vm2595_vm7, %v2577_v16, %v12968_v12 }
 0x461   :  { %4509 = vst.msk [vmem:[#allocation3 + $0xe0] sm:$0xff] %vm4480_vm15, %v4444_v34  ;;  %9465 = vpow2.f32 %v3902_v3  ;;  %v925_v4 = vsel %vm782_vm2, %v923_v33, %v924_v18  ;;  %v2707_v26 = vsel %vm2660_vm8, %v2642_v43, %v12979_v47  ;;  %v768_v28 = vrot.slane %v13110_v53, 1 }
 0x462   :  { %9467 = vpow2.f32 %v3900_v39  ;;  %v2430_v54 = vpop.permute.xlu1 %2429  ;;  %v1856_v32 = vpop.permute.xlu0 %1855  ;;  %v766_v10 = vsel %vm621_vm3, %v763_v27, %v765_v30  ;;  %v2772_v1 = vsel %vm2725_vm9, %v2707_v26, %v13005_v46  ;;  %v2578_v39 = vsel %vm178_vm0, %v9711_v57, %v12970_v2 }
 0x463   :  { %v3031_v62 = vsel %vm2985_vm13, %v2966_v61, %v2430_v54  ;;  %v2837_v5 = vsel %vm2790_vm10, %v2772_v1, %v1856_v32  ;;  %v2643_v30 = vsel %vm2595_vm7, %v2578_v39, %v12981_v17  ;;  %v512_v17 = vld [vmem:[#allocation2 + $0x2f8] sm:$0x3] }
 0x464   :  { %1679 = vrot.lane.b32.xlu1 %v764_v42, %s10030_s5  ;;  %1489 = vrot.lane.b32.xlu0 %v13009_v11, %s10029_s26  ;;  %v2708_v32 = vsel %vm2660_vm8, %v2643_v30, %v13007_v63  ;;  %v9712_v30 = vld [vmem:[#allocation2 + $0x270] sm:$0xff] }
 0x465   :  { %8490 = vmatmul.mubr.msk.f32.gmra.mrb[44].mxu0 %vm3052_vm14, %v3031_v62 }
 0x466   :  { %v13079_v44 = vpop.permute.xlu1 %1283  ;;  %v13081_v41 = vpop.permute.xlu0 %1093 }
 0x468   :  { %2443 = vrot.lane.b32.xlu1 %v925_v4, %s10015_s16  ;;  %2253 = vrot.lane.b32.xlu0 %v766_v10, %s10033_s4  ;;  %v4637_v13 = vld [vmem:[#allocation3 + $0xe1] ss:$2 sm:$0xff] }
 0x46a   :  { %v2048_v14 = vpop.permute.xlu1 %2047  ;;  %v13085_v24 = vpop.permute.xlu0 %1857 }
 0x46b   :  { %v9466_v48 = vpop.eup %9465  ;;  %v2902_v12 = vsel %vm2855_vm11, %v2837_v5, %v2048_v14  ;;  %v931_v5 = vrot.slane %v512_v17, 2 }
 0x46c   :  { %v9468_v11 = vpop.eup %9467  ;;  %v3999_v59 = vadd.f32 2.0, %v9466_v48  ;;  %1681 = vrot.lane.b32.xlu1 %v766_v10, %s10030_s5  ;;  %1107 = vrot.lane.b32.xlu0 %v764_v42, %s10028_s1  ;;  %v767_v42 = vrot.slane %v13102_v22, 1 }
 0x46d   :  { %v3998_v37 = vadd.f32 2.0, %v9468_v11 }
 0x46e   :  { %v4063_v19 = vmul.f32 %v9466_v48, %v3999_v59  ;;  %v13090_v56 = vpop.permute.xlu1 %1475  ;;  %v13092_v52 = vpop.permute.xlu0 %1285  ;;  %v769_v2 = vsel %vm621_vm3, %v767_v42, %v768_v28  ;;  %v2773_v48 = vsel %vm2725_vm9, %v2708_v32, %v13051_v50 }
 0x46f   :  { %v4062_v20 = vmul.f32 %v9468_v11, %v3998_v37  ;;  %v2838_v59 = vsel %vm2790_vm10, %v2773_v48, %v13085_v24 }
 0x470   :  { %v4191_v27 = vadd.f32 2.0, %v4063_v19  ;;  %2445 = vrot.lane.b32.xlu1 %v927_v38, %s10015_s16  ;;  %1871 = vrot.lane.b32.xlu0 %v925_v4, %s10031_s24  ;;  %v4127_v15 = vmul.f32 %v4063_v19, %v13030_v6  ;;  %v770_v19 = vrot.slane %v512_v17, 1  ;;  %v13206_v17 = vld [vmem:[#allocation2 + $0x308] sm:$0xff] }
 0x471   :  { %v4190_v36 = vadd.f32 2.0, %v4062_v20  ;;  %v4126_v33 = vmul.f32 %v4062_v20, %v13037_v21 }
 0x472   :  { %9469 = vrcp.f32 %v4191_v27  ;;  %v2240_v40 = vpop.permute.xlu1 %2239  ;;  %v2050_v51 = vpop.permute.xlu0 %2049 }
 0x473   :  { %9471 = vrcp.f32 %v4190_v36  ;;  %v2967_v55 = vsel %vm2920_vm12, %v2902_v12, %v2240_v40  ;;  %v2903_v50 = vsel %vm2855_vm11, %v2838_v59, %v2050_v51  ;;  %v771_v40 = vsel %vm621_vm3, %v768_v28, %v770_v19  ;;  %v4573_v51 = vld [vmem:[#allocation3 + $0xe0] ss:$2 sm:$0xff] }
 0x474   :  { %1299 = vrot.lane.b32.xlu1 %v925_v4, %s10027_s6  ;;  %1109 = vrot.lane.b32.xlu0 %v766_v10, %s10028_s1  ;;  %v4686_v1 = vadd.f32 %v4637_v13, %v4573_v51  ;;  %v773_v59 = vrot.slane %v13206_v17, 1 }
 0x476   :  { %v13106_v31 = vpop.permute.xlu1 %1667  ;;  %v13108_v9 = vpop.permute.xlu0 %1477 }
 0x478   :  { %v8473_v8 = vpop.f32.mrb[32].mxu0  ;;  %2063 = vrot.lane.b32.xlu1 %v13102_v22, %s10032_s30  ;;  %1873 = vrot.lane.b32.xlu0 %v927_v38, %s10031_s24 }
 0x479   :  { %v3674_v47 = vmul.f32 %v13019_v23, %v8473_v8  ;;  %v3475_v60 = vpop.f32.mrb[33].mxu0 }
 0x47a   :  { %v3673_v46 = vmul.f32 %v13019_v23, %v3475_v60  ;;  %v2432_v7 = vpop.permute.xlu1 %2431  ;;  %v2242_v35 = vpop.permute.xlu0 %2241 }
 0x47b   :  { %v13126_v49 = vadd.f32 %v13027_v25, %v3674_v47  ;;  %v3032_v3 = vsel %vm2985_vm13, %v2967_v55, %v2432_v7 }
 0x47c   :  { %v9470_v34 = vpop.eup %9469  ;;  %v13133_v29 = vadd.f32 %v13027_v25, %v3673_v46  ;;  %1491 = vrot.lane.b32.xlu1 %v13102_v22, %s10029_s26  ;;  %1301 = vrot.lane.b32.xlu0 %v927_v38, %s10027_s6  ;;  %v929_v38 = vrot.slane %v13110_v53, 2 }
 0x47d   :  { %v9472_v18 = vpop.eup %9471  ;;  %v4319_v61 = vmul.f32 %v9470_v34, %v4127_v15  ;;  %v3809_v54 = vmin.f32 %v13126_v49, 20.0  ;;  %8492 = vmatprep.mubr.msk.f32.mxu0 %vm3052_vm14, %v3032_v3  ;;  %vm4385_vm4 = vcmp.gt.f32.partialorder %v13126_v49, 20.0 }
 0x47e   :  { %v4318_v62 = vmul.f32 %v9472_v18, %v4126_v33  ;;  %v3808_v4 = vmin.f32 %v13133_v29, 20.0  ;;  %v13147_v10 = vpop.permute.xlu1 %1669  ;;  %v13149_v58 = vpop.permute.xlu0 %1095  ;;  %v932_v7 = vsel %vm782_vm2, %v929_v38, %v931_v5  ;;  %vm4384_vm5 = vcmp.gt.f32.partialorder %v13133_v29, 20.0 }
 0x47f   :  { %v4447_v14 = vsel %vm4383_vm6, %v13030_v6, %v4319_v61  ;;  %v3906_v11 = vmul.f32 1.442695, %v3809_v54  ;;  %v928_v6 = vrot.slane %v13102_v22, 2  ;;  %v2579_v61 = vsel %vm178_vm0, %v9712_v30, %v13053_v45 }
 0x480   :  { %4512 = vst.msk [vmem:[#allocation3 + $0xf8] sm:$0xff] %vm4480_vm15, %v4447_v14  ;;  %v4446_v63 = vsel %vm4382_vm1, %v13037_v21, %v4318_v62  ;;  %v3904_v37 = vmul.f32 1.442695, %v3808_v4  ;;  %2255 = vrot.lane.b32.xlu1 %v769_v2, %s10033_s4  ;;  %2065 = vrot.lane.b32.xlu0 %v13110_v53, %s10032_s30  ;;  %v2968_v21 = vsel %vm2920_vm12, %v2903_v50, %v2242_v35 }
 0x481   :  { %4511 = vst.msk [vmem:[#allocation3 + $0xf0] sm:$0xff] %vm4480_vm15, %v4446_v63  ;;  %9473 = vpow2.f32 %v3906_v11  ;;  %v930_v36 = vsel %vm782_vm2, %v928_v6, %v929_v38  ;;  %v2644_v54 = vsel %vm2595_vm7, %v2579_v61, %v13079_v44 }
 0x482   :  { %9475 = vpow2.f32 %v3904_v37  ;;  %v2434_v24 = vpop.permute.xlu1 %2433  ;;  %v1860_v20 = vpop.permute.xlu0 %1859  ;;  %v2709_v32 = vsel %vm2660_vm8, %v2644_v54, %v13090_v56 }
 0x483   :  { %v3033_v27 = vsel %vm2985_vm13, %v2968_v21, %v2434_v24  ;;  %v2774_v45 = vsel %vm2725_vm9, %v2709_v32, %v13106_v31 }
 0x484   :  { %1683 = vrot.lane.b32.xlu1 %v769_v2, %s10030_s5  ;;  %1493 = vrot.lane.b32.xlu0 %v13110_v53, %s10029_s26  ;;  %v2839_v14 = vsel %vm2790_vm10, %v2774_v45, %v1860_v20  ;;  %v9713_v20 = vld [vmem:[#allocation2 + $0x278] sm:$0xff] }
 0x485   :  { %8493 = vmatmul.mubr.msk.f32.gmra.mrb[46].mxu0 %vm3052_vm14, %v3033_v27  ;;  %v2580_v27 = vsel %vm178_vm0, %v9713_v20, %v13081_v41 }
 0x486   :  { %v13174_v16 = vpop.permute.xlu1 %1287  ;;  %v13176_v43 = vpop.permute.xlu0 %1097  ;;  %v2645_v13 = vsel %vm2595_vm7, %v2580_v27, %v13092_v52  ;;  %v515_v52 = vld [vmem:[#allocation2 + $0x310] sm:$0x3] }
 0x487   :  { %v936_v61 = vrot.slane %v515_v52, 2 }
 0x488   :  { %v4575_v22 = vld [vmem:[#allocation3 + $0xf0] ss:$2 sm:$0xff]  ;;  %v4639_v26 = vld [vmem:[#allocation3 + $0xf1] ss:$2 sm:$0xff]  ;;  %2447 = vrot.lane.b32.xlu1 %v930_v36, %s10015_s16  ;;  %2257 = vrot.lane.b32.xlu0 %v771_v40, %s10033_s4 }
 0x489   :  { %v4687_v53 = vadd.f32 %v4639_v26, %v4575_v22 }
 0x48a   :  { %v2052_v8 = vpop.permute.xlu1 %2051  ;;  %v13180_v12 = vpop.permute.xlu0 %1861 }
 0x48b   :  { %v9474_v47 = vpop.eup %9473  ;;  %v4711_v60 = vadd.f32 %v4687_v53, %v4686_v1  ;;  %v2904_v44 = vsel %vm2855_vm11, %v2839_v14, %v2052_v8  ;;  %v2710_v1 = vsel %vm2660_vm8, %v2645_v13, %v13108_v9 }
 0x48c   :  { %v9476_v42 = vpop.eup %9475  ;;  %v4001_v28 = vadd.f32 2.0, %v9474_v47  ;;  %1685 = vrot.lane.b32.xlu1 %v771_v40, %s10030_s5  ;;  %1111 = vrot.lane.b32.xlu0 %v769_v2, %s10028_s1  ;;  %v13198_v2 = vld [vmem:[#allocation2 + $0x300] sm:$0xff] }
 0x48d   :  { %v4727_v55 = vmul.f32 0.25, %v4711_v60  ;;  %v4000_v46 = vadd.f32 2.0, %v9476_v42  ;;  %v772_v63 = vrot.slane %v13198_v2, 1 }
 0x48e   :  { %v4065_v35 = vmul.f32 %v9474_v47, %v4001_v28  ;;  %v13185_v15 = vpop.permute.xlu1 %1479  ;;  %v13187_v3 = vpop.permute.xlu0 %1289 }
 0x48f   :  { %v4064_v34 = vmul.f32 %v9476_v42, %v4000_v46  ;;  %4785 = vst.msk [vmem:[#allocation4 + $0x81] sm:$0xff] %vm4480_vm15, %v4727_v55  ;;  %v774_v41 = vsel %vm621_vm3, %v772_v63, %v773_v59  ;;  %v2775_v42 = vsel %vm2725_vm9, %v2710_v1, %v13147_v10 }
 0x490   :  { %v4193_v57 = vadd.f32 2.0, %v4065_v35  ;;  %2449 = vrot.lane.b32.xlu1 %v932_v7, %s10015_s16  ;;  %1875 = vrot.lane.b32.xlu0 %v930_v36, %s10031_s24  ;;  %v4129_v38 = vmul.f32 %v4065_v35, %v13126_v49  ;;  %v2840_v55 = vsel %vm2790_vm10, %v2775_v42, %v13180_v12  ;;  %v775_v35 = vrot.slane %v515_v52, 1 }
 0x491   :  { %v4192_v39 = vadd.f32 2.0, %v4064_v34 }
 0x492   :  { %9477 = vrcp.f32 %v4193_v57  ;;  %v2244_v33 = vpop.permute.xlu1 %2243  ;;  %v2054_v18 = vpop.permute.xlu0 %2053 }
 0x493   :  { %9479 = vrcp.f32 %v4192_v39  ;;  %v2969_v37 = vsel %vm2920_vm12, %v2904_v44, %v2244_v33  ;;  %v2905_v10 = vsel %vm2855_vm11, %v2840_v55, %v2054_v18  ;;  %v776_v33 = vsel %vm621_vm3, %v773_v59, %v775_v35  ;;  %v9715_v55 = vld [vmem:[#allocation2 + $0x290] sm:$0xff] }
 0x494   :  { %1303 = vrot.lane.b32.xlu1 %v930_v36, %s10027_s6  ;;  %1113 = vrot.lane.b32.xlu0 %v771_v40, %s10028_s1  ;;  %v4128_v36 = vmul.f32 %v4064_v34, %v13133_v29 }
 0x496   :  { %v13202_v62 = vpop.permute.xlu1 %1671  ;;  %v13204_v4 = vpop.permute.xlu0 %1481 }
 0x498   :  { %v8476_v48 = vpop.f32.mrb[34].mxu0  ;;  %2067 = vrot.lane.b32.xlu1 %v13198_v2, %s10032_s30  ;;  %1877 = vrot.lane.b32.xlu0 %v932_v7, %s10031_s24 }
 0x499   :  { %v3676_v56 = vmul.f32 %v13019_v23, %v8476_v48  ;;  %v3485_v11 = vpop.f32.mrb[35].mxu0 }
 0x49a   :  { %v3675_v31 = vmul.f32 %v13019_v23, %v3485_v11  ;;  %v2436_v6 = vpop.permute.xlu1 %2435  ;;  %v2246_v50 = vpop.permute.xlu0 %2245 }
 0x49b   :  { %v13222_v19 = vadd.f32 %v13027_v25, %v3676_v56  ;;  %v3034_v21 = vsel %vm2985_vm13, %v2969_v37, %v2436_v6 }
 0x49c   :  { %v9478_v24 = vpop.eup %9477  ;;  %v13229_v40 = vadd.f32 %v13027_v25, %v3675_v31  ;;  %1495 = vrot.lane.b32.xlu1 %v13198_v2, %s10029_s26  ;;  %1305 = vrot.lane.b32.xlu0 %v932_v7, %s10027_s6  ;;  %v934_v7 = vrot.slane %v13206_v17, 2 }
 0x49d   :  { %v9480_v51 = vpop.eup %9479  ;;  %v4321_v22 = vmul.f32 %v9478_v24, %v4129_v38  ;;  %v3811_v26 = vmin.f32 %v13222_v19, 20.0  ;;  %8495 = vmatprep.mubr.msk.f32.mxu0 %vm3052_vm14, %v3034_v21  ;;  %v13293_v24 = vld [vmem:[#allocation2 + $0x318] sm:$0xff]  ;;  %vm4387_vm6 = vcmp.gt.f32.partialorder %v13222_v19, 20.0 }
 0x49e   :  { %v4320_v53 = vmul.f32 %v9480_v51, %v4128_v36  ;;  %v3810_v5 = vmin.f32 %v13229_v40, 20.0  ;;  %v13243_v8 = vpop.permute.xlu1 %1673  ;;  %v13245_v47 = vpop.permute.xlu0 %1099  ;;  %v937_v48 = vsel %vm782_vm2, %v934_v7, %v936_v61  ;;  %v13301_v51 = vld [vmem:[#allocation2 + $0x320] sm:$0xff]  ;;  %vm4386_vm1 = vcmp.gt.f32.partialorder %v13229_v40, 20.0 }
 0x49f   :  { %v4449_v60 = vsel %vm4385_vm4, %v13126_v49, %v4321_v22  ;;  %v3910_v28 = vmul.f32 1.442695, %v3811_v26  ;;  %v933_v49 = vrot.slane %v13198_v2, 2  ;;  %v778_v1 = vrot.slane %v13301_v51, 1 }
 0x4a0   :  { %4514 = vst.msk [vmem:[#allocation3 + $0x108] sm:$0xff] %vm4480_vm15, %v4449_v60  ;;  %v4448_v9 = vsel %vm4384_vm5, %v13133_v29, %v4320_v53  ;;  %v3908_v46 = vmul.f32 1.442695, %v3810_v5  ;;  %2259 = vrot.lane.b32.xlu1 %v774_v41, %s10033_s4  ;;  %2069 = vrot.lane.b32.xlu0 %v13206_v17, %s10032_s30  ;;  %v2970_v29 = vsel %vm2920_vm12, %v2905_v10, %v2246_v50  ;;  %v9714_v50 = vld [vmem:[#allocation2 + $0x288] sm:$0xff] }
 0x4a1   :  { %4513 = vst.msk [vmem:[#allocation3 + $0x100] sm:$0xff] %vm4480_vm15, %v4448_v9  ;;  %9481 = vpow2.f32 %v3910_v28  ;;  %v935_v39 = vsel %vm782_vm2, %v933_v49, %v934_v7  ;;  %v2581_v38 = vsel %vm178_vm0, %v9714_v50, %v13149_v58 }
 0x4a2   :  { %9483 = vpow2.f32 %v3908_v46  ;;  %v2438_v12 = vpop.permute.xlu1 %2437  ;;  %v1864_v34 = vpop.permute.xlu0 %1863  ;;  %v2646_v21 = vsel %vm2595_vm7, %v2581_v38, %v13174_v16  ;;  %v2582_v46 = vsel %vm178_vm0, %v9715_v55, %v13176_v43 }
 0x4a3   :  { %v3035_v57 = vsel %vm2985_vm13, %v2970_v29, %v2438_v12  ;;  %v2711_v20 = vsel %vm2660_vm8, %v2646_v21, %v13185_v15  ;;  %v2647_v35 = vsel %vm2595_vm7, %v2582_v46, %v13187_v3  ;;  %v518_v3 = vld [vmem:[#allocation2 + $0x328] sm:$0x3] }
 0x4a4   :  { %1687 = vrot.lane.b32.xlu1 %v774_v41, %s10030_s5  ;;  %1497 = vrot.lane.b32.xlu0 %v13206_v17, %s10029_s26  ;;  %v2776_v58 = vsel %vm2725_vm9, %v2711_v20, %v13202_v62 }
 0x4a5   :  { %8496 = vmatmul.mubr.msk.f32.gmra.mrb[48].mxu0 %vm3052_vm14, %v3035_v57  ;;  %v2841_v13 = vsel %vm2790_vm10, %v2776_v58, %v1864_v34  ;;  %v2712_v34 = vsel %vm2660_vm8, %v2647_v35, %v13204_v4  ;;  %v13385_v35 = vld [vmem:[#allocation2 + $0x338] sm:$0xff] }
 0x4a6   :  { %v13270_v18 = vpop.permute.xlu1 %1291  ;;  %v13272_v30 = vpop.permute.xlu0 %1101 }
 0x4a8   :  { %2451 = vrot.lane.b32.xlu1 %v935_v39, %s10015_s16  ;;  %2261 = vrot.lane.b32.xlu0 %v776_v33, %s10033_s4  ;;  %v4641_v50 = vld [vmem:[#allocation3 + $0x101] ss:$2 sm:$0xff] }
 0x4aa   :  { %v2056_v54 = vpop.permute.xlu1 %2055  ;;  %v13276_v2 = vpop.permute.xlu0 %1865 }
 0x4ab   :  { %v9482_v32 = vpop.eup %9481  ;;  %v2906_v16 = vsel %vm2855_vm11, %v2841_v13, %v2056_v54  ;;  %v941_v13 = vrot.slane %v518_v3, 2 }
 0x4ac   :  { %v9484_v17 = vpop.eup %9483  ;;  %v4003_v45 = vadd.f32 2.0, %v9482_v32  ;;  %1689 = vrot.lane.b32.xlu1 %v776_v33, %s10030_s5  ;;  %1115 = vrot.lane.b32.xlu0 %v774_v41, %s10028_s1  ;;  %v777_v41 = vrot.slane %v13293_v24, 1 }
 0x4ad   :  { %v4002_v14 = vadd.f32 2.0, %v9484_v17 }
 0x4ae   :  { %v4067_v44 = vmul.f32 %v9482_v32, %v4003_v45  ;;  %v13281_v56 = vpop.permute.xlu1 %1483  ;;  %v13283_v11 = vpop.permute.xlu0 %1293  ;;  %v779_v43 = vsel %vm621_vm3, %v777_v41, %v778_v1  ;;  %v2777_v32 = vsel %vm2725_vm9, %v2712_v34, %v13243_v8  ;;  %v13393_v34 = vld [vmem:[#allocation2 + $0x330] sm:$0xff] }
 0x4af   :  { %v4066_v63 = vmul.f32 %v9484_v17, %v4002_v14  ;;  %v2842_v45 = vsel %vm2790_vm10, %v2777_v32, %v13276_v2  ;;  %v5250_v32 = vld [vmem:[#allocation12 + $0x80] sm:$0xff] }
 0x4b0   :  { %v4195_v59 = vadd.f32 2.0, %v4067_v44  ;;  %2453 = vrot.lane.b32.xlu1 %v937_v48, %s10015_s16  ;;  %1879 = vrot.lane.b32.xlu0 %v935_v39, %s10031_s24  ;;  %v4131_v60 = vmul.f32 %v4067_v44, %v13222_v19  ;;  %v780_v44 = vrot.slane %v518_v3, 1 }
 0x4b1   :  { %v4194_v37 = vadd.f32 2.0, %v4066_v63  ;;  %v4130_v49 = vmul.f32 %v4066_v63, %v13229_v40 }
 0x4b2   :  { %9485 = vrcp.f32 %v4195_v59  ;;  %v2248_v31 = vpop.permute.xlu1 %2247  ;;  %v2058_v6 = vpop.permute.xlu0 %2057 }
 0x4b3   :  { %9487 = vrcp.f32 %v4194_v37  ;;  %v2971_v53 = vsel %vm2920_vm12, %v2906_v16, %v2248_v31  ;;  %v2907_v8 = vsel %vm2855_vm11, %v2842_v45, %v2058_v6  ;;  %v781_v31 = vsel %vm621_vm3, %v778_v1, %v780_v44  ;;  %v4577_v6 = vld [vmem:[#allocation3 + $0x100] ss:$2 sm:$0xff]  ;;  %v5234_v45 = vld [vmem:[#allocation12] sm:$0xff] }
 0x4b4   :  { %1307 = vrot.lane.b32.xlu1 %v935_v39, %s10027_s6  ;;  %1117 = vrot.lane.b32.xlu0 %v776_v33, %s10028_s1  ;;  %v4688_v58 = vadd.f32 %v4641_v50, %v4577_v6 }
 0x4b6   :  { %v13297_v27 = vpop.permute.xlu1 %1675  ;;  %v13299_v36 = vpop.permute.xlu0 %1485 }
 0x4b8   :  { %v8479_v22 = vpop.f32.mrb[36].mxu0  ;;  %2071 = vrot.lane.b32.xlu1 %v13293_v24, %s10032_s30  ;;  %1881 = vrot.lane.b32.xlu0 %v937_v48, %s10031_s24 }
 0x4b9   :  { %v3678_v15 = vmul.f32 %v13019_v23, %v8479_v22  ;;  %v3495_v26 = vpop.f32.mrb[37].mxu0 }
 0x4ba   :  { %v3677_v62 = vmul.f32 %v13019_v23, %v3495_v26  ;;  %v2440_v5 = vpop.permute.xlu1 %2439  ;;  %v2250_v52 = vpop.permute.xlu0 %2249 }
 0x4bb   :  { %v13317_v42 = vadd.f32 %v13027_v25, %v3678_v15  ;;  %v3036_v28 = vsel %vm2985_vm13, %v2971_v53, %v2440_v5 }
 0x4bc   :  { %v9486_v9 = vpop.eup %9485  ;;  %v13324_v10 = vadd.f32 %v13027_v25, %v3677_v62  ;;  %1499 = vrot.lane.b32.xlu1 %v13293_v24, %s10029_s26  ;;  %1309 = vrot.lane.b32.xlu0 %v937_v48, %s10027_s6  ;;  %v939_v48 = vrot.slane %v13301_v51, 2 }
 0x4bd   :  { %v9488_v7 = vpop.eup %9487  ;;  %v4323_v29 = vmul.f32 %v9486_v9, %v4131_v60  ;;  %v3813_v12 = vmin.f32 %v13317_v42, 20.0  ;;  %8498 = vmatprep.mubr.msk.f32.mxu0 %vm3052_vm14, %v3036_v28  ;;  %vm4389_vm4 = vcmp.gt.f32.partialorder %v13317_v42, 20.0 }
 0x4be   :  { %v4322_v57 = vmul.f32 %v9488_v7, %v4130_v49  ;;  %v3812_v39 = vmin.f32 %v13324_v10, 20.0  ;;  %v13338_v33 = vpop.permute.xlu1 %1677  ;;  %v13340_v61 = vpop.permute.xlu0 %1103  ;;  %v942_v5 = vsel %vm782_vm2, %v939_v48, %v941_v13  ;;  %v5237_v13 = vld [vmem:[#allocation12 + $0x18] sm:$0xff]  ;;  %vm4388_vm5 = vcmp.gt.f32.partialorder %v13324_v10, 20.0 }
 0x4bf   :  { %v4451_v54 = vsel %vm4387_vm6, %v13222_v19, %v4323_v29  ;;  %v3914_v17 = vmul.f32 1.442695, %v3813_v12  ;;  %v938_v19 = vrot.slane %v13293_v24, 2  ;;  %v9716_v29 = vld [vmem:[#allocation2 + $0x2a0] sm:$0xff] }
 0x4c0   :  { %4516 = vst.msk [vmem:[#allocation3 + $0x118] sm:$0xff] %vm4480_vm15, %v4451_v54  ;;  %v4450_v4 = vsel %vm4386_vm1, %v13229_v40, %v4322_v57  ;;  %v3912_v14 = vmul.f32 1.442695, %v3812_v39  ;;  %2263 = vrot.lane.b32.xlu1 %v779_v43, %s10033_s4  ;;  %2073 = vrot.lane.b32.xlu0 %v13301_v51, %s10032_s30  ;;  %v2972_v40 = vsel %vm2920_vm12, %v2907_v8, %v2250_v52  ;;  %v954_v54 = vrot.slane %v13393_v34, 1 }
 0x4c1   :  { %4515 = vst.msk [vmem:[#allocation3 + $0x110] sm:$0xff] %vm4480_vm15, %v4450_v4  ;;  %9489 = vpow2.f32 %v3914_v17  ;;  %v940_v37 = vsel %vm782_vm2, %v938_v19, %v939_v48  ;;  %v2583_v12 = vsel %vm178_vm0, %v9716_v29, %v13245_v47  ;;  %v955_v47 = vrot.slane %v13385_v35, 1  ;;  %v5251_v4 = vld [vmem:[#allocation12 + $0x88] sm:$0xff]  ;;  %v9717_v48 = vld [vmem:[#allocation2 + $0x2a8] sm:$0xff]  ;;  %v5254_v29 = vld [vmem:[#allocation12 + $0xa0] sm:$0xff] }
 0x4c2   :  { %9491 = vpow2.f32 %v3912_v14  ;;  %v2442_v2 = vpop.permute.xlu1 %2441  ;;  %v1868_v63 = vpop.permute.xlu0 %1867  ;;  %v2584_v44 = vsel %vm178_vm0, %v9717_v48, %v13272_v30  ;;  %v5252_v30 = vld [vmem:[#allocation12 + $0x90] sm:$0xff] }
 0x4c3   :  { %v3037_v59 = vsel %vm2985_vm13, %v2972_v40, %v2442_v2  ;;  %v13420_v50 = vsel %vm621_vm3, %v954_v54, %v955_v47  ;;  %v5239_v54 = vld [vmem:[#allocation12 + $0x28] sm:$0xff] }
 0x4c4   :  { %1691 = vrot.lane.b32.xlu1 %v779_v43, %s10030_s5  ;;  %1501 = vrot.lane.b32.xlu0 %v13301_v51, %s10029_s26 }
 0x4c5   :  { %8499 = vmatmul.mubr.msk.f32.gmra.mrb[50].mxu0 %vm3052_vm14, %v3037_v59 }
 0x4c6   :  { %v13365_v38 = vpop.permute.xlu1 %1295  ;;  %v13367_v21 = vpop.permute.xlu0 %1105 }
 0x4c8   :  { %v4579_v24 = vld [vmem:[#allocation3 + $0x110] ss:$2 sm:$0xff]  ;;  %v4643_v20 = vld [vmem:[#allocation3 + $0x111] ss:$2 sm:$0xff]  ;;  %2455 = vrot.lane.b32.xlu1 %v940_v37, %s10015_s16  ;;  %2265 = vrot.lane.b32.xlu0 %v781_v31, %s10033_s4 }
 0x4c9   :  { %v4689_v51 = vadd.f32 %v4643_v20, %v4579_v24  ;;  %v5253_v24 = vld [vmem:[#allocation12 + $0x98] sm:$0xff] }
 0x4ca   :  { %v2060_v22 = vpop.permute.xlu1 %2059  ;;  %v13371_v16 = vpop.permute.xlu0 %1869 }
 0x4cb   :  { %v9490_v15 = vpop.eup %9489  ;;  %v4712_v26 = vadd.f32 %v4689_v51, %v4688_v58  ;;  %v8569_v51 = vpack.c.bf16 %v5253_v24, %v5252_v30  ;;  %v5242_v30 = vld [vmem:[#allocation12 + $0x40] sm:$0xff]  ;;  %v5243_v24 = vld [vmem:[#allocation12 + $0x48] sm:$0xff] }
 0x4cc   :  { %v9492_v41 = vpop.eup %9491  ;;  %v4005_v1 = vadd.f32 2.0, %v9490_v15  ;;  %1693 = vrot.lane.b32.xlu1 %v781_v31, %s10030_s5  ;;  %1119 = vrot.lane.b32.xlu0 %v779_v43, %s10028_s1  ;;  %v2648_v43 = vsel %vm2595_vm7, %v2583_v12, %v13270_v18  ;;  %v5235_v18 = vld [vmem:[#allocation12 + $0x8] sm:$0xff] }
 0x4cd   :  { %v4728_v53 = vmul.f32 0.25, %v4712_v26  ;;  %v4004_v62 = vadd.f32 2.0, %v9492_v41  ;;  %v2713_v57 = vsel %vm2660_vm8, %v2648_v43, %v13281_v56  ;;  %v8565_v56 = vpack.c.bf16 %v5251_v4, %v5250_v32  ;;  %v5255_v12 = vld [vmem:[#allocation12 + $0xa8] sm:$0xff] }
 0x4ce   :  { %v4069_v52 = vmul.f32 %v9490_v15, %v4005_v1  ;;  %v13376_v60 = vpop.permute.xlu1 %1487  ;;  %v13378_v28 = vpop.permute.xlu0 %1297  ;;  %v2778_v17 = vsel %vm2725_vm9, %v2713_v57, %v13297_v27  ;;  %v8567_v8 = vpack.c.bf16 %v5235_v18, %v5234_v45  ;;  %v965_v45 = vrot.slane %v13385_v35, 2 }
 0x4cf   :  { %v4068_v9 = vmul.f32 %v9492_v41, %v4004_v62  ;;  %4786 = vst.msk [vmem:[#allocation4 + $0xb1] sm:$0xff] %vm4480_vm15, %v4728_v53  ;;  %v2843_v14 = vsel %vm2790_vm10, %v2778_v17, %v1868_v63  ;;  %v2649_v63 = vsel %vm2595_vm7, %v2584_v44, %v13283_v11  ;;  %8566 = vmatprep.subr.bf16.mxu0 %v8565_v56  ;;  %v5256_v56 = vld [vmem:[#allocation12 + $0xb0] sm:$0xff] }
 0x4d0   :  { %v4197_v55 = vadd.f32 2.0, %v4069_v52  ;;  %2457 = vrot.lane.b32.xlu1 %v942_v5, %s10015_s16  ;;  %1883 = vrot.lane.b32.xlu0 %v940_v37, %s10031_s24  ;;  %v2908_v40 = vsel %vm2855_vm11, %v2843_v14, %v2060_v22  ;;  %v4133_v20 = vmul.f32 %v4069_v52, %v13317_v42  ;;  %v2714_v53 = vsel %vm2660_vm8, %v2649_v63, %v13299_v36  ;;  %v13447_v36 = vld [vmem:[#allocation2 + $0x340] sm:$0x3] }
 0x4d1   :  { %v4196_v46 = vadd.f32 2.0, %v4068_v9  ;;  %8568 = vmatpush3.bf16.msra.mxu0 %v8567_v8  ;;  %v4132_v15 = vmul.f32 %v4068_v9, %v13324_v10  ;;  %v964_v9 = vrot.slane %v13393_v34, 2  ;;  %v957_v18 = vrot.slane %v13447_v36, 1  ;;  %v5257_v8 = vld [vmem:[#allocation12 + $0xb8] sm:$0xff] }
 0x4d2   :  { %9493 = vrcp.f32 %v4197_v55  ;;  %v2252_v49 = vpop.permute.xlu1 %2251  ;;  %v13383_v7 = vpop.permute.xlu0 %2061  ;;  %8570 = vmatprep.subr.bf16.mxu0 %v8569_v51  ;;  %v2779_v55 = vsel %vm2725_vm9, %v2714_v53, %v13338_v33  ;;  %v5238_v33 = vld [vmem:[#allocation12 + $0x20] sm:$0xff]  ;;  %v8577_v44 = vpack.c.bf16 %v5257_v8, %v5256_v56  ;;  %v13488_v51 = vld [vmem:[#allocation4] sm:$0xff]  ;;  %v5245_v53 = vld [vmem:[#allocation12 + $0x58] sm:$0xff] }
 0x4d3   :  { %9495 = vrcp.f32 %v4196_v46  ;;  %v2973_v59 = vsel %vm2920_vm12, %v2908_v40, %v2252_v49  ;;  %v8575_v4 = vpack.c.bf16 %v5239_v54, %v5238_v33  ;;  %v5240_v40 = vld [vmem:[#allocation12 + $0x30] sm:$0xff]  ;;  %v958_v63 = vsel %vm621_vm3, %v955_v47, %v957_v18  ;;  %v5262_v54 = vld [vmem:[#allocation12 + $0xe0] sm:$0xff] }
 0x4d4   :  { %1311 = vrot.lane.b32.xlu1 %v940_v37, %s10027_s6  ;;  %1121 = vrot.lane.b32.xlu0 %v781_v31, %s10028_s1  ;;  %v5246_v18 = vld [vmem:[#allocation12 + $0x60] sm:$0xff] }
 0x4d5   :  { %v13519_v8 = vld [vmem:[#allocation4 + $0x18] sm:$0x3] }
 0x4d6   :  { %v13397_v39 = vpop.permute.xlu1 %1679  ;;  %v13399_v3 = vpop.permute.xlu0 %1489 }
 0x4d8   :  { %v8482_v19 = vpop.f32.mrb[38].mxu0  ;;  %2075 = vrot.lane.b32.xlu1 %v13393_v34, %s10032_s30  ;;  %1885 = vrot.lane.b32.xlu0 %v942_v5, %s10031_s24 }
 0x4d9   :  { %v3680_v27 = vmul.f32 %v13019_v23, %v8482_v19  ;;  %v3505_v2 = vpop.f32.mrb[39].mxu0 }
 0x4da   :  { %v3679_v37 = vmul.f32 %v13019_v23, %v3505_v2  ;;  %v2444_v31 = vpop.permute.xlu1 %2443  ;;  %v2254_v6 = vpop.permute.xlu0 %2253  ;;  %v5236_v23 = vld [vmem:[#allocation12 + $0x10] sm:$0xff]  ;;  %v966_v2 = vsel %vm782_vm2, %v964_v9, %v965_v45  ;;  %v13494_v9 = vld [vmem:[#allocation2 + $0x350] sm:$0xff] }
 0x4db   :  { %v13424_v58 = vadd.f32 %v13027_v25, %v3680_v27  ;;  %v3038_v11 = vsel %vm2985_vm13, %v2973_v59, %v2444_v31  ;;  %v8571_v41 = vpack.c.bf16 %v5237_v13, %v5236_v23  ;;  %v5258_v31 = vld [vmem:[#allocation12 + $0xc0] sm:$0xff]  ;;  %v5260_v23 = vld [vmem:[#allocation12 + $0xd0] sm:$0xff]  ;;  %v5261_v13 = vld [vmem:[#allocation12 + $0xd8] sm:$0xff] }
 0x4dc   :  { %v9494_v22 = vpop.eup %9493  ;;  %v13429_v26 = vadd.f32 %v13027_v25, %v3679_v37  ;;  %1503 = vrot.lane.b32.xlu1 %v13393_v34, %s10029_s26  ;;  %1313 = vrot.lane.b32.xlu0 %v942_v5, %s10027_s6  ;;  %v2844_v34 = vsel %vm2790_vm10, %v2779_v55, %v13371_v16 }
 0x4dd   :  { %v9496_v1 = vpop.eup %9495  ;;  %v4325_v62 = vmul.f32 %v9494_v22, %v4133_v20  ;;  %v3815_v52 = vmin.f32 %v13424_v58, 20.0  ;;  %8501 = vmatprep.mubr.msk.f32.mxu0 %vm3052_vm14, %v3038_v11  ;;  %8572 = vmatpush3.bf16.msra.mxu0 %v8571_v41  ;;  %v2909_v16 = vsel %vm2855_vm11, %v2844_v34, %v13383_v7  ;;  %v5241_v7 = vld [vmem:[#allocation12 + $0x38] sm:$0xff]  ;;  %v8583_v20 = vpack.c.bf16 %v5243_v24, %v5242_v30  ;;  %v5248_v24 = vld [vmem:[#allocation12 + $0x70] sm:$0xff] }
 0x4de   :  { %v4324_v25 = vmul.f32 %v9496_v1, %v4132_v15  ;;  %v3814_v5 = vmin.f32 %v13429_v26, 20.0  ;;  %v13443_v46 = vpop.permute.xlu1 %1681  ;;  %v13445_v49 = vpop.permute.xlu0 %1107  ;;  %v8579_v27 = vpack.c.bf16 %v5241_v7, %v5240_v40  ;;  %v13490_v15 = vld [vmem:[#allocation4 + $0x8] sm:$0x3]  ;;  %v8585_v41 = vpack.c.bf16 %v5261_v13, %v5260_v23 }
 0x4df   :  { %v4453_v43 = vsel %vm4389_vm4, %v13317_v42, %v4325_v62  ;;  %v3918_v57 = vmul.f32 1.442695, %v3815_v52  ;;  %v8573_v42 = vpack.c.bf16 %v5255_v12, %v5254_v29  ;;  %v5244_v1 = vld [vmem:[#allocation12 + $0x50] sm:$0xff]  ;;  %v4867_v33 = vrot.slane %v13490_v15, 1 }
 0x4e0   :  { %4518 = vst.msk [vmem:[#allocation3 + $0x128] sm:$0xff] %vm4480_vm15, %v4453_v43  ;;  %v4452_v32 = vsel %vm4388_vm5, %v13324_v10, %v4324_v25  ;;  %v3916_v17 = vmul.f32 1.442695, %v3814_v5  ;;  %2267 = vrot.lane.b32.xlu1 %v13420_v50, %s10033_s4  ;;  %2077 = vrot.lane.b32.xlu0 %v13385_v35, %s10032_s30  ;;  %v2974_v10 = vsel %vm2920_vm12, %v2909_v16, %v2254_v6  ;;  %v5259_v6 = vld [vmem:[#allocation12 + $0xc8] sm:$0xff]  ;;  %v13496_v25 = vld [vmem:[#allocation2 + $0x358] sm:$0x3] }
 0x4e1   :  { %4517 = vst.msk [vmem:[#allocation3 + $0x120] sm:$0xff] %vm4480_vm15, %v4452_v32  ;;  %9497 = vpow2.f32 %v3918_v57  ;;  %8574 = vmatprep.subr.bf16.mxu0 %v8573_v42  ;;  %v8587_v55 = vpack.c.bf16 %v5245_v53, %v5244_v1  ;;  %v13499_v29 = vld [vmem:[#allocation2 + $0x348] sm:$0xff]  ;;  %v4866_v57 = vrot.slane %v13488_v51, 1  ;;  %v5263_v32 = vld [vmem:[#allocation12 + $0xe8] sm:$0xff]  ;;  %v981_v42 = vrot.slane %v13494_v9, 1  ;;  %v13513_v16 = vld [vmem:[#allocation4 + $0x10] sm:$0xff] }
 0x4e2   :  { %9499 = vpow2.f32 %v3916_v17  ;;  %v2446_v14 = vpop.permute.xlu1 %2445  ;;  %v13465_v19 = vpop.permute.xlu0 %1871  ;;  %8576 = vmatpush3.bf16.msra.mxu0 %v8575_v4  ;;  %v983_v4 = vrot.slane %v13496_v25, 1  ;;  %v980_v56 = vrot.slane %v13499_v29, 1  ;;  %v991_v1 = vrot.slane %v13494_v9, 2 }
 0x4e3   :  { %v3039_v48 = vsel %vm2985_vm13, %v2974_v10, %v2446_v14  ;;  %8578 = vmatprep.subr.bf16.mxu0 %v8577_v44  ;;  %v5247_v10 = vld [vmem:[#allocation12 + $0x68] sm:$0xff]  ;;  %v990_v53 = vrot.slane %v13499_v29, 2  ;;  %vm4391_vm6 = vcmp.gt.f32.partialorder %v13424_v58, 20.0  ;;  %vm4390_vm1 = vcmp.gt.f32.partialorder %v13429_v26, 20.0 }
 0x4e4   :  { %1695 = vrot.lane.b32.xlu1 %v13420_v50, %s10030_s5  ;;  %1505 = vrot.lane.b32.xlu0 %v13385_v35, %s10029_s26  ;;  %v8581_v50 = vpack.c.bf16 %v5259_v6, %v5258_v31  ;;  %v967_v35 = vrot.slane %v13447_v36, 2  ;;  %v5265_v31 = vld [vmem:[#allocation12 + $0xf8] sm:$0xff]  ;;  %v984_v6 = vsel %vm621_vm3, %v981_v42, %v983_v4  ;;  %v982_v13 = vsel %vm621_vm3, %v980_v56, %v981_v42  ;;  %v13580_v56 = vld [vmem:[#allocation4 + $0x48] sm:$0x3] }
 0x4e5   :  { %8502 = vmatmul.mubr.msk.f32.gmra.mrb[52].mxu0 %vm3052_vm14, %v3039_v48  ;;  %v8591_v48 = vpack.c.bf16 %v5247_v10, %v5246_v18 }
 0x4e6   :  { %v13477_v59 = vpop.permute.xlu1 %1299  ;;  %v13479_v37 = vpop.permute.xlu0 %1109  ;;  %8580 = vmatpush3.bf16.msra.mxu0 %v8579_v27  ;;  %v968_v36 = vsel %vm782_vm2, %v965_v45, %v967_v35  ;;  %v8589_v45 = vpack.c.bf16 %v5263_v32, %v5262_v54  ;;  %v4869_v27 = vrot.slane %v13513_v16, 1  ;;  %v9718_v35 = vld [vmem:[#allocation2 + $0x2b8] sm:$0xff]  ;;  %v13569_v54 = vld [vmem:[#allocation4 + $0x40] sm:$0xff] }
 0x4e7   :  { %8582 = vmatprep.subr.bf16.mxu0 %v8581_v50  ;;  %v4870_v50 = vrot.slane %v13519_v8, 1  ;;  %v2585_v23 = vsel %vm178_vm0, %v9718_v35, %v13340_v61  ;;  %v13544_v61 = vld [vmem:[#allocation4 + $0x28] sm:$0x3]  ;;  %v9721_v35 = vld [vmem:[#allocation2 + $0x2c0] sm:$0xff] }
 0x4e8   :  { %2459 = vrot.lane.b32.xlu1 %v966_v2, %s10015_s16  ;;  %2269 = vrot.lane.b32.xlu0 %v958_v63, %s10033_s4  ;;  %v4873_v42 = vrot.slane %v13544_v61, 1 }
 0x4ea   :  { %v13484_v47 = vpop.permute.xlu1 %2063  ;;  %v13486_v11 = vpop.permute.xlu0 %1873  ;;  %8584 = vmatpush3.bf16.msra.mxu0 %v8583_v20  ;;  %v5249_v20 = vld [vmem:[#allocation12 + $0x78] sm:$0xff] }
 0x4eb   :  { %v9498_v22 = vpop.eup %9497  ;;  %8586 = vmatprep.subr.bf16.mxu0 %v8585_v41  ;;  %v2650_v41 = vsel %vm2595_vm7, %v2585_v23, %v13365_v38  ;;  %v2586_v23 = vsel %vm178_vm0, %v9721_v35, %v13367_v21  ;;  %v13611_v21 = vld [vmem:[#allocation4 + $0x58] sm:$0x3] }
 0x4ec   :  { %v9500_v62 = vpop.eup %9499  ;;  %v4007_v52 = vadd.f32 2.0, %v9498_v22  ;;  %1887 = vrot.lane.b32.xlu1 %v966_v2, %s10031_s24  ;;  %1697 = vrot.lane.b32.xlu0 %v958_v63, %s10030_s5  ;;  %v13526_v2 = vsel %vm621_vm3, %v4866_v57, %v4867_v33  ;;  %v5264_v63 = vld [vmem:[#allocation12 + $0xf0] sm:$0xff]  ;;  %v13561_v57 = vld [vmem:[#allocation4 + $0x38] sm:$0x3] }
 0x4ed   :  { %v4006_v5 = vadd.f32 2.0, %v9500_v62  ;;  %v8593_v30 = vpack.c.bf16 %v5265_v31, %v5264_v63  ;;  %v13586_v31 = vld [vmem:[#allocation4 + $0x50] sm:$0xff] }
 0x4ee   :  { %v13501_v12 = vmul.f32 %v9498_v22, %v4007_v52  ;;  %v13503_v43 = vpop.permute.xlu1 %1491  ;;  %v13505_v34 = vpop.permute.xlu0 %1301  ;;  %8588 = vmatpush3.bf16.msra.mxu0 %v8587_v55  ;;  %v8595_v22 = vpack.c.bf16 %v5249_v20, %v5248_v24  ;;  %v13542_v52 = vld [vmem:[#allocation4 + $0x20] sm:$0xff]  ;;  %v2715_v55 = vsel %vm2660_vm8, %v2650_v41, %v13376_v60  ;;  %v4878_v24 = vrot.slane %v13569_v54, 1 }
 0x4ef   :  { %v13509_v17 = vmul.f32 %v9500_v62, %v4006_v5  ;;  %8590 = vmatprep.subr.bf16.mxu0 %v8589_v45  ;;  %v993_v62 = vrot.slane %v13496_v25, 2  ;;  %v2780_v38 = vsel %vm2725_vm9, %v2715_v55, %v13397_v39  ;;  %v9245_v25 = vpack.i.bf16 %v13526_v2, %v13513_v16  ;;  %v13575_v45 = vld [vmem:[#allocation9] ss:$0 sm:$0xff] }
 0x4f0   :  { %v4199_v14 = vadd.f32 2.0, %v13501_v12  ;;  %1889 = vrot.lane.b32.xlu1 %v968_v36, %s10031_s24  ;;  %2461 = vrot.lane.b32.xlu0 %v968_v36, %s10015_s16  ;;  %v2845_v60 = vsel %vm2790_vm10, %v2780_v38, %v13465_v19  ;;  %v4872_v32 = vrot.slane %v13542_v52, 1 }
 0x4f1   :  { %v4198_v44 = vadd.f32 2.0, %v13509_v17  ;;  %v2910_v4 = vsel %vm2855_vm11, %v2845_v60, %v13484_v47  ;;  %v994_v10 = vsel %vm782_vm2, %v991_v1, %v993_v62  ;;  %v4876_v47 = vrot.slane %v13561_v57, 1 }
 0x4f2   :  { %9501 = vrcp.f32 %v4199_v14  ;;  %v2256_v40 = vpop.permute.xlu1 %2255  ;;  %v13522_v7 = vpop.permute.xlu0 %2065  ;;  %8592 = vmatpush3.bf16.msra.mxu0 %v8591_v48  ;;  %v992_v14 = vsel %vm782_vm2, %v990_v53, %v991_v1  ;;  %v2651_v1 = vsel %vm2595_vm7, %v2586_v23, %v13378_v28 }
 0x4f3   :  { %9503 = vrcp.f32 %v4198_v44  ;;  %8594 = vmatprep.subr.bf16.mxu0 %v8593_v30  ;;  %v2975_v48 = vsel %vm2920_vm12, %v2910_v4, %v2256_v40  ;;  %v2716_v55 = vsel %vm2660_vm8, %v2651_v1, %v13399_v3  ;;  %v4581_v1 = vld [vmem:[#allocation3 + $0x120] ss:$2 sm:$0xff] }
 0x4f4   :  { %2081 = vrot.lane.b32.xlu1 %v13494_v9, %s10032_s30  ;;  %2079 = vrot.lane.b32.xlu0 %v13499_v29, %s10032_s30  ;;  %v13555_v9 = vsel %vm621_vm3, %v4869_v27, %v4870_v50  ;;  %v13559_v29 = vld [vmem:[#allocation4 + $0x30] sm:$0xff] }
 0x4f5   :  { %v9250_v39 = vpack.i.bf16 %v13555_v9, %v13542_v52  ;;  %v4875_v63 = vrot.slane %v13559_v29, 1  ;;  %v13590_v50 = vld [vmem:[#allocation11] ss:$0 sm:$0xff] }
 0x4f6   :  { %v13548_v5 = vpop.permute.xlu1 %1683  ;;  %v13550_v36 = vpop.permute.xlu0 %1493  ;;  %8596 = vmatpush3.bf16.msra.mxu0 %v8595_v22 }
 0x4f8   :  { %v8485_v33 = vpop.f32.mrb[40].mxu0  ;;  %2273 = vrot.lane.b32.xlu1 %v984_v6, %s10033_s4  ;;  %2271 = vrot.lane.b32.xlu0 %v982_v13, %s10033_s4  ;;  %v4135_v6 = vmul.f32 %v13501_v12, %v13424_v58  ;;  %v4134_v13 = vmul.f32 %v13509_v17, %v13429_v26  ;;  %v4879_v12 = vrot.slane %v13580_v56, 1  ;;  %v4881_v17 = vrot.slane %v13586_v31, 1 }
 0x4f9   :  { %v3682_v19 = vmul.f32 %v13575_v45, %v8485_v33  ;;  %v3515_v18 = vpop.f32.mrb[41].mxu0 }
 0x4fa   :  { %v3681_v44 = vmul.f32 %v13575_v45, %v3515_v18  ;;  %v2448_v27 = vpop.permute.xlu1 %2447  ;;  %v2258_v2 = vpop.permute.xlu0 %2257 }
 0x4fb   :  { %v13593_v30 = vadd.f32 %v13590_v50, %v3682_v19  ;;  %v3040_v40 = vsel %vm2985_vm13, %v2975_v48, %v2448_v27  ;;  %v2781_v19 = vsel %vm2725_vm9, %v2716_v55, %v13443_v46  ;;  %v13637_v48 = vsel %vm621_vm3, %v4875_v63, %v4876_v47  ;;  %v13653_v63 = vld [vmem:[#allocation4 + $0x78] sm:$0x3]  ;;  %v4810_v55 = vld [vmem:[#allocation4 + $0x80] sm:$0xff] }
 0x4fc   :  { %v9502_v20 = vpop.eup %9501  ;;  %v13602_v22 = vadd.f32 %v13590_v50, %v3681_v44  ;;  %2465 = vrot.lane.b32.xlu1 %v994_v10, %s10015_s16  ;;  %2463 = vrot.lane.b32.xlu0 %v992_v14, %s10015_s16  ;;  %v2846_v10 = vsel %vm2790_vm10, %v2781_v19, %v13486_v11  ;;  %v13642_v11 = vld [vmem:[#allocation4 + $0x60] sm:$0xff]  ;;  %v9260_v27 = vpack.i.bf16 %v13637_v48, %v13569_v54  ;;  %v4888_v23 = vrot.slane %v13653_v63, 1 }
 0x4fd   :  { %v9504_v41 = vpop.eup %9503  ;;  %v4327_v53 = vmul.f32 %v9502_v20, %v4135_v6  ;;  %v3817_v62 = vmin.f32 %v13593_v30, 20.0  ;;  %8504 = vmatprep.mubr.msk.f32.mxu0 %vm3052_vm14, %v3040_v40  ;;  %v2911_v46 = vsel %vm2855_vm11, %v2846_v10, %v13522_v7  ;;  %v13651_v6 = vld [vmem:[#allocation4 + $0x70] sm:$0xff]  ;;  %v13664_v47 = vsel %vm621_vm3, %v4878_v24, %v4879_v12  ;;  %v13666_v40 = vld [vmem:[#allocation4 + $0xa0] sm:$0xff]  ;;  %v13668_v20 = vld [vmem:[#allocation4 + $0xa8] sm:$0x3] }
 0x4fe   :  { %v4326_v38 = vmul.f32 %v9504_v41, %v4134_v13  ;;  %v3816_v60 = vmin.f32 %v13602_v22, 20.0  ;;  %v13618_v33 = vpop.permute.xlu1 %1685  ;;  %v13620_v28 = vpop.permute.xlu0 %1111  ;;  %v4887_v35 = vrot.slane %v13651_v6, 1  ;;  %v4884_v13 = vrot.slane %v13642_v11, 1 }
 0x4ff   :  { %v4455_v4 = vsel %vm4391_vm6, %v13424_v58, %v4327_v53  ;;  %v3922_v18 = vmul.f32 1.442695, %v3817_v62  ;;  %v4882_v58 = vrot.slane %v13611_v21, 1  ;;  %v4645_v53 = vld [vmem:[#allocation3 + $0x121] ss:$2 sm:$0xff]  ;;  %vm4393_vm4 = vcmp.gt.f32.partialorder %v13593_v30, 20.0 }
 0x500   :  { %4520 = vst.msk [vmem:[#allocation3 + $0x138] sm:$0xff] %vm4480_vm15, %v4455_v4  ;;  %v4454_v3 = vsel %vm4390_vm1, %v13429_v26, %v4326_v38  ;;  %v3920_v14 = vmul.f32 1.442695, %v3816_v60  ;;  %9251 = vrot.lane.b32.xlu1 %v9250_v39, %s10035_s0  ;;  %9246 = vrot.lane.b32.xlu0 %v9245_v25, %s10035_s0  ;;  %v13640_v26 = vsel %vm621_vm3, %v4872_v32, %v4873_v42  ;;  %v13655_v32 = vld [vmem:[#allocation4 + $0x68] sm:$0x3]  ;;  %v4890_v38 = vrot.slane %v13666_v40, 1 }
 0x501   :  { %4519 = vst.msk [vmem:[#allocation3 + $0x130] sm:$0xff] %vm4480_vm15, %v4454_v3  ;;  %9505 = vpow2.f32 %v3922_v18  ;;  %v2976_v39 = vsel %vm2920_vm12, %v2911_v46, %v2258_v2  ;;  %v9255_v7 = vpack.i.bf16 %v13640_v26, %v13559_v29  ;;  %v13661_v2 = vsel %vm621_vm3, %v4881_v17, %v4882_v58 }
 0x502   :  { %9507 = vpow2.f32 %v3920_v14  ;;  %v2450_v25 = vpop.permute.xlu1 %2449  ;;  %v13645_v44 = vpop.permute.xlu0 %1875  ;;  %v4885_v41 = vrot.slane %v13655_v32, 1  ;;  %v9270_v12 = vpack.i.bf16 %v13661_v2, %v13642_v11  ;;  %v9265_v17 = vpack.i.bf16 %v13664_v47, %v13586_v31 }
 0x503   :  { %v3041_v42 = vsel %vm2985_vm13, %v2976_v39, %v2450_v25  ;;  %v4891_v60 = vrot.slane %v13668_v20, 1  ;;  %v4690_v18 = vadd.f32 %v4645_v53, %v4581_v1  ;;  %v13688_v10 = vsel %vm621_vm3, %v4887_v35, %v4888_v23 }
 0x504   :  { %9261 = vrot.lane.b32.xlu1 %v9260_v27, %s10035_s0  ;;  %9256 = vrot.lane.b32.xlu0 %v9255_v7, %s10035_s0  ;;  %14950 = vst [vmem:[#allocation32_spill] sm:$0xff] %v13688_v10  ;;  %v13691_v14 = vsel %vm621_vm3, %v4884_v13, %v4885_v41  ;;  %v9280_v39 = vpack.i.bf16 %v13688_v10, %v4810_v55  ;;  %vm4392_vm5 = vcmp.gt.f32.partialorder %v13602_v22, 20.0 }
 0x505   :  { %8505 = vmatmul.mubr.msk.f32.gmra.mrb[54].mxu0 %vm3052_vm14, %v3041_v42  ;;  %14951 = vst [vmem:[#allocation33_spill] sm:$0xff] %v13691_v14  ;;  %v9275_v25 = vpack.i.bf16 %v13691_v14, %v13651_v6  ;;  %v13698_v42 = vld [vmem:[#allocation4 + $0xb0] sm:$0xff]  ;;  %v4892_v1 = vsel %vm621_vm3, %v4890_v38, %v4891_v60 }
 0x506   :  { %v13675_v62 = vpop.permute.xlu1 %1303  ;;  %v13677_v24 = vpop.permute.xlu0 %1113  ;;  %v9285_v55 = vpack.i.bf16 %v4892_v1, %v13698_v42 }
 0x508   :  { %v4583_v4 = vld [vmem:[#allocation3 + $0x130] ss:$2 sm:$0xff]  ;;  %v4647_v19 = vld [vmem:[#allocation3 + $0x131] ss:$2 sm:$0xff]  ;;  %9271 = vrot.lane.b32.xlu1 %v9270_v12, %s10035_s0  ;;  %9266 = vrot.lane.b32.xlu0 %v9265_v17, %s10035_s0 }
 0x509   :  { %v4691_v3 = vadd.f32 %v4647_v19, %v4583_v4  ;;  %v13709_v19 = vld [vmem:[#allocation4 + $0xb8] sm:$0x3] }
 0x50a   :  { %v2068_v58 = vpop.permute.xlu1 %2067  ;;  %v13693_v46 = vpop.permute.xlu0 %1877 }
 0x50b   :  { %v9506_v27 = vpop.eup %9505  ;;  %v4713_v7 = vadd.f32 %v4691_v3, %v4690_v18 }
 0x50c   :  { %v9508_v53 = vpop.eup %9507  ;;  %v4009_v35 = vadd.f32 2.0, %v9506_v27  ;;  %9281 = vrot.lane.b32.xlu1 %v9280_v39, %s10035_s0  ;;  %9276 = vrot.lane.b32.xlu0 %v9275_v25, %s10035_s0  ;;  %v4893_v39 = vrot.slane %v13698_v42, 1  ;;  %v4894_v25 = vrot.slane %v13709_v19, 1 }
 0x50d   :  { %v4729_v23 = vmul.f32 0.25, %v4713_v7  ;;  %v4008_v13 = vadd.f32 2.0, %v9508_v53 }
 0x50e   :  { %v4073_v41 = vmul.f32 %v9506_v27, %v4009_v35  ;;  %v13703_v12 = vpop.permute.xlu1 %1495  ;;  %v13705_v17 = vpop.permute.xlu0 %1305  ;;  %v9722_v27 = vld [vmem:[#allocation2 + $0x2d0] sm:$0xff] }
 0x50f   :  { %v4072_v4 = vmul.f32 %v9508_v53, %v4008_v13  ;;  %4787 = vst.msk [vmem:[#allocation4 + $0xc1] sm:$0xff] %vm4480_vm15, %v4729_v23  ;;  %v2587_v7 = vsel %vm178_vm0, %v9722_v27, %v13445_v49 }
 0x510   :  { %v4201_v38 = vadd.f32 2.0, %v4073_v41  ;;  %9286 = vrot.lane.b32.xlu0 %v9285_v55, %s10035_s0  ;;  %v2652_v1 = vsel %vm2595_vm7, %v2587_v7, %v13477_v59  ;;  %v13727_v55 = vsel %vm621_vm3, %v4893_v39, %v4894_v25 }
 0x511   :  { %v4200_v60 = vadd.f32 2.0, %v4072_v4  ;;  %v2717_v53 = vsel %vm2660_vm8, %v2652_v1, %v13503_v43  ;;  %14952 = vst [vmem:[#allocation34_spill] sm:$0xff] %v13727_v55 }
 0x512   :  { %9509 = vrcp.f32 %v4201_v38  ;;  %v2260_v18 = vpop.permute.xlu1 %2259  ;;  %v2070_v3 = vpop.permute.xlu0 %2069  ;;  %v2782_v38 = vsel %vm2725_vm9, %v2717_v53, %v13548_v5  ;;  %v4137_v53 = vmul.f32 %v4073_v41, %v13593_v30 }
 0x513   :  { %9511 = vrcp.f32 %v4200_v60  ;;  %v2847_v59 = vsel %vm2790_vm10, %v2782_v38, %v13645_v44 }
 0x514   :  { %v2912_v43 = vsel %vm2855_vm11, %v2847_v59, %v2068_v58  ;;  %v9723_v58 = vld [vmem:[#allocation2 + $0x2d8] sm:$0xff] }
 0x515   :  { %v2977_v39 = vsel %vm2920_vm12, %v2912_v43, %v2260_v18  ;;  %v2588_v59 = vsel %vm178_vm0, %v9723_v58, %v13479_v37 }
 0x516   :  { %v13720_v35 = vpop.permute.xlu1 %1687  ;;  %v13722_v23 = vpop.permute.xlu0 %1497  ;;  %v13724_v13 = vld [vmem:[#allocation4 + $0xc0] sm:$0xff]  ;;  %v2653_v41 = vsel %vm2595_vm7, %v2588_v59, %v13505_v34 }
 0x517   :  { %v9290_v49 = vpack.i.bf16 %v13727_v55, %v13724_v13 }
 0x518   :  { %v8488_v60 = vpop.f32.mrb[42].mxu0 }
 0x519   :  { %v3684_v27 = vmul.f32 %v13575_v45, %v8488_v60  ;;  %9291 = vrot.lane.b32.xlu1 %v9290_v49, %s10035_s0  ;;  %v3525_v7 = vpop.f32.mrb[43].mxu0  ;;  %v4136_v49 = vmul.f32 %v4072_v4, %v13602_v22 }
 0x51a   :  { %v3683_v25 = vmul.f32 %v13575_v45, %v3525_v7  ;;  %v2452_v1 = vpop.permute.xlu1 %2451  ;;  %v2262_v5 = vpop.permute.xlu0 %2261  ;;  %v2718_v7 = vsel %vm2660_vm8, %v2653_v41, %v13550_v36 }
 0x51b   :  { %v13742_v0 = vadd.f32 %v13590_v50, %v3684_v27  ;;  %v3042_v44 = vsel %vm2985_vm13, %v2977_v39, %v2452_v1  ;;  %v2783_v34 = vsel %vm2725_vm9, %v2718_v7, %v13618_v33 }
 0x51c   :  { %v9510_v38 = vpop.eup %9509  ;;  %v13749_v18 = vadd.f32 %v13590_v50, %v3683_v25  ;;  %8507 = vmatprep.mubr.msk.f32.mxu0 %vm3052_vm14, %v3042_v44  ;;  %v2848_v44 = vsel %vm2790_vm10, %v2783_v34, %v13693_v46 }
 0x51d   :  { %v9512_v60 = vpop.eup %9511  ;;  %v4329_v43 = vmul.f32 %v9510_v38, %v4137_v53  ;;  %v3819_v27 = vmin.f32 %v13742_v0, 20.0  ;;  %v2913_v58 = vsel %vm2855_vm11, %v2848_v44, %v2070_v3  ;;  %vm4395_vm6 = vcmp.gt.f32.partialorder %v13742_v0, 20.0 }
 0x51e   :  { %v4328_v37 = vmul.f32 %v9512_v60, %v4136_v49  ;;  %v3818_v4 = vmin.f32 %v13749_v18, 20.0  ;;  %v13759_v39 = vpop.permute.xlu1 %1689  ;;  %v13761_v25 = vpop.permute.xlu0 %1115  ;;  %vm4394_vm1 = vcmp.gt.f32.partialorder %v13749_v18, 20.0 }
 0x51f   :  { %v4457_v1 = vsel %vm4393_vm4, %v13593_v30, %v4329_v43  ;;  %v3926_v53 = vmul.f32 1.442695, %v3819_v27  ;;  %v2978_v30 = vsel %vm2920_vm12, %v2913_v58, %v2262_v5 }
 0x520   :  { %4522 = vst.msk [vmem:[#allocation3 + $0x148] sm:$0xff] %vm4480_vm15, %v4457_v1  ;;  %v4456_v36 = vsel %vm4392_vm5, %v13602_v22, %v4328_v37  ;;  %v3924_v38 = vmul.f32 1.442695, %v3818_v4 }
 0x521   :  { %4521 = vst.msk [vmem:[#allocation3 + $0x140] sm:$0xff] %vm4480_vm15, %v4456_v36  ;;  %9513 = vpow2.f32 %v3926_v53 }
 0x522   :  { %9515 = vpow2.f32 %v3924_v38  ;;  %v2454_v59 = vpop.permute.xlu1 %2453  ;;  %v1880_v49 = vpop.permute.xlu0 %1879  ;;  %v9724_v38 = vld [vmem:[#allocation2 + $0x2e8] sm:$0xff] }
 0x523   :  { %v3043_v33 = vsel %vm2985_vm13, %v2978_v30, %v2454_v59  ;;  %v2589_v58 = vsel %vm178_vm0, %v9724_v38, %v13620_v28 }
 0x524   :  { %8508 = vmatmul.mubr.msk.f32.gmra.mrb[56].mxu0 %vm3052_vm14, %v3043_v33  ;;  %v2654_v30 = vsel %vm2595_vm7, %v2589_v58, %v13675_v62 }
 0x525   :  { %v2719_v59 = vsel %vm2660_vm8, %v2654_v30, %v13703_v12 }
 0x526   :  { %v13776_v60 = vpop.permute.xlu1 %1307  ;;  %v13778_v22 = vpop.permute.xlu0 %1117 }
 0x52a   :  { %v2072_v46 = vpop.permute.xlu1 %2071  ;;  %v1882_v41 = vpop.permute.xlu0 %1881 }
 0x52b   :  { %v9514_v43 = vpop.eup %9513 }
 0x52c   :  { %v9516_v27 = vpop.eup %9515  ;;  %v4011_v7 = vadd.f32 2.0, %v9514_v43 }
 0x52d   :  { %v4010_v3 = vadd.f32 2.0, %v9516_v27 }
 0x52e   :  { %v4075_v37 = vmul.f32 %v9514_v43, %v4011_v7  ;;  %v13780_v4 = vpop.permute.xlu1 %1499  ;;  %v13782_v5 = vpop.permute.xlu0 %1309 }
 0x52f   :  { %v4074_v1 = vmul.f32 %v9516_v27, %v4010_v3  ;;  %v2784_v27 = vsel %vm2725_vm9, %v2719_v59, %v13720_v35  ;;  %v9725_v59 = vld [vmem:[#allocation2 + $0x2f0] sm:$0xff] }
 0x530   :  { %v4203_v34 = vadd.f32 2.0, %v4075_v37  ;;  %v2849_v7 = vsel %vm2790_vm10, %v2784_v27, %v1880_v49  ;;  %v4139_v30 = vmul.f32 %v4075_v37, %v13742_v0 }
 0x531   :  { %v4202_v53 = vadd.f32 2.0, %v4074_v1  ;;  %v4138_v27 = vmul.f32 %v4074_v1, %v13749_v18 }
 0x532   :  { %9517 = vrcp.f32 %v4203_v34  ;;  %v2264_v36 = vpop.permute.xlu1 %2263  ;;  %v2074_v44 = vpop.permute.xlu0 %2073  ;;  %v2914_v34 = vsel %vm2855_vm11, %v2849_v7, %v2072_v46  ;;  %v2590_v46 = vsel %vm178_vm0, %v9725_v59, %v13677_v24 }
 0x533   :  { %9519 = vrcp.f32 %v4202_v53  ;;  %v2979_v62 = vsel %vm2920_vm12, %v2914_v34, %v2264_v36  ;;  %v2655_v37 = vsel %vm2595_vm7, %v2590_v46, %v13705_v17 }
 0x536   :  { %v13790_v33 = vpop.permute.xlu1 %1691  ;;  %v13792_v43 = vpop.permute.xlu0 %1501 }
 0x538   :  { %v8491_v3 = vpop.f32.mrb[44].mxu0 }
 0x539   :  { %v3686_v28 = vmul.f32 %v13575_v45, %v8491_v3  ;;  %v3535_v53 = vpop.f32.mrb[45].mxu0 }
 0x53a   :  { %v3685_v38 = vmul.f32 %v13575_v45, %v3535_v53  ;;  %v2456_v12 = vpop.permute.xlu1 %2455  ;;  %v2266_v58 = vpop.permute.xlu0 %2265 }
 0x53b   :  { %v13803_v55 = vadd.f32 %v13590_v50, %v3686_v28  ;;  %v3044_v35 = vsel %vm2985_vm13, %v2979_v62, %v2456_v12  ;;  %v2720_v28 = vsel %vm2660_vm8, %v2655_v37, %v13722_v23 }
 0x53c   :  { %v9518_v49 = vpop.eup %9517  ;;  %v13810_v36 = vadd.f32 %v13590_v50, %v3685_v38  ;;  %8510 = vmatprep.mubr.msk.f32.mxu0 %vm3052_vm14, %v3044_v35  ;;  %v2785_v17 = vsel %vm2725_vm9, %v2720_v28, %v13759_v39 }
 0x53d   :  { %v9520_v7 = vpop.eup %9519  ;;  %v4331_v3 = vmul.f32 %v9518_v49, %v4139_v30  ;;  %v3821_v34 = vmin.f32 %v13803_v55, 20.0  ;;  %v2850_v30 = vsel %vm2790_vm10, %v2785_v17, %v1882_v41  ;;  %vm4397_vm4 = vcmp.gt.f32.partialorder %v13803_v55, 20.0 }
 0x53e   :  { %v4330_v24 = vmul.f32 %v9520_v7, %v4138_v27  ;;  %v3820_v1 = vmin.f32 %v13810_v36, 20.0  ;;  %v13820_v53 = vpop.permute.xlu1 %1693  ;;  %v13822_v62 = vpop.permute.xlu0 %1119  ;;  %v2915_v49 = vsel %vm2855_vm11, %v2850_v30, %v2074_v44  ;;  %v4585_v27 = vld [vmem:[#allocation3 + $0x140] ss:$2 sm:$0xff]  ;;  %v4649_v7 = vld [vmem:[#allocation3 + $0x141] ss:$2 sm:$0xff]  ;;  %vm4396_vm5 = vcmp.gt.f32.partialorder %v13810_v36, 20.0 }
 0x53f   :  { %v4459_v38 = vsel %vm4395_vm6, %v13742_v0, %v4331_v3  ;;  %v3930_v12 = vmul.f32 1.442695, %v3821_v34  ;;  %v2980_v0 = vsel %vm2920_vm12, %v2915_v49, %v2266_v58  ;;  %v4692_v34 = vadd.f32 %v4649_v7, %v4585_v27 }
 0x540   :  { %4524 = vst.msk [vmem:[#allocation3 + $0x158] sm:$0xff] %vm4480_vm15, %v4459_v38  ;;  %v4458_v23 = vsel %vm4394_vm1, %v13749_v18, %v4330_v24  ;;  %v3928_v35 = vmul.f32 1.442695, %v3820_v1 }
 0x541   :  { %4523 = vst.msk [vmem:[#allocation3 + $0x150] sm:$0xff] %vm4480_vm15, %v4458_v23  ;;  %9521 = vpow2.f32 %v3930_v12 }
 0x542   :  { %9523 = vpow2.f32 %v3928_v35  ;;  %v2458_v59 = vpop.permute.xlu1 %2457  ;;  %v1884_v46 = vpop.permute.xlu0 %1883 }
 0x543   :  { %v3045_v39 = vsel %vm2985_vm13, %v2980_v0, %v2458_v59  ;;  %v13847_v59 = vld [vmem:[#allocation4 + $0xc8] sm:$0x3] }
 0x544   :  { %8511 = vmatmul.mubr.msk.f32.gmra.mrb[58].mxu0 %vm3052_vm14, %v3045_v39 }
 0x546   :  { %v13836_v18 = vpop.permute.xlu1 %1311  ;;  %v13838_v41 = vpop.permute.xlu0 %1121 }
 0x548   :  { %v4587_v37 = vld [vmem:[#allocation3 + $0x150] ss:$2 sm:$0xff]  ;;  %v4651_v3 = vld [vmem:[#allocation3 + $0x151] ss:$2 sm:$0xff] }
 0x549   :  { %v4693_v44 = vadd.f32 %v4651_v3, %v4587_v37  ;;  %v4896_v3 = vrot.slane %v13724_v13, 1 }
 0x54a   :  { %v2076_v28 = vpop.permute.xlu1 %2075  ;;  %v13840_v24 = vpop.permute.xlu0 %1885 }
 0x54b   :  { %v9522_v58 = vpop.eup %9521  ;;  %v4714_v1 = vadd.f32 %v4693_v44, %v4692_v34  ;;  %v4897_v34 = vrot.slane %v13847_v59, 1  ;;  %v9726_v44 = vld [vmem:[#allocation2 + $0x300] sm:$0xff] }
 0x54c   :  { %v9524_v38 = vpop.eup %9523  ;;  %v4013_v17 = vadd.f32 2.0, %v9522_v58 }
 0x54d   :  { %v4730_v12 = vmul.f32 0.25, %v4714_v1  ;;  %v4012_v23 = vadd.f32 2.0, %v9524_v38 }
 0x54e   :  { %v4077_v30 = vmul.f32 %v9522_v58, %v4013_v17  ;;  %v13842_v35 = vpop.permute.xlu1 %1503  ;;  %v13844_v49 = vpop.permute.xlu0 %1313  ;;  %v2591_v58 = vsel %vm178_vm0, %v9726_v44, %v13761_v25 }
 0x54f   :  { %4788 = vst.msk [vmem:[#allocation4 + $0xd1] sm:$0xff] %vm4480_vm15, %v4730_v12  ;;  %v4076_v0 = vmul.f32 %v9524_v38, %v4012_v23  ;;  %v2656_v1 = vsel %vm2595_vm7, %v2591_v58, %v13776_v60 }
 0x550   :  { %v4205_v39 = vadd.f32 2.0, %v4077_v30  ;;  %v2721_v38 = vsel %vm2660_vm8, %v2656_v1, %v13780_v4 }
 0x551   :  { %v4204_v27 = vadd.f32 2.0, %v4076_v0 }
 0x552   :  { %9525 = vrcp.f32 %v4205_v39  ;;  %v2268_v7 = vpop.permute.xlu1 %2267  ;;  %v2078_v37 = vpop.permute.xlu0 %2077  ;;  %v13862_v39 = vsel %vm621_vm3, %v4896_v3, %v4897_v34 }
 0x553   :  { %9527 = vrcp.f32 %v4204_v27  ;;  %v2786_v27 = vsel %vm2725_vm9, %v2721_v38, %v13790_v33  ;;  %v4141_v33 = vmul.f32 %v4077_v30, %v13803_v55 }
 0x554   :  { %v2851_v44 = vsel %vm2790_vm10, %v2786_v27, %v1884_v46 }
 0x555   :  { %v2916_v58 = vsel %vm2855_vm11, %v2851_v44, %v2076_v28  ;;  %v9727_v28 = vld [vmem:[#allocation2 + $0x308] sm:$0xff] }
 0x556   :  { %v13857_v17 = vpop.permute.xlu1 %1695  ;;  %v1506_v12 = vpop.permute.xlu0 %1505  ;;  %v13859_v23 = vld [vmem:[#allocation4 + $0xd0] sm:$0xff]  ;;  %v2981_v10 = vsel %vm2920_vm12, %v2916_v58, %v2268_v7  ;;  %v2592_v44 = vsel %vm178_vm0, %v9727_v28, %v13778_v22 }
 0x557   :  { %v9295_v25 = vpack.i.bf16 %v13862_v39, %v13859_v23  ;;  %v2657_v30 = vsel %vm2595_vm7, %v2592_v44, %v13782_v5 }
 0x558   :  { %v8494_v60 = vpop.f32.mrb[46].mxu0 }
 0x559   :  { %v3688_v4 = vmul.f32 %v13575_v45, %v8494_v60  ;;  %v3545_v1 = vpop.f32.mrb[47].mxu0  ;;  %9296 = vrot.lane.b32.xlu0 %v9295_v25, %s10035_s0  ;;  %v4140_v25 = vmul.f32 %v4076_v0, %v13810_v36 }
 0x55a   :  { %v3687_v3 = vmul.f32 %v13575_v45, %v3545_v1  ;;  %v2460_v34 = vpop.permute.xlu1 %2459  ;;  %v2270_v14 = vpop.permute.xlu0 %2269 }
 0x55b   :  { %v13876_v38 = vadd.f32 %v13590_v50, %v3688_v4  ;;  %v3046_v46 = vsel %vm2985_vm13, %v2981_v10, %v2460_v34  ;;  %v2722_v10 = vsel %vm2660_vm8, %v2657_v30, %v13792_v43  ;;  %v9728_v30 = vld [vmem:[#allocation2 + $0x318] sm:$0xff] }
 0x55c   :  { %v9526_v27 = vpop.eup %9525  ;;  %v13883_v7 = vadd.f32 %v13590_v50, %v3687_v3  ;;  %8513 = vmatprep.mubr.msk.f32.mxu0 %vm3052_vm14, %v3046_v46  ;;  %v2787_v5 = vsel %vm2725_vm9, %v2722_v10, %v13820_v53 }
 0x55d   :  { %v9528_v60 = vpop.eup %9527  ;;  %v4333_v58 = vmul.f32 %v9526_v27, %v4141_v33  ;;  %v3823_v4 = vmin.f32 %v13876_v38, 20.0  ;;  %v2852_v43 = vsel %vm2790_vm10, %v2787_v5, %v13840_v24  ;;  %v2593_v24 = vsel %vm178_vm0, %v9728_v30, %v13822_v62 }
 0x55e   :  { %v4332_v22 = vmul.f32 %v9528_v60, %v4140_v25  ;;  %v3822_v0 = vmin.f32 %v13883_v7, 20.0  ;;  %v1888_v1 = vpop.permute.xlu1 %1887  ;;  %v1698_v3 = vpop.permute.xlu0 %1697  ;;  %v2917_v28 = vsel %vm2855_vm11, %v2852_v43, %v2078_v37 }
 0x55f   :  { %v4461_v34 = vsel %vm4397_vm4, %v13803_v55, %v4333_v58  ;;  %v3934_v33 = vmul.f32 1.442695, %v3823_v4  ;;  %v2982_v55 = vsel %vm2920_vm12, %v2917_v28, %v2270_v14  ;;  %v9729_v58 = vld [vmem:[#allocation2 + $0x320] sm:$0xff]  ;;  %v2658_v4 = vsel %vm2595_vm7, %v2593_v24, %v13836_v18 }
 0x560   :  { %4526 = vst.msk [vmem:[#allocation3 + $0x168] sm:$0xff] %vm4480_vm15, %v4461_v34  ;;  %v4460_v46 = vsel %vm4396_vm5, %v13810_v36, %v4332_v22  ;;  %v3932_v27 = vmul.f32 1.442695, %v3822_v0  ;;  %v2594_v37 = vsel %vm178_vm0, %v9729_v58, %v13838_v41  ;;  %v2723_v10 = vsel %vm2660_vm8, %v2658_v4, %v13842_v35 }
 0x561   :  { %4525 = vst.msk [vmem:[#allocation3 + $0x160] sm:$0xff] %vm4480_vm15, %v4460_v46  ;;  %9529 = vpow2.f32 %v3934_v33  ;;  %v2659_v14 = vsel %vm2595_vm7, %v2594_v37, %v13844_v49  ;;  %v2788_v62 = vsel %vm2725_vm9, %v2723_v10, %v13857_v17  ;;  %v4917_v37 = vrot.slane %v13513_v16, 2 }
 0x562   :  { %9531 = vpow2.f32 %v3932_v27  ;;  %v1890_v44 = vpop.permute.xlu1 %1889  ;;  %v2462_v25 = vpop.permute.xlu0 %2461  ;;  %v2724_v22 = vsel %vm2660_vm8, %v2659_v14, %v1506_v12  ;;  %v2853_v18 = vsel %vm2790_vm10, %v2788_v62, %v1888_v1  ;;  %v4918_v10 = vrot.slane %v13519_v8, 2 }
 0x563   :  { %v3047_v53 = vsel %vm2985_vm13, %v2982_v55, %v2462_v25  ;;  %v2789_v33 = vsel %vm2725_vm9, %v2724_v22, %v1698_v3  ;;  %v4914_v3 = vrot.slane %v13488_v51, 2  ;;  %vm4399_vm0 = vcmp.gt.f32.partialorder %v13876_v38, 20.0 }
 0x564   :  { %8514 = vmatmul.mubr.msk.f32.gmra.mrb[60].mxu0 %vm3052_vm14, %v3047_v53  ;;  %v2854_v43 = vsel %vm2790_vm10, %v2789_v33, %v1890_v44  ;;  %v4915_v44 = vrot.slane %v13490_v15, 2  ;;  %v4921_v33 = vrot.slane %v13544_v61, 2  ;;  %v13943_v8 = vsel %vm782_vm2, %v4917_v37, %v4918_v10 }
 0x565   :  { %vm4398_vm7 = vcmp.gt.f32.partialorder %v13883_v7, 20.0 }
 0x566   :  { %v2082_v60 = vpop.permute.xlu1 %2081  ;;  %v2080_v36 = vpop.permute.xlu0 %2079  ;;  %v4916_v14 = vsel %vm782_vm2, %v4914_v3, %v4915_v44 }
 0x567   :  { %v2919_v27 = vsel %vm2855_vm11, %v2854_v43, %v2082_v60  ;;  %v2918_v35 = vsel %vm2855_vm11, %v2853_v18, %v2080_v36 }
 0x56a   :  { %v2274_v0 = vpop.permute.xlu1 %2273  ;;  %v2272_v34 = vpop.permute.xlu0 %2271 }
 0x56b   :  { %v9530_v5 = vpop.eup %9529  ;;  %v2984_v28 = vsel %vm2920_vm12, %v2919_v27, %v2274_v0  ;;  %v2983_v55 = vsel %vm2920_vm12, %v2918_v35, %v2272_v34  ;;  %v4920_v34 = vrot.slane %v13542_v52, 2 }
 0x56c   :  { %v9532_v41 = vpop.eup %9531  ;;  %v4015_v46 = vadd.f32 2.0, %v9530_v5 }
 0x56d   :  { %v4014_v49 = vadd.f32 2.0, %v9532_v41 }
 0x56e   :  { %v4079_v12 = vmul.f32 %v9530_v5, %v4015_v46  ;;  %v2466_v25 = vpop.permute.xlu1 %2465  ;;  %v2464_v17 = vpop.permute.xlu0 %2463  ;;  %v4924_v46 = vrot.slane %v13561_v57, 2  ;;  %v13950_v57 = vsel %vm782_vm2, %v4920_v34, %v4921_v33 }
 0x56f   :  { %v4078_v53 = vmul.f32 %v9532_v41, %v4014_v49  ;;  %v3049_v30 = vsel %vm2985_vm13, %v2984_v28, %v2466_v25  ;;  %v3048_v1 = vsel %vm2985_vm13, %v2983_v55, %v2464_v17  ;;  %v4923_v41 = vrot.slane %v13559_v29, 2 }
 0x570   :  { %v4207_v24 = vadd.f32 2.0, %v4079_v12  ;;  %8516 = vmatprep.mubr.msk.f32.mxu0 %vm3052_vm14, %v3048_v1  ;;  %v4143_v25 = vmul.f32 %v4079_v12, %v13876_v38 }
 0x571   :  { %v4206_v60 = vadd.f32 2.0, %v4078_v53  ;;  %8517 = vmatmul.mubr.msk.f32.gmra.mrb[62].mxu0 %vm3052_vm14, %v3049_v30  ;;  %v13953_v55 = vsel %vm782_vm2, %v4923_v41, %v4924_v46  ;;  %v4142_v44 = vmul.f32 %v4078_v53, %v13883_v7  ;;  %v4929_v46 = vrot.slane %v13586_v31, 2 }
 0x572   :  { %9533 = vrcp.f32 %v4207_v24  ;;  %v9252_v36 = vpop.permute.xlu1 %9251  ;;  %v9247_v58 = vpop.permute.xlu0 %9246 }
 0x573   :  { %9535 = vrcp.f32 %v4206_v60  ;;  %v9249_v4 = vunpack.i.h.bf16 %v9247_v58  ;;  %v9253_v22 = vunpack.i.l.bf16 %v9252_v36  ;;  %v9248_v0 = vunpack.i.l.bf16 %v9247_v58 }
 0x574   :  { %v9254_v18 = vunpack.i.h.bf16 %v9252_v36 }
 0x575   :  { %v5182_v15 = vsel %vm4480_vm15, %v13488_v51, %v9249_v4  ;;  %v5198_v62 = vsel %vm4480_vm15, %v4916_v14, %v9248_v0  ;;  %v5199_v51 = vsel %vm4480_vm15, %v13943_v8, %v9253_v22  ;;  %v4926_v14 = vrot.slane %v13569_v54, 2 }
 0x576   :  { %v9257_v5 = vpop.permute.xlu0 %9256  ;;  %5402 = vmatprep.mubr.f32.mxu0 %v5198_v62  ;;  %v9262_v27 = vpop.permute.xlu1 %9261  ;;  %v5183_v30 = vsel %vm4480_vm15, %v13513_v16, %v9254_v18  ;;  %v4927_v16 = vrot.slane %v13580_v56, 2  ;;  %v4930_v18 = vrot.slane %v13611_v21, 2 }
 0x577   :  { %v9258_v43 = vunpack.i.l.bf16 %v9257_v5  ;;  %5403 = vmatmul.mubr.f32.vlgmr.msra.gmra.mrb[64].mxu0 %v5182_v15  ;;  %v9259_v17 = vunpack.i.h.bf16 %v9257_v5  ;;  %v9263_v24 = vunpack.i.l.bf16 %v9262_v27  ;;  %v9264_v0 = vunpack.i.h.bf16 %v9262_v27  ;;  %v4589_v27 = vld [vmem:[#allocation3 + $0x160] ss:$2 sm:$0xff] }
 0x578   :  { %v8497_v49 = vpop.f32.mrb[48].mxu0  ;;  %5407 = vmatprep.mubr.f32.mxu0 %v5199_v51  ;;  %v14003_v21 = vsel %vm782_vm2, %v4929_v46, %v4930_v18  ;;  %v14030_v18 = vld [vmem:[#allocation4 + $0xd8] sm:$0x3] }
 0x579   :  { %v3690_v35 = vmul.f32 %v13575_v45, %v8497_v49  ;;  %v3555_v28 = vpop.f32.mrb[49].mxu0  ;;  %v5200_v36 = vsel %vm4480_vm15, %v13950_v57, %v9258_v43  ;;  %v13976_v34 = vsel %vm4480_vm15, %v13542_v52, %v9259_v17  ;;  %v5201_v33 = vsel %vm4480_vm15, %v13953_v55, %v9263_v24 }
 0x57a   :  { %v3689_v61 = vmul.f32 %v13575_v45, %v3555_v28  ;;  %v9267_v4 = vpop.permute.xlu0 %9266  ;;  %v13985_v52 = vsel %vm782_vm2, %v4926_v14, %v4927_v16  ;;  %v4932_v28 = vrot.slane %v13642_v11, 2  ;;  %v4936_v16 = vrot.slane %v13653_v63, 2 }
 0x57b   :  { %v13957_v3 = vadd.f32 %v13590_v50, %v3690_v35  ;;  %5408 = vmatmul.mubr.f32.gmra.mrb[66].mxu0 %v5183_v30  ;;  %v9268_v62 = vunpack.i.l.bf16 %v9267_v4  ;;  %v9269_v41 = vunpack.i.h.bf16 %v9267_v4  ;;  %v4653_v35 = vld [vmem:[#allocation3 + $0x161] ss:$2 sm:$0xff] }
 0x57c   :  { %v9534_v1 = vpop.eup %9533  ;;  %v13963_v60 = vadd.f32 %v13590_v50, %v3689_v61  ;;  %5412 = vmatprep.mubr.f32.mxu0 %v5200_v36  ;;  %v4933_v61 = vrot.slane %v13655_v32, 2  ;;  %v4694_v24 = vadd.f32 %v4653_v35, %v4589_v27 }
 0x57d   :  { %v9536_v58 = vpop.eup %9535  ;;  %v4335_v12 = vmul.f32 %v9534_v1, %v4143_v25  ;;  %v3825_v37 = vmin.f32 %v13957_v3, 20.0  ;;  %v5202_v49 = vsel %vm4480_vm15, %v13985_v52, %v9268_v62  ;;  %v14000_v25 = vsel %vm4480_vm15, %v13569_v54, %v9269_v41 }
 0x57e   :  { %v4334_v53 = vmul.f32 %v9536_v58, %v4142_v44  ;;  %v3824_v10 = vmin.f32 %v13963_v60, 20.0  ;;  %v9277_v51 = vpop.permute.xlu0 %9276  ;;  %v14009_v32 = vsel %vm782_vm2, %v4932_v28, %v4933_v61  ;;  %v4935_v54 = vrot.slane %v13651_v6, 2 }
 0x57f   :  { %v4463_v22 = vsel %vm4399_vm0, %v13876_v38, %v4335_v12  ;;  %v3938_v15 = vmul.f32 1.442695, %v3825_v37  ;;  %5413 = vmatmul.mubr.f32.gmra.mrb[68].mxu0 %v13976_v34  ;;  %v9272_v38 = vpop.permute.xlu1 %9271  ;;  %v9278_v1 = vunpack.i.l.bf16 %v9277_v51  ;;  %v9279_v4 = vunpack.i.h.bf16 %v9277_v51 }
 0x580   :  { %4528 = vst.msk [vmem:[#allocation3 + $0x178] sm:$0xff] %vm4480_vm15, %v4463_v22  ;;  %v4462_v5 = vsel %vm4398_vm7, %v13883_v7, %v4334_v53  ;;  %v3936_v56 = vmul.f32 1.442695, %v3824_v10  ;;  %5417 = vmatprep.mubr.f32.mxu0 %v5201_v33  ;;  %v13989_v7 = vsel %vm4480_vm15, %v13559_v29, %v9264_v0  ;;  %v9273_v43 = vunpack.i.l.bf16 %v9272_v38 }
 0x581   :  { %4527 = vst.msk [vmem:[#allocation3 + $0x170] sm:$0xff] %vm4480_vm15, %v4462_v5  ;;  %9537 = vpow2.f32 %v3938_v15  ;;  %v9274_v29 = vunpack.i.h.bf16 %v9272_v38  ;;  %v5204_v0 = vsel %vm4480_vm15, %v14009_v32, %v9278_v1  ;;  %v4938_v62 = vrot.slane %v13666_v40, 2 }
 0x582   :  { %9539 = vpow2.f32 %v3936_v56  ;;  %v5203_v44 = vsel %vm4480_vm15, %v14003_v21, %v9273_v43  ;;  %v9287_v56 = vpop.permute.xlu0 %9286  ;;  %v4939_v33 = vrot.slane %v13668_v20, 2  ;;  %v14025_v41 = vsel %vm4480_vm15, %v13642_v11, %v9279_v4 }
 0x583   :  { %5418 = vmatmul.mubr.f32.gmra.mrb[70].mxu0 %v13989_v7  ;;  %v9282_v58 = vpop.permute.xlu1 %9281  ;;  %v14014_v14 = vsel %vm4480_vm15, %v13586_v31, %v9274_v29  ;;  %v14028_v46 = vsel %vm782_vm2, %v4935_v54, %v4936_v16  ;;  %v4899_v11 = vrot.slane %v13859_v23, 1  ;;  %v4900_v28 = vrot.slane %v14030_v18, 1 }
 0x584   :  { %5422 = vmatprep.mubr.f32.mxu0 %v5202_v49  ;;  %v9283_v22 = vunpack.i.l.bf16 %v9282_v58  ;;  %v9284_v38 = vunpack.i.h.bf16 %v9282_v58  ;;  %v9288_v49 = vunpack.i.l.bf16 %v9287_v56  ;;  %v4940_v35 = vsel %vm782_vm2, %v4938_v62, %v4939_v33 }
 0x585   :  { %v4941_v61 = vrot.slane %v13698_v42, 2  ;;  %v9289_v29 = vunpack.i.h.bf16 %v9287_v56  ;;  %vm4401_vm8 = vcmp.gt.f32.partialorder %v13957_v3, 20.0  ;;  %vm4400_vm9 = vcmp.gt.f32.partialorder %v13963_v60, 20.0 }
 0x586   :  { %v5205_v20 = vsel %vm4480_vm15, %v14028_v46, %v9283_v22 }
 0x587   :  { %5423 = vmatmul.mubr.f32.gmra.mrb[72].mxu0 %v14000_v25  ;;  %v5190_v54 = vsel %vm4480_vm15, %v13666_v40, %v9289_v29 }
 0x588   :  { %v4591_v17 = vld [vmem:[#allocation3 + $0x170] ss:$2 sm:$0xff]  ;;  %v4655_v30 = vld [vmem:[#allocation3 + $0x171] ss:$2 sm:$0xff]  ;;  %5427 = vmatprep.mubr.f32.mxu0 %v5203_v44  ;;  %v5206_v44 = vsel %vm4480_vm15, %v4940_v35, %v9288_v49 }
 0x589   :  { %v4695_v36 = vadd.f32 %v4655_v30, %v4591_v17  ;;  %v14041_v17 = vsel %vm4480_vm15, %v13651_v6, %v9284_v38  ;;  %v4942_v30 = vrot.slane %v13709_v19, 2 }
 0x58b   :  { %v9538_v12 = vpop.eup %9537  ;;  %v4715_v37 = vadd.f32 %v4695_v36, %v4694_v24  ;;  %5428 = vmatmul.mubr.f32.gmra.mrb[74].mxu0 %v14014_v14  ;;  %v9292_v27 = vpop.permute.xlu1 %9291  ;;  %v14049_v36 = vsel %vm621_vm3, %v4899_v11, %v4900_v28  ;;  %v14056_v19 = vsel %vm782_vm2, %v4941_v61, %v4942_v30 }
 0x58c   :  { %v9540_v53 = vpop.eup %9539  ;;  %v4017_v10 = vadd.f32 2.0, %v9538_v12  ;;  %5432 = vmatprep.mubr.f32.mxu0 %v5204_v0  ;;  %v9293_v1 = vunpack.i.l.bf16 %v9292_v27  ;;  %v9294_v58 = vunpack.i.h.bf16 %v9292_v27 }
 0x58d   :  { %v4731_v15 = vmul.f32 0.25, %v4715_v37  ;;  %v4016_v5 = vadd.f32 2.0, %v9540_v53 }
 0x58e   :  { %v4081_v31 = vmul.f32 %v9538_v12, %v4017_v10  ;;  %v5207_v37 = vsel %vm4480_vm15, %v14056_v19, %v9293_v1  ;;  %v5191_v0 = vsel %vm4480_vm15, %v13698_v42, %v9294_v58 }
 0x58f   :  { %4789 = vst.msk [vmem:[#allocation4 + $0xe1] sm:$0xff] %vm4480_vm15, %v4731_v15  ;;  %v4080_v63 = vmul.f32 %v9540_v53, %v4016_v5  ;;  %5433 = vmatmul.mubr.f32.gmra.mrb[76].mxu0 %v14025_v41  ;;  %v14062_v53 = vld [vmem:[#allocation9] ss:$0 sm:$0xff] }
 0x590   :  { %v4209_v43 = vadd.f32 2.0, %v4081_v31  ;;  %5437 = vmatprep.mubr.f32.mxu0 %v5205_v20  ;;  %v4145_v10 = vmul.f32 %v4081_v31, %v13957_v3 }
 0x591   :  { %v4208_v51 = vadd.f32 2.0, %v4080_v63  ;;  %v4144_v5 = vmul.f32 %v4080_v63, %v13963_v60 }
 0x592   :  { %9541 = vrcp.f32 %v4209_v43 }
 0x593   :  { %9543 = vrcp.f32 %v4208_v51  ;;  %5438 = vmatmul.mubr.f32.gmra.mrb[78].mxu0 %v14041_v17 }
 0x594   :  { %5442 = vmatprep.mubr.f32.mxu0 %v5206_v44  ;;  %v14079_v44 = vld [vmem:[#allocation11] ss:$0 sm:$0xff] }
 0x596   :  { %v14046_v24 = vld [vmem:[#allocation4 + $0xe0] sm:$0xff] }
 0x597   :  { %v9300_v6 = vpack.i.bf16 %v14049_v36, %v14046_v24  ;;  %5443 = vmatmul.mubr.f32.gmra.mrb[80].mxu0 %v5190_v54 }
 0x598   :  { %v8500_v12 = vpop.f32.mrb[50].mxu0  ;;  %5447 = vmatprep.mubr.f32.mxu0 %v5207_v37 }
 0x599   :  { %v3692_v4 = vmul.f32 %v13575_v45, %v8500_v12  ;;  %9301 = vrot.lane.b32.xlu1 %v9300_v6, %s10035_s0  ;;  %v3565_v16 = vpop.f32.mrb[51].mxu0 }
 0x59a   :  { %v3691_v40 = vmul.f32 %v14062_v53, %v3565_v16 }
 0x59b   :  { %v3763_v22 = vadd.f32 %v13590_v50, %v3692_v4  ;;  %5448 = vmatmul.mubr.f32.gmra.mrb[82].mxu0 %v5191_v0 }
 0x59c   :  { %v9542_v15 = vpop.eup %9541  ;;  %v3762_v45 = vadd.f32 %v13590_v50, %v3691_v40 }
 0x59d   :  { %v9544_v56 = vpop.eup %9543  ;;  %v4337_v62 = vmul.f32 %v9542_v15, %v4145_v10  ;;  %v3827_v33 = vmin.f32 %v3763_v22, 20.0  ;;  %vm4403_vm10 = vcmp.gt.f32.partialorder %v3763_v22, 20.0 }
 0x59e   :  { %v4336_v38 = vmul.f32 %v9544_v56, %v4144_v5  ;;  %v3826_v43 = vmin.f32 %v3762_v45, 20.0  ;;  %vm4402_vm11 = vcmp.gt.f32.partialorder %v3762_v45, 20.0 }
 0x59f   :  { %v4465_v31 = vsel %vm4401_vm8, %v13957_v3, %v4337_v62  ;;  %v3942_v49 = vmul.f32 1.442695, %v3827_v33 }
 0x5a0   :  { %4530 = vst.msk [vmem:[#allocation3 + $0x188] sm:$0xff] %vm4480_vm15, %v4465_v31  ;;  %v4464_v42 = vsel %vm4400_vm9, %v13963_v60, %v4336_v38  ;;  %v3940_v63 = vmul.f32 1.442695, %v3826_v43 }
 0x5a1   :  { %4529 = vst.msk [vmem:[#allocation3 + $0x180] sm:$0xff] %vm4480_vm15, %v4464_v42  ;;  %9545 = vpow2.f32 %v3942_v49  ;;  %v4944_v42 = vrot.slane %v13724_v13, 2 }
 0x5a2   :  { %9547 = vpow2.f32 %v3940_v63 }
 0x5a8   :  { %v4593_v62 = vld [vmem:[#allocation3 + $0x180] ss:$2 sm:$0xff]  ;;  %v4657_v33 = vld [vmem:[#allocation3 + $0x181] ss:$2 sm:$0xff] }
 0x5a9   :  { %v4696_v31 = vadd.f32 %v4657_v33, %v4593_v62 }
 0x5ab   :  { %v9546_v50 = vpop.eup %9545 }
 0x5ac   :  { %v9548_v20 = vpop.eup %9547  ;;  %v4019_v51 = vadd.f32 2.0, %v9546_v50 }
 0x5ad   :  { %v4018_v27 = vadd.f32 2.0, %v9548_v20 }
 0x5ae   :  { %v4083_v35 = vmul.f32 %v9546_v50, %v4019_v51 }
 0x5af   :  { %v4082_v11 = vmul.f32 %v9548_v20, %v4018_v27 }
 0x5b0   :  { %v4211_v28 = vadd.f32 2.0, %v4083_v35  ;;  %v4147_v1 = vmul.f32 %v4083_v35, %v3763_v22 }
 0x5b1   :  { %v4210_v3 = vadd.f32 2.0, %v4082_v11  ;;  %v4146_v6 = vmul.f32 %v4082_v11, %v3762_v45 }
 0x5b2   :  { %9549 = vrcp.f32 %v4211_v28 }
 0x5b3   :  { %9551 = vrcp.f32 %v4210_v3 }
 0x5b8   :  { %v8503_v61 = vpop.f32.mrb[52].mxu0 }
 0x5b9   :  { %v3694_v29 = vmul.f32 %v14062_v53, %v8503_v61  ;;  %v3575_v30 = vpop.f32.mrb[53].mxu0 }
 0x5ba   :  { %v3693_v60 = vmul.f32 %v14062_v53, %v3575_v30 }
 0x5bb   :  { %v14082_v58 = vadd.f32 %v14079_v44, %v3694_v29 }
 0x5bc   :  { %v9550_v54 = vpop.eup %9549  ;;  %v14085_v12 = vadd.f32 %v14079_v44, %v3693_v60  ;;  %v14103_v60 = vld [vmem:[#allocation4 + $0xe8] sm:$0x3] }
 0x5bd   :  { %v9552_v37 = vpop.eup %9551  ;;  %v4339_v4 = vmul.f32 %v9550_v54, %v4147_v1  ;;  %v3829_v16 = vmin.f32 %v14082_v58, 20.0  ;;  %vm4405_vm12 = vcmp.gt.f32.partialorder %v14082_v58, 20.0 }
 0x5be   :  { %v4338_v40 = vmul.f32 %v9552_v37, %v4146_v6  ;;  %v3828_v10 = vmin.f32 %v14085_v12, 20.0  ;;  %v4902_v6 = vrot.slane %v14046_v24, 1  ;;  %v4903_v37 = vrot.slane %v14103_v60, 1 }
 0x5bf   :  { %v4467_v0 = vsel %vm4403_vm10, %v3763_v22, %v4339_v4  ;;  %v3946_v15 = vmul.f32 1.442695, %v3829_v16  ;;  %v4945_v22 = vrot.slane %v13847_v59, 2  ;;  %vm4404_vm13 = vcmp.gt.f32.partialorder %v14085_v12, 20.0 }
 0x5c0   :  { %4532 = vst.msk [vmem:[#allocation3 + $0x198] sm:$0xff] %vm4480_vm15, %v4467_v0  ;;  %v4466_v5 = vsel %vm4402_vm11, %v3762_v45, %v4338_v40  ;;  %v3944_v56 = vmul.f32 1.442695, %v3828_v10 }
 0x5c1   :  { %4531 = vst.msk [vmem:[#allocation3 + $0x190] sm:$0xff] %vm4480_vm15, %v4466_v5  ;;  %9553 = vpow2.f32 %v3946_v15  ;;  %v14094_v3 = vsel %vm782_vm2, %v4944_v42, %v4945_v22 }
 0x5c2   :  { %9555 = vpow2.f32 %v3944_v56 }
 0x5c8   :  { %v4595_v38 = vld [vmem:[#allocation3 + $0x190] ss:$2 sm:$0xff]  ;;  %v4659_v43 = vld [vmem:[#allocation3 + $0x191] ss:$2 sm:$0xff] }
 0x5c9   :  { %v4697_v49 = vadd.f32 %v4659_v43, %v4595_v38 }
 0x5cb   :  { %v9554_v63 = vpop.eup %9553  ;;  %v4716_v50 = vadd.f32 %v4697_v49, %v4696_v31  ;;  %v9297_v20 = vpop.permute.xlu0 %9296 }
 0x5cc   :  { %v9556_v51 = vpop.eup %9555  ;;  %v4021_v45 = vadd.f32 2.0, %v9554_v63  ;;  %v9299_v27 = vunpack.i.h.bf16 %v9297_v20  ;;  %v9298_v35 = vunpack.i.l.bf16 %v9297_v20 }
 0x5cd   :  { %v4732_v11 = vmul.f32 0.25, %v4716_v50  ;;  %v4020_v28 = vadd.f32 2.0, %v9556_v51 }
 0x5ce   :  { %v4085_v61 = vmul.f32 %v9554_v63, %v4021_v45  ;;  %v5208_v29 = vsel %vm4480_vm15, %v14094_v3, %v9298_v35  ;;  %v14100_v30 = vsel %vm4480_vm15, %v13724_v13, %v9299_v27  ;;  %v14111_v13 = vsel %vm621_vm3, %v4902_v6, %v4903_v37 }
 0x5cf   :  { %4790 = vst.msk [vmem:[#allocation4 + $0xf1] sm:$0xff] %vm4480_vm15, %v4732_v11  ;;  %v4084_v59 = vmul.f32 %v9556_v51, %v4020_v28  ;;  %5452 = vmatprep.mubr.f32.mxu0 %v5208_v29 }
 0x5d0   :  { %v4213_v1 = vadd.f32 2.0, %v4085_v61  ;;  %5453 = vmatmul.mubr.f32.gmra.mrb[84].mxu0 %v14100_v30  ;;  %v4149_v5 = vmul.f32 %v4085_v61, %v14082_v58 }
 0x5d1   :  { %v4212_v54 = vadd.f32 2.0, %v4084_v59  ;;  %v4148_v33 = vmul.f32 %v4084_v59, %v14085_v12 }
 0x5d2   :  { %9557 = vrcp.f32 %v4213_v1 }
 0x5d3   :  { %9559 = vrcp.f32 %v4212_v54 }
 0x5d6   :  { %v14108_v4 = vld [vmem:[#allocation4 + $0xf0] sm:$0xff] }
 0x5d7   :  { %v9305_v16 = vpack.i.bf16 %v14111_v13, %v14108_v4 }
 0x5d8   :  { %v8506_v40 = vpop.f32.mrb[54].mxu0 }
 0x5d9   :  { %v3696_v10 = vmul.f32 %v14062_v53, %v8506_v40  ;;  %9306 = vrot.lane.b32.xlu0 %v9305_v16, %s10035_s0  ;;  %v3585_v0 = vpop.f32.mrb[55].mxu0 }
 0x5da   :  { %v3695_v15 = vmul.f32 %v14062_v53, %v3585_v0 }
 0x5db   :  { %v3767_v56 = vadd.f32 %v14079_v44, %v3696_v10 }
 0x5dc   :  { %v9558_v62 = vpop.eup %9557  ;;  %v3766_v38 = vadd.f32 %v14079_v44, %v3695_v15 }
 0x5dd   :  { %v9560_v43 = vpop.eup %9559  ;;  %v4341_v31 = vmul.f32 %v9558_v62, %v4149_v5  ;;  %v3831_v49 = vmin.f32 %v3767_v56, 20.0  ;;  %vm4407_vm14 = vcmp.gt.f32.partialorder %v3767_v56, 20.0 }
 0x5de   :  { %v4340_v42 = vmul.f32 %v9560_v43, %v4148_v33  ;;  %v3830_v22 = vmin.f32 %v3766_v38, 20.0  ;;  %vm4406_vm6 = vcmp.gt.f32.partialorder %v3766_v38, 20.0 }
 0x5df   :  { %v4469_v63 = vsel %vm4405_vm12, %v14082_v58, %v4341_v31  ;;  %v3950_v50 = vmul.f32 1.442695, %v3831_v49 }
 0x5e0   :  { %4534 = vst.msk [vmem:[#allocation3 + $0x1a8] sm:$0xff] %vm4480_vm15, %v4469_v63  ;;  %v4468_v20 = vsel %vm4404_vm13, %v14085_v12, %v4340_v42  ;;  %v3948_v51 = vmul.f32 1.442695, %v3830_v22 }
 0x5e1   :  { %4533 = vst.msk [vmem:[#allocation3 + $0x1a0] sm:$0xff] %vm4480_vm15, %v4468_v20  ;;  %9561 = vpow2.f32 %v3950_v50 }
 0x5e2   :  { %9563 = vpow2.f32 %v3948_v51 }
 0x5e8   :  { %v4597_v22 = vld [vmem:[#allocation3 + $0x1a0] ss:$2 sm:$0xff]  ;;  %v4661_v63 = vld [vmem:[#allocation3 + $0x1a1] ss:$2 sm:$0xff] }
 0x5e9   :  { %v4698_v51 = vadd.f32 %v4661_v63, %v4597_v22 }
 0x5eb   :  { %v9562_v45 = vpop.eup %9561 }
 0x5ec   :  { %v9564_v27 = vpop.eup %9563  ;;  %v4023_v35 = vadd.f32 2.0, %v9562_v45 }
 0x5ed   :  { %v4022_v11 = vadd.f32 2.0, %v9564_v27 }
 0x5ee   :  { %v4087_v28 = vmul.f32 %v9562_v45, %v4023_v35  ;;  %v4948_v35 = vrot.slane %v14030_v18, 2 }
 0x5ef   :  { %v4086_v61 = vmul.f32 %v9564_v27, %v4022_v11  ;;  %v4947_v27 = vrot.slane %v13859_v23, 2 }
 0x5f0   :  { %v4215_v29 = vadd.f32 2.0, %v4087_v28  ;;  %v4151_v37 = vmul.f32 %v4087_v28, %v3767_v56 }
 0x5f1   :  { %v4214_v58 = vadd.f32 2.0, %v4086_v61  ;;  %v4150_v10 = vmul.f32 %v4086_v61, %v3766_v38 }
 0x5f2   :  { %9565 = vrcp.f32 %v4215_v29 }
 0x5f3   :  { %9567 = vrcp.f32 %v4214_v58 }
 0x5f7   :  { %v8509_v59 = vpop.f32.mrb[56].mxu0 }
 0x5f8   :  { %v3698_v1 = vmul.f32 %v14062_v53, %v8509_v59  ;;  %v3595_v54 = vpop.f32.mrb[57].mxu0 }
 0x5f9   :  { %v3697_v12 = vmul.f32 %v14062_v53, %v3595_v54 }
 0x5fa   :  { %v14131_v6 = vadd.f32 %v14079_v44, %v3698_v1 }
 0x5fb   :  { %v14134_v16 = vadd.f32 %v14079_v44, %v3697_v12  ;;  %v14143_v12 = vsel %vm782_vm2, %v4947_v27, %v4948_v35 }
 0x5fc   :  { %v9566_v40 = vpop.eup %9565  ;;  %v3833_v0 = vmin.f32 %v14131_v6, 20.0  ;;  %vm4409_vm1 = vcmp.gt.f32.partialorder %v14131_v6, 20.0 }
 0x5fd   :  { %v9568_v15 = vpop.eup %9567  ;;  %v4343_v5 = vmul.f32 %v9566_v40, %v4151_v37  ;;  %v3832_v62 = vmin.f32 %v14134_v16, 20.0  ;;  %vm4408_vm4 = vcmp.gt.f32.partialorder %v14134_v16, 20.0 }
 0x5fe   :  { %v4342_v33 = vmul.f32 %v9568_v15, %v4150_v10  ;;  %v3954_v43 = vmul.f32 1.442695, %v3833_v0  ;;  %v14152_v0 = vld [vmem:[#allocation4 + $0xf8] sm:$0x3] }
 0x5ff   :  { %v4471_v31 = vsel %vm4407_vm14, %v3767_v56, %v4343_v5  ;;  %v3952_v49 = vmul.f32 1.442695, %v3832_v62  ;;  %v4905_v5 = vrot.slane %v14108_v4, 1  ;;  %v4906_v62 = vrot.slane %v14152_v0, 1 }
 0x600   :  { %4536 = vst.msk [vmem:[#allocation3 + $0x1b8] sm:$0xff] %vm4480_vm15, %v4471_v31  ;;  %v4470_v42 = vsel %vm4406_vm6, %v3766_v38, %v4342_v33  ;;  %9569 = vpow2.f32 %v3954_v43 }
 0x601   :  { %4535 = vst.msk [vmem:[#allocation3 + $0x1b0] sm:$0xff] %vm4480_vm15, %v4470_v42  ;;  %9571 = vpow2.f32 %v3952_v49 }
 0x608   :  { %v4599_v50 = vld [vmem:[#allocation3 + $0x1b0] ss:$2 sm:$0xff]  ;;  %v4663_v20 = vld [vmem:[#allocation3 + $0x1b1] ss:$2 sm:$0xff] }
 0x609   :  { %v4699_v45 = vadd.f32 %v4663_v20, %v4599_v50 }
 0x60a   :  { %v9570_v56 = vpop.eup %9569 }
 0x60b   :  { %v9572_v11 = vpop.eup %9571  ;;  %v4717_v28 = vadd.f32 %v4699_v45, %v4698_v51  ;;  %v4025_v61 = vadd.f32 2.0, %v9570_v56  ;;  %v9302_v29 = vpop.permute.xlu1 %9301 }
 0x60c   :  { %v4024_v38 = vadd.f32 2.0, %v9572_v11  ;;  %v9304_v58 = vunpack.i.h.bf16 %v9302_v29  ;;  %v9303_v59 = vunpack.i.l.bf16 %v9302_v29 }
 0x60d   :  { %v4733_v1 = vmul.f32 0.25, %v4717_v28  ;;  %v4089_v54 = vmul.f32 %v9570_v56, %v4025_v61 }
 0x60e   :  { %v4088_v37 = vmul.f32 %v9572_v11, %v4024_v38  ;;  %v5209_v40 = vsel %vm4480_vm15, %v14143_v12, %v9303_v59  ;;  %v14149_v18 = vsel %vm4480_vm15, %v13859_v23, %v9304_v58  ;;  %v14160_v23 = vsel %vm621_vm3, %v4905_v5, %v4906_v62  ;;  %v5282_v59 = vld [vmem:[#allocation12 + $0x180] sm:$0xff]  ;;  %v5268_v62 = vld [vmem:[#allocation12 + $0x110] sm:$0xff] }
 0x60f   :  { %4791 = vst.msk [vmem:[#allocation4 + $0x101] sm:$0xff] %vm4480_vm15, %v4733_v1  ;;  %v4217_v10 = vadd.f32 2.0, %v4089_v54  ;;  %5457 = vmatprep.mubr.f32.mxu0 %v5209_v40  ;;  %v4153_v63 = vmul.f32 %v4089_v54, %v14131_v6  ;;  %v5283_v1 = vld [vmem:[#allocation12 + $0x188] sm:$0xff]  ;;  %v5266_v54 = vld [vmem:[#allocation12 + $0x100] sm:$0xff] }
 0x610   :  { %v4216_v15 = vadd.f32 2.0, %v4088_v37  ;;  %5458 = vmatmul.mubr.f32.gmra.mrb[86].mxu0 %v14149_v18  ;;  %v4152_v51 = vmul.f32 %v4088_v37, %v14134_v16  ;;  %v8597_v37 = vpack.c.bf16 %v5283_v1, %v5282_v59  ;;  %v5267_v40 = vld [vmem:[#allocation12 + $0x108] sm:$0xff] }
 0x611   :  { %9573 = vrcp.f32 %v4217_v10  ;;  %v5284_v10 = vld [vmem:[#allocation12 + $0x190] sm:$0xff] }
 0x612   :  { %9575 = vrcp.f32 %v4216_v15  ;;  %v5285_v15 = vld [vmem:[#allocation12 + $0x198] sm:$0xff]  ;;  %8598 = vmatprep.subr.bf16.mxu0 %v8597_v37 }
 0x613   :  { %v8601_v5 = vpack.c.bf16 %v5285_v15, %v5284_v10 }
 0x616   :  { %v14157_v33 = vld [vmem:[#allocation4 + $0x100] sm:$0xff] }
 0x617   :  { %v8512_v43 = vpop.f32.mrb[58].mxu0  ;;  %v9310_v31 = vpack.i.bf16 %v14160_v23, %v14157_v33 }
 0x618   :  { %v3700_v49 = vmul.f32 %v14062_v53, %v8512_v43  ;;  %v3605_v42 = vpop.f32.mrb[59].mxu0  ;;  %v5269_v43 = vld [vmem:[#allocation12 + $0x118] sm:$0xff] }
 0x619   :  { %9311 = vrot.lane.b32.xlu1 %v9310_v31, %s10035_s0  ;;  %v3699_v22 = vmul.f32 %v14062_v53, %v3605_v42  ;;  %v8603_v31 = vpack.c.bf16 %v5269_v43, %v5268_v62 }
 0x61a   :  { %v3771_v50 = vadd.f32 %v14079_v44, %v3700_v49 }
 0x61b   :  { %v9574_v20 = vpop.eup %9573  ;;  %v3770_v45 = vadd.f32 %v14079_v44, %v3699_v22 }
 0x61c   :  { %v9576_v27 = vpop.eup %9575  ;;  %v4345_v35 = vmul.f32 %v9574_v20, %v4153_v63  ;;  %v3835_v56 = vmin.f32 %v3771_v50, 20.0  ;;  %vm4411_vm5 = vcmp.gt.f32.partialorder %v3771_v50, 20.0 }
 0x61d   :  { %v4344_v11 = vmul.f32 %v9576_v27, %v4152_v51  ;;  %v3834_v28 = vmin.f32 %v3770_v45, 20.0  ;;  %vm4410_vm0 = vcmp.gt.f32.partialorder %v3770_v45, 20.0 }
 0x61e   :  { %v4473_v61 = vsel %vm4409_vm1, %v14131_v6, %v4345_v35  ;;  %v3958_v29 = vmul.f32 1.442695, %v3835_v56  ;;  %v8599_v6 = vpack.c.bf16 %v5267_v40, %v5266_v54 }
 0x61f   :  { %4538 = vst.msk [vmem:[#allocation3 + $0x1c8] sm:$0xff] %vm4480_vm15, %v4473_v61  ;;  %v4472_v38 = vsel %vm4408_vm4, %v14134_v16, %v4344_v11  ;;  %v3956_v58 = vmul.f32 1.442695, %v3834_v28 }
 0x620   :  { %4537 = vst.msk [vmem:[#allocation3 + $0x1c0] sm:$0xff] %vm4480_vm15, %v4472_v38  ;;  %9577 = vpow2.f32 %v3958_v29  ;;  %8600 = vmatpush3.bf16.msra.mxu0 %v8599_v6 }
 0x621   :  { %9579 = vpow2.f32 %v3956_v58  ;;  %8602 = vmatprep.subr.bf16.mxu0 %v8601_v5 }
 0x624   :  { %8604 = vmatpush3.bf16.msra.mxu0 %v8603_v31 }
 0x627   :  { %v4601_v31 = vld [vmem:[#allocation3 + $0x1c0] ss:$2 sm:$0xff] }
 0x62a   :  { %v9578_v16 = vpop.eup %9577 }
 0x62b   :  { %v9580_v49 = vpop.eup %9579  ;;  %v4027_v42 = vadd.f32 2.0, %v9578_v16 }
 0x62c   :  { %v4026_v22 = vadd.f32 2.0, %v9580_v49 }
 0x62d   :  { %v4091_v63 = vmul.f32 %v9578_v16, %v4027_v42  ;;  %v4665_v16 = vld [vmem:[#allocation3 + $0x1c1] ss:$2 sm:$0xff] }
 0x62e   :  { %v4090_v20 = vmul.f32 %v9580_v49, %v4026_v22 }
 0x62f   :  { %v4219_v51 = vadd.f32 2.0, %v4091_v63  ;;  %v4155_v61 = vmul.f32 %v4091_v63, %v3771_v50 }
 0x630   :  { %v4218_v27 = vadd.f32 2.0, %v4090_v20  ;;  %v4154_v58 = vmul.f32 %v4090_v20, %v3770_v45 }
 0x631   :  { %9581 = vrcp.f32 %v4219_v51  ;;  %v4700_v51 = vadd.f32 %v4665_v16, %v4601_v31 }
 0x632   :  { %9583 = vrcp.f32 %v4218_v27 }
 0x637   :  { %v8515_v35 = vpop.f32.mrb[60].mxu0 }
 0x638   :  { %v3702_v56 = vmul.f32 %v14062_v53, %v8515_v35  ;;  %v3615_v11 = vpop.f32.mrb[61].mxu0 }
 0x639   :  { %v3701_v28 = vmul.f32 %v14062_v53, %v3615_v11 }
 0x63a   :  { %v14180_v29 = vadd.f32 %v14079_v44, %v3702_v56 }
 0x63b   :  { %v9582_v38 = vpop.eup %9581  ;;  %v14183_v59 = vadd.f32 %v14079_v44, %v3701_v28 }
 0x63c   :  { %v9584_v1 = vpop.eup %9583  ;;  %v4347_v54 = vmul.f32 %v9582_v38, %v4155_v61  ;;  %v3837_v37 = vmin.f32 %v14180_v29, 20.0  ;;  %v4950_v61 = vrot.slane %v14046_v24, 2  ;;  %vm4413_vm7 = vcmp.gt.f32.partialorder %v14180_v29, 20.0 }
 0x63d   :  { %v4346_v40 = vmul.f32 %v9584_v1, %v4154_v58  ;;  %v3836_v10 = vmin.f32 %v14183_v59, 20.0  ;;  %vm4412_vm8 = vcmp.gt.f32.partialorder %v14183_v59, 20.0 }
 0x63e   :  { %v4475_v15 = vsel %vm4411_vm5, %v3771_v50, %v4347_v54  ;;  %v3962_v6 = vmul.f32 1.442695, %v3837_v37 }
 0x63f   :  { %4540 = vst.msk [vmem:[#allocation3 + $0x1d8] sm:$0xff] %vm4480_vm15, %v4475_v15  ;;  %v4474_v5 = vsel %vm4410_vm0, %v3770_v45, %v4346_v40  ;;  %v3960_v62 = vmul.f32 1.442695, %v3836_v10 }
 0x640   :  { %4539 = vst.msk [vmem:[#allocation3 + $0x1d0] sm:$0xff] %vm4480_vm15, %v4474_v5  ;;  %9585 = vpow2.f32 %v3962_v6 }
 0x641   :  { %9587 = vpow2.f32 %v3960_v62 }
 0x644   :  { %v8518_v43 = vpop.f32.mrb[62].mxu0 }
 0x645   :  { %v3704_v49 = vmul.f32 %v14062_v53, %v8518_v43  ;;  %v3625_v42 = vpop.f32.mrb[63].mxu0 }
 0x646   :  { %v3703_v22 = vmul.f32 %v14062_v53, %v3625_v42  ;;  %v4951_v53 = vrot.slane %v14103_v60, 2 }
 0x647   :  { %v4603_v63 = vld [vmem:[#allocation3 + $0x1d0] ss:$2 sm:$0xff]  ;;  %v4667_v50 = vld [vmem:[#allocation3 + $0x1d1] ss:$2 sm:$0xff]  ;;  %v14192_v20 = vadd.f32 %v14079_v44, %v3704_v49  ;;  %v14211_v49 = vld [vmem:[#allocation4 + $0x108] sm:$0x3] }
 0x648   :  { %v4701_v45 = vadd.f32 %v4667_v50, %v4603_v63  ;;  %v14195_v27 = vadd.f32 %v14079_v44, %v3703_v22  ;;  %v14205_v60 = vsel %vm782_vm2, %v4950_v61, %v4951_v53  ;;  %v5286_v50 = vld [vmem:[#allocation12 + $0x1a0] sm:$0xff]  ;;  %v5271_v61 = vld [vmem:[#allocation12 + $0x128] sm:$0xff]  ;;  %v4909_v53 = vrot.slane %v14211_v49, 1 }
 0x649   :  { %v3839_v35 = vmin.f32 %v14192_v20, 20.0  ;;  %vm4415_vm9 = vcmp.gt.f32.partialorder %v14192_v20, 20.0 }
 0x64a   :  { %v9586_v56 = vpop.eup %9585  ;;  %v4718_v11 = vadd.f32 %v4701_v45, %v4700_v51  ;;  %v3838_v28 = vmin.f32 %v14195_v27, 20.0  ;;  %v8232_v37 = vpop.f32.mrb[64].mxu0  ;;  %v5287_v51 = vld [vmem:[#allocation12 + $0x1a8] sm:$0xff]  ;;  %v5270_v45 = vld [vmem:[#allocation12 + $0x120] sm:$0xff]  ;;  %vm4414_vm10 = vcmp.gt.f32.partialorder %v14195_v27, 20.0 }
 0x64b   :  { %v9588_v38 = vpop.eup %9587  ;;  %v4029_v58 = vadd.f32 2.0, %v9586_v56  ;;  %v3966_v1 = vmul.f32 1.442695, %v3839_v35  ;;  %v9307_v54 = vpop.permute.xlu0 %9306 }
 0x64c   :  { %v4734_v40 = vmul.f32 0.25, %v4718_v11  ;;  %v4028_v10 = vadd.f32 2.0, %v9588_v38  ;;  %v3964_v15 = vmul.f32 1.442695, %v3838_v28  ;;  %v9309_v44 = vunpack.i.h.bf16 %v9307_v54  ;;  %v8233_v6 = vpop.f32.mrb[65].mxu0 }
 0x64d   :  { %v4093_v5 = vmul.f32 %v9586_v56, %v4029_v58  ;;  %9589 = vpow2.f32 %v3966_v1  ;;  %v9308_v62 = vunpack.i.l.bf16 %v9307_v54  ;;  %v14201_v43 = vadd.f32 %v8233_v6, %v8232_v37  ;;  %v5272_v6 = vld [vmem:[#allocation12 + $0x130] sm:$0xff] }
 0x64e   :  { %4792 = vst.msk [vmem:[#allocation4 + $0x111] sm:$0xff] %vm4480_vm15, %v4734_v40  ;;  %v4092_v31 = vmul.f32 %v9588_v38, %v4028_v10  ;;  %9591 = vpow2.f32 %v3964_v15  ;;  %v14209_v16 = vsel %vm4480_vm15, %v14046_v24, %v9309_v44  ;;  %v8235_v22 = vpop.f32.mrb[66].mxu0  ;;  %v4908_v11 = vrot.slane %v14157_v33, 1  ;;  %v5288_v15 = vld [vmem:[#allocation12 + $0x1b0] sm:$0xff]  ;;  %v5289_v44 = vld [vmem:[#allocation12 + $0x1b8] sm:$0xff] }
 0x64f   :  { %v4221_v42 = vadd.f32 2.0, %v4093_v5  ;;  %v5210_v63 = vsel %vm4480_vm15, %v14205_v60, %v9308_v62  ;;  %v8236_v56 = vpop.f32.mrb[67].mxu0  ;;  %v8605_v28 = vpack.c.bf16 %v5287_v51, %v5286_v50  ;;  %v8607_v38 = vpack.c.bf16 %v5271_v61, %v5270_v45 }
 0x650   :  { %v4220_v35 = vadd.f32 2.0, %v4092_v31  ;;  %5462 = vmatprep.mubr.f32.mxu0 %v5210_v63  ;;  %v14216_v24 = vadd.f32 %v8236_v56, %v8235_v22  ;;  %v14225_v40 = vsel %vm621_vm3, %v4908_v11, %v4909_v53  ;;  %v8609_v22 = vpack.c.bf16 %v5289_v44, %v5288_v15  ;;  %v5273_v63 = vld [vmem:[#allocation12 + $0x138] sm:$0xff]  ;;  %v14234_v44 = vld [vmem:[#allocation4 + $0x88] sm:$0x3] }
 0x651   :  { %9593 = vrcp.f32 %v4221_v42  ;;  %5463 = vmatmul.mubr.f32.gmra.mrb[88].mxu0 %v14209_v16  ;;  %8606 = vmatprep.subr.bf16.mxu0 %v8605_v28  ;;  %v4157_v11 = vmul.f32 %v4093_v5, %v14180_v29 }
 0x652   :  { %14953 = vst [vmem:[#allocation35_spill] sm:$0xff] %v14216_v24  ;;  %9595 = vrcp.f32 %v4220_v35  ;;  %v8238_v58 = vpop.f32.mrb[68].mxu0  ;;  %8608 = vmatpush3.bf16.msra.mxu0 %v8607_v38  ;;  %v8611_v35 = vpack.c.bf16 %v5273_v63, %v5272_v6  ;;  %v4156_v38 = vmul.f32 %v4092_v31, %v14183_v59  ;;  %v5290_v63 = vld [vmem:[#allocation12 + $0x1c0] sm:$0xff] }
 0x653   :  { %v8239_v1 = vpop.f32.mrb[69].mxu0  ;;  %8610 = vmatprep.subr.bf16.mxu0 %v8609_v22 }
 0x654   :  { %v14220_v54 = vadd.f32 %v8239_v1, %v8238_v58 }
 0x655   :  { %v14222_v37 = vld [vmem:[#allocation4 + $0x110] sm:$0xff] }
 0x656   :  { %14954 = vst [vmem:[#allocation36_spill] sm:$0xff] %v14220_v54  ;;  %v9315_v10 = vpack.i.bf16 %v14225_v40, %v14222_v37  ;;  %v8241_v42 = vpop.f32.mrb[70].mxu0  ;;  %8612 = vmatpush3.bf16.msra.mxu0 %v8611_v35 }
 0x657   :  { %v9590_v62 = vpop.eup %9589  ;;  %v8242_v45 = vpop.f32.mrb[71].mxu0 }
 0x658   :  { %v9592_v50 = vpop.eup %9591  ;;  %v4031_v51 = vadd.f32 2.0, %v9590_v62  ;;  %9316 = vrot.lane.b32.xlu0 %v9315_v10, %s10035_s0  ;;  %v14230_v28 = vadd.f32 %v8242_v45, %v8241_v42  ;;  %v14241_v42 = vld [vmem:[#allocation4 + $0x80] sm:$0xff] }
 0x659   :  { %v4030_v56 = vadd.f32 2.0, %v9592_v50  ;;  %v4982_v31 = vrot.slane %v14241_v42, 1 }
 0x65a   :  { %v4095_v61 = vmul.f32 %v9590_v62, %v4031_v51  ;;  %v8244_v1 = vpop.f32.mrb[72].mxu0  ;;  %v5274_v51 = vld [vmem:[#allocation12 + $0x140] sm:$0xff] }
 0x65b   :  { %v9594_v53 = vpop.eup %9593  ;;  %v4094_v58 = vmul.f32 %v9592_v50, %v4030_v56  ;;  %v8245_v10 = vpop.f32.mrb[73].mxu0  ;;  %v5291_v50 = vld [vmem:[#allocation12 + $0x1c8] sm:$0xff] }
 0x65c   :  { %v9596_v15 = vpop.eup %9595  ;;  %v4349_v54 = vmul.f32 %v9594_v53, %v4157_v11  ;;  %v4223_v24 = vadd.f32 2.0, %v4095_v61  ;;  %5122 = vrot.lane.b32.xlu0 %v13943_v8, %s10035_s0  ;;  %v14239_v62 = vadd.f32 %v8245_v10, %v8244_v1  ;;  %v4983_v8 = vrot.slane %v14234_v44, 1  ;;  %v5275_v11 = vld [vmem:[#allocation12 + $0x148] sm:$0xff]  ;;  %v5292_v10 = vld [vmem:[#allocation12 + $0x1d0] sm:$0xff] }
 0x65d   :  { %v4348_v6 = vmul.f32 %v9596_v15, %v4156_v38  ;;  %v4222_v5 = vadd.f32 2.0, %v4094_v58  ;;  %v8613_v56 = vpack.c.bf16 %v5291_v50, %v5290_v63 }
 0x65e   :  { %v4477_v22 = vsel %vm4413_vm7, %v14180_v29, %v4349_v54  ;;  %9597 = vrcp.f32 %v4223_v24  ;;  %v8247_v35 = vpop.f32.mrb[74].mxu0  ;;  %v8615_v29 = vpack.c.bf16 %v5275_v11, %v5274_v51  ;;  %v14255_v54 = vsel %vm621_vm3, %v4982_v31, %v4983_v8  ;;  %v5277_v51 = vld [vmem:[#allocation12 + $0x158] sm:$0xff]  ;;  %v5295_v11 = vld [vmem:[#allocation12 + $0x1e8] sm:$0xff] }
 0x65f   :  { %4542 = vst.msk [vmem:[#allocation3 + $0x1e8] sm:$0xff] %vm4480_vm15, %v4477_v22  ;;  %v4476_v45 = vsel %vm4412_vm8, %v14183_v59, %v4348_v6  ;;  %9599 = vrcp.f32 %v4222_v5  ;;  %v8248_v53 = vpop.f32.mrb[75].mxu0  ;;  %8614 = vmatprep.subr.bf16.mxu0 %v8613_v56  ;;  %v9325_v15 = vpack.i.bf16 %v14028_v46, %v14255_v54  ;;  %v5293_v6 = vld [vmem:[#allocation12 + $0x1d8] sm:$0xff]  ;;  %v5276_v5 = vld [vmem:[#allocation12 + $0x150] sm:$0xff]  ;;  %v4159_v22 = vmul.f32 %v4095_v61, %v14192_v20  ;;  %v5294_v56 = vld [vmem:[#allocation12 + $0x1e0] sm:$0xff] }
 0x660   :  { %4541 = vst.msk [vmem:[#allocation3 + $0x1e0] sm:$0xff] %vm4480_vm15, %v4476_v45  ;;  %5126 = vrot.lane.b32.xlu0 %v13953_v55, %s10035_s0  ;;  %v14252_v24 = vadd.f32 %v8248_v53, %v8247_v35  ;;  %8616 = vmatpush3.bf16.msra.mxu0 %v8615_v29  ;;  %v8617_v50 = vpack.c.bf16 %v5293_v6, %v5292_v10  ;;  %v5278_v53 = vld [vmem:[#allocation12 + $0x160] sm:$0xff]  ;;  %v5279_v61 = vld [vmem:[#allocation12 + $0x168] sm:$0xff]  ;;  %vm6158_vm8 = vcmask 1041409  }
 0x661   :  { %v4158_v8 = vmul.f32 %v4094_v58, %v14195_v27  ;;  %v8619_v35 = vpack.c.bf16 %v5277_v51, %v5276_v5  ;;  %v8623_v6 = vpack.c.bf16 %v5279_v61, %v5278_v53  ;;  %v4954_v51 = vrot.slane %v14152_v0, 2  ;;  %v5296_v0 = vld [vmem:[#allocation12 + $0x1f0] sm:$0xff] }
 0x662   :  { %v8250_v38 = vpop.f32.mrb[76].mxu0  ;;  %8618 = vmatprep.subr.bf16.mxu0 %v8617_v50 }
 0x663   :  { %v8251_v59 = vpop.f32.mrb[77].mxu0 }
 0x664   :  { %5130 = vrot.lane.b32.xlu0 %v14003_v21, %s10035_s0  ;;  %v14259_v1 = vadd.f32 %v8251_v59, %v8250_v38  ;;  %8620 = vmatpush3.bf16.msra.mxu0 %v8619_v35 }
 0x666   :  { %14955 = vst [vmem:[#allocation37_spill] sm:$0xff] %v14259_v1  ;;  %v8253_v63 = vpop.f32.mrb[78].mxu0  ;;  %v8621_v1 = vpack.c.bf16 %v5295_v11, %v5294_v56 }
 0x667   :  { %v8254_v45 = vpop.f32.mrb[79].mxu0 }
 0x668   :  { %v9598_v31 = vpop.eup %9597  ;;  %9326 = vrot.lane.b32.xlu0 %v9325_v15, %s10035_s0  ;;  %v14266_v59 = vadd.f32 %v8254_v45, %v8253_v63  ;;  %8622 = vmatprep.subr.bf16.mxu0 %v8621_v1 }
 0x669   :  { %v9600_v29 = vpop.eup %9599  ;;  %v4351_v38 = vmul.f32 %v9598_v31, %v4159_v22  ;;  %8624 = vmatpush3.bf16.msra.mxu0 %v8623_v6  ;;  %v5281_v6 = vld [vmem:[#allocation12 + $0x178] sm:$0xff] }
 0x66a   :  { %v4350_v10 = vmul.f32 %v9600_v29, %v4158_v8  ;;  %v8256_v15 = vpop.f32.mrb[80].mxu0  ;;  %v4669_v8 = vld [vmem:[#allocation3 + $0x1e1] ss:$2 sm:$0xff] }
 0x66b   :  { %v4479_v58 = vsel %vm4415_vm9, %v14192_v20, %v4351_v38  ;;  %v8257_v22 = vpop.f32.mrb[81].mxu0  ;;  %v4953_v20 = vrot.slane %v14108_v4, 2  ;;  %v5297_v29 = vld [vmem:[#allocation12 + $0x1f8] sm:$0xff]  ;;  %v5280_v38 = vld [vmem:[#allocation12 + $0x170] sm:$0xff] }
 0x66c   :  { %4544 = vst.msk [vmem:[#allocation3 + $0x1f8] sm:$0xff] %vm4480_vm15, %v4479_v58  ;;  %v4478_v5 = vsel %vm4414_vm10, %v14195_v27, %v4350_v10  ;;  %5138 = vrot.lane.b32.xlu0 %v14056_v19, %s10035_s0  ;;  %v14276_v63 = vadd.f32 %v8257_v22, %v8256_v15  ;;  %v4605_v27 = vld [vmem:[#allocation3 + $0x1e0] ss:$2 sm:$0xff]  ;;  %v8625_v10 = vpack.c.bf16 %v5297_v29, %v5296_v0  ;;  %v4829_v15 = vld [vmem:[#allocation4 + $0x118] sm:$0x3] }
 0x66d   :  { %4543 = vst.msk [vmem:[#allocation3 + $0x1f0] sm:$0xff] %vm4480_vm15, %v4478_v5  ;;  %v14285_v19 = vsel %vm782_vm2, %v4953_v20, %v4954_v51  ;;  %v4702_v56 = vadd.f32 %v4669_v8, %v4605_v27  ;;  %v8627_v58 = vpack.c.bf16 %v5281_v6, %v5280_v38  ;;  %v4911_v5 = vrot.slane %v14222_v37, 1  ;;  %v5299_v20 = vld [vmem:[#allocation12 + $0x208] sm:$0xff] }
 0x66e   :  { %14956 = vst [vmem:[#allocation38_spill] sm:$0xff] %v14276_v63  ;;  %v8259_v50 = vpop.f32.mrb[82].mxu0  ;;  %8626 = vmatprep.subr.bf16.mxu0 %v8625_v10  ;;  %v4912_v22 = vrot.slane %v4829_v15, 1  ;;  %v4960_v27 = vrot.slane %v4829_v15, 2  ;;  %v14315_v10 = vld [vmem:[#allocation4 + $0x98] sm:$0x3] }
 0x66f   :  { %v8260_v31 = vpop.f32.mrb[83].mxu0  ;;  %8628 = vmatpush3.bf16.msra.mxu0 %v8627_v58  ;;  %v5015_v15 = vrot.slane %v14315_v10, 1 }
 0x670   :  { %5142 = vrot.lane.b32.xlu0 %v14143_v12, %s10035_s0  ;;  %v14282_v1 = vadd.f32 %v8260_v31, %v8259_v50  ;;  %v5298_v50 = vld [vmem:[#allocation12 + $0x200] sm:$0xff]  ;;  %v4959_v31 = vrot.slane %v14222_v37, 2 }
 0x671   :  { %v14291_v51 = vpack.c.bf16 %v5299_v20, %v5298_v50  ;;  %v5004_v50 = vrot.slane %v14241_v42, 2  ;;  %v5005_v20 = vrot.slane %v14234_v44, 2 }
 0x672   :  { %14957 = vst [vmem:[#allocation39_spill] sm:$0xff] %v14282_v1  ;;  %v14305_v0 = vsel %vm782_vm2, %v4959_v31, %v4960_v27 }
 0x673   :  { %8630 = vmatprep.subr.bf16.mxu0 %v14291_v51 }
 0x674   :  { %v4607_v45 = vld [vmem:[#allocation3 + $0x1f0] ss:$2 sm:$0xff]  ;;  %v4671_v35 = vld [vmem:[#allocation3 + $0x1f1] ss:$2 sm:$0xff]  ;;  %5146 = vrot.lane.b32.xlu0 %v14285_v19, %s10035_s0 }
 0x675   :  { %v4703_v11 = vadd.f32 %v4671_v35, %v4607_v45  ;;  %v14297_v45 = vsel %vm621_vm3, %v4911_v5, %v4912_v22 }
 0x677   :  { %v4719_v53 = vadd.f32 %v4703_v11, %v4702_v56 }
 0x679   :  { %v4735_v61 = vmul.f32 0.25, %v4719_v53 }
 0x67b   :  { %4793 = vst.msk [vmem:[#allocation4 + $0x121] sm:$0xff] %vm4480_vm15, %v4735_v61  ;;  %v14313_v61 = vld [vmem:[#allocation4 + $0x90] sm:$0xff] }
 0x67c   :  { %v5014_v58 = vrot.slane %v14313_v61, 1 }
 0x682   :  { %v14294_v8 = vld [vmem:[#allocation4 + $0x120] sm:$0xff]  ;;  %v4831_v35 = vld [vmem:[#allocation4 + $0x128] sm:$0x3] }
 0x683   :  { %v9320_v56 = vpack.i.bf16 %v14297_v45, %v14294_v8  ;;  %v4985_v11 = vrot.slane %v14294_v8, 1  ;;  %v4986_v53 = vrot.slane %v4831_v35, 1 }
 0x685   :  { %9321 = vrot.lane.b32.xlu1 %v9320_v56, %s10035_s0  ;;  %v14308_v29 = vsel %vm621_vm3, %v4985_v11, %v4986_v53  ;;  %v14333_v56 = vsel %vm782_vm2, %v5004_v50, %v5005_v20  ;;  %v5016_v11 = vsel %vm621_vm3, %v5014_v58, %v5015_v15  ;;  %v14340_v53 = vld [vmem:[#allocation4 + $0x130] sm:$0xff]  ;;  %v4956_v58 = vrot.slane %v14157_v33, 2 }
 0x686   :  { %v9335_v38 = vpack.i.bf16 %v14305_v0, %v14308_v29  ;;  %v9330_v44 = vpack.i.bf16 %v14333_v56, %v5016_v11  ;;  %v4957_v15 = vrot.slane %v14211_v49, 2 }
 0x688   :  { %9336 = vrot.lane.b32.xlu0 %v9335_v38, %s10035_s0  ;;  %v14342_v38 = vld [vmem:[#allocation4 + $0x138] sm:$0x3]  ;;  %v14354_v50 = vsel %vm782_vm2, %v4956_v58, %v4957_v15 }
 0x689   :  { %5124 = vrot.lane.b32.xlu1 %v13950_v57, %s10035_s0 }
 0x68b   :  { %v9312_v6 = vpop.permute.xlu1 %9311 }
 0x68c   :  { %v9314_v5 = vunpack.i.h.bf16 %v9312_v6  ;;  %v9313_v22 = vunpack.i.l.bf16 %v9312_v6  ;;  %v5018_v6 = vrot.slane %v14342_v38, 1 }
 0x68d   :  { %5128 = vrot.lane.b32.xlu1 %v13985_v52, %s10035_s0 }
 0x68e   :  { %v5211_v31 = vsel %vm4480_vm15, %v14285_v19, %v9313_v22  ;;  %v14329_v27 = vsel %vm4480_vm15, %v14108_v4, %v9314_v5  ;;  %v5017_v4 = vrot.slane %v14340_v53, 1  ;;  %v5007_v5 = vrot.slane %v14294_v8, 2 }
 0x68f   :  { %5467 = vmatprep.mubr.f32.mxu0 %v5211_v31  ;;  %v5008_v22 = vrot.slane %v4831_v35, 2 }
 0x690   :  { %5468 = vmatmul.mubr.f32.gmra.mrb[90].mxu0 %v14329_v27  ;;  %v5019_v31 = vsel %vm621_vm3, %v5017_v4, %v5018_v6 }
 0x691   :  { %5132 = vrot.lane.b32.xlu1 %v14009_v32, %s10035_s0  ;;  %v14357_v20 = vsel %vm782_vm2, %v5007_v5, %v5008_v22 }
 0x692   :  { %v9340_v49 = vpack.i.bf16 %v14357_v20, %v5019_v31 }
 0x695   :  { %9331 = vrot.lane.b32.xlu1 %v9330_v44, %s10035_s0 }
 0x699   :  { %5140 = vrot.lane.b32.xlu1 %v14094_v3, %s10035_s0 }
 0x69d   :  { %5144 = vrot.lane.b32.xlu1 %v14205_v60, %s10035_s0 }
 0x6a1   :  { %5148 = vrot.lane.b32.xlu1 %v14354_v50, %s10035_s0 }
 0x6a3   :  { %v8262_v11 = vpop.f32.mrb[84].mxu0 }
 0x6a4   :  { %v8263_v44 = vpop.f32.mrb[85].mxu0 }
 0x6a5   :  { %v14363_v1 = vadd.f32 %v8263_v44, %v8262_v11  ;;  %9341 = vrot.lane.b32.xlu1 %v9340_v49, %s10035_s0 }
 0x6ca   :  { %v9317_v35 = vpop.permute.xlu0 %9316 }
 0x6cb   :  { %v9319_v63 = vunpack.i.h.bf16 %v9317_v35  ;;  %v9318_v58 = vunpack.i.l.bf16 %v9317_v35 }
 0x6cd   :  { %v5212_v15 = vsel %vm4480_vm15, %v14354_v50, %v9318_v58  ;;  %v14370_v4 = vsel %vm4480_vm15, %v14157_v33, %v9319_v63  ;;  %v5300_v33 = vld [vmem:[#allocation12 + $0x210] sm:$0xff]  ;;  %v5301_v63 = vld [vmem:[#allocation12 + $0x218] sm:$0xff] }
 0x6ce   :  { %5472 = vmatprep.mubr.f32.mxu0 %v5212_v15  ;;  %v5123_v58 = vpop.permute.xlu0 %5122  ;;  %v8633_v15 = vpack.c.bf16 %v5301_v63, %v5300_v33 }
 0x6cf   :  { %5473 = vmatmul.mubr.f32.gmra.mrb[92].mxu0 %v14370_v4 }
 0x6e3   :  { %v8265_v6 = vpop.f32.mrb[86].mxu0 }
 0x6e4   :  { %v8266_v5 = vpop.f32.mrb[87].mxu0 }
 0x6e5   :  { %v14373_v22 = vadd.f32 %v8266_v5, %v8265_v6  ;;  %v5214_v6 = vsel %vm4480_vm15, %v13555_v9, %v5123_v58 }
 0x6e7   :  { %14958 = vst [vmem:[#allocation40_spill] sm:$0xff] %v14373_v22  ;;  %v5303_v22 = vld [vmem:[#allocation12 + $0x228] sm:$0xff] }
 0x6f7   :  { %v9322_v31 = vpop.permute.xlu1 %9321 }
 0x6f8   :  { %v9324_v11 = vunpack.i.h.bf16 %v9322_v31  ;;  %v9323_v49 = vunpack.i.l.bf16 %v9322_v31  ;;  %v5302_v31 = vld [vmem:[#allocation12 + $0x220] sm:$0xff] }
 0x6fa   :  { %v5213_v44 = vsel %vm4480_vm15, %v14305_v0, %v9323_v49  ;;  %v14379_v35 = vsel %vm4480_vm15, %v14222_v37, %v9324_v11  ;;  %v5127_v49 = vpop.permute.xlu0 %5126  ;;  %v8637_v37 = vpack.c.bf16 %v5303_v22, %v5302_v31  ;;  %v14960_v31 = vld [vmem:[#allocation32_spill] sm:$0xff] }
 0x6fb   :  { %5477 = vmatprep.mubr.f32.mxu0 %v5213_v44  ;;  %v5125_v5 = vpop.permute.xlu1 %5124  ;;  %v5304_v44 = vld [vmem:[#allocation12 + $0x230] sm:$0xff] }
 0x6fc   :  { %5478 = vmatmul.mubr.f32.gmra.mrb[94].mxu0 %v14379_v35  ;;  %v5215_v11 = vsel %vm4480_vm15, %v13640_v26, %v5125_v5 }
 0x6fd   :  { %5547 = vmatprep.mubr.f32.mxu0 %v13976_v34  ;;  %v5305_v34 = vld [vmem:[#allocation12 + $0x238] sm:$0xff] }
 0x6fe   :  { %v8641_v9 = vpack.c.bf16 %v5305_v34, %v5304_v44  ;;  %v5131_v58 = vpop.permute.xlu0 %5130  ;;  %v14961_v44 = vld [vmem:[#allocation34_spill] sm:$0xff] }
 0x6ff   :  { %v5129_v33 = vpop.permute.xlu1 %5128 }
 0x700   :  { %5548 = vmatmul.mubr.f32.vlgmr.msra.gmra.mrb[96].mxu0 %v5214_v6  ;;  %v5217_v26 = vsel %vm4480_vm15, %v13664_v47, %v5129_v33 }
 0x701   :  { %8632 = vmatpush3.bf16.msra.mxu0 %v14291_v51  ;;  %5552 = vmatprep.mubr.f32.mxu0 %v13989_v7  ;;  %v5216_v51 = vsel %vm4480_vm15, %v13637_v48, %v5127_v49 }
 0x702   :  { %8634 = vmatprep.subr.bf16.mxu0 %v8633_v15  ;;  %v9327_v22 = vpop.permute.xlu0 %9326 }
 0x703   :  { %v5133_v7 = vpop.permute.xlu1 %5132  ;;  %v9328_v63 = vunpack.i.l.bf16 %v9327_v22 }
 0x704   :  { %5553 = vmatmul.mubr.f32.gmra.mrb[98].mxu0 %v5215_v11 }
 0x705   :  { %5557 = vmatprep.mubr.f32.mxu0 %v14000_v25  ;;  %8636 = vmatpush3.bf16.msra.mxu0 %v8633_v15  ;;  %v5218_v25 = vsel %vm4480_vm15, %v13661_v2, %v5131_v58  ;;  %v14959_v15 = vld [vmem:[#allocation33_spill] sm:$0xff]  ;;  %v5230_v47 = vsel %vm4480_vm15, %v14241_v42, %v9328_v63 }
 0x706   :  { %8638 = vmatprep.subr.bf16.mxu0 %v8637_v37  ;;  %v5219_v6 = vsel %vm4480_vm15, %v14959_v15, %v5133_v7  ;;  %v6419_v15 = vld [vmem:[#allocation17 + $0x310] sm:$0xff] }
 0x707   :  { %v9332_v48 = vpop.permute.xlu1 %9331 }
 0x708   :  { %5558 = vmatmul.mubr.f32.gmra.mrb[100].mxu0 %v5216_v51  ;;  %v9333_v5 = vunpack.i.l.bf16 %v9332_v48 }
 0x709   :  { %5562 = vmatprep.mubr.f32.mxu0 %v14014_v14  ;;  %8640 = vmatpush3.bf16.msra.mxu0 %v8637_v37  ;;  %v9329_v14 = vunpack.i.h.bf16 %v9327_v22  ;;  %v5139_v37 = vpop.permute.xlu0 %5138 }
 0x70a   :  { %8642 = vmatprep.subr.bf16.mxu0 %v8641_v9  ;;  %v5231_v2 = vsel %vm4480_vm15, %v14313_v61, %v9333_v5  ;;  %v5222_v42 = vsel %vm4480_vm15, %v14961_v44, %v5139_v37  ;;  %v6422_v44 = vld [vmem:[#allocation17 + $0x328] sm:$0xff] }
 0x70b   :  { %v5220_v49 = vsel %vm4480_vm15, %v14960_v31, %v9329_v14  ;;  %v5141_v11 = vpop.permute.xlu1 %5140  ;;  %v6417_v14 = vld [vmem:[#allocation17 + $0x300] sm:$0xff] }
 0x70c   :  { %5563 = vmatmul.mubr.f32.gmra.mrb[102].mxu0 %v5217_v26  ;;  %v5223_v33 = vsel %vm4480_vm15, %v13862_v39, %v5141_v11  ;;  %v8743_v5 = vpack.c.bf16 %v6419_v15, %v6417_v14  ;;  %v6139_v15 = vld [vmem:[#allocation17 + $0x180] sm:$0xff] }
 0x70d   :  { %5567 = vmatprep.mubr.f32.mxu0 %v14025_v41  ;;  %8644 = vmatpush3.bf16.msra.mxu0 %v8641_v9  ;;  %v9334_v41 = vunpack.i.h.bf16 %v9332_v48  ;;  %v5143_v34 = vpop.permute.xlu0 %5142 }
 0x70f   :  { %v5145_v58 = vpop.permute.xlu1 %5144 }
 0x710   :  { %5568 = vmatmul.mubr.f32.gmra.mrb[104].mxu0 %v5218_v25  ;;  %v5225_v26 = vsel %vm4480_vm15, %v14111_v13, %v5145_v58 }
 0x711   :  { %5572 = vmatprep.mubr.f32.mxu0 %v14041_v17  ;;  %v5221_v17 = vsel %vm4480_vm15, %v14255_v54, %v9334_v41  ;;  %v5147_v7 = vpop.permute.xlu0 %5146  ;;  %v6130_v41 = vld [vmem:[#allocation17 + $0x138] sm:$0xff] }
 0x714   :  { %5573 = vmatmul.mubr.f32.gmra.mrb[106].mxu0 %v5219_v6 }
 0x715   :  { %5577 = vmatprep.mubr.f32.mxu0 %v5230_v47  ;;  %v9337_v39 = vpop.permute.xlu0 %9336  ;;  %v6128_v47 = vld [vmem:[#allocation17 + $0x128] sm:$0xff] }
 0x716   :  { %v9338_v22 = vunpack.i.l.bf16 %v9337_v39 }
 0x718   :  { %5578 = vmatmul.mubr.f32.gmra.mrb[108].mxu0 %v5220_v49  ;;  %v5232_v13 = vsel %vm4480_vm15, %v14294_v8, %v9338_v22  ;;  %v5021_v8 = vrot.slane %v14315_v10, 2  ;;  %v6123_v10 = vld [vmem:[#allocation17 + $0x100] sm:$0xff]  ;;  %v8649_v49 = vpack.c.bf16 %v6130_v41, %v6128_v47  ;;  %v6434_v41 = vld [vmem:[#allocation17 + $0x388] sm:$0xff] }
 0x719   :  { %5582 = vmatprep.mubr.f32.mxu0 %v5231_v2  ;;  %v6127_v2 = vld [vmem:[#allocation17 + $0x120] sm:$0xff] }
 0x71c   :  { %5583 = vmatmul.mubr.f32.gmra.mrb[110].mxu0 %v5221_v17  ;;  %v6129_v17 = vld [vmem:[#allocation17 + $0x130] sm:$0xff] }
 0x71d   :  { %5587 = vmatprep.mubr.f32.mxu0 %v14100_v30  ;;  %v5224_v30 = vsel %vm4480_vm15, %v14049_v36, %v5143_v34  ;;  %v9339_v36 = vunpack.i.h.bf16 %v9337_v39  ;;  %v8651_v11 = vpack.c.bf16 %v6129_v17, %v6127_v2  ;;  %v6131_v39 = vld [vmem:[#allocation17 + $0x140] sm:$0xff]  ;;  %v6435_v17 = vld [vmem:[#allocation17 + $0x390] sm:$0xff] }
 0x71e   :  { %v6433_v2 = vld [vmem:[#allocation17 + $0x380] sm:$0xff] }
 0x720   :  { %5588 = vmatmul.mubr.f32.gmra.mrb[112].mxu0 %v5222_v42  ;;  %v6424_v42 = vld [vmem:[#allocation17 + $0x338] sm:$0xff] }
 0x721   :  { %5592 = vmatprep.mubr.f32.mxu0 %v14149_v18  ;;  %v5149_v18 = vpop.permute.xlu1 %5148  ;;  %v8745_v34 = vpack.c.bf16 %v6424_v42, %v6422_v44  ;;  %v14964_v44 = vld [vmem:[#allocation36_spill] sm:$0xff] }
 0x724   :  { %v8268_v9 = vpop.f32.mrb[88].mxu0  ;;  %5593 = vmatmul.mubr.f32.gmra.mrb[114].mxu0 %v5223_v33  ;;  %v6421_v33 = vld [vmem:[#allocation17 + $0x320] sm:$0xff] }
 0x725   :  { %v8269_v51 = vpop.f32.mrb[89].mxu0  ;;  %5597 = vmatprep.mubr.f32.mxu0 %v14209_v16  ;;  %v5226_v16 = vsel %vm4480_vm15, %v14160_v23, %v5147_v7  ;;  %v9342_v25 = vpop.permute.xlu1 %9341  ;;  %v6134_v7 = vld [vmem:[#allocation17 + $0x158] sm:$0xff] }
 0x726   :  { %v14416_v54 = vadd.f32 %v8269_v51, %v8268_v9  ;;  %v9343_v63 = vunpack.i.l.bf16 %v9342_v25  ;;  %v9344_v48 = vunpack.i.h.bf16 %v9342_v25  ;;  %v6423_v9 = vld [vmem:[#allocation17 + $0x330] sm:$0xff] }
 0x727   :  { %v8747_v51 = vpack.c.bf16 %v6423_v9, %v6421_v33  ;;  %v6144_v33 = vld [vmem:[#allocation17 + $0x1a8] sm:$0xff]  ;;  %v6146_v9 = vld [vmem:[#allocation17 + $0x1b8] sm:$0xff] }
 0x728   :  { %5598 = vmatmul.mubr.f32.gmra.mrb[116].mxu0 %v5224_v30  ;;  %v5233_v23 = vsel %vm4480_vm15, %v14340_v53, %v9343_v63  ;;  %v6132_v30 = vld [vmem:[#allocation17 + $0x148] sm:$0xff] }
 0x729   :  { %5602 = vmatprep.mubr.f32.mxu0 %v14329_v27  ;;  %v5227_v27 = vsel %vm4480_vm15, %v14225_v40, %v5149_v18  ;;  %v5020_v40 = vrot.slane %v14313_v61, 2  ;;  %v6126_v61 = vld [vmem:[#allocation17 + $0x118] sm:$0xff] }
 0x72c   :  { %5603 = vmatmul.mubr.f32.gmra.mrb[118].mxu0 %v5225_v26  ;;  %v8653_v26 = vpack.c.bf16 %v6134_v7, %v6132_v30  ;;  %v6143_v30 = vld [vmem:[#allocation17 + $0x1a0] sm:$0xff]  ;;  %v6145_v7 = vld [vmem:[#allocation17 + $0x1b0] sm:$0xff] }
 0x72d   :  { %5607 = vmatprep.mubr.f32.mxu0 %v14370_v4  ;;  %v5228_v4 = vsel %vm4480_vm15, %v14297_v45, %v9339_v36  ;;  %v6426_v36 = vld [vmem:[#allocation17 + $0x348] sm:$0xff] }
 0x730   :  { %5608 = vmatmul.mubr.f32.gmra.mrb[120].mxu0 %v5226_v16  ;;  %v6133_v16 = vld [vmem:[#allocation17 + $0x150] sm:$0xff] }
 0x731   :  { %5612 = vmatprep.mubr.f32.mxu0 %v14379_v35  ;;  %v5229_v35 = vsel %vm4480_vm15, %v14308_v29, %v9344_v48  ;;  %v6124_v29 = vld [vmem:[#allocation17 + $0x108] sm:$0xff]  ;;  %v8655_v25 = vpack.c.bf16 %v6133_v16, %v6131_v39  ;;  %v6427_v48 = vld [vmem:[#allocation17 + $0x350] sm:$0xff]  ;;  %v6440_v16 = vld [vmem:[#allocation17 + $0x3b8] sm:$0xff] }
 0x732   :  { %v6438_v39 = vld [vmem:[#allocation17 + $0x3a8] sm:$0xff] }
 0x734   :  { %5613 = vmatmul.mubr.f32.gmra.mrb[122].mxu0 %v5227_v27  ;;  %v6428_v27 = vld [vmem:[#allocation17 + $0x358] sm:$0xff] }
 0x735   :  { %5617 = vmatprep.mubr.f32.mxu0 %v5232_v13  ;;  %v8749_v63 = vpack.c.bf16 %v6428_v27, %v6426_v36  ;;  %v6425_v13 = vld [vmem:[#allocation17 + $0x340] sm:$0xff]  ;;  %v6439_v36 = vld [vmem:[#allocation17 + $0x3b0] sm:$0xff] }
 0x738   :  { %5618 = vmatmul.mubr.f32.gmra.mrb[124].mxu0 %v5228_v4 }
 0x739   :  { %5622 = vmatprep.mubr.f32.mxu0 %v5233_v23 }
 0x73c   :  { %5623 = vmatmul.mubr.f32.gmra.mrb[126].mxu0 %v5229_v35  ;;  %v8751_v35 = vpack.c.bf16 %v6427_v48, %v6425_v13  ;;  %v6148_v48 = vld [vmem:[#allocation17 + $0x1c8] sm:$0xff] }
 0x73d   :  { %8535 = vmatprep.mubr.msk.f32.mxu0 %vm4480_vm15, %v13950_v57  ;;  %v5022_v57 = vsel %vm782_vm2, %v5020_v40, %v5021_v8  ;;  %v6136_v40 = vld [vmem:[#allocation17 + $0x168] sm:$0xff]  ;;  %v6138_v8 = vld [vmem:[#allocation17 + $0x178] sm:$0xff] }
 0x740   :  { %8536 = vmatmul.mubr.msk.f32.vlgmr.msra.gmra.mrb[128].mxu0 %vm4480_vm15, %v13953_v55  ;;  %v5023_v55 = vrot.slane %v14340_v53, 2 }
 0x741   :  { %8538 = vmatprep.mubr.msk.f32.mxu0 %vm4480_vm15, %v13985_v52  ;;  %v5024_v52 = vrot.slane %v14342_v38, 2  ;;  %v6418_v38 = vld [vmem:[#allocation17 + $0x308] sm:$0xff] }
 0x744   :  { %8539 = vmatmul.mubr.msk.f32.gmra.mrb[130].mxu0 %vm4480_vm15, %v14003_v21  ;;  %v5025_v21 = vsel %vm782_vm2, %v5023_v55, %v5024_v52  ;;  %v8657_v55 = vpack.c.bf16 %v6138_v8, %v6136_v40  ;;  %v6135_v52 = vld [vmem:[#allocation17 + $0x160] sm:$0xff] }
 0x745   :  { %8541 = vmatprep.mubr.msk.f32.mxu0 %vm4480_vm15, %v14009_v32  ;;  %v14962_v32 = vmov 0.0   ;;  %v6147_v8 = vld [vmem:[#allocation17 + $0x1c0] sm:$0xff] }
 0x748   :  { %8542 = vmatmul.mubr.msk.f32.gmra.mrb[132].mxu0 %vm4480_vm15, %v14028_v46 }
 0x749   :  { %8544 = vmatprep.mubr.msk.f32.mxu0 %vm4480_vm15, %v14333_v56  ;;  %v6125_v56 = vld [vmem:[#allocation17 + $0x110] sm:$0xff] }
 0x74a   :  { %v8647_v53 = vpack.c.bf16 %v6125_v56, %v6123_v10  ;;  %v14963_v10 = vld [vmem:[#allocation35_spill] sm:$0xff] }
 0x74c   :  { %8545 = vmatmul.mubr.msk.f32.gmra.mrb[134].mxu0 %vm4480_vm15, %v5022_v57 }
 0x74d   :  { %8547 = vmatprep.mubr.msk.f32.mxu0 %vm4480_vm15, %v14094_v3 }
 0x750   :  { %8548 = vmatmul.mubr.msk.f32.gmra.mrb[136].mxu0 %vm4480_vm15, %v14143_v12 }
 0x751   :  { %8550 = vmatprep.mubr.msk.f32.mxu0 %vm4480_vm15, %v14205_v60 }
 0x754   :  { %8551 = vmatmul.mubr.msk.f32.gmra.mrb[138].mxu0 %vm4480_vm15, %v14285_v19 }
 0x755   :  { %8553 = vmatprep.mubr.msk.f32.mxu0 %vm4480_vm15, %v14354_v50  ;;  %v6420_v50 = vld [vmem:[#allocation17 + $0x318] sm:$0xff] }
 0x758   :  { %8554 = vmatmul.mubr.msk.f32.gmra.mrb[140].mxu0 %vm4480_vm15, %v14305_v0  ;;  %v8645_v0 = vpack.c.bf16 %v6126_v61, %v6124_v29  ;;  %v6429_v61 = vld [vmem:[#allocation17 + $0x360] sm:$0xff] }
 0x759   :  { %8556 = vmatprep.mubr.msk.f32.mxu0 %vm4480_vm15, %v14357_v20  ;;  %v8741_v20 = vpack.c.bf16 %v6420_v50, %v6418_v38  ;;  %v6140_v38 = vld [vmem:[#allocation17 + $0x188] sm:$0xff]  ;;  %v6142_v50 = vld [vmem:[#allocation17 + $0x198] sm:$0xff] }
 0x75a   :  { %8646 = vmatprep.subr.bf16.mxu0 %v8645_v0  ;;  %v6431_v0 = vld [vmem:[#allocation17 + $0x370] sm:$0xff]  ;;  %v8661_v14 = vpack.c.bf16 %v6142_v50, %v6140_v38  ;;  %v6151_v38 = vld [vmem:[#allocation17 + $0x1e0] sm:$0xff] }
 0x75b   :  { %8648 = vmatpush1.bf16.msra.mxu0 %v8647_v53  ;;  %8742 = vmatprep.subr.bf16.mxu1 %v8741_v20  ;;  %v8755_v53 = vpack.c.bf16 %v6431_v0, %v6429_v61  ;;  %v6152_v0 = vld [vmem:[#allocation17 + $0x1e8] sm:$0xff]  ;;  %v6153_v50 = vld [vmem:[#allocation17 + $0x1f0] sm:$0xff] }
 0x75c   :  { %8557 = vmatmul.mubr.msk.f32.gmra.mrb[142].mxu0 %vm4480_vm15, %v5025_v21  ;;  %8744 = vmatpush1.bf16.msra.mxu1 %v8743_v5  ;;  %v6137_v21 = vld [vmem:[#allocation17 + $0x170] sm:$0xff] }
 0x75d   :  { %6225 = vmatprep.mubr.f32.mxu0 %v14962_v32  ;;  %8650 = vmatprep.subr.bf16.mxu0 %v8649_v49 }
 0x75e   :  { %8746 = vmatprep.subr.bf16.mxu1 %v8745_v34  ;;  %v8759_v34 = vpack.c.bf16 %v6435_v17, %v6433_v2  ;;  %v6093_v17 = vld [vmem:[#allocation17 + $0x18] sm:$0xff] }
 0x75f   :  { %8652 = vmatpush1.bf16.msra.mxu0 %v8651_v11 }
 0x760   :  { %8748 = vmatpush1.bf16.msra.mxu1 %v8747_v51  ;;  %8654 = vmatprep.subr.bf16.mxu0 %v8653_v26  ;;  %v8665_v51 = vpack.c.bf16 %v6146_v9, %v6144_v33  ;;  %v8667_v26 = vpack.c.bf16 %v6145_v7, %v6143_v30  ;;  %v6530_v33 = vld [vmem:[#allocation17 + $0x418] sm:$0xff] }
 0x761   :  { %8750 = vmatprep.subr.bf16.mxu1 %v8749_v63  ;;  %v14965_v30 = vld [vmem:[#allocation37_spill] sm:$0xff] }
 0x763   :  { %v8271_v46 = vpop.f32.mrb[90].mxu0  ;;  %8656 = vmatpush1.bf16.msra.mxu0 %v8655_v25  ;;  %v6437_v25 = vld [vmem:[#allocation17 + $0x3a0] sm:$0xff] }
 0x764   :  { %v8272_v3 = vpop.f32.mrb[91].mxu0  ;;  %8752 = vmatpush1.bf16.msra.mxu1 %v8751_v35  ;;  %8658 = vmatprep.subr.bf16.mxu0 %v8657_v55  ;;  %v8763_v13 = vpack.c.bf16 %v6439_v36, %v6437_v25  ;;  %v14966_v36 = vld [vmem:[#allocation38_spill] sm:$0xff] }
 0x765   :  { %v14474_v12 = vadd.f32 %v8272_v3, %v8271_v46  ;;  %v8659_v3 = vpack.c.bf16 %v6137_v21, %v6135_v52  ;;  %v6442_v21 = vld [vmem:[#allocation17 + $0x3c8] sm:$0xff] }
 0x767   :  { %8660 = vmatpush1.bf16.msra.mxu0 %v8659_v3 }
 0x768   :  { %8662 = vmatprep.subr.bf16.mxu0 %v8661_v14  ;;  %v8675_v14 = vpack.c.bf16 %v6153_v50, %v6151_v38 }
 0x7a2   :  { %v8274_v60 = vpop.f32.mrb[92].mxu0 }
 0x7a3   :  { %v8275_v19 = vpop.f32.mrb[93].mxu0 }
 0x7a4   :  { %v14476_v45 = vadd.f32 %v8275_v19, %v8274_v60  ;;  %v6430_v60 = vld [vmem:[#allocation17 + $0x368] sm:$0xff]  ;;  %v6432_v19 = vld [vmem:[#allocation17 + $0x378] sm:$0xff] }
 0x7a5   :  { %v8753_v29 = vpack.c.bf16 %v6432_v19, %v6430_v60  ;;  %v6441_v60 = vld [vmem:[#allocation17 + $0x3c0] sm:$0xff]  ;;  %v6443_v19 = vld [vmem:[#allocation17 + $0x3d0] sm:$0xff] }
 0x7a6   :  { %v8767_v61 = vpack.c.bf16 %v6443_v19, %v6441_v60 }
 0x7a7   :  { %8754 = vmatprep.subr.bf16.mxu1 %v8753_v29 }
 0x7a8   :  { %8756 = vmatpush1.bf16.msra.mxu1 %v8755_v53 }
 0x7cf   :  { %v8277_v6 = vpop.f32.mrb[94].mxu0 }
 0x7d0   :  { %v8278_v31 = vpop.f32.mrb[95].mxu0 }
 0x7d1   :  { %v14478_v37 = vadd.f32 %v8278_v31, %v8277_v6  ;;  %v6141_v6 = vld [vmem:[#allocation17 + $0x190] sm:$0xff]  ;;  %v6436_v31 = vld [vmem:[#allocation17 + $0x398] sm:$0xff] }
 0x7d2   :  { %v8663_v47 = vpack.c.bf16 %v6141_v6, %v6139_v15  ;;  %v8757_v49 = vpack.c.bf16 %v6436_v31, %v6434_v41  ;;  %v6446_v15 = vld [vmem:[#allocation17 + $0x3e8] sm:$0xff]  ;;  %v6448_v6 = vld [vmem:[#allocation17 + $0x3f8] sm:$0xff]  ;;  %v6447_v41 = vld [vmem:[#allocation17 + $0x3f0] sm:$0xff] }
 0x7d3   :  { %v8312_v58 = vpop.f32.mrb[96].mxu0 }
 0x7d4   :  { %v8313_v18 = vpop.f32.mrb[97].mxu0  ;;  %8664 = vmatpush1.bf16.msra.mxu0 %v8663_v47  ;;  %8758 = vmatprep.subr.bf16.mxu1 %v8757_v49  ;;  %v6445_v47 = vld [vmem:[#allocation17 + $0x3e0] sm:$0xff] }
 0x7d5   :  { %v8314_v22 = vadd.f32 %v8313_v18, %v8312_v58  ;;  %8760 = vmatpush1.bf16.msra.mxu1 %v8759_v34  ;;  %8666 = vmatprep.subr.bf16.mxu0 %v8665_v51  ;;  %v8771_v2 = vpack.c.bf16 %v6447_v41, %v6445_v47  ;;  %v6528_v34 = vld [vmem:[#allocation17 + $0x408] sm:$0xff]  ;;  %v14525_v47 = vld [vmem:[#allocation14] ss:$0 sm:$0xff] }
 0x7d7   :  { %v8315_v4 = vpop.f32.mrb[98].mxu0  ;;  %v14481_v23 = vadd.f32 %v8314_v22, %v14201_v43  ;;  %v8761_v22 = vpack.c.bf16 %v6440_v16, %v6438_v39 }
 0x7d8   :  { %v8316_v57 = vpop.f32.mrb[99].mxu0  ;;  %8668 = vmatpush1.bf16.msra.mxu0 %v8667_v26 }
 0x7d9   :  { %v8317_v46 = vadd.f32 %v8316_v57, %v8315_v4  ;;  %v6150_v4 = vld [vmem:[#allocation17 + $0x1d8] sm:$0xff]  ;;  %8762 = vmatprep.subr.bf16.mxu1 %v8761_v22  ;;  %v6149_v57 = vld [vmem:[#allocation17 + $0x1d0] sm:$0xff] }
 0x7da   :  { %v8669_v40 = vpack.c.bf16 %v6150_v4, %v6148_v48  ;;  %8764 = vmatpush1.bf16.msra.mxu1 %v8763_v13  ;;  %v8671_v52 = vpack.c.bf16 %v6149_v57, %v6147_v8 }
 0x7db   :  { %v8318_v43 = vpop.f32.mrb[100].mxu0  ;;  %v14484_v56 = vadd.f32 %v8317_v46, %v14963_v10  ;;  %v6444_v46 = vld [vmem:[#allocation17 + $0x3d8] sm:$0xff] }
 0x7dc   :  { %v8319_v20 = vpop.f32.mrb[101].mxu0  ;;  %8670 = vmatprep.subr.bf16.mxu0 %v8669_v40  ;;  %v8765_v3 = vpack.c.bf16 %v6444_v46, %v6442_v21 }
 0x7dd   :  { %v8320_v5 = vadd.f32 %v8319_v20, %v8318_v43  ;;  %8672 = vmatpush1.bf16.msra.mxu0 %v8671_v52  ;;  %v6154_v43 = vld [vmem:[#allocation17 + $0x1f8] sm:$0xff] }
 0x7de   :  { %8766 = vmatprep.subr.bf16.mxu1 %v8765_v3  ;;  %v8673_v53 = vpack.c.bf16 %v6154_v43, %v6152_v0  ;;  %v14968_v3 = vld [vmem:[#allocation40_spill] sm:$0xff] }
 0x7df   :  { %v8321_v11 = vpop.f32.mrb[102].mxu0  ;;  %v14487_v42 = vadd.f32 %v8320_v5, %v14964_v44  ;;  %8768 = vmatpush1.bf16.msra.mxu1 %v8767_v61  ;;  %v8769_v5 = vpack.c.bf16 %v6448_v6, %v6446_v15 }
 0x7e0   :  { %v8322_v58 = vpop.f32.mrb[103].mxu0  ;;  %8674 = vmatprep.subr.bf16.mxu0 %v8673_v53 }
 0x7e1   :  { %v8323_v18 = vadd.f32 %v8322_v58, %v8321_v11  ;;  %8676 = vmatpush1.bf16.msra.mxu0 %v8675_v14  ;;  %8770 = vmatprep.subr.bf16.mxu1 %v8769_v5  ;;  %v8773_v58 = vpack.c.bf16 %v6530_v33, %v6528_v34 }
 0x7e3   :  { %v8324_v27 = vpop.f32.mrb[104].mxu0  ;;  %v14490_v63 = vadd.f32 %v8323_v18, %v14230_v28  ;;  %8772 = vmatpush1.bf16.msra.mxu1 %v8771_v2 }
 0x7e4   :  { %v8325_v35 = vpop.f32.mrb[105].mxu0  ;;  %8774 = vmatprep.subr.bf16.mxu1 %v8773_v58 }
 0x7e5   :  { %v8326_v55 = vadd.f32 %v8325_v35, %v8324_v27  ;;  %v14967_v35 = vld [vmem:[#allocation39_spill] sm:$0xff] }
 0x7e7   :  { %v8327_v28 = vpop.f32.mrb[106].mxu0  ;;  %v14493_v29 = vadd.f32 %v8326_v55, %v14239_v62  ;;  %v6091_v62 = vld [vmem:[#allocation17 + $0x8] sm:$0xff] }
 0x7e8   :  { %v8328_v10 = vpop.f32.mrb[107].mxu0  ;;  %v8677_v44 = vpack.c.bf16 %v6093_v17, %v6091_v62 }
 0x7e9   :  { %v8329_v20 = vadd.f32 %v8328_v10, %v8327_v28 }
 0x7ea   :  { %8678 = vmatprep.subr.bf16.mxu0 %v8677_v44 }
 0x7eb   :  { %v8330_v31 = vpop.f32.mrb[108].mxu0  ;;  %v14496_v49 = vadd.f32 %v8329_v20, %v14252_v24 }
 0x7ec   :  { %v8331_v11 = vpop.f32.mrb[109].mxu0 }
 0x7ed   :  { %v8332_v9 = vadd.f32 %v8331_v11, %v8330_v31  ;;  %v14531_v31 = vld [vmem:[#allocation15] ss:$0 sm:$0xff] }
 0x7ef   :  { %v8333_v51 = vpop.f32.mrb[110].mxu0  ;;  %v14499_v7 = vadd.f32 %v8332_v9, %v14965_v30 }
 0x7f0   :  { %v8334_v18 = vpop.f32.mrb[111].mxu0 }
 0x7f1   :  { %v8335_v24 = vadd.f32 %v8334_v18, %v8333_v51 }
 0x7f3   :  { %v8336_v26 = vpop.f32.mrb[112].mxu0  ;;  %v14502_v39 = vadd.f32 %v8335_v24, %v14266_v59 }
 0x7f4   :  { %v8337_v16 = vpop.f32.mrb[113].mxu0 }
 0x7f5   :  { %v8338_v22 = vadd.f32 %v8337_v16, %v8336_v26 }
 0x7f7   :  { %v8339_v25 = vpop.f32.mrb[114].mxu0  ;;  %v14505_v27 = vadd.f32 %v8338_v22, %v14966_v36 }
 0x7f8   :  { %v8340_v13 = vpop.f32.mrb[115].mxu0 }
 0x7f9   :  { %v8341_v48 = vadd.f32 %v8340_v13, %v8339_v25 }
 0x7fb   :  { %v8342_v4 = vpop.f32.mrb[116].mxu0  ;;  %v14508_v40 = vadd.f32 %v8341_v48, %v14967_v35 }
 0x7fc   :  { %v8343_v8 = vpop.f32.mrb[117].mxu0 }
 0x7fd   :  { %v8344_v57 = vadd.f32 %v8343_v8, %v8342_v4 }
 0x7ff   :  { %v8345_v55 = vpop.f32.mrb[118].mxu0  ;;  %v14511_v52 = vadd.f32 %v8344_v57, %v14363_v1 }
 0x800   :  { %v8346_v59 = vpop.f32.mrb[119].mxu0 }
 0x801   :  { %v8347_v21 = vadd.f32 %v8346_v59, %v8345_v55 }
 0x803   :  { %v8348_v46 = vpop.f32.mrb[120].mxu0  ;;  %v14514_v60 = vadd.f32 %v8347_v21, %v14968_v3 }
 0x804   :  { %v8349_v19 = vpop.f32.mrb[121].mxu0 }
 0x805   :  { %v8350_v28 = vadd.f32 %v8349_v19, %v8348_v46 }
 0x807   :  { %v8351_v61 = vpop.f32.mrb[122].mxu0  ;;  %v14517_v0 = vadd.f32 %v8350_v28, %v14416_v54 }
 0x808   :  { %v8352_v43 = vpop.f32.mrb[123].mxu0 }
 0x809   :  { %v8353_v10 = vadd.f32 %v8352_v43, %v8351_v61 }
 0x80b   :  { %v8354_v53 = vpop.f32.mrb[124].mxu0  ;;  %v14520_v38 = vadd.f32 %v8353_v10, %v14474_v12 }
 0x80c   :  { %v8355_v1 = vpop.f32.mrb[125].mxu0 }
 0x80d   :  { %v8356_v50 = vadd.f32 %v8355_v1, %v8354_v53 }
 0x80f   :  { %v8357_v20 = vpop.f32.mrb[126].mxu0  ;;  %v14523_v14 = vadd.f32 %v8356_v50, %v14476_v45 }
 0x810   :  { %v8358_v15 = vpop.f32.mrb[127].mxu0 }
 0x811   :  { %v8359_v6 = vadd.f32 %v8358_v15, %v8357_v20 }
 0x813   :  { %v8537_v5 = vpop.f32.mrb[128].mxu0  ;;  %v14528_v54 = vadd.f32 %v8359_v6, %v14478_v37 }
 0x814   :  { %v5700_v41 = vadd.f32 %v8537_v5, %v14484_v56  ;;  %v5694_v62 = vpop.f32.mrb[129].mxu0 }
 0x815   :  { %v5695_v12 = vadd.f32 %v5694_v62, %v14481_v23 }
 0x816   :  { %v5781_v2 = vmul.f32 %v14525_v47, %v5700_v41 }
 0x817   :  { %v5780_v45 = vmul.f32 %v14525_v47, %v5695_v12  ;;  %v8540_v17 = vpop.f32.mrb[130].mxu0 }
 0x818   :  { %v14537_v11 = vadd.f32 %v14531_v31, %v5781_v2  ;;  %v5710_v44 = vadd.f32 %v8540_v17, %v14490_v63  ;;  %v5704_v34 = vpop.f32.mrb[131].mxu0 }
 0x819   :  { %v14541_v37 = vadd.f32 %v14531_v31, %v5780_v45  ;;  %v5705_v56 = vadd.f32 %v5704_v34, %v14487_v42 }
 0x81a   :  { %v5820_v33 = vmin.f32 %v14537_v11, 20.0  ;;  %v5783_v23 = vmul.f32 %v14525_v47, %v5710_v44  ;;  %vm5964_vm2 = vcmp.gt.f32.partialorder %v14537_v11, 20.0 }
 0x81b   :  { %v5819_v9 = vmin.f32 %v14541_v37, 20.0  ;;  %v5782_v58 = vmul.f32 %v14525_v47, %v5705_v56  ;;  %v8543_v51 = vpop.f32.mrb[132].mxu0  ;;  %vm5963_vm3 = vcmp.gt.f32.partialorder %v14541_v37, 20.0 }
 0x81c   :  { %v5837_v30 = vmul.f32 1.442695, %v5820_v33  ;;  %v14549_v18 = vadd.f32 %v14531_v31, %v5783_v23  ;;  %v5720_v63 = vadd.f32 %v8543_v51, %v14496_v49  ;;  %v5714_v24 = vpop.f32.mrb[133].mxu0 }
 0x81d   :  { %v5835_v26 = vmul.f32 1.442695, %v5819_v9  ;;  %v14553_v16 = vadd.f32 %v14531_v31, %v5782_v58  ;;  %v5715_v42 = vadd.f32 %v5714_v24, %v14493_v29 }
 0x81e   :  { %9601 = vpow2.f32 %v5837_v30  ;;  %v5822_v22 = vmin.f32 %v14549_v18, 20.0  ;;  %v5785_v25 = vmul.f32 %v14525_v47, %v5720_v63  ;;  %vm5966_vm15 = vcmp.gt.f32.partialorder %v14549_v18, 20.0 }
 0x81f   :  { %9603 = vpow2.f32 %v5835_v26  ;;  %v5821_v36 = vmin.f32 %v14553_v16, 20.0  ;;  %v5784_v13 = vmul.f32 %v14525_v47, %v5715_v42  ;;  %v8546_v48 = vpop.f32.mrb[134].mxu0  ;;  %vm5965_vm11 = vcmp.gt.f32.partialorder %v14553_v16, 20.0 }
 0x820   :  { %v5841_v4 = vmul.f32 1.442695, %v5822_v22  ;;  %v14561_v49 = vadd.f32 %v14531_v31, %v5785_v25  ;;  %v5730_v35 = vadd.f32 %v8546_v48, %v14502_v39  ;;  %v5724_v8 = vpop.f32.mrb[135].mxu0 }
 0x821   :  { %v5839_v57 = vmul.f32 1.442695, %v5821_v36  ;;  %v14565_v29 = vadd.f32 %v14531_v31, %v5784_v13  ;;  %v5725_v55 = vadd.f32 %v5724_v8, %v14499_v7 }
 0x822   :  { %9605 = vpow2.f32 %v5841_v4  ;;  %v5824_v59 = vmin.f32 %v14561_v49, 20.0  ;;  %v5787_v21 = vmul.f32 %v14525_v47, %v5730_v35  ;;  %vm5968_vm12 = vcmp.gt.f32.partialorder %v14561_v49, 20.0 }
 0x823   :  { %9607 = vpow2.f32 %v5839_v57  ;;  %v5823_v46 = vmin.f32 %v14565_v29, 20.0  ;;  %v5786_v3 = vmul.f32 %v14525_v47, %v5725_v55  ;;  %v8549_v19 = vpop.f32.mrb[136].mxu0  ;;  %vm5967_vm13 = vcmp.gt.f32.partialorder %v14565_v29, 20.0 }
 0x824   :  { %v5845_v28 = vmul.f32 1.442695, %v5824_v59  ;;  %v14573_v39 = vadd.f32 %v14531_v31, %v5787_v21  ;;  %v5740_v61 = vadd.f32 %v8549_v19, %v14508_v40  ;;  %v5734_v43 = vpop.f32.mrb[137].mxu0 }
 0x825   :  { %v5843_v10 = vmul.f32 1.442695, %v5823_v46  ;;  %v14577_v7 = vadd.f32 %v14531_v31, %v5786_v3  ;;  %v5735_v53 = vadd.f32 %v5734_v43, %v14505_v27 }
 0x826   :  { %9609 = vpow2.f32 %v5845_v28  ;;  %v5826_v1 = vmin.f32 %v14573_v39, 20.0  ;;  %v5789_v50 = vmul.f32 %v14525_v47, %v5740_v61  ;;  %vm5970_vm14 = vcmp.gt.f32.partialorder %v14573_v39, 20.0 }
 0x827   :  { %9611 = vpow2.f32 %v5843_v10  ;;  %v5825_v20 = vmin.f32 %v14577_v7, 20.0  ;;  %v5788_v15 = vmul.f32 %v14525_v47, %v5735_v53  ;;  %v8552_v6 = vpop.f32.mrb[138].mxu0  ;;  %vm5969_vm6 = vcmp.gt.f32.partialorder %v14577_v7, 20.0 }
 0x828   :  { %v9602_v5 = vpop.eup %9601  ;;  %v5849_v40 = vmul.f32 1.442695, %v5826_v1  ;;  %v14585_v41 = vadd.f32 %v14531_v31, %v5789_v50  ;;  %v5750_v62 = vadd.f32 %v8552_v6, %v14514_v60  ;;  %v5744_v12 = vpop.f32.mrb[139].mxu0 }
 0x829   :  { %v9604_v27 = vpop.eup %9603  ;;  %v5868_v2 = vadd.f32 2.0, %v9602_v5  ;;  %v5847_v45 = vmul.f32 1.442695, %v5825_v20  ;;  %v14589_v17 = vadd.f32 %v14531_v31, %v5788_v15  ;;  %v5745_v44 = vadd.f32 %v5744_v12, %v14511_v52 }
 0x82a   :  { %v5867_v34 = vadd.f32 2.0, %v9604_v27  ;;  %9613 = vpow2.f32 %v5849_v40  ;;  %v5828_v56 = vmin.f32 %v14585_v41, 20.0  ;;  %v5791_v30 = vmul.f32 %v14525_v47, %v5750_v62 }
 0x82b   :  { %v5884_v33 = vmul.f32 %v9602_v5, %v5868_v2  ;;  %9615 = vpow2.f32 %v5847_v45  ;;  %v5827_v23 = vmin.f32 %v14589_v17, 20.0  ;;  %v8555_v9 = vpop.f32.mrb[140].mxu0  ;;  %v5790_v63 = vmul.f32 %v14525_v47, %v5745_v44 }
 0x82c   :  { %v9606_v58 = vpop.eup %9605  ;;  %v5883_v60 = vmul.f32 %v9604_v27, %v5867_v34  ;;  %v5853_v51 = vmul.f32 1.442695, %v5828_v56  ;;  %v5754_v24 = vpop.f32.mrb[141].mxu0  ;;  %v14597_v48 = vadd.f32 %v14531_v31, %v5791_v30  ;;  %v5760_v55 = vadd.f32 %v8555_v9, %v14520_v38 }
 0x82d   :  { %v9608_v26 = vpop.eup %9607  ;;  %v5916_v42 = vadd.f32 2.0, %v5884_v33  ;;  %v5870_v52 = vadd.f32 2.0, %v9606_v58  ;;  %v5851_v22 = vmul.f32 1.442695, %v5827_v23  ;;  %v14600_v4 = vadd.f32 %v14531_v31, %v5790_v63 }
 0x82e   :  { %v5915_v25 = vadd.f32 2.0, %v5883_v60  ;;  %v5869_v36 = vadd.f32 2.0, %v9608_v26  ;;  %9617 = vpow2.f32 %v5853_v51  ;;  %v5755_v59 = vadd.f32 %v5754_v24, %v14517_v0 }
 0x82f   :  { %9619 = vrcp.f32 %v5916_v42  ;;  %v5886_v13 = vmul.f32 %v9606_v58, %v5870_v52  ;;  %v8558_v35 = vpop.f32.mrb[142].mxu0  ;;  %v5830_v43 = vmin.f32 %v14597_v48, 20.0  ;;  %v5829_v53 = vmin.f32 %v14600_v4, 20.0 }
 0x830   :  { %v9610_v8 = vpop.eup %9609  ;;  %9621 = vrcp.f32 %v5915_v25  ;;  %v5885_v57 = vmul.f32 %v9608_v26, %v5869_v36  ;;  %v5764_v21 = vpop.f32.mrb[143].mxu0  ;;  %v5900_v5 = vmul.f32 %v5884_v33, %v14537_v11  ;;  %v5793_v27 = vmul.f32 %v14525_v47, %v5760_v55 }
 0x831   :  { %v9612_v46 = vpop.eup %9611  ;;  %v5918_v3 = vadd.f32 2.0, %v5886_v13  ;;  %v5872_v19 = vadd.f32 2.0, %v9610_v8  ;;  %9623 = vpow2.f32 %v5851_v22  ;;  %v5857_v50 = vmul.f32 1.442695, %v5830_v43 }
 0x832   :  { %v5917_v28 = vadd.f32 2.0, %v5885_v57  ;;  %v5871_v61 = vadd.f32 2.0, %v9612_v46  ;;  %v5855_v6 = vmul.f32 1.442695, %v5829_v53  ;;  %v5792_v2 = vmul.f32 %v14525_v47, %v5755_v59 }
 0x833   :  { %9625 = vrcp.f32 %v5918_v3  ;;  %v5888_v10 = vmul.f32 %v9610_v8, %v5872_v19  ;;  %v5770_v34 = vadd.f32 %v8558_v35, %v14528_v54  ;;  %v5765_v56 = vadd.f32 %v5764_v21, %v14523_v14 }
 0x834   :  { %v9614_v1 = vpop.eup %9613  ;;  %9627 = vrcp.f32 %v5917_v28  ;;  %v5887_v38 = vmul.f32 %v9612_v46, %v5871_v61  ;;  %v5899_v23 = vmul.f32 %v5883_v60, %v14541_v37  ;;  %v5902_v63 = vmul.f32 %v5886_v13, %v14549_v18 }
 0x835   :  { %v9616_v0 = vpop.eup %9615  ;;  %v5920_v20 = vadd.f32 2.0, %v5888_v10  ;;  %v5874_v15 = vadd.f32 2.0, %v9614_v1  ;;  %9629 = vpow2.f32 %v5857_v50  ;;  %v14624_v26 = vadd.f32 %v14531_v31, %v5793_v27 }
 0x836   :  { %v5919_v40 = vadd.f32 2.0, %v5887_v38  ;;  %v5873_v62 = vadd.f32 2.0, %v9616_v0  ;;  %v14629_v60 = vadd.f32 %v14531_v31, %v5792_v2  ;;  %v5901_v35 = vmul.f32 %v5885_v57, %v14553_v16 }
 0x837   :  { %9631 = vrcp.f32 %v5920_v20  ;;  %v14610_v12 = vmul.f32 %v9614_v1, %v5874_v15  ;;  %v5832_v25 = vmin.f32 %v14624_v26, 20.0  ;;  %v5904_v19 = vmul.f32 %v5888_v10, %v14561_v49 }
 0x838   :  { %v9618_v45 = vpop.eup %9617  ;;  %9633 = vrcp.f32 %v5919_v40  ;;  %v14615_v44 = vmul.f32 %v9616_v0, %v5873_v62  ;;  %v5831_v46 = vmin.f32 %v14629_v60, 20.0  ;;  %v5795_v28 = vmul.f32 %v14525_v47, %v5770_v34 }
 0x839   :  { %v9620_v33 = vpop.eup %9619  ;;  %v5922_v9 = vadd.f32 2.0, %v14610_v12  ;;  %v5876_v58 = vadd.f32 2.0, %v9618_v45  ;;  %9635 = vpow2.f32 %v5855_v6  ;;  %v5861_v21 = vmul.f32 1.442695, %v5832_v25 }
 0x83a   :  { %v9622_v51 = vpop.eup %9621  ;;  %v5948_v30 = vmul.f32 %v9620_v33, %v5900_v5  ;;  %v5921_v24 = vadd.f32 2.0, %v14615_v44  ;;  %v5903_v61 = vmul.f32 %v5887_v38, %v14565_v29  ;;  %v5859_v10 = vmul.f32 1.442695, %v5831_v46 }
 0x83b   :  { %v9624_v42 = vpop.eup %9623  ;;  %v5947_v54 = vmul.f32 %v9622_v51, %v5899_v23  ;;  %9637 = vrcp.f32 %v5922_v9  ;;  %v14626_v14 = vmul.f32 %v9618_v45, %v5876_v58  ;;  %v14652_v0 = vadd.f32 %v14531_v31, %v5795_v28 }
 0x83c   :  { %v5980_v52 = vsel %vm5964_vm2, %v14537_v11, %v5948_v30  ;;  %9639 = vrcp.f32 %v5921_v24  ;;  %v5875_v22 = vadd.f32 2.0, %v9624_v42  ;;  %v5906_v62 = vmul.f32 %v14610_v12, %v14573_v39 }
 0x83d   :  { %v9626_v36 = vpop.eup %9625  ;;  %5996 = vst [vmem:[#allocation5 + $0x8] sm:$0xff] %v5980_v52  ;;  %v5979_v13 = vsel %vm5963_vm3, %v14541_v37, %v5947_v54  ;;  %v5924_v8 = vadd.f32 2.0, %v14626_v14  ;;  %v5834_v40 = vmin.f32 %v14652_v0, 20.0  ;;  %v5905_v34 = vmul.f32 %v14615_v44, %v14577_v7 }
 0x83e   :  { %v9628_v55 = vpop.eup %9627  ;;  %5995 = vst [vmem:[#allocation5] sm:$0xff] %v5979_v13  ;;  %v5950_v59 = vmul.f32 %v9626_v36, %v5902_v63  ;;  %v5891_v11 = vmul.f32 %v9624_v42, %v5875_v22  ;;  %vm5972_vm1 = vcmp.gt.f32.partialorder %v14585_v41, 20.0  ;;  %vm5971_vm4 = vcmp.gt.f32.partialorder %v14589_v17, 20.0 }
 0x83f   :  { %v5949_v3 = vmul.f32 %v9628_v55, %v5901_v35  ;;  %9641 = vrcp.f32 %v5924_v8  ;;  %v9630_v37 = vpop.eup %9629  ;;  %v5865_v33 = vmul.f32 1.442695, %v5834_v40  ;;  %vm5974_vm5 = vcmp.gt.f32.partialorder %v14597_v48, 20.0 }
 0x840   :  { %v5982_v57 = vsel %vm5966_vm15, %v14549_v18, %v5950_v59  ;;  %v5923_v43 = vadd.f32 2.0, %v5891_v11  ;;  %9643 = vpow2.f32 %v5861_v21  ;;  %v5878_v50 = vadd.f32 2.0, %v9630_v37 }
 0x841   :  { %v9632_v53 = vpop.eup %9631  ;;  %5998 = vst [vmem:[#allocation5 + $0x18] sm:$0xff] %v5982_v57  ;;  %v5981_v1 = vsel %vm5965_vm11, %v14553_v16, %v5949_v3  ;;  %v5794_v18 = vmul.f32 %v14525_v47, %v5765_v56  ;;  %v5907_v54 = vmul.f32 %v5891_v11, %v14589_v17  ;;  %vm5973_vm0 = vcmp.gt.f32.partialorder %v14600_v4, 20.0 }
 0x842   :  { %v9634_v20 = vpop.eup %9633  ;;  %5997 = vst [vmem:[#allocation5 + $0x10] sm:$0xff] %v5981_v1  ;;  %v5952_v15 = vmul.f32 %v9632_v53, %v5904_v19  ;;  %9645 = vrcp.f32 %v5923_v43  ;;  %v5894_v5 = vmul.f32 %v9630_v37, %v5878_v50  ;;  %vm5976_vm7 = vcmp.gt.f32.partialorder %v14624_v26, 20.0 }
 0x843   :  { %v9636_v38 = vpop.eup %9635  ;;  %v5951_v6 = vmul.f32 %v9634_v20, %v5903_v61  ;;  %9647 = vpow2.f32 %v5859_v10  ;;  %v14663_v2 = vadd.f32 %v14531_v31, %v5794_v18  ;;  %vm5975_vm9 = vcmp.gt.f32.partialorder %v14629_v60, 20.0 }
 0x844   :  { %v5984_v16 = vsel %vm5968_vm12, %v14561_v49, %v5952_v15  ;;  %v5877_v27 = vadd.f32 2.0, %v9636_v38  ;;  %v5926_v56 = vadd.f32 2.0, %v5894_v5  ;;  %v5910_v11 = vmul.f32 %v5894_v5, %v14597_v48 }
 0x845   :  { %v9638_v45 = vpop.eup %9637  ;;  %6000 = vst [vmem:[#allocation5 + $0x28] sm:$0xff] %v5984_v16  ;;  %v5983_v47 = vsel %vm5967_vm13, %v14565_v29, %v5951_v6  ;;  %v5833_v58 = vmin.f32 %v14663_v2, 20.0  ;;  %v5908_v29 = vmul.f32 %v14626_v14, %v14585_v41  ;;  %v6027_v22 = vld [vmem:[#allocation5 + $0x1] ss:$2 sm:$0xff]  ;;  %vm5978_vm10 = vcmp.gt.f32.partialorder %v14652_v0, 20.0 }
 0x846   :  { %v9640_v23 = vpop.eup %9639  ;;  %5999 = vst [vmem:[#allocation5 + $0x20] sm:$0xff] %v5983_v47  ;;  %v5954_v9 = vmul.f32 %v9638_v45, %v5906_v62  ;;  %v5893_v49 = vmul.f32 %v9636_v38, %v5877_v27  ;;  %9649 = vrcp.f32 %v5926_v56  ;;  %v6092_v56 = vld [vmem:[#allocation17 + $0x10] sm:$0xff]  ;;  %vm5977_vm2 = vcmp.gt.f32.partialorder %v14663_v2, 20.0 }
 0x847   :  { %v5953_v12 = vmul.f32 %v9640_v23, %v5905_v34  ;;  %9651 = vpow2.f32 %v5865_v33  ;;  %v5863_v63 = vmul.f32 1.442695, %v5833_v58  ;;  %v6090_v34 = vld [vmem:[#allocation17] sm:$0xff]  ;;  %v6529_v23 = vld [vmem:[#allocation17 + $0x410] sm:$0xff]  ;;  %v6095_v58 = vld [vmem:[#allocation17 + $0x28] sm:$0xff]  ;;  %vm8025_vm11 = vcmask 25600  }
 0x848   :  { %v5986_v31 = vsel %vm5970_vm14, %v14573_v39, %v5954_v9  ;;  %v5925_v44 = vadd.f32 2.0, %v5893_v49  ;;  %v6011_v39 = vld [vmem:[#allocation5] ss:$2 sm:$0xff]  ;;  %v5909_v37 = vmul.f32 %v5893_v49, %v14600_v4  ;;  %v14695_v33 = vld [vmem:[#allocation17 + $0x400] sm:$0xff] }
 0x849   :  { %v9642_v51 = vpop.eup %9641  ;;  %6002 = vst [vmem:[#allocation5 + $0x38] sm:$0xff] %v5986_v31  ;;  %v5985_v30 = vsel %vm5969_vm6, %v14577_v7, %v5953_v12  ;;  %v6042_v8 = vadd.f32 %v6027_v22, %v6011_v39  ;;  %v6013_v50 = vld [vmem:[#allocation5 + $0x10] ss:$2 sm:$0xff]  ;;  %v6029_v10 = vld [vmem:[#allocation5 + $0x11] ss:$2 sm:$0xff]  ;;  %v6532_v39 = vld [vmem:[#allocation17 + $0x428] sm:$0xff] }
 0x84a   :  { %v9644_v24 = vpop.eup %9643  ;;  %6001 = vst [vmem:[#allocation5 + $0x30] sm:$0xff] %v5985_v30  ;;  %v5956_v42 = vmul.f32 %v9642_v51, %v5908_v29  ;;  %9653 = vrcp.f32 %v5925_v44  ;;  %v6043_v16 = vadd.f32 %v6029_v10, %v6013_v50  ;;  %v6097_v12 = vld [vmem:[#allocation17 + $0x38] sm:$0xff]  ;;  %v8679_v44 = vpack.c.bf16 %v6092_v56, %v6090_v34  ;;  %v14699_v51 = vld [vmem:[#allocation17 + $0x20] sm:$0xff]  ;;  %v14701_v30 = vld [vmem:[#allocation17 + $0x30] sm:$0xff] }
 0x84b   :  { %v5880_v52 = vadd.f32 2.0, %v9644_v24  ;;  %9655 = vpow2.f32 %v5863_v63  ;;  %v6058_v28 = vrot.slane %v6042_v8, 4  ;;  %v6534_v22 = vld [vmem:[#allocation17 + $0x438] sm:$0xff] }
 0x84c   :  { %v9646_v14 = vpop.eup %9645  ;;  %v5988_v25 = vsel %vm5972_vm1, %v14585_v41, %v5956_v42  ;;  %v6059_v31 = vrot.slane %v6043_v16, 4  ;;  %v6538_v50 = vld [vmem:[#allocation17 + $0x458] sm:$0xff] }
 0x84d   :  { %v9648_v36 = vpop.eup %9647  ;;  %6004 = vst [vmem:[#allocation5 + $0x48] sm:$0xff] %v5988_v25  ;;  %v5955_v13 = vmul.f32 %v9646_v14, %v5907_v54  ;;  %v5896_v7 = vmul.f32 %v9644_v24, %v5880_v52  ;;  %v6074_v15 = vadd.f32 %v6058_v28, %v6042_v8  ;;  %v8775_v52 = vpack.c.bf16 %v6529_v23, %v14695_v33  ;;  %v14708_v14 = vld [vmem:[#allocation17 + $0x48] sm:$0xff]  ;;  %v6533_v28 = vld [vmem:[#allocation17 + $0x430] sm:$0xff] }
 0x84e   :  { %v5879_v35 = vadd.f32 2.0, %v9648_v36 }
 0x84f   :  { %v5987_v55 = vsel %vm5971_vm4, %v14589_v17, %v5955_v13  ;;  %v5928_v59 = vadd.f32 2.0, %v5896_v7  ;;  %v5912_v62 = vmul.f32 %v5896_v7, %v14624_v26  ;;  %v14693_v47 = vmul.f32 0.25, %v6074_v15 }
 0x850   :  { %6003 = vst [vmem:[#allocation5 + $0x40] sm:$0xff] %v5987_v55  ;;  %v5895_v21 = vmul.f32 %v9648_v36, %v5879_v35  ;;  %v9650_v46 = vpop.eup %9649  ;;  %v8681_v13 = vpack.c.bf16 %v6097_v12, %v6095_v58  ;;  %v6101_v55 = vld [vmem:[#allocation17 + $0x58] sm:$0xff]  ;;  %v6102_v58 = vld [vmem:[#allocation17 + $0x60] sm:$0xff]  ;;  %v6540_v12 = vld [vmem:[#allocation17 + $0x468] sm:$0xff] }
 0x851   :  { %9657 = vrcp.f32 %v5928_v59  ;;  %v9652_v3 = vpop.eup %9651  ;;  %v5958_v19 = vmul.f32 %v9650_v46, %v5910_v11  ;;  %v6157_v54 = vrot.slane %v14693_v47, 1  ;;  %v6449_v36 = vrot.slane %v14693_v47, 3  ;;  %v6031_v46 = vld [vmem:[#allocation5 + $0x21] ss:$2 sm:$0xff] }
 0x852   :  { %v5927_v41 = vadd.f32 2.0, %v5895_v21  ;;  %v5882_v57 = vadd.f32 2.0, %v9652_v3  ;;  %v5911_v29 = vmul.f32 %v5895_v21, %v14629_v60  ;;  %v6075_v11 = vadd.f32 %v6059_v31, %v6043_v16  ;;  %v6015_v21 = vld [vmem:[#allocation5 + $0x20] ss:$2 sm:$0xff]  ;;  %v6542_v31 = vld [vmem:[#allocation17 + $0x478] sm:$0xff] }
 0x853   :  { %v5990_v43 = vsel %vm5974_vm5, %v14597_v48, %v5958_v19  ;;  %v8777_v19 = vpack.c.bf16 %v6534_v22, %v6532_v39  ;;  %v8685_v15 = vpack.c.bf16 %v6101_v55, %v14708_v14  ;;  %v6546_v55 = vld [vmem:[#allocation17 + $0x498] sm:$0xff] }
 0x854   :  { %v9654_v61 = vpop.eup %9653  ;;  %9659 = vrcp.f32 %v5927_v41  ;;  %6006 = vst [vmem:[#allocation5 + $0x58] sm:$0xff] %v5990_v43  ;;  %v14684_v1 = vmul.f32 %v9652_v3, %v5882_v57  ;;  %v6531_v41 = vld [vmem:[#allocation17 + $0x420] sm:$0xff]  ;;  %v14729_v34 = vmul.f32 0.25, %v6075_v11 }
 0x855   :  { %v9656_v17 = vpop.eup %9655  ;;  %v5957_v53 = vmul.f32 %v9654_v61, %v5909_v37  ;;  %v6339_v37 = vrot.slane %v14693_v47, 2  ;;  %v8779_v16 = vpack.c.bf16 %v6533_v28, %v6531_v41 }
 0x856   :  { %v5881_v20 = vadd.f32 2.0, %v9656_v17  ;;  %v5930_v38 = vadd.f32 2.0, %v14684_v1  ;;  %v5914_v61 = vmul.f32 %v14684_v1, %v14652_v0  ;;  %v6537_v1 = vld [vmem:[#allocation17 + $0x450] sm:$0xff]  ;;  %v6889_v22 = vrot.slane %v14729_v34, 3 }
 0x857   :  { %v5989_v18 = vsel %vm5973_vm0, %v14600_v4, %v5957_v53  ;;  %v6019_v6 = vld [vmem:[#allocation5 + $0x40] ss:$2 sm:$0xff]  ;;  %v6035_v5 = vld [vmem:[#allocation5 + $0x41] ss:$2 sm:$0xff]  ;;  %v6098_v53 = vld [vmem:[#allocation17 + $0x40] sm:$0xff] }
 0x858   :  { %6005 = vst [vmem:[#allocation5 + $0x50] sm:$0xff] %v5989_v18  ;;  %v14689_v48 = vmul.f32 %v9656_v17, %v5881_v20  ;;  %v6046_v40 = vadd.f32 %v6035_v5, %v6019_v6  ;;  %9661 = vrcp.f32 %v5930_v38  ;;  %v8683_v17 = vpack.c.bf16 %v14701_v30, %v14699_v51  ;;  %v6100_v18 = vld [vmem:[#allocation17 + $0x50] sm:$0xff]  ;;  %v6535_v38 = vld [vmem:[#allocation17 + $0x440] sm:$0xff] }
 0x859   :  { %v6044_v5 = vadd.f32 %v6031_v46, %v6015_v21  ;;  %v6539_v30 = vld [vmem:[#allocation17 + $0x460] sm:$0xff] }
 0x85a   :  { %v5929_v27 = vadd.f32 2.0, %v14689_v48  ;;  %v6062_v45 = vrot.slane %v6046_v40, 4  ;;  %v5913_v56 = vmul.f32 %v14689_v48, %v14663_v2  ;;  %v6104_v48 = vld [vmem:[#allocation17 + $0x70] sm:$0xff] }
 0x85b   :  { %v9658_v4 = vpop.eup %9657 }
 0x85c   :  { %v5960_v9 = vmul.f32 %v9658_v4, %v5912_v62  ;;  %9663 = vrcp.f32 %v5929_v27  ;;  %v6078_v49 = vadd.f32 %v6062_v45, %v6046_v40  ;;  %v6103_v62 = vld [vmem:[#allocation17 + $0x68] sm:$0xff]  ;;  %v6105_v27 = vld [vmem:[#allocation17 + $0x78] sm:$0xff] }
 0x85d   :  { %v8689_v51 = vpack.c.bf16 %v6105_v27, %v6103_v62 }
 0x85e   :  { %v9660_v63 = vpop.eup %9659  ;;  %v5992_v24 = vsel %vm5976_vm7, %v14624_v26, %v5960_v9  ;;  %v14704_v42 = vmul.f32 0.25, %v6078_v49  ;;  %v8687_v9 = vpack.c.bf16 %v6100_v18, %v6098_v53  ;;  %v8783_v49 = vpack.c.bf16 %v6537_v1, %v6535_v38  ;;  %v6545_v53 = vld [vmem:[#allocation17 + $0x490] sm:$0xff]  ;;  %v6115_v1 = vld [vmem:[#allocation17 + $0xc8] sm:$0xff] }
 0x85f   :  { %6008 = vst [vmem:[#allocation5 + $0x68] sm:$0xff] %v5992_v24  ;;  %v5959_v25 = vmul.f32 %v9660_v63, %v5911_v29  ;;  %v6021_v7 = vld [vmem:[#allocation5 + $0x50] ss:$2 sm:$0xff]  ;;  %v6037_v35 = vld [vmem:[#allocation5 + $0x51] ss:$2 sm:$0xff]  ;;  %v6541_v63 = vld [vmem:[#allocation17 + $0x470] sm:$0xff] }
 0x860   :  { %v6159_v26 = vsel %vm6158_vm8, %v14704_v42, %v6157_v54  ;;  %v6450_v8 = vrot.slane %v14704_v42, 2  ;;  %v6047_v59 = vadd.f32 %v6037_v35, %v6021_v7  ;;  %v6340_v57 = vrot.slane %v14704_v42, 1  ;;  %v6109_v54 = vld [vmem:[#allocation17 + $0x98] sm:$0xff]  ;;  %v6112_v38 = vld [vmem:[#allocation17 + $0xb0] sm:$0xff] }
 0x861   :  { %v5991_v3 = vsel %vm5975_vm9, %v14629_v60, %v5959_v25  ;;  %6226 = vmatmul.mubr.f32.vlgmr.msra.gmra.mrb[144].mxu0 %v6159_v26  ;;  %v6536_v60 = vld [vmem:[#allocation17 + $0x448] sm:$0xff]  ;;  %v6060_v24 = vrot.slane %v6044_v5, 4  ;;  %v6017_v7 = vld [vmem:[#allocation5 + $0x30] ss:$2 sm:$0xff]  ;;  %v6033_v35 = vld [vmem:[#allocation5 + $0x31] ss:$2 sm:$0xff]  ;;  %v8691_v26 = vpack.c.bf16 %v6104_v48, %v6102_v58  ;;  %v8787_v28 = vpack.c.bf16 %v6541_v63, %v6539_v30 }
 0x862   :  { %6007 = vst [vmem:[#allocation5 + $0x60] sm:$0xff] %v5991_v3  ;;  %8680 = vmatpush1.bf16.msra.mxu0 %v8679_v44  ;;  %v6451_v43 = vsel %vm6158_vm8, %v6450_v8, %v6449_v36  ;;  %6299 = vmatprep.mubr.f32.mxu0 %v14962_v32  ;;  %v6063_v10 = vrot.slane %v6047_v59, 4  ;;  %v9662_v20 = vpop.eup %9661  ;;  %v14726_v6 = vsel %vm6158_vm8, %v6340_v57, %v6339_v37  ;;  %v6544_v8 = vld [vmem:[#allocation17 + $0x488] sm:$0xff]  ;;  %v6108_v3 = vld [vmem:[#allocation17 + $0x90] sm:$0xff]  ;;  %v6113_v57 = vld [vmem:[#allocation17 + $0xb8] sm:$0xff] }
 0x863   :  { %6518 = vmatmul.mubr.f32.vlgmr.msra.gmra.mrb[0].mxu1 %v6451_v43  ;;  %8682 = vmatprep.subr.bf16.mxu0 %v8681_v13  ;;  %v5962_v40 = vmul.f32 %v9662_v20, %v5914_v61  ;;  %v8781_v4 = vpack.c.bf16 %v6538_v50, %v6536_v60  ;;  %v8785_v36 = vpack.c.bf16 %v6542_v31, %v6540_v12  ;;  %v6111_v37 = vld [vmem:[#allocation17 + $0xa8] sm:$0xff]  ;;  %v6554_v12 = vld [vmem:[#allocation17 + $0x4d8] sm:$0xff] }
 0x864   :  { %8776 = vmatpush1.bf16.msra.mxu1 %v8775_v52  ;;  %6628 = vmatprep.mubr.f32.mxu1 %v14962_v32  ;;  %v6079_v45 = vadd.f32 %v6063_v10, %v6047_v59  ;;  %v6779_v52 = vrot.slane %v14729_v34, 2  ;;  %v6076_v41 = vadd.f32 %v6060_v24, %v6044_v5  ;;  %v6045_v61 = vadd.f32 %v6033_v35, %v6017_v7  ;;  %v6110_v10 = vld [vmem:[#allocation17 + $0xa0] sm:$0xff]  ;;  %v6548_v20 = vld [vmem:[#allocation17 + $0x4a8] sm:$0xff]  ;;  %v6117_v5 = vld [vmem:[#allocation17 + $0xd8] sm:$0xff] }
 0x865   :  { %8778 = vmatprep.subr.bf16.mxu1 %v8777_v19  ;;  %v5994_v23 = vsel %vm5978_vm10, %v14652_v0, %v5962_v40  ;;  %v6107_v0 = vld [vmem:[#allocation17 + $0x88] sm:$0xff]  ;;  %v8789_v43 = vpack.c.bf16 %v6546_v55, %v6544_v8  ;;  %v8697_v18 = vpack.c.bf16 %v6113_v57, %v6111_v37  ;;  %v6558_v8 = vld [vmem:[#allocation17 + $0x4f8] sm:$0xff] }
 0x866   :  { %v9664_v33 = vpop.eup %9663  ;;  %8684 = vmatpush1.bf16.msra.mxu0 %v8683_v17  ;;  %v14735_v29 = vmul.f32 0.25, %v6079_v45  ;;  %6010 = vst [vmem:[#allocation5 + $0x78] sm:$0xff] %v5994_v23  ;;  %v8693_v46 = vpack.c.bf16 %v6109_v54, %v6107_v0  ;;  %v6543_v17 = vld [vmem:[#allocation17 + $0x480] sm:$0xff]  ;;  %v6061_v27 = vrot.slane %v6045_v61, 4  ;;  %v6552_v58 = vld [vmem:[#allocation17 + $0x4c8] sm:$0xff]  ;;  %v6310_v37 = vld [vmem:[#allocation17 + $0x218] sm:$0xff] }
 0x867   :  { %v5961_v44 = vmul.f32 %v9664_v33, %v5913_v56  ;;  %8686 = vmatprep.subr.bf16.mxu0 %v8685_v15  ;;  %v6550_v15 = vld [vmem:[#allocation17 + $0x4b8] sm:$0xff]  ;;  %v8791_v62 = vpack.c.bf16 %v6545_v53, %v6543_v17  ;;  %v6547_v56 = vld [vmem:[#allocation17 + $0x4a0] sm:$0xff]  ;;  %v6119_v54 = vld [vmem:[#allocation17 + $0xe8] sm:$0xff] }
 0x868   :  { %8780 = vmatpush1.bf16.msra.mxu1 %v8779_v16  ;;  %v6780_v39 = vrot.slane %v14735_v29, 1  ;;  %v6890_v14 = vrot.slane %v14735_v29, 2  ;;  %v14749_v16 = vmul.f32 0.25, %v6076_v41  ;;  %v8793_v45 = vpack.c.bf16 %v6550_v15, %v6548_v20  ;;  %v6557_v41 = vld [vmem:[#allocation17 + $0x4f0] sm:$0xff]  ;;  %v6639_v53 = vld [vmem:[#allocation17 + $0x508] sm:$0xff] }
 0x869   :  { %v5993_v25 = vsel %vm5977_vm2, %v14663_v2, %v5961_v44  ;;  %8782 = vmatprep.subr.bf16.mxu1 %v8781_v4  ;;  %v6023_v13 = vld [vmem:[#allocation5 + $0x60] ss:$2 sm:$0xff]  ;;  %v6039_v21 = vld [vmem:[#allocation5 + $0x61] ss:$2 sm:$0xff]  ;;  %v6106_v2 = vld [vmem:[#allocation17 + $0x80] sm:$0xff]  ;;  %v6232_v20 = vrot.slane %v14704_v42, 7 }
 0x86a   :  { %6009 = vst [vmem:[#allocation5 + $0x70] sm:$0xff] %v5993_v25  ;;  %8688 = vmatpush1.bf16.msra.mxu0 %v8687_v9  ;;  %v14744_v59 = vsel %vm6158_vm8, %v6780_v39, %v6779_v52  ;;  %v14747_v11 = vsel %vm6158_vm8, %v6890_v14, %v6889_v22  ;;  %v6048_v19 = vadd.f32 %v6039_v21, %v6023_v13  ;;  %v6549_v4 = vld [vmem:[#allocation17 + $0x4b0] sm:$0xff]  ;;  %v6114_v44 = vld [vmem:[#allocation17 + $0xc0] sm:$0xff]  ;;  %v7219_v48 = vrot.slane %v14749_v16, 2  ;;  %v6121_v52 = vld [vmem:[#allocation17 + $0xf8] sm:$0xff] }
 0x86b   :  { %8690 = vmatprep.subr.bf16.mxu0 %v8689_v51  ;;  %v8695_v50 = vpack.c.bf16 %v6108_v3, %v6106_v2  ;;  %v8699_v9 = vpack.c.bf16 %v6112_v38, %v6110_v10  ;;  %v6116_v51 = vld [vmem:[#allocation17 + $0xd0] sm:$0xff]  ;;  %v7329_v63 = vrot.slane %v14749_v16, 3  ;;  %v8795_v0 = vpack.c.bf16 %v6549_v4, %v6547_v56  ;;  %v6551_v25 = vld [vmem:[#allocation17 + $0x4c0] sm:$0xff] }
 0x86c   :  { %8784 = vmatpush1.bf16.msra.mxu1 %v8783_v49  ;;  %v6064_v60 = vrot.slane %v6048_v19, 4  ;;  %v8701_v49 = vpack.c.bf16 %v6117_v5, %v6115_v1  ;;  %v6077_v22 = vadd.f32 %v6061_v27, %v6045_v61  ;;  %v8797_v14 = vpack.c.bf16 %v6554_v12, %v6552_v58  ;;  %v6120_v2 = vld [vmem:[#allocation17 + $0xf0] sm:$0xff]  ;;  %v6555_v3 = vld [vmem:[#allocation17 + $0x4e0] sm:$0xff]  ;;  %v6312_v1 = vld [vmem:[#allocation17 + $0x228] sm:$0xff] }
 0x86d   :  { %8786 = vmatprep.subr.bf16.mxu1 %v8785_v36  ;;  %v6553_v36 = vld [vmem:[#allocation17 + $0x4d0] sm:$0xff]  ;;  %v8703_v35 = vpack.c.bf16 %v6116_v51, %v6114_v44  ;;  %v8705_v21 = vpack.c.bf16 %v6121_v52, %v6119_v54  ;;  %v8803_v10 = vpack.c.bf16 %v6557_v41, %v6555_v3  ;;  %v6314_v5 = vld [vmem:[#allocation17 + $0x238] sm:$0xff]  ;;  %v6638_v4 = vld [vmem:[#allocation17 + $0x500] sm:$0xff] }
 0x86e   :  { %8692 = vmatpush1.bf16.msra.mxu0 %v8691_v26  ;;  %v6080_v40 = vadd.f32 %v6064_v60, %v6048_v19  ;;  %v6556_v26 = vld [vmem:[#allocation17 + $0x4e8] sm:$0xff]  ;;  %v8799_v19 = vpack.c.bf16 %v6553_v36, %v6551_v25  ;;  %v14763_v61 = vmul.f32 0.25, %v6077_v22  ;;  %v6641_v60 = vld [vmem:[#allocation17 + $0x518] sm:$0xff]  ;;  %v6309_v38 = vld [vmem:[#allocation17 + $0x210] sm:$0xff]  ;;  %v8713_v44 = vpack.c.bf16 %v6314_v5, %v6312_v1 }
 0x86f   :  { %8694 = vmatprep.subr.bf16.mxu0 %v8693_v46  ;;  %v6118_v46 = vld [vmem:[#allocation17 + $0xe0] sm:$0xff]  ;;  %v8805_v56 = vpack.c.bf16 %v6641_v60, %v6639_v53  ;;  %v6645_v58 = vld [vmem:[#allocation17 + $0x538] sm:$0xff]  ;;  %v6647_v25 = vld [vmem:[#allocation17 + $0x548] sm:$0xff] }
 0x870   :  { %8788 = vmatpush1.bf16.msra.mxu1 %v8787_v28  ;;  %v14751_v33 = vmul.f32 0.25, %v6080_v40  ;;  %v6308_v28 = vld [vmem:[#allocation17 + $0x208] sm:$0xff]  ;;  %v8707_v17 = vpack.c.bf16 %v6120_v2, %v6118_v46  ;;  %v7659_v40 = vrot.slane %v14763_v61, 2  ;;  %v7769_v27 = vrot.slane %v14763_v61, 3  ;;  %v6311_v51 = vld [vmem:[#allocation17 + $0x220] sm:$0xff]  ;;  %v6649_v36 = vld [vmem:[#allocation17 + $0x558] sm:$0xff] }
 0x871   :  { %8790 = vmatprep.subr.bf16.mxu1 %v8789_v43  ;;  %v6025_v23 = vld [vmem:[#allocation5 + $0x70] ss:$2 sm:$0xff]  ;;  %v6041_v31 = vld [vmem:[#allocation5 + $0x71] ss:$2 sm:$0xff]  ;;  %v8801_v43 = vpack.c.bf16 %v6558_v8, %v6556_v26  ;;  %v8709_v15 = vpack.c.bf16 %v6310_v37, %v6308_v28  ;;  %v6317_v26 = vld [vmem:[#allocation17 + $0x250] sm:$0xff]  ;;  %v8813_v46 = vpack.c.bf16 %v6649_v36, %v6647_v25 }
 0x872   :  { %8696 = vmatpush1.bf16.msra.mxu0 %v8695_v50  ;;  %v7220_v30 = vrot.slane %v14751_v33, 1  ;;  %v7330_v24 = vrot.slane %v14751_v33, 2  ;;  %v6049_v39 = vadd.f32 %v6041_v31, %v6025_v23  ;;  %v6640_v23 = vld [vmem:[#allocation17 + $0x510] sm:$0xff]  ;;  %v6642_v52 = vld [vmem:[#allocation17 + $0x520] sm:$0xff]  ;;  %v6651_v41 = vld [vmem:[#allocation17 + $0x568] sm:$0xff] }
 0x873   :  { %8698 = vmatprep.subr.bf16.mxu0 %v8697_v18  ;;  %v6307_v18 = vld [vmem:[#allocation17 + $0x200] sm:$0xff]  ;;  %v6648_v3 = vld [vmem:[#allocation17 + $0x550] sm:$0xff]  ;;  %v6653_v28 = vld [vmem:[#allocation17 + $0x578] sm:$0xff] }
 0x874   :  { %8792 = vmatpush1.bf16.msra.mxu1 %v8791_v62  ;;  %v14758_v13 = vsel %vm6158_vm8, %v7220_v30, %v7219_v48  ;;  %v14761_v7 = vsel %vm6158_vm8, %v7330_v24, %v7329_v63  ;;  %v6065_v55 = vrot.slane %v6049_v39, 4  ;;  %v8711_v42 = vpack.c.bf16 %v6309_v38, %v6307_v18  ;;  %v6313_v48 = vld [vmem:[#allocation17 + $0x230] sm:$0xff]  ;;  %v6316_v24 = vld [vmem:[#allocation17 + $0x248] sm:$0xff]  ;;  %v6646_v2 = vld [vmem:[#allocation17 + $0x540] sm:$0xff] }
 0x875   :  { %8794 = vmatprep.subr.bf16.mxu1 %v8793_v45  ;;  %v6233_v30 = vsel %vm6158_vm8, %v6232_v20, %v14693_v47  ;;  %v8807_v63 = vpack.c.bf16 %v6640_v23, %v6638_v4  ;;  %v6324_v53 = vld [vmem:[#allocation17 + $0x288] sm:$0xff]  ;;  %v6326_v60 = vld [vmem:[#allocation17 + $0x298] sm:$0xff]  ;;  %v6650_v20 = vld [vmem:[#allocation17 + $0x560] sm:$0xff] }
 0x876   :  { %8700 = vmatpush1.bf16.msra.mxu0 %v8699_v9  ;;  %v6081_v57 = vadd.f32 %v6065_v55, %v6049_v39  ;;  %v6561_v9 = vrot.slane %v14735_v29, 7  ;;  %v6644_v39 = vld [vmem:[#allocation17 + $0x530] sm:$0xff]  ;;  %v6320_v55 = vld [vmem:[#allocation17 + $0x268] sm:$0xff]  ;;  %v6657_v1 = vld [vmem:[#allocation17 + $0x598] sm:$0xff]  ;;  %v8725_v5 = vpack.c.bf16 %v6326_v60, %v6324_v53 }
 0x877   :  { %8702 = vmatprep.subr.bf16.mxu0 %v8701_v49  ;;  %v6643_v49 = vld [vmem:[#allocation17 + $0x528] sm:$0xff]  ;;  %v8811_v8 = vpack.c.bf16 %v6644_v39, %v6642_v52  ;;  %v6654_v23 = vld [vmem:[#allocation17 + $0x580] sm:$0xff]  ;;  %v6660_v52 = vld [vmem:[#allocation17 + $0x5b0] sm:$0xff] }
 0x878   :  { %8796 = vmatpush1.bf16.msra.mxu1 %v8795_v0  ;;  %v14765_v50 = vmul.f32 0.25, %v6081_v57  ;;  %v6318_v0 = vld [vmem:[#allocation17 + $0x258] sm:$0xff]  ;;  %v8809_v54 = vpack.c.bf16 %v6645_v58, %v6643_v49  ;;  %v6562_v22 = vsel %vm6158_vm8, %v6561_v9, %v14729_v34  ;;  %v6319_v57 = vld [vmem:[#allocation17 + $0x260] sm:$0xff]  ;;  %v6655_v38 = vld [vmem:[#allocation17 + $0x588] sm:$0xff] }
 0x879   :  { %8798 = vmatprep.subr.bf16.mxu1 %v8797_v14  ;;  %v8715_v14 = vpack.c.bf16 %v6313_v48, %v6311_v51  ;;  %v8717_v47 = vpack.c.bf16 %v6318_v0, %v6316_v24  ;;  %v8821_v4 = vpack.c.bf16 %v6657_v1, %v6655_v38  ;;  %v6659_v49 = vld [vmem:[#allocation17 + $0x5a8] sm:$0xff]  ;;  %v6661_v58 = vld [vmem:[#allocation17 + $0x5b8] sm:$0xff]  ;;  %v6327_v51 = vld [vmem:[#allocation17 + $0x2a0] sm:$0xff] }
 0x87a   :  { %8704 = vmatpush1.bf16.msra.mxu0 %v8703_v35  ;;  %v7660_v62 = vrot.slane %v14765_v50, 1  ;;  %v7770_v45 = vrot.slane %v14765_v50, 2  ;;  %v6315_v35 = vld [vmem:[#allocation17 + $0x240] sm:$0xff]  ;;  %v6329_v48 = vld [vmem:[#allocation17 + $0x2b0] sm:$0xff]  ;;  %v6334_v24 = vld [vmem:[#allocation17 + $0x2d8] sm:$0xff]  ;;  %v8825_v0 = vpack.c.bf16 %v6661_v58, %v6659_v49 }
 0x87b   :  { %8706 = vmatprep.subr.bf16.mxu0 %v8705_v21  ;;  %v6322_v21 = vld [vmem:[#allocation17 + $0x278] sm:$0xff]  ;;  %v8731_v39 = vpack.c.bf16 %v6329_v48, %v6327_v51  ;;  %v6331_v36 = vld [vmem:[#allocation17 + $0x2c0] sm:$0xff]  ;;  %v6668_v53 = vld [vmem:[#allocation17 + $0x5f0] sm:$0xff] }
 0x87c   :  { %8800 = vmatpush1.bf16.msra.mxu1 %v8799_v19  ;;  %v14774_v12 = vsel %vm6158_vm8, %v7660_v62, %v7659_v40  ;;  %v14777_v31 = vsel %vm6158_vm8, %v7770_v45, %v7769_v27  ;;  %v8719_v19 = vpack.c.bf16 %v6317_v26, %v6315_v35  ;;  %v8721_v37 = vpack.c.bf16 %v6322_v21, %v6320_v55  ;;  %v6323_v40 = vld [vmem:[#allocation17 + $0x280] sm:$0xff]  ;;  %v6325_v62 = vld [vmem:[#allocation17 + $0x290] sm:$0xff]  ;;  %v6328_v45 = vld [vmem:[#allocation17 + $0x2a8] sm:$0xff] }
 0x87d   :  { %8802 = vmatprep.subr.bf16.mxu1 %v8801_v43  ;;  %v6321_v43 = vld [vmem:[#allocation17 + $0x270] sm:$0xff]  ;;  %v8727_v9 = vpack.c.bf16 %v6325_v62, %v6323_v40  ;;  %v6336_v26 = vld [vmem:[#allocation17 + $0x2e8] sm:$0xff]  ;;  %v6662_v21 = vld [vmem:[#allocation17 + $0x5c0] sm:$0xff]  ;;  %v6670_v62 = vrot.slane %v14729_v34, 1 }
 0x87e   :  { %8708 = vmatpush1.bf16.msra.mxu0 %v8707_v17  ;;  %v8815_v17 = vpack.c.bf16 %v6648_v3, %v6646_v2  ;;  %v8723_v18 = vpack.c.bf16 %v6321_v43, %v6319_v57  ;;  %v6667_v3 = vld [vmem:[#allocation17 + $0x5e8] sm:$0xff]  ;;  %v6747_v38 = vld [vmem:[#allocation17 + $0x600] sm:$0xff]  ;;  %v6749_v1 = vld [vmem:[#allocation17 + $0x610] sm:$0xff] }
 0x87f   :  { %8710 = vmatprep.subr.bf16.mxu0 %v8709_v15  ;;  %v6652_v15 = vld [vmem:[#allocation17 + $0x570] sm:$0xff]  ;;  %v6754_v40 = vld [vmem:[#allocation17 + $0x638] sm:$0xff]  ;;  %v6755_v34 = vld [vmem:[#allocation17 + $0x640] sm:$0xff] }
 0x880   :  { %8804 = vmatpush1.bf16.msra.mxu1 %v8803_v10  ;;  %v8817_v10 = vpack.c.bf16 %v6653_v28, %v6651_v41  ;;  %v8819_v27 = vpack.c.bf16 %v6652_v15, %v6650_v20  ;;  %v6335_v28 = vld [vmem:[#allocation17 + $0x2e0] sm:$0xff]  ;;  %v6750_v20 = vld [vmem:[#allocation17 + $0x618] sm:$0xff]  ;;  %v6760_v51 = vld [vmem:[#allocation17 + $0x668] sm:$0xff] }
 0x881   :  { %6300 = vmatmul.mubr.f32.vlgmr.msra.gmra.mrb[144].mxu0 %v6233_v30  ;;  %8806 = vmatprep.subr.bf16.mxu1 %v8805_v56  ;;  %v6330_v56 = vld [vmem:[#allocation17 + $0x2b8] sm:$0xff] }
 0x882   :  { %8712 = vmatpush1.bf16.msra.mxu0 %v8711_v42  ;;  %6407 = vmatprep.mubr.f32.mxu0 %v14962_v32  ;;  %v6656_v42 = vld [vmem:[#allocation17 + $0x590] sm:$0xff] }
 0x883   :  { %6629 = vmatmul.mubr.f32.vlgmr.msra.gmra.mrb[0].mxu1 %v6562_v22  ;;  %8714 = vmatprep.subr.bf16.mxu0 %v8713_v44  ;;  %v8729_v44 = vpack.c.bf16 %v6330_v56, %v6328_v45  ;;  %v8823_v30 = vpack.c.bf16 %v6656_v42, %v6654_v23  ;;  %v6663_v22 = vld [vmem:[#allocation17 + $0x5c8] sm:$0xff]  ;;  %v6751_v56 = vld [vmem:[#allocation17 + $0x620] sm:$0xff]  ;;  %v6671_v23 = vsel %vm6158_vm8, %v14735_v29, %v6670_v62  ;;  %v6863_v62 = vld [vmem:[#allocation17 + $0x730] sm:$0xff] }
 0x884   :  { %8808 = vmatpush1.bf16.msra.mxu1 %v8807_v63  ;;  %6737 = vmatprep.mubr.f32.mxu1 %v14962_v32  ;;  %v6332_v63 = vld [vmem:[#allocation17 + $0x2c8] sm:$0xff] }
 0x885   :  { %8810 = vmatprep.subr.bf16.mxu1 %v8809_v54  ;;  %v6658_v54 = vld [vmem:[#allocation17 + $0x5a0] sm:$0xff]  ;;  %v8733_v25 = vpack.c.bf16 %v6334_v24, %v6332_v63  ;;  %v6756_v42 = vld [vmem:[#allocation17 + $0x648] sm:$0xff]  ;;  %v6761_v24 = vld [vmem:[#allocation17 + $0x670] sm:$0xff] }
 0x886   :  { %8716 = vmatpush1.bf16.msra.mxu0 %v8715_v14  ;;  %v6665_v14 = vld [vmem:[#allocation17 + $0x5d8] sm:$0xff]  ;;  %v8827_v35 = vpack.c.bf16 %v6660_v52, %v6658_v54  ;;  %v6759_v63 = vld [vmem:[#allocation17 + $0x660] sm:$0xff]  ;;  %v6764_v29 = vld [vmem:[#allocation17 + $0x688] sm:$0xff] }
 0x887   :  { %8718 = vmatprep.subr.bf16.mxu0 %v8717_v47  ;;  %v6333_v47 = vld [vmem:[#allocation17 + $0x2d0] sm:$0xff]  ;;  %v8829_v55 = vpack.c.bf16 %v6665_v14, %v6663_v22  ;;  %v8851_v54 = vpack.c.bf16 %v6761_v24, %v6759_v63  ;;  %v6768_v14 = vld [vmem:[#allocation17 + $0x6a8] sm:$0xff]  ;;  %v6873_v63 = vld [vmem:[#allocation17 + $0x780] sm:$0xff] }
 0x888   :  { %8812 = vmatpush1.bf16.msra.mxu1 %v8811_v8  ;;  %v6338_v8 = vld [vmem:[#allocation17 + $0x2f8] sm:$0xff]  ;;  %v8735_v2 = vpack.c.bf16 %v6333_v47, %v6331_v36  ;;  %v6765_v22 = vld [vmem:[#allocation17 + $0x690] sm:$0xff] }
 0x889   :  { %8814 = vmatprep.subr.bf16.mxu1 %v8813_v46  ;;  %v6664_v46 = vld [vmem:[#allocation17 + $0x5d0] sm:$0xff]  ;;  %v8737_v41 = vpack.c.bf16 %v6338_v8, %v6336_v26  ;;  %v6772_v8 = vld [vmem:[#allocation17 + $0x6c8] sm:$0xff] }
 0x88a   :  { %8720 = vmatpush1.bf16.msra.mxu0 %v8719_v19  ;;  %v6669_v19 = vld [vmem:[#allocation17 + $0x5f8] sm:$0xff]  ;;  %v8831_v57 = vpack.c.bf16 %v6664_v46, %v6662_v21  ;;  %v6769_v26 = vld [vmem:[#allocation17 + $0x6b0] sm:$0xff] }
 0x88b   :  { %8722 = vmatprep.subr.bf16.mxu0 %v8721_v37  ;;  %v6337_v37 = vld [vmem:[#allocation17 + $0x2f0] sm:$0xff]  ;;  %v8833_v43 = vpack.c.bf16 %v6669_v19, %v6667_v3  ;;  %v6776_v19 = vld [vmem:[#allocation17 + $0x6e8] sm:$0xff] }
 0x88c   :  { %8816 = vmatpush1.bf16.msra.mxu1 %v8815_v17  ;;  %v6666_v17 = vld [vmem:[#allocation17 + $0x5e0] sm:$0xff]  ;;  %v8739_v60 = vpack.c.bf16 %v6337_v37, %v6335_v28  ;;  %v6773_v3 = vld [vmem:[#allocation17 + $0x6d0] sm:$0xff] }
 0x88d   :  { %8818 = vmatprep.subr.bf16.mxu1 %v8817_v10  ;;  %v6748_v10 = vld [vmem:[#allocation17 + $0x608] sm:$0xff]  ;;  %v8835_v15 = vpack.c.bf16 %v6668_v53, %v6666_v17  ;;  %v6860_v53 = vld [vmem:[#allocation17 + $0x718] sm:$0xff]  ;;  %v6875_v24 = vld [vmem:[#allocation17 + $0x790] sm:$0xff] }
 0x88e   :  { %8724 = vmatpush1.bf16.msra.mxu0 %v8723_v18  ;;  %v8837_v18 = vpack.c.bf16 %v6750_v20, %v6748_v10  ;;  %v6858_v17 = vld [vmem:[#allocation17 + $0x708] sm:$0xff]  ;;  %v6857_v20 = vld [vmem:[#allocation17 + $0x700] sm:$0xff] }
 0x88f   :  { %8726 = vmatprep.subr.bf16.mxu0 %v8725_v5  ;;  %v6752_v5 = vld [vmem:[#allocation17 + $0x628] sm:$0xff]  ;;  %v8869_v10 = vpack.c.bf16 %v6860_v53, %v6858_v17  ;;  %v6974_v53 = vld [vmem:[#allocation17 + $0x838] sm:$0xff] }
 0x890   :  { %8820 = vmatpush1.bf16.msra.mxu1 %v8819_v27  ;;  %v8839_v27 = vpack.c.bf16 %v6749_v1, %v6747_v38  ;;  %v8841_v45 = vpack.c.bf16 %v6754_v40, %v6752_v5  ;;  %v6864_v38 = vld [vmem:[#allocation17 + $0x738] sm:$0xff]  ;;  %v6861_v40 = vld [vmem:[#allocation17 + $0x720] sm:$0xff]  ;;  %v6972_v17 = vld [vmem:[#allocation17 + $0x828] sm:$0xff] }
 0x891   :  { %8822 = vmatprep.subr.bf16.mxu1 %v8821_v4  ;;  %v6753_v4 = vld [vmem:[#allocation17 + $0x630] sm:$0xff] }
 0x892   :  { %8728 = vmatpush1.bf16.msra.mxu0 %v8727_v9  ;;  %v6758_v9 = vld [vmem:[#allocation17 + $0x658] sm:$0xff]  ;;  %v8843_v49 = vpack.c.bf16 %v6753_v4, %v6751_v56  ;;  %v8875_v56 = vpack.c.bf16 %v6863_v62, %v6861_v40  ;;  %v6975_v40 = vld [vmem:[#allocation17 + $0x840] sm:$0xff]  ;;  %v6977_v62 = vld [vmem:[#allocation17 + $0x850] sm:$0xff] }
 0x893   :  { %8730 = vmatprep.subr.bf16.mxu0 %v8729_v44  ;;  %v8845_v58 = vpack.c.bf16 %v6758_v9, %v6756_v42  ;;  %v6757_v44 = vld [vmem:[#allocation17 + $0x650] sm:$0xff]  ;;  %v6870_v9 = vld [vmem:[#allocation17 + $0x768] sm:$0xff] }
 0x894   :  { %8824 = vmatpush1.bf16.msra.mxu1 %v8823_v30  ;;  %v8847_v48 = vpack.c.bf16 %v6757_v44, %v6755_v34  ;;  %v6867_v42 = vld [vmem:[#allocation17 + $0x750] sm:$0xff]  ;;  %v6869_v44 = vld [vmem:[#allocation17 + $0x760] sm:$0xff] }
 0x895   :  { %8826 = vmatprep.subr.bf16.mxu1 %v8825_v0  ;;  %v6766_v0 = vld [vmem:[#allocation17 + $0x698] sm:$0xff] }
 0x896   :  { %8732 = vmatpush1.bf16.msra.mxu0 %v8731_v39  ;;  %v8853_v52 = vpack.c.bf16 %v6766_v0, %v6764_v29  ;;  %v6763_v39 = vld [vmem:[#allocation17 + $0x680] sm:$0xff]  ;;  %v6878_v29 = vld [vmem:[#allocation17 + $0x7a8] sm:$0xff]  ;;  %v6880_v0 = vld [vmem:[#allocation17 + $0x7b8] sm:$0xff] }
 0x897   :  { %8734 = vmatprep.subr.bf16.mxu0 %v8733_v25  ;;  %v6770_v25 = vld [vmem:[#allocation17 + $0x6b8] sm:$0xff]  ;;  %v8855_v36 = vpack.c.bf16 %v6765_v22, %v6763_v39  ;;  %v6877_v39 = vld [vmem:[#allocation17 + $0x7a0] sm:$0xff]  ;;  %v6879_v22 = vld [vmem:[#allocation17 + $0x7b0] sm:$0xff] }
 0x898   :  { %8828 = vmatpush1.bf16.msra.mxu1 %v8827_v35  ;;  %v8857_v47 = vpack.c.bf16 %v6770_v25, %v6768_v14  ;;  %v6767_v35 = vld [vmem:[#allocation17 + $0x6a0] sm:$0xff]  ;;  %v6882_v14 = vld [vmem:[#allocation17 + $0x7c8] sm:$0xff]  ;;  %v6884_v25 = vld [vmem:[#allocation17 + $0x7d8] sm:$0xff] }
 0x899   :  { %8830 = vmatprep.subr.bf16.mxu1 %v8829_v55  ;;  %v6774_v55 = vld [vmem:[#allocation17 + $0x6d8] sm:$0xff]  ;;  %v8859_v21 = vpack.c.bf16 %v6769_v26, %v6767_v35  ;;  %v6881_v35 = vld [vmem:[#allocation17 + $0x7c0] sm:$0xff]  ;;  %v6883_v26 = vld [vmem:[#allocation17 + $0x7d0] sm:$0xff] }
 0x89a   :  { %8736 = vmatpush1.bf16.msra.mxu0 %v8735_v2  ;;  %v8861_v46 = vpack.c.bf16 %v6774_v55, %v6772_v8  ;;  %v6771_v2 = vld [vmem:[#allocation17 + $0x6c0] sm:$0xff]  ;;  %v6886_v8 = vld [vmem:[#allocation17 + $0x7e8] sm:$0xff]  ;;  %v6888_v55 = vld [vmem:[#allocation17 + $0x7f8] sm:$0xff] }
 0x89b   :  { %8738 = vmatprep.subr.bf16.mxu0 %v8737_v41  ;;  %v6778_v41 = vld [vmem:[#allocation17 + $0x6f8] sm:$0xff]  ;;  %v8863_v28 = vpack.c.bf16 %v6773_v3, %v6771_v2  ;;  %v6885_v2 = vld [vmem:[#allocation17 + $0x7e0] sm:$0xff]  ;;  %v6887_v3 = vld [vmem:[#allocation17 + $0x7f0] sm:$0xff] }
 0x89c   :  { %8832 = vmatpush1.bf16.msra.mxu1 %v8831_v57  ;;  %v8865_v37 = vpack.c.bf16 %v6778_v41, %v6776_v19  ;;  %v6775_v57 = vld [vmem:[#allocation17 + $0x6e0] sm:$0xff]  ;;  %v6968_v19 = vld [vmem:[#allocation17 + $0x808] sm:$0xff]  ;;  %v6970_v41 = vld [vmem:[#allocation17 + $0x818] sm:$0xff] }
 0x89d   :  { %8834 = vmatprep.subr.bf16.mxu1 %v8833_v43  ;;  %v6777_v43 = vld [vmem:[#allocation17 + $0x6f0] sm:$0xff] }
 0x89e   :  { %8740 = vmatpush1.bf16.msra.mxu0 %v8739_v60  ;;  %v8867_v60 = vpack.c.bf16 %v6777_v43, %v6775_v57  ;;  %v6967_v57 = vld [vmem:[#allocation17 + $0x800] sm:$0xff]  ;;  %v6969_v43 = vld [vmem:[#allocation17 + $0x810] sm:$0xff] }
 0x8a0   :  { %8836 = vmatpush1.bf16.msra.mxu1 %v8835_v15  ;;  %v6859_v15 = vld [vmem:[#allocation17 + $0x710] sm:$0xff] }
 0x8a1   :  { %6408 = vmatmul.mubr.f32.vlgmr.msra.gmra.mrb[144].mxu0 %v14726_v6  ;;  %8838 = vmatprep.subr.bf16.mxu1 %v8837_v18  ;;  %v6762_v6 = vld [vmem:[#allocation17 + $0x678] sm:$0xff]  ;;  %v6862_v18 = vld [vmem:[#allocation17 + $0x728] sm:$0xff]  ;;  %v8871_v1 = vpack.c.bf16 %v6859_v15, %v6857_v20  ;;  %v6971_v20 = vld [vmem:[#allocation17 + $0x820] sm:$0xff] }
 0x8a2   :  { %v8849_v30 = vpack.c.bf16 %v6762_v6, %v6760_v51  ;;  %v8873_v5 = vpack.c.bf16 %v6864_v38, %v6862_v18  ;;  %v6871_v51 = vld [vmem:[#allocation17 + $0x770] sm:$0xff]  ;;  %v6874_v6 = vld [vmem:[#allocation17 + $0x788] sm:$0xff]  ;;  %v6978_v38 = vld [vmem:[#allocation17 + $0x858] sm:$0xff] }
 0x8a3   :  { %6738 = vmatmul.mubr.f32.vlgmr.msra.gmra.mrb[0].mxu1 %v6671_v23  ;;  %v6865_v23 = vld [vmem:[#allocation17 + $0x740] sm:$0xff]  ;;  %v6973_v15 = vld [vmem:[#allocation17 + $0x830] sm:$0xff]  ;;  %v6976_v18 = vld [vmem:[#allocation17 + $0x848] sm:$0xff] }
 0x8a4   :  { %8840 = vmatpush1.bf16.msra.mxu1 %v8839_v27  ;;  %6847 = vmatprep.mubr.f32.mxu1 %v14962_v32  ;;  %v6866_v27 = vld [vmem:[#allocation17 + $0x748] sm:$0xff] }
 0x8a5   :  { %8842 = vmatprep.subr.bf16.mxu1 %v8841_v45  ;;  %v6868_v45 = vld [vmem:[#allocation17 + $0x758] sm:$0xff] }
 0x8a6   :  { %v8877_v4 = vpack.c.bf16 %v6868_v45, %v6866_v27  ;;  %v6980_v27 = vld [vmem:[#allocation17 + $0x868] sm:$0xff]  ;;  %v6982_v45 = vld [vmem:[#allocation17 + $0x878] sm:$0xff] }
 0x8a8   :  { %8844 = vmatpush1.bf16.msra.mxu1 %v8843_v49  ;;  %v6872_v49 = vld [vmem:[#allocation17 + $0x778] sm:$0xff] }
 0x8a9   :  { %8846 = vmatprep.subr.bf16.mxu1 %v8845_v58  ;;  %v8879_v58 = vpack.c.bf16 %v6867_v42, %v6865_v23  ;;  %v8881_v34 = vpack.c.bf16 %v6872_v49, %v6870_v9  ;;  %v6979_v23 = vld [vmem:[#allocation17 + $0x860] sm:$0xff]  ;;  %v6981_v42 = vld [vmem:[#allocation17 + $0x870] sm:$0xff]  ;;  %v6984_v9 = vld [vmem:[#allocation17 + $0x888] sm:$0xff] }
 0x8aa   :  { %v6986_v49 = vld [vmem:[#allocation17 + $0x898] sm:$0xff] }
 0x8ac   :  { %8848 = vmatpush1.bf16.msra.mxu1 %v8847_v48  ;;  %v6876_v48 = vld [vmem:[#allocation17 + $0x798] sm:$0xff] }
 0x8ad   :  { %8850 = vmatprep.subr.bf16.mxu1 %v8849_v30  ;;  %v8885_v30 = vpack.c.bf16 %v6876_v48, %v6874_v6  ;;  %v6990_v6 = vld [vmem:[#allocation17 + $0x8b8] sm:$0xff] }
 0x8b0   :  { %8852 = vmatpush1.bf16.msra.mxu1 %v8851_v54  ;;  %v8887_v54 = vpack.c.bf16 %v6875_v24, %v6873_v63  ;;  %v6989_v63 = vld [vmem:[#allocation17 + $0x8b0] sm:$0xff]  ;;  %v6992_v24 = vld [vmem:[#allocation17 + $0x8c8] sm:$0xff] }
 0x8b1   :  { %8854 = vmatprep.subr.bf16.mxu1 %v8853_v52  ;;  %v8889_v52 = vpack.c.bf16 %v6880_v0, %v6878_v29  ;;  %v6994_v29 = vld [vmem:[#allocation17 + $0x8d8] sm:$0xff] }
 0x8b4   :  { %8856 = vmatpush1.bf16.msra.mxu1 %v8855_v36  ;;  %v8891_v36 = vpack.c.bf16 %v6879_v22, %v6877_v39  ;;  %v6993_v39 = vld [vmem:[#allocation17 + $0x8d0] sm:$0xff]  ;;  %v6996_v22 = vld [vmem:[#allocation17 + $0x8e8] sm:$0xff] }
 0x8b5   :  { %8858 = vmatprep.subr.bf16.mxu1 %v8857_v47  ;;  %v8893_v47 = vpack.c.bf16 %v6884_v25, %v6882_v14  ;;  %v6998_v14 = vld [vmem:[#allocation17 + $0x8f8] sm:$0xff] }
 0x8b8   :  { %8860 = vmatpush1.bf16.msra.mxu1 %v8859_v21  ;;  %v8895_v21 = vpack.c.bf16 %v6883_v26, %v6881_v35  ;;  %v6997_v35 = vld [vmem:[#allocation17 + $0x8f0] sm:$0xff]  ;;  %v7079_v26 = vld [vmem:[#allocation17 + $0x908] sm:$0xff] }
 0x8b9   :  { %8862 = vmatprep.subr.bf16.mxu1 %v8861_v46  ;;  %v8897_v46 = vpack.c.bf16 %v6888_v55, %v6886_v8  ;;  %v7081_v8 = vld [vmem:[#allocation17 + $0x918] sm:$0xff] }
 0x8bc   :  { %8864 = vmatpush1.bf16.msra.mxu1 %v8863_v28  ;;  %v8899_v28 = vpack.c.bf16 %v6887_v3, %v6885_v2  ;;  %v7080_v2 = vld [vmem:[#allocation17 + $0x910] sm:$0xff]  ;;  %v7001_v3 = vrot.slane %v14751_v33, 7 }
 0x8bd   :  { %8866 = vmatprep.subr.bf16.mxu1 %v8865_v37  ;;  %v8901_v37 = vpack.c.bf16 %v6970_v41, %v6968_v19  ;;  %v7083_v19 = vld [vmem:[#allocation17 + $0x928] sm:$0xff]  ;;  %v7085_v41 = vld [vmem:[#allocation17 + $0x938] sm:$0xff] }
 0x8c0   :  { %8868 = vmatpush1.bf16.msra.mxu1 %v8867_v60  ;;  %v8903_v60 = vpack.c.bf16 %v6969_v43, %v6967_v57  ;;  %v7082_v57 = vld [vmem:[#allocation17 + $0x920] sm:$0xff]  ;;  %v7084_v43 = vld [vmem:[#allocation17 + $0x930] sm:$0xff] }
 0x8c1   :  { %8870 = vmatprep.subr.bf16.mxu1 %v8869_v10  ;;  %v8905_v10 = vpack.c.bf16 %v6974_v53, %v6972_v17  ;;  %v7002_v17 = vsel %vm6158_vm8, %v7001_v3, %v14749_v16  ;;  %v7087_v53 = vld [vmem:[#allocation17 + $0x948] sm:$0xff]  ;;  %v7191_v3 = vld [vmem:[#allocation17 + $0xa20] sm:$0xff] }
 0x8c3   :  { %6848 = vmatmul.mubr.f32.vlgmr.msra.gmra.mrb[0].mxu1 %v14744_v59  ;;  %v8883_v59 = vpack.c.bf16 %v6871_v51, %v6869_v44  ;;  %v6985_v44 = vld [vmem:[#allocation17 + $0x890] sm:$0xff]  ;;  %v6988_v51 = vld [vmem:[#allocation17 + $0x8a8] sm:$0xff] }
 0x8c4   :  { %8872 = vmatpush1.bf16.msra.mxu1 %v8871_v1  ;;  %6957 = vmatprep.mubr.f32.mxu1 %v14962_v32  ;;  %v8907_v1 = vpack.c.bf16 %v6973_v15, %v6971_v20  ;;  %v7086_v15 = vld [vmem:[#allocation17 + $0x940] sm:$0xff] }
 0x8c5   :  { %8874 = vmatprep.subr.bf16.mxu1 %v8873_v5  ;;  %v8909_v5 = vpack.c.bf16 %v6978_v38, %v6976_v18  ;;  %v7088_v18 = vld [vmem:[#allocation17 + $0x950] sm:$0xff]  ;;  %v7091_v38 = vld [vmem:[#allocation17 + $0x968] sm:$0xff] }
 0x8c8   :  { %8876 = vmatpush1.bf16.msra.mxu1 %v8875_v56  ;;  %v8911_v56 = vpack.c.bf16 %v6977_v62, %v6975_v40  ;;  %v7090_v62 = vld [vmem:[#allocation17 + $0x960] sm:$0xff] }
 0x8c9   :  { %8878 = vmatprep.subr.bf16.mxu1 %v8877_v4  ;;  %v8913_v4 = vpack.c.bf16 %v6982_v45, %v6980_v27  ;;  %v7092_v27 = vld [vmem:[#allocation17 + $0x970] sm:$0xff]  ;;  %v7095_v45 = vld [vmem:[#allocation17 + $0x988] sm:$0xff] }
 0x8cc   :  { %8880 = vmatpush1.bf16.msra.mxu1 %v8879_v58  ;;  %v8917_v58 = vpack.c.bf16 %v6986_v49, %v6984_v9  ;;  %v7096_v9 = vld [vmem:[#allocation17 + $0x990] sm:$0xff]  ;;  %v7099_v49 = vld [vmem:[#allocation17 + $0x9a8] sm:$0xff] }
 0x8cd   :  { %8882 = vmatprep.subr.bf16.mxu1 %v8881_v34  ;;  %v6983_v34 = vld [vmem:[#allocation17 + $0x880] sm:$0xff] }
 0x8ce   :  { %v8919_v48 = vpack.c.bf16 %v6985_v44, %v6983_v34  ;;  %v7098_v44 = vld [vmem:[#allocation17 + $0x9a0] sm:$0xff] }
 0x8d0   :  { %8884 = vmatpush1.bf16.msra.mxu1 %v8883_v59  ;;  %v8921_v59 = vpack.c.bf16 %v6990_v6, %v6988_v51  ;;  %v7100_v51 = vld [vmem:[#allocation17 + $0x9b0] sm:$0xff]  ;;  %v7103_v6 = vld [vmem:[#allocation17 + $0x9c8] sm:$0xff] }
 0x8d1   :  { %8886 = vmatprep.subr.bf16.mxu1 %v8885_v30  ;;  %v6987_v30 = vld [vmem:[#allocation17 + $0x8a0] sm:$0xff] }
 0x8d2   :  { %v8923_v0 = vpack.c.bf16 %v6989_v63, %v6987_v30  ;;  %v7102_v63 = vld [vmem:[#allocation17 + $0x9c0] sm:$0xff] }
 0x8d4   :  { %8888 = vmatpush1.bf16.msra.mxu1 %v8887_v54  ;;  %v8925_v54 = vpack.c.bf16 %v6994_v29, %v6992_v24  ;;  %v7104_v24 = vld [vmem:[#allocation17 + $0x9d0] sm:$0xff]  ;;  %v7107_v29 = vld [vmem:[#allocation17 + $0x9e8] sm:$0xff] }
 0x8d5   :  { %8890 = vmatprep.subr.bf16.mxu1 %v8889_v52  ;;  %v6991_v52 = vld [vmem:[#allocation17 + $0x8c0] sm:$0xff] }
 0x8d6   :  { %v8927_v25 = vpack.c.bf16 %v6993_v39, %v6991_v52  ;;  %v7106_v39 = vld [vmem:[#allocation17 + $0x9e0] sm:$0xff] }
 0x8d8   :  { %8892 = vmatpush1.bf16.msra.mxu1 %v8891_v36  ;;  %v8929_v36 = vpack.c.bf16 %v6998_v14, %v6996_v22  ;;  %v7108_v22 = vld [vmem:[#allocation17 + $0x9f0] sm:$0xff]  ;;  %v7188_v14 = vld [vmem:[#allocation17 + $0xa08] sm:$0xff] }
 0x8d9   :  { %8894 = vmatprep.subr.bf16.mxu1 %v8893_v47  ;;  %v6995_v47 = vld [vmem:[#allocation17 + $0x8e0] sm:$0xff] }
 0x8da   :  { %v8931_v55 = vpack.c.bf16 %v6997_v35, %v6995_v47  ;;  %v7187_v35 = vld [vmem:[#allocation17 + $0xa00] sm:$0xff] }
 0x8dc   :  { %8896 = vmatpush1.bf16.msra.mxu1 %v8895_v21  ;;  %v8933_v21 = vpack.c.bf16 %v7081_v8, %v7079_v26  ;;  %v7189_v26 = vld [vmem:[#allocation17 + $0xa10] sm:$0xff]  ;;  %v7192_v8 = vld [vmem:[#allocation17 + $0xa28] sm:$0xff] }
 0x8dd   :  { %8898 = vmatprep.subr.bf16.mxu1 %v8897_v46  ;;  %v7078_v46 = vld [vmem:[#allocation17 + $0x900] sm:$0xff] }
 0x8e0   :  { %8900 = vmatpush1.bf16.msra.mxu1 %v8899_v28  ;;  %v8935_v28 = vpack.c.bf16 %v7080_v2, %v7078_v46  ;;  %v8967_v46 = vpack.c.bf16 %v7189_v26, %v7187_v35  ;;  %v7303_v35 = vld [vmem:[#allocation17 + $0xb30] sm:$0xff]  ;;  %v7306_v26 = vld [vmem:[#allocation17 + $0xb48] sm:$0xff] }
 0x8e1   :  { %8902 = vmatprep.subr.bf16.mxu1 %v8901_v37  ;;  %v8937_v37 = vpack.c.bf16 %v7085_v41, %v7083_v19  ;;  %v7193_v19 = vld [vmem:[#allocation17 + $0xa30] sm:$0xff] }
 0x8e3   :  { %6958 = vmatmul.mubr.f32.vlgmr.msra.gmra.mrb[0].mxu1 %v14747_v11  ;;  %v8915_v11 = vpack.c.bf16 %v6981_v42, %v6979_v23  ;;  %v7094_v42 = vld [vmem:[#allocation17 + $0x980] sm:$0xff] }
 0x8e4   :  { %8904 = vmatpush1.bf16.msra.mxu1 %v8903_v60  ;;  %7068 = vmatprep.mubr.f32.mxu1 %v14962_v32  ;;  %v7089_v60 = vld [vmem:[#allocation17 + $0x958] sm:$0xff] }
 0x8e5   :  { %8906 = vmatprep.subr.bf16.mxu1 %v8905_v10  ;;  %v8939_v10 = vpack.c.bf16 %v7084_v43, %v7082_v57  ;;  %v8941_v20 = vpack.c.bf16 %v7089_v60, %v7087_v53  ;;  %v8971_v57 = vpack.c.bf16 %v7193_v19, %v7191_v3  ;;  %v7197_v53 = vld [vmem:[#allocation17 + $0xa50] sm:$0xff]  ;;  %v7202_v60 = vld [vmem:[#allocation17 + $0xa78] sm:$0xff]  ;;  %v7310_v3 = vld [vmem:[#allocation17 + $0xb68] sm:$0xff] }
 0x8e6   :  { %v7312_v19 = vld [vmem:[#allocation17 + $0xb78] sm:$0xff] }
 0x8e8   :  { %8908 = vmatpush1.bf16.msra.mxu1 %v8907_v1  ;;  %v7093_v1 = vld [vmem:[#allocation17 + $0x978] sm:$0xff] }
 0x8e9   :  { %8910 = vmatprep.subr.bf16.mxu1 %v8909_v5  ;;  %v8943_v5 = vpack.c.bf16 %v7088_v18, %v7086_v15  ;;  %v8945_v40 = vpack.c.bf16 %v7093_v1, %v7091_v38  ;;  %v7199_v15 = vld [vmem:[#allocation17 + $0xa60] sm:$0xff]  ;;  %v7201_v18 = vld [vmem:[#allocation17 + $0xa70] sm:$0xff]  ;;  %v7206_v38 = vld [vmem:[#allocation17 + $0xa98] sm:$0xff] }
 0x8ea   :  { %v8979_v1 = vpack.c.bf16 %v7201_v18, %v7199_v15 }
 0x8ec   :  { %8912 = vmatpush1.bf16.msra.mxu1 %v8911_v56  ;;  %v7097_v56 = vld [vmem:[#allocation17 + $0x998] sm:$0xff] }
 0x8ed   :  { %8914 = vmatprep.subr.bf16.mxu1 %v8913_v4  ;;  %v8947_v4 = vpack.c.bf16 %v7092_v27, %v7090_v62  ;;  %v8949_v23 = vpack.c.bf16 %v7097_v56, %v7095_v45  ;;  %v7205_v62 = vld [vmem:[#allocation17 + $0xa90] sm:$0xff]  ;;  %v7208_v27 = vld [vmem:[#allocation17 + $0xaa8] sm:$0xff]  ;;  %v7210_v45 = vld [vmem:[#allocation17 + $0xab8] sm:$0xff] }
 0x8f0   :  { %8916 = vmatpush1.bf16.msra.mxu1 %v8915_v11  ;;  %v7101_v11 = vld [vmem:[#allocation17 + $0x9b8] sm:$0xff] }
 0x8f1   :  { %8918 = vmatprep.subr.bf16.mxu1 %v8917_v58  ;;  %v8951_v58 = vpack.c.bf16 %v7096_v9, %v7094_v42  ;;  %v8953_v34 = vpack.c.bf16 %v7101_v11, %v7099_v49  ;;  %v7209_v42 = vld [vmem:[#allocation17 + $0xab0] sm:$0xff]  ;;  %v7212_v9 = vld [vmem:[#allocation17 + $0xac8] sm:$0xff]  ;;  %v7214_v49 = vld [vmem:[#allocation17 + $0xad8] sm:$0xff] }
 0x8f4   :  { %8920 = vmatpush1.bf16.msra.mxu1 %v8919_v48  ;;  %v7105_v48 = vld [vmem:[#allocation17 + $0x9d8] sm:$0xff] }
 0x8f5   :  { %8922 = vmatprep.subr.bf16.mxu1 %v8921_v59  ;;  %v8955_v59 = vpack.c.bf16 %v7100_v51, %v7098_v44  ;;  %v8957_v30 = vpack.c.bf16 %v7105_v48, %v7103_v6  ;;  %v7213_v44 = vld [vmem:[#allocation17 + $0xad0] sm:$0xff]  ;;  %v7216_v51 = vld [vmem:[#allocation17 + $0xae8] sm:$0xff]  ;;  %v7218_v6 = vld [vmem:[#allocation17 + $0xaf8] sm:$0xff] }
 0x8f8   :  { %8924 = vmatpush1.bf16.msra.mxu1 %v8923_v0  ;;  %v7109_v0 = vld [vmem:[#allocation17 + $0x9f8] sm:$0xff] }
 0x8f9   :  { %8926 = vmatprep.subr.bf16.mxu1 %v8925_v54  ;;  %v8959_v54 = vpack.c.bf16 %v7104_v24, %v7102_v63  ;;  %v8961_v52 = vpack.c.bf16 %v7109_v0, %v7107_v29  ;;  %v7217_v63 = vld [vmem:[#allocation17 + $0xaf0] sm:$0xff]  ;;  %v7298_v24 = vld [vmem:[#allocation17 + $0xb08] sm:$0xff]  ;;  %v7300_v29 = vld [vmem:[#allocation17 + $0xb18] sm:$0xff] }
 0x8fc   :  { %8928 = vmatpush1.bf16.msra.mxu1 %v8927_v25  ;;  %v7190_v25 = vld [vmem:[#allocation17 + $0xa18] sm:$0xff] }
 0x8fd   :  { %8930 = vmatprep.subr.bf16.mxu1 %v8929_v36  ;;  %v8963_v36 = vpack.c.bf16 %v7108_v22, %v7106_v39  ;;  %v8965_v47 = vpack.c.bf16 %v7190_v25, %v7188_v14  ;;  %v7299_v39 = vld [vmem:[#allocation17 + $0xb10] sm:$0xff]  ;;  %v7302_v22 = vld [vmem:[#allocation17 + $0xb28] sm:$0xff]  ;;  %v7304_v14 = vld [vmem:[#allocation17 + $0xb38] sm:$0xff] }
 0x900   :  { %8932 = vmatpush1.bf16.msra.mxu1 %v8931_v55  ;;  %v7194_v55 = vld [vmem:[#allocation17 + $0xa38] sm:$0xff] }
 0x901   :  { %8934 = vmatprep.subr.bf16.mxu1 %v8933_v21  ;;  %v7110_v21 = vrot.slane %v14749_v16, 1  ;;  %v8969_v2 = vpack.c.bf16 %v7194_v55, %v7192_v8  ;;  %v7200_v16 = vld [vmem:[#allocation17 + $0xa68] sm:$0xff]  ;;  %v7308_v8 = vld [vmem:[#allocation17 + $0xb58] sm:$0xff] }
 0x903   :  { %7069 = vmatmul.mubr.f32.vlgmr.msra.gmra.mrb[0].mxu1 %v7002_v17  ;;  %v7111_v41 = vsel %vm6158_vm8, %v14751_v33, %v7110_v21  ;;  %v7195_v17 = vld [vmem:[#allocation17 + $0xa40] sm:$0xff]  ;;  %v7204_v33 = vld [vmem:[#allocation17 + $0xa88] sm:$0xff]  ;;  %v9005_v21 = vpack.c.bf16 %v7308_v8, %v7306_v26  ;;  %v7421_v8 = vld [vmem:[#allocation17 + $0xc70] sm:$0xff] }
 0x904   :  { %8936 = vmatpush1.bf16.msra.mxu1 %v8935_v28  ;;  %7177 = vmatprep.mubr.f32.mxu1 %v14962_v32  ;;  %v7196_v28 = vld [vmem:[#allocation17 + $0xa48] sm:$0xff]  ;;  %v7419_v26 = vld [vmem:[#allocation17 + $0xc60] sm:$0xff] }
 0x905   :  { %8938 = vmatprep.subr.bf16.mxu1 %v8937_v37  ;;  %v7198_v37 = vld [vmem:[#allocation17 + $0xa58] sm:$0xff] }
 0x906   :  { %v8973_v43 = vpack.c.bf16 %v7198_v37, %v7196_v28  ;;  %v9009_v28 = vpack.c.bf16 %v7312_v19, %v7310_v3  ;;  %v7309_v37 = vld [vmem:[#allocation17 + $0xb60] sm:$0xff]  ;;  %v7425_v3 = vld [vmem:[#allocation17 + $0xc90] sm:$0xff]  ;;  %v7428_v19 = vld [vmem:[#allocation17 + $0xca8] sm:$0xff] }
 0x908   :  { %8940 = vmatpush1.bf16.msra.mxu1 %v8939_v10  ;;  %v8975_v10 = vpack.c.bf16 %v7197_v53, %v7195_v17  ;;  %v7316_v17 = vld [vmem:[#allocation17 + $0xb98] sm:$0xff] }
 0x909   :  { %8942 = vmatprep.subr.bf16.mxu1 %v8941_v20  ;;  %v8977_v20 = vpack.c.bf16 %v7202_v60, %v7200_v16  ;;  %v7313_v16 = vld [vmem:[#allocation17 + $0xb80] sm:$0xff]  ;;  %v7315_v60 = vld [vmem:[#allocation17 + $0xb90] sm:$0xff] }
 0x90a   :  { %v9015_v15 = vpack.c.bf16 %v7315_v60, %v7313_v16 }
 0x90c   :  { %8944 = vmatpush1.bf16.msra.mxu1 %v8943_v5  ;;  %v8981_v5 = vpack.c.bf16 %v7206_v38, %v7204_v33  ;;  %v7317_v33 = vld [vmem:[#allocation17 + $0xba0] sm:$0xff]  ;;  %v7319_v38 = vld [vmem:[#allocation17 + $0xbb0] sm:$0xff] }
 0x90d   :  { %8946 = vmatprep.subr.bf16.mxu1 %v8945_v40  ;;  %v7203_v40 = vld [vmem:[#allocation17 + $0xa80] sm:$0xff] }
 0x90e   :  { %v8983_v56 = vpack.c.bf16 %v7205_v62, %v7203_v40  ;;  %v9019_v40 = vpack.c.bf16 %v7319_v38, %v7317_v33  ;;  %v7438_v33 = vld [vmem:[#allocation17 + $0xcf8] sm:$0xff] }
 0x910   :  { %8948 = vmatpush1.bf16.msra.mxu1 %v8947_v4  ;;  %v8985_v4 = vpack.c.bf16 %v7210_v45, %v7208_v27  ;;  %v7321_v27 = vld [vmem:[#allocation17 + $0xbc0] sm:$0xff]  ;;  %v7323_v45 = vld [vmem:[#allocation17 + $0xbd0] sm:$0xff] }
 0x911   :  { %8950 = vmatprep.subr.bf16.mxu1 %v8949_v23  ;;  %v7207_v23 = vld [vmem:[#allocation17 + $0xaa0] sm:$0xff] }
 0x912   :  { %v8987_v11 = vpack.c.bf16 %v7209_v42, %v7207_v23  ;;  %v9023_v23 = vpack.c.bf16 %v7323_v45, %v7321_v27  ;;  %v7521_v27 = vld [vmem:[#allocation17 + $0xd18] sm:$0xff] }
 0x914   :  { %8952 = vmatpush1.bf16.msra.mxu1 %v8951_v58  ;;  %v8989_v58 = vpack.c.bf16 %v7214_v49, %v7212_v9  ;;  %v7325_v9 = vld [vmem:[#allocation17 + $0xbe0] sm:$0xff]  ;;  %v7327_v49 = vld [vmem:[#allocation17 + $0xbf0] sm:$0xff] }
 0x915   :  { %8954 = vmatprep.subr.bf16.mxu1 %v8953_v34  ;;  %v7211_v34 = vld [vmem:[#allocation17 + $0xac0] sm:$0xff] }
 0x916   :  { %v8991_v48 = vpack.c.bf16 %v7213_v44, %v7211_v34  ;;  %v9027_v34 = vpack.c.bf16 %v7327_v49, %v7325_v9  ;;  %v7523_v9 = vld [vmem:[#allocation17 + $0xd28] sm:$0xff]  ;;  %v7525_v49 = vld [vmem:[#allocation17 + $0xd38] sm:$0xff] }
 0x918   :  { %8956 = vmatpush1.bf16.msra.mxu1 %v8955_v59  ;;  %v8993_v59 = vpack.c.bf16 %v7218_v6, %v7216_v51  ;;  %v7407_v51 = vld [vmem:[#allocation17 + $0xc00] sm:$0xff]  ;;  %v7409_v6 = vld [vmem:[#allocation17 + $0xc10] sm:$0xff] }
 0x919   :  { %8958 = vmatprep.subr.bf16.mxu1 %v8957_v30  ;;  %v7215_v30 = vld [vmem:[#allocation17 + $0xae0] sm:$0xff] }
 0x91a   :  { %v8995_v0 = vpack.c.bf16 %v7217_v63, %v7215_v30  ;;  %v9031_v30 = vpack.c.bf16 %v7409_v6, %v7407_v51  ;;  %v7527_v6 = vld [vmem:[#allocation17 + $0xd48] sm:$0xff] }
 0x91c   :  { %8960 = vmatpush1.bf16.msra.mxu1 %v8959_v54  ;;  %v8997_v54 = vpack.c.bf16 %v7300_v29, %v7298_v24  ;;  %v7411_v24 = vld [vmem:[#allocation17 + $0xc20] sm:$0xff]  ;;  %v7413_v29 = vld [vmem:[#allocation17 + $0xc30] sm:$0xff] }
 0x91d   :  { %8962 = vmatprep.subr.bf16.mxu1 %v8961_v52  ;;  %v7297_v52 = vld [vmem:[#allocation17 + $0xb00] sm:$0xff] }
 0x91e   :  { %v8999_v25 = vpack.c.bf16 %v7299_v39, %v7297_v52  ;;  %v9035_v52 = vpack.c.bf16 %v7413_v29, %v7411_v24  ;;  %v7528_v24 = vld [vmem:[#allocation17 + $0xd50] sm:$0xff]  ;;  %v7531_v29 = vld [vmem:[#allocation17 + $0xd68] sm:$0xff] }
 0x920   :  { %8964 = vmatpush1.bf16.msra.mxu1 %v8963_v36  ;;  %v9001_v36 = vpack.c.bf16 %v7304_v14, %v7302_v22  ;;  %v7415_v22 = vld [vmem:[#allocation17 + $0xc40] sm:$0xff]  ;;  %v7417_v14 = vld [vmem:[#allocation17 + $0xc50] sm:$0xff] }
 0x921   :  { %8966 = vmatprep.subr.bf16.mxu1 %v8965_v47  ;;  %v7301_v47 = vld [vmem:[#allocation17 + $0xb20] sm:$0xff] }
 0x922   :  { %v9003_v55 = vpack.c.bf16 %v7303_v35, %v7301_v47  ;;  %v9039_v47 = vpack.c.bf16 %v7417_v14, %v7415_v22  ;;  %v7532_v22 = vld [vmem:[#allocation17 + $0xd70] sm:$0xff]  ;;  %v7535_v14 = vld [vmem:[#allocation17 + $0xd88] sm:$0xff] }
 0x923   :  { %7178 = vmatmul.mubr.f32.vlgmr.msra.gmra.mrb[0].mxu1 %v7111_v41 }
 0x924   :  { %8968 = vmatpush1.bf16.msra.mxu1 %v8967_v46  ;;  %7287 = vmatprep.mubr.f32.mxu1 %v14962_v32  ;;  %v7305_v46 = vld [vmem:[#allocation17 + $0xb40] sm:$0xff] }
 0x925   :  { %8970 = vmatprep.subr.bf16.mxu1 %v8969_v2  ;;  %v7307_v2 = vld [vmem:[#allocation17 + $0xb50] sm:$0xff] }
 0x926   :  { %v9007_v41 = vpack.c.bf16 %v7307_v2, %v7305_v46  ;;  %v7423_v2 = vld [vmem:[#allocation17 + $0xc80] sm:$0xff] }
 0x928   :  { %8972 = vmatpush1.bf16.msra.mxu1 %v8971_v57  ;;  %v7311_v57 = vld [vmem:[#allocation17 + $0xb70] sm:$0xff] }
 0x929   :  { %8974 = vmatprep.subr.bf16.mxu1 %v8973_v43  ;;  %v7314_v43 = vld [vmem:[#allocation17 + $0xb88] sm:$0xff] }
 0x92a   :  { %v9013_v53 = vpack.c.bf16 %v7316_v17, %v7314_v43  ;;  %v7429_v43 = vld [vmem:[#allocation17 + $0xcb0] sm:$0xff]  ;;  %v7432_v17 = vld [vmem:[#allocation17 + $0xcc8] sm:$0xff] }
 0x92c   :  { %8976 = vmatpush1.bf16.msra.mxu1 %v8975_v10  ;;  %v7318_v10 = vld [vmem:[#allocation17 + $0xba8] sm:$0xff] }
 0x92d   :  { %8978 = vmatprep.subr.bf16.mxu1 %v8977_v20  ;;  %v7320_v20 = vld [vmem:[#allocation17 + $0xbb8] sm:$0xff] }
 0x92e   :  { %v9017_v18 = vpack.c.bf16 %v7320_v20, %v7318_v10  ;;  %v7431_v20 = vld [vmem:[#allocation17 + $0xcc0] sm:$0xff] }
 0x930   :  { %8980 = vmatpush1.bf16.msra.mxu1 %v8979_v1  ;;  %v7322_v1 = vld [vmem:[#allocation17 + $0xbc8] sm:$0xff] }
 0x931   :  { %8982 = vmatprep.subr.bf16.mxu1 %v8981_v5  ;;  %v7324_v5 = vld [vmem:[#allocation17 + $0xbd8] sm:$0xff] }
 0x932   :  { %v9021_v62 = vpack.c.bf16 %v7324_v5, %v7322_v1  ;;  %v7435_v5 = vld [vmem:[#allocation17 + $0xce0] sm:$0xff] }
 0x934   :  { %8984 = vmatpush1.bf16.msra.mxu1 %v8983_v56  ;;  %v7326_v56 = vld [vmem:[#allocation17 + $0xbe8] sm:$0xff] }
 0x935   :  { %8986 = vmatprep.subr.bf16.mxu1 %v8985_v4  ;;  %v7328_v4 = vld [vmem:[#allocation17 + $0xbf8] sm:$0xff] }
 0x936   :  { %v9025_v42 = vpack.c.bf16 %v7328_v4, %v7326_v56  ;;  %v7518_v4 = vld [vmem:[#allocation17 + $0xd00] sm:$0xff] }
 0x938   :  { %8988 = vmatpush1.bf16.msra.mxu1 %v8987_v11  ;;  %v7408_v11 = vld [vmem:[#allocation17 + $0xc08] sm:$0xff] }
 0x939   :  { %8990 = vmatprep.subr.bf16.mxu1 %v8989_v58  ;;  %v7410_v58 = vld [vmem:[#allocation17 + $0xc18] sm:$0xff] }
 0x93a   :  { %v9029_v44 = vpack.c.bf16 %v7410_v58, %v7408_v11  ;;  %v9065_v58 = vpack.c.bf16 %v7525_v49, %v7523_v9  ;;  %v7636_v9 = vld [vmem:[#allocation17 + $0xe48] sm:$0xff]  ;;  %v7638_v49 = vld [vmem:[#allocation17 + $0xe58] sm:$0xff] }
 0x93c   :  { %8992 = vmatpush1.bf16.msra.mxu1 %v8991_v48  ;;  %v7412_v48 = vld [vmem:[#allocation17 + $0xc28] sm:$0xff] }
 0x93d   :  { %8994 = vmatprep.subr.bf16.mxu1 %v8993_v59  ;;  %v7414_v59 = vld [vmem:[#allocation17 + $0xc38] sm:$0xff] }
 0x93e   :  { %v9033_v63 = vpack.c.bf16 %v7414_v59, %v7412_v48  ;;  %v7529_v48 = vld [vmem:[#allocation17 + $0xd58] sm:$0xff] }
 0x940   :  { %8996 = vmatpush1.bf16.msra.mxu1 %v8995_v0  ;;  %v7416_v0 = vld [vmem:[#allocation17 + $0xc48] sm:$0xff] }
 0x941   :  { %8998 = vmatprep.subr.bf16.mxu1 %v8997_v54  ;;  %v7418_v54 = vld [vmem:[#allocation17 + $0xc58] sm:$0xff] }
 0x942   :  { %v9037_v39 = vpack.c.bf16 %v7418_v54, %v7416_v0  ;;  %v7533_v0 = vld [vmem:[#allocation17 + $0xd78] sm:$0xff] }
 0x943   :  { %7288 = vmatmul.mubr.f32.vlgmr.msra.gmra.mrb[0].mxu1 %v14758_v13  ;;  %v9011_v13 = vpack.c.bf16 %v7311_v57, %v7309_v37  ;;  %v7427_v57 = vld [vmem:[#allocation17 + $0xca0] sm:$0xff] }
 0x944   :  { %9000 = vmatpush1.bf16.msra.mxu1 %v8999_v25  ;;  %7397 = vmatprep.mubr.f32.mxu1 %v14962_v32  ;;  %v7420_v25 = vld [vmem:[#allocation17 + $0xc68] sm:$0xff]  ;;  %v9051_v16 = vpack.c.bf16 %v7429_v43, %v7427_v57  ;;  %v7544_v57 = vld [vmem:[#allocation17 + $0xdd0] sm:$0xff] }
 0x945   :  { %9002 = vmatprep.subr.bf16.mxu1 %v9001_v36  ;;  %v7422_v36 = vld [vmem:[#allocation17 + $0xc78] sm:$0xff]  ;;  %v7547_v43 = vld [vmem:[#allocation17 + $0xde8] sm:$0xff] }
 0x946   :  { %v9041_v35 = vpack.c.bf16 %v7422_v36, %v7420_v25  ;;  %v7537_v25 = vld [vmem:[#allocation17 + $0xd98] sm:$0xff] }
 0x948   :  { %9004 = vmatpush1.bf16.msra.mxu1 %v9003_v55  ;;  %v7424_v55 = vld [vmem:[#allocation17 + $0xc88] sm:$0xff] }
 0x949   :  { %9006 = vmatprep.subr.bf16.mxu1 %v9005_v21  ;;  %v7426_v21 = vld [vmem:[#allocation17 + $0xc98] sm:$0xff] }
 0x94a   :  { %v9045_v46 = vpack.c.bf16 %v7426_v21, %v7424_v55  ;;  %v7541_v55 = vld [vmem:[#allocation17 + $0xdb8] sm:$0xff] }
 0x94c   :  { %9008 = vmatpush1.bf16.msra.mxu1 %v9007_v41  ;;  %v7430_v41 = vld [vmem:[#allocation17 + $0xcb8] sm:$0xff] }
 0x94d   :  { %9010 = vmatprep.subr.bf16.mxu1 %v9009_v28  ;;  %v9047_v28 = vpack.c.bf16 %v7425_v3, %v7423_v2  ;;  %v9049_v37 = vpack.c.bf16 %v7430_v41, %v7428_v19  ;;  %v7540_v2 = vld [vmem:[#allocation17 + $0xdb0] sm:$0xff]  ;;  %v7543_v3 = vld [vmem:[#allocation17 + $0xdc8] sm:$0xff]  ;;  %v7545_v19 = vld [vmem:[#allocation17 + $0xdd8] sm:$0xff] }
 0x950   :  { %9012 = vmatpush1.bf16.msra.mxu1 %v9011_v13  ;;  %v7434_v13 = vld [vmem:[#allocation17 + $0xcd8] sm:$0xff] }
 0x951   :  { %9014 = vmatprep.subr.bf16.mxu1 %v9013_v53  ;;  %v9053_v10 = vpack.c.bf16 %v7434_v13, %v7432_v17  ;;  %v7549_v17 = vld [vmem:[#allocation17 + $0xdf8] sm:$0xff] }
 0x954   :  { %9016 = vmatpush1.bf16.msra.mxu1 %v9015_v15  ;;  %v7433_v15 = vld [vmem:[#allocation17 + $0xcd0] sm:$0xff] }
 0x955   :  { %9018 = vmatprep.subr.bf16.mxu1 %v9017_v18  ;;  %v7436_v18 = vld [vmem:[#allocation17 + $0xce8] sm:$0xff]  ;;  %v9055_v38 = vpack.c.bf16 %v7433_v15, %v7431_v20  ;;  %v7548_v20 = vld [vmem:[#allocation17 + $0xdf0] sm:$0xff] }
 0x956   :  { %v9057_v1 = vpack.c.bf16 %v7438_v33, %v7436_v18  ;;  %v7628_v15 = vld [vmem:[#allocation17 + $0xe08] sm:$0xff]  ;;  %v7630_v18 = vld [vmem:[#allocation17 + $0xe18] sm:$0xff] }
 0x958   :  { %9020 = vmatpush1.bf16.msra.mxu1 %v9019_v40  ;;  %v7437_v40 = vld [vmem:[#allocation17 + $0xcf0] sm:$0xff] }
 0x959   :  { %9022 = vmatprep.subr.bf16.mxu1 %v9021_v62  ;;  %v7519_v62 = vld [vmem:[#allocation17 + $0xd08] sm:$0xff]  ;;  %v9059_v45 = vpack.c.bf16 %v7437_v40, %v7435_v5  ;;  %v7629_v5 = vld [vmem:[#allocation17 + $0xe10] sm:$0xff] }
 0x95a   :  { %v9061_v56 = vpack.c.bf16 %v7521_v27, %v7519_v62  ;;  %v7632_v40 = vld [vmem:[#allocation17 + $0xe28] sm:$0xff]  ;;  %v7634_v62 = vld [vmem:[#allocation17 + $0xe38] sm:$0xff]  ;;  %v7550_v27 = vrot.slane %v14763_v61, 1 }
 0x95c   :  { %9024 = vmatpush1.bf16.msra.mxu1 %v9023_v23  ;;  %v7520_v23 = vld [vmem:[#allocation17 + $0xd10] sm:$0xff] }
 0x95d   :  { %9026 = vmatprep.subr.bf16.mxu1 %v9025_v42  ;;  %v7441_v42 = vrot.slane %v14765_v50, 7  ;;  %v9063_v11 = vpack.c.bf16 %v7520_v23, %v7518_v4  ;;  %v7631_v4 = vld [vmem:[#allocation17 + $0xe20] sm:$0xff]  ;;  %v7633_v23 = vld [vmem:[#allocation17 + $0xe30] sm:$0xff] }
 0x95f   :  { %v7442_v51 = vsel %vm6158_vm8, %v7441_v42, %v14763_v61  ;;  %v7551_v42 = vsel %vm6158_vm8, %v14765_v50, %v7550_v27  ;;  %v7640_v61 = vld [vmem:[#allocation17 + $0xe68] sm:$0xff]  ;;  %v7747_v27 = vld [vmem:[#allocation17 + $0xf50] sm:$0xff] }
 0x960   :  { %9028 = vmatpush1.bf16.msra.mxu1 %v9027_v34  ;;  %v7522_v34 = vld [vmem:[#allocation17 + $0xd20] sm:$0xff]  ;;  %v7644_v50 = vld [vmem:[#allocation17 + $0xe88] sm:$0xff] }
 0x961   :  { %9030 = vmatprep.subr.bf16.mxu1 %v9029_v44  ;;  %v7524_v44 = vld [vmem:[#allocation17 + $0xd30] sm:$0xff] }
 0x962   :  { %v9067_v59 = vpack.c.bf16 %v7524_v44, %v7522_v34  ;;  %v7635_v34 = vld [vmem:[#allocation17 + $0xe40] sm:$0xff]  ;;  %v7637_v44 = vld [vmem:[#allocation17 + $0xe50] sm:$0xff] }
 0x963   :  { %7398 = vmatmul.mubr.f32.vlgmr.msra.gmra.mrb[0].mxu1 %v14761_v7  ;;  %v9043_v7 = vpack.c.bf16 %v7421_v8, %v7419_v26  ;;  %v7536_v26 = vld [vmem:[#allocation17 + $0xd90] sm:$0xff]  ;;  %v7539_v8 = vld [vmem:[#allocation17 + $0xda8] sm:$0xff] }
 0x964   :  { %9032 = vmatpush1.bf16.msra.mxu1 %v9031_v30  ;;  %7508 = vmatprep.mubr.f32.mxu1 %v14962_v32  ;;  %v9069_v30 = vpack.c.bf16 %v7529_v48, %v7527_v6  ;;  %v9103_v6 = vpack.c.bf16 %v7637_v44, %v7635_v34  ;;  %v7753_v34 = vld [vmem:[#allocation17 + $0xf80] sm:$0xff]  ;;  %v7758_v44 = vld [vmem:[#allocation17 + $0xfa8] sm:$0xff] }
 0x965   :  { %9034 = vmatprep.subr.bf16.mxu1 %v9033_v63  ;;  %v7526_v63 = vld [vmem:[#allocation17 + $0xd40] sm:$0xff] }
 0x966   :  { %v9071_v54 = vpack.c.bf16 %v7528_v24, %v7526_v63  ;;  %v7646_v63 = vld [vmem:[#allocation17 + $0xe98] sm:$0xff] }
 0x968   :  { %9036 = vmatpush1.bf16.msra.mxu1 %v9035_v52  ;;  %v9073_v52 = vpack.c.bf16 %v7533_v0, %v7531_v29  ;;  %v9109_v29 = vpack.c.bf16 %v7646_v63, %v7644_v50  ;;  %v7643_v0 = vld [vmem:[#allocation17 + $0xe80] sm:$0xff]  ;;  %v7764_v50 = vld [vmem:[#allocation17 + $0xfd8] sm:$0xff] }
 0x969   :  { %9038 = vmatprep.subr.bf16.mxu1 %v9037_v39  ;;  %v7530_v39 = vld [vmem:[#allocation17 + $0xd60] sm:$0xff] }
 0x96a   :  { %v9075_v36 = vpack.c.bf16 %v7532_v22, %v7530_v39  ;;  %v7650_v39 = vld [vmem:[#allocation17 + $0xeb8] sm:$0xff] }
 0x96c   :  { %9040 = vmatpush1.bf16.msra.mxu1 %v9039_v47  ;;  %v9077_v47 = vpack.c.bf16 %v7537_v25, %v7535_v14  ;;  %v7647_v25 = vld [vmem:[#allocation17 + $0xea0] sm:$0xff] }
 0x96d   :  { %9042 = vmatprep.subr.bf16.mxu1 %v9041_v35  ;;  %v7534_v35 = vld [vmem:[#allocation17 + $0xd80] sm:$0xff] }
 0x96e   :  { %v9079_v21 = vpack.c.bf16 %v7536_v26, %v7534_v35  ;;  %v7654_v35 = vld [vmem:[#allocation17 + $0xed8] sm:$0xff] }
 0x970   :  { %9044 = vmatpush1.bf16.msra.mxu1 %v9043_v7  ;;  %v9081_v7 = vpack.c.bf16 %v7541_v55, %v7539_v8  ;;  %v7651_v55 = vld [vmem:[#allocation17 + $0xec0] sm:$0xff] }
 0x971   :  { %9046 = vmatprep.subr.bf16.mxu1 %v9045_v46  ;;  %v7538_v46 = vld [vmem:[#allocation17 + $0xda0] sm:$0xff] }
 0x972   :  { %v9083_v41 = vpack.c.bf16 %v7540_v2, %v7538_v46  ;;  %v7658_v46 = vld [vmem:[#allocation17 + $0xef8] sm:$0xff] }
 0x974   :  { %v14806_v53 = vpop.f32.mrb[144].mxu0  ;;  %9048 = vmatpush1.bf16.msra.mxu1 %v9047_v28  ;;  %v9085_v28 = vpack.c.bf16 %v7545_v19, %v7543_v3  ;;  %v7655_v19 = vld [vmem:[#allocation17 + $0xee0] sm:$0xff] }
 0x975   :  { %v14808_v60 = vpop.f32.mrb[145].mxu0  ;;  %9050 = vmatprep.subr.bf16.mxu1 %v9049_v37  ;;  %v7542_v37 = vld [vmem:[#allocation17 + $0xdc0] sm:$0xff] }
 0x976   :  { %v9087_v13 = vpack.c.bf16 %v7544_v57, %v7542_v37  ;;  %v7740_v37 = vld [vmem:[#allocation17 + $0xf18] sm:$0xff] }
 0x978   :  { %9052 = vmatpush1.bf16.msra.mxu1 %v9051_v16  ;;  %v9089_v16 = vpack.c.bf16 %v7549_v17, %v7547_v43  ;;  %v7737_v17 = vld [vmem:[#allocation17 + $0xf00] sm:$0xff] }
 0x979   :  { %9054 = vmatprep.subr.bf16.mxu1 %v9053_v10  ;;  %v7546_v10 = vld [vmem:[#allocation17 + $0xde0] sm:$0xff] }
 0x97a   :  { %v9091_v33 = vpack.c.bf16 %v7548_v20, %v7546_v10  ;;  %v7744_v10 = vld [vmem:[#allocation17 + $0xf38] sm:$0xff] }
 0x97c   :  { %9056 = vmatpush1.bf16.msra.mxu1 %v9055_v38  ;;  %v9093_v38 = vpack.c.bf16 %v7630_v18, %v7628_v15  ;;  %v7741_v18 = vld [vmem:[#allocation17 + $0xf20] sm:$0xff] }
 0x97d   :  { %9058 = vmatprep.subr.bf16.mxu1 %v9057_v1  ;;  %v7627_v1 = vld [vmem:[#allocation17 + $0xe00] sm:$0xff] }
 0x980   :  { %9060 = vmatpush1.bf16.msra.mxu1 %v9059_v45  ;;  %v9095_v45 = vpack.c.bf16 %v7629_v5, %v7627_v1  ;;  %v7748_v1 = vld [vmem:[#allocation17 + $0xf58] sm:$0xff] }
 0x981   :  { %9062 = vmatprep.subr.bf16.mxu1 %v9061_v56  ;;  %v9097_v56 = vpack.c.bf16 %v7634_v62, %v7632_v40  ;;  %v7745_v62 = vld [vmem:[#allocation17 + $0xf40] sm:$0xff] }
 0x983   :  { %7509 = vmatmul.mubr.f32.vlgmr.msra.gmra.mrb[0].mxu1 %v7442_v51  ;;  %v7642_v51 = vld [vmem:[#allocation17 + $0xe78] sm:$0xff] }
 0x984   :  { %9064 = vmatpush1.bf16.msra.mxu1 %v9063_v11  ;;  %7617 = vmatprep.mubr.f32.mxu1 %v14962_v32  ;;  %v9099_v11 = vpack.c.bf16 %v7633_v23, %v7631_v4  ;;  %v9105_v48 = vpack.c.bf16 %v7642_v51, %v7640_v61  ;;  %v9135_v4 = vpack.c.bf16 %v7747_v27, %v7745_v62  ;;  %v7760_v61 = vld [vmem:[#allocation17 + $0xfb8] sm:$0xff]  ;;  %v7923_v27 = vld [vmem:[%s14941_s10 + $0xd8] sm:$0xff] }
 0x985   :  { %9066 = vmatprep.subr.bf16.mxu1 %v9065_v58  ;;  %v9101_v58 = vpack.c.bf16 %v7638_v49, %v7636_v9  ;;  %v7751_v9 = vld [vmem:[#allocation17 + $0xf70] sm:$0xff]  ;;  %v7754_v49 = vld [vmem:[#allocation17 + $0xf88] sm:$0xff]  ;;  %v7922_v62 = vld [vmem:[%s14941_s10 + $0xd0] sm:$0xff] }
 0x988   :  { %9068 = vmatpush1.bf16.msra.mxu1 %v9067_v59  ;;  %v7639_v59 = vld [vmem:[#allocation17 + $0xe60] sm:$0xff] }
 0x989   :  { %9070 = vmatprep.subr.bf16.mxu1 %v9069_v30  ;;  %v7641_v30 = vld [vmem:[#allocation17 + $0xe70] sm:$0xff] }
 0x98a   :  { %v9107_v24 = vpack.c.bf16 %v7641_v30, %v7639_v59  ;;  %v7759_v59 = vld [vmem:[#allocation17 + $0xfb0] sm:$0xff]  ;;  %v7762_v30 = vld [vmem:[#allocation17 + $0xfc8] sm:$0xff] }
 0x98c   :  { %9072 = vmatpush1.bf16.msra.mxu1 %v9071_v54  ;;  %v7645_v54 = vld [vmem:[#allocation17 + $0xe90] sm:$0xff] }
 0x98d   :  { %9074 = vmatprep.subr.bf16.mxu1 %v9073_v52  ;;  %v7648_v52 = vld [vmem:[#allocation17 + $0xea8] sm:$0xff]  ;;  %v9111_v22 = vpack.c.bf16 %v7645_v54, %v7643_v0  ;;  %v7763_v0 = vld [vmem:[#allocation17 + $0xfd0] sm:$0xff] }
 0x98e   :  { %v9113_v14 = vpack.c.bf16 %v7650_v39, %v7648_v52  ;;  %v7766_v54 = vld [vmem:[#allocation17 + $0xfe8] sm:$0xff]  ;;  %v7768_v52 = vld [vmem:[#allocation17 + $0xff8] sm:$0xff] }
 0x990   :  { %9076 = vmatpush1.bf16.msra.mxu1 %v9075_v36  ;;  %v7649_v36 = vld [vmem:[#allocation17 + $0xeb0] sm:$0xff] }
 0x991   :  { %9078 = vmatprep.subr.bf16.mxu1 %v9077_v47  ;;  %v7652_v47 = vld [vmem:[#allocation17 + $0xec8] sm:$0xff]  ;;  %v9115_v26 = vpack.c.bf16 %v7649_v36, %v7647_v25  ;;  %v7767_v25 = vld [vmem:[#allocation17 + $0xff0] sm:$0xff] }
 0x992   :  { %v9117_v8 = vpack.c.bf16 %v7654_v35, %v7652_v47  ;;  %v7912_v47 = vld [vmem:[%s14941_s10 + $0x80] sm:$0xff]  ;;  %v7913_v35 = vld [vmem:[%s14941_s10 + $0x88] sm:$0xff] }
 0x994   :  { %9080 = vmatpush1.bf16.msra.mxu1 %v9079_v21  ;;  %v7653_v21 = vld [vmem:[#allocation17 + $0xed0] sm:$0xff] }
 0x995   :  { %9082 = vmatprep.subr.bf16.mxu1 %v9081_v7  ;;  %v7656_v7 = vld [vmem:[#allocation17 + $0xee8] sm:$0xff]  ;;  %v9119_v2 = vpack.c.bf16 %v7653_v21, %v7651_v55  ;;  %v7897_v55 = vld [vmem:[%s14941_s10 + $0x8] sm:$0xff]  ;;  %v7915_v21 = vld [vmem:[%s14941_s10 + $0x98] sm:$0xff] }
 0x996   :  { %v9121_v3 = vpack.c.bf16 %v7658_v46, %v7656_v7 }
 0x998   :  { %9084 = vmatpush1.bf16.msra.mxu1 %v9083_v41  ;;  %v7657_v41 = vld [vmem:[#allocation17 + $0xef0] sm:$0xff] }
 0x999   :  { %9086 = vmatprep.subr.bf16.mxu1 %v9085_v28  ;;  %v7738_v28 = vld [vmem:[#allocation17 + $0xf08] sm:$0xff]  ;;  %v9123_v57 = vpack.c.bf16 %v7657_v41, %v7655_v19  ;;  %v7917_v41 = vld [vmem:[%s14941_s10 + $0xa8] sm:$0xff] }
 0x99a   :  { %v9125_v43 = vpack.c.bf16 %v7740_v37, %v7738_v28  ;;  %v7916_v19 = vld [vmem:[%s14941_s10 + $0xa0] sm:$0xff] }
 0x99b   :  { %v9165_v37 = vpack.c.bf16 %v7917_v41, %v7916_v19 }
 0x99c   :  { %9088 = vmatpush1.bf16.msra.mxu1 %v9087_v13  ;;  %v7739_v13 = vld [vmem:[#allocation17 + $0xf10] sm:$0xff] }
 0x99d   :  { %9090 = vmatprep.subr.bf16.mxu1 %v9089_v16  ;;  %v7742_v16 = vld [vmem:[#allocation17 + $0xf28] sm:$0xff]  ;;  %v9127_v20 = vpack.c.bf16 %v7739_v13, %v7737_v17  ;;  %v7918_v17 = vld [vmem:[%s14941_s10 + $0xb0] sm:$0xff]  ;;  %v7919_v13 = vld [vmem:[%s14941_s10 + $0xb8] sm:$0xff] }
 0x99e   :  { %v9129_v15 = vpack.c.bf16 %v7744_v10, %v7742_v16  ;;  %v9169_v10 = vpack.c.bf16 %v7919_v13, %v7918_v17 }
 0x9a0   :  { %9092 = vmatpush1.bf16.msra.mxu1 %v9091_v33  ;;  %v7743_v33 = vld [vmem:[#allocation17 + $0xf30] sm:$0xff] }
 0x9a1   :  { %9094 = vmatprep.subr.bf16.mxu1 %v9093_v38  ;;  %v7746_v38 = vld [vmem:[#allocation17 + $0xf48] sm:$0xff]  ;;  %v9131_v5 = vpack.c.bf16 %v7743_v33, %v7741_v18  ;;  %v7921_v33 = vld [vmem:[%s14941_s10 + $0xc8] sm:$0xff] }
 0x9a2   :  { %v9133_v40 = vpack.c.bf16 %v7748_v1, %v7746_v38  ;;  %v7920_v18 = vld [vmem:[%s14941_s10 + $0xc0] sm:$0xff] }
 0x9a3   :  { %7618 = vmatmul.mubr.f32.vlgmr.msra.gmra.mrb[0].mxu1 %v7551_v42  ;;  %v7749_v42 = vld [vmem:[#allocation17 + $0xf60] sm:$0xff]  ;;  %v9173_v1 = vpack.c.bf16 %v7921_v33, %v7920_v18 }
 0x9a4   :  { %9096 = vmatpush1.bf16.msra.mxu1 %v9095_v45  ;;  %7727 = vmatprep.mubr.f32.mxu1 %v14962_v32  ;;  %v7750_v45 = vld [vmem:[#allocation17 + $0xf68] sm:$0xff]  ;;  %v8132_v33 = vld [vmem:[#allocation21] ss:$0 sm:$0xff] }
 0x9a5   :  { %9098 = vmatprep.subr.bf16.mxu1 %v9097_v56  ;;  %v7752_v56 = vld [vmem:[#allocation17 + $0xf78] sm:$0xff] }
 0x9a6   :  { %v9137_v23 = vpack.c.bf16 %v7752_v56, %v7750_v45  ;;  %v9177_v56 = vpack.c.bf16 %v7923_v27, %v7922_v62 }
 0x9a8   :  { %9100 = vmatpush1.bf16.msra.mxu1 %v9099_v11  ;;  %v7756_v11 = vld [vmem:[#allocation17 + $0xf98] sm:$0xff] }
 0x9a9   :  { %9102 = vmatprep.subr.bf16.mxu1 %v9101_v58  ;;  %v9141_v58 = vpack.c.bf16 %v7756_v11, %v7754_v49 }
 0x9ac   :  { %9104 = vmatpush1.bf16.msra.mxu1 %v9103_v6  ;;  %v9145_v6 = vpack.c.bf16 %v7760_v61, %v7758_v44 }
 0x9ad   :  { %9106 = vmatprep.subr.bf16.mxu1 %v9105_v48  ;;  %v7757_v48 = vld [vmem:[#allocation17 + $0xfa0] sm:$0xff] }
 0x9ae   :  { %v9147_v63 = vpack.c.bf16 %v7759_v59, %v7757_v48  ;;  %v7848_v59 = vlaneseq }
 0x9b0   :  { %9108 = vmatpush1.bf16.msra.mxu1 %v9107_v24  ;;  %v9149_v24 = vpack.c.bf16 %v7764_v50, %v7762_v30  ;;  %v7849_v30 = vshrl.u32 %v7848_v59, 7 }
 0x9b1   :  { %9110 = vmatprep.subr.bf16.mxu1 %v9109_v29  ;;  %v7761_v29 = vld [vmem:[#allocation17 + $0xfc0] sm:$0xff] }
 0x9b2   :  { %v9151_v39 = vpack.c.bf16 %v7763_v0, %v7761_v29  ;;  %v7850_v50 = vsub.s32 0, %v7849_v30  ;;  %v7860_v29 = vld [vmem:[#allocation20] sm:$0x3] }
 0x9b4   :  { %9112 = vmatpush1.bf16.msra.mxu1 %v9111_v22  ;;  %v9153_v22 = vpack.c.bf16 %v7768_v52, %v7766_v54 }
 0x9b5   :  { %9114 = vmatprep.subr.bf16.mxu1 %v9113_v14  ;;  %v7765_v14 = vld [vmem:[#allocation17 + $0xfe0] sm:$0xff] }
 0x9b6   :  { %v9155_v36 = vpack.c.bf16 %v7767_v25, %v7765_v14 }
 0x9b8   :  { %9116 = vmatpush1.bf16.msra.mxu1 %v9115_v26  ;;  %v7896_v26 = vld [vmem:[%s14941_s10] sm:$0xff] }
 0x9b9   :  { %9118 = vmatprep.subr.bf16.mxu1 %v9117_v8  ;;  %v9157_v8 = vpack.c.bf16 %v7913_v35, %v7912_v47  ;;  %v9159_v7 = vpack.c.bf16 %v7897_v55, %v7896_v26 }
 0x9bb   :  { %9158 = vmatprep.subr.bf16.mxu0 %v9157_v8 }
 0x9bc   :  { %9120 = vmatpush1.bf16.msra.mxu1 %v9119_v2  ;;  %v7898_v2 = vld [vmem:[%s14941_s10 + $0x10] sm:$0xff]  ;;  %9160 = vmatpush3.bf16.msra.mxu0 %v9159_v7 }
 0x9bd   :  { %9122 = vmatprep.subr.bf16.mxu1 %v9121_v3  ;;  %v7899_v3 = vld [vmem:[%s14941_s10 + $0x18] sm:$0xff] }
 0x9be   :  { %v9163_v28 = vpack.c.bf16 %v7899_v3, %v7898_v2 }
 0x9c0   :  { %9124 = vmatpush1.bf16.msra.mxu1 %v9123_v57  ;;  %v7900_v57 = vld [vmem:[%s14941_s10 + $0x20] sm:$0xff] }
 0x9c1   :  { %9126 = vmatprep.subr.bf16.mxu1 %v9125_v43  ;;  %v7901_v43 = vld [vmem:[%s14941_s10 + $0x28] sm:$0xff] }
 0x9c2   :  { %v9167_v16 = vpack.c.bf16 %v7901_v43, %v7900_v57 }
 0x9c3   :  { %7728 = vmatmul.mubr.f32.vlgmr.msra.gmra.mrb[0].mxu1 %v14774_v12  ;;  %v9139_v12 = vpack.c.bf16 %v7751_v9, %v7749_v42  ;;  %v7924_v42 = vld [vmem:[%s14941_s10 + $0xe0] sm:$0xff]  ;;  %v7925_v9 = vld [vmem:[%s14941_s10 + $0xe8] sm:$0xff] }
 0x9c4   :  { %9128 = vmatpush1.bf16.msra.mxu1 %v9127_v20  ;;  %7837 = vmatprep.mubr.f32.mxu1 %v14962_v32  ;;  %v7755_v32 = vld [vmem:[#allocation17 + $0xf90] sm:$0xff]  ;;  %v7902_v20 = vld [vmem:[%s14941_s10 + $0x30] sm:$0xff]  ;;  %v9181_v11 = vpack.c.bf16 %v7925_v9, %v7924_v42 }
 0x9c5   :  { %9130 = vmatprep.subr.bf16.mxu1 %v9129_v15  ;;  %v9143_v51 = vpack.c.bf16 %v7755_v32, %v7753_v34  ;;  %v7903_v15 = vld [vmem:[%s14941_s10 + $0x38] sm:$0xff]  ;;  %v7926_v34 = vld [vmem:[%s14941_s10 + $0xf0] sm:$0xff] }
 0x9c6   :  { %v9171_v38 = vpack.c.bf16 %v7903_v15, %v7902_v20  ;;  %v7927_v32 = vld [vmem:[%s14941_s10 + $0xf8] sm:$0xff] }
 0x9c7   :  { %v9185_v61 = vpack.c.bf16 %v7927_v32, %v7926_v34 }
 0x9c8   :  { %9132 = vmatpush1.bf16.msra.mxu1 %v9131_v5  ;;  %v7904_v5 = vld [vmem:[%s14941_s10 + $0x40] sm:$0xff] }
 0x9c9   :  { %9134 = vmatprep.subr.bf16.mxu1 %v9133_v40  ;;  %v7905_v40 = vld [vmem:[%s14941_s10 + $0x48] sm:$0xff] }
 0x9ca   :  { %v9175_v45 = vpack.c.bf16 %v7905_v40, %v7904_v5 }
 0x9cc   :  { %9136 = vmatpush1.bf16.msra.mxu1 %v9135_v4  ;;  %v7906_v4 = vld [vmem:[%s14941_s10 + $0x50] sm:$0xff] }
 0x9cd   :  { %9138 = vmatprep.subr.bf16.mxu1 %v9137_v23  ;;  %v7907_v23 = vld [vmem:[%s14941_s10 + $0x58] sm:$0xff] }
 0x9ce   :  { %v9179_v49 = vpack.c.bf16 %v7907_v23, %v7906_v4 }
 0x9d0   :  { %9140 = vmatpush1.bf16.msra.mxu1 %v9139_v12  ;;  %v7908_v12 = vld [vmem:[%s14941_s10 + $0x60] sm:$0xff] }
 0x9d1   :  { %9142 = vmatprep.subr.bf16.mxu1 %v9141_v58  ;;  %v7909_v58 = vld [vmem:[%s14941_s10 + $0x68] sm:$0xff] }
 0x9d2   :  { %v9183_v44 = vpack.c.bf16 %v7909_v58, %v7908_v12 }
 0x9d4   :  { %9144 = vmatpush1.bf16.msra.mxu1 %v9143_v51  ;;  %v7910_v51 = vld [vmem:[%s14941_s10 + $0x70] sm:$0xff] }
 0x9d5   :  { %9146 = vmatprep.subr.bf16.mxu1 %v9145_v6  ;;  %v7911_v6 = vld [vmem:[%s14941_s10 + $0x78] sm:$0xff] }
 0x9d6   :  { %v9187_v48 = vpack.c.bf16 %v7911_v6, %v7910_v51 }
 0x9d8   :  { %9148 = vmatpush1.bf16.msra.mxu1 %v9147_v63  ;;  %v7846_v63 = vld [vmem:[#allocation18] sm:$0x3] }
 0x9d9   :  { %9150 = vmatprep.subr.bf16.mxu1 %v9149_v24  ;;  %v7854_v24 = vsub.s32 1, %v7849_v30  ;;  %v7851_v0 = vrot.slane %v7846_v63, %v7850_v50 }
 0x9db   :  { %v7855_v52 = vrot.slane %v7846_v63, %v7854_v24 }
 0x9dc   :  { %9152 = vmatpush1.bf16.msra.mxu1 %v9151_v39 }
 0x9dd   :  { %9154 = vmatprep.subr.bf16.mxu1 %v9153_v22  ;;  %v7865_v22 = vrot.slane %v7860_v29, %v7850_v50 }
 0x9e0   :  { %9156 = vmatpush1.bf16.msra.mxu1 %v9155_v36  ;;  %v7869_v36 = vrot.slane %v7860_v29, %v7854_v24 }
 0x9e3   :  { %7838 = vmatmul.mubr.f32.vlgmr.msra.gmra.mrb[0].mxu1 %v14777_v31  ;;  %v7914_v31 = vld [vmem:[%s14941_s10 + $0x90] sm:$0xff]  ;;  %s10036_s10 = smov [#allocation24]  }
 0x9e4   :  { %v9161_v46 = vpack.c.bf16 %v7915_v21, %v7914_v31  ;;  %s8033_s30 = sshll.u32 %s10036_s10, 4  ;;  %s8034_s30 = int_to_ptr.vmem [resolvable:$true] %s8033_s30 }
 0x9e5   :  { %s9975_s4 = scalar_lea.vmem %s8034_s30, 32  ;;  %p9980_p5 = scmp.lt.s32.totalorder %s8034_s30, %s8034_s30 }
 0x9e6   :  { %9162 = vmatprep.subr.bf16.mxu0 %v9161_v46  ;;  %p9976_p4 = scmp.ne.s32.totalorder %s8034_s30, %s9975_s4  ;;  %p9981_p6 = scmp.lt.s32.totalorder %s9975_s4, %s9975_s4 }
 0x9e7   :  { %9164 = vmatpush3.bf16.msra.mxu0 %v9163_v28 }
 0x9e8   :  { %9166 = vmatprep.subr.bf16.mxu0 %v9165_v37  ;;  %p9982_p7 = por %p9981_p6, %p9980_p5 }
 0x9ea   :  { %p9983_p8 = pnand %p9982_p7, %p9976_p4 }
 0x9eb   :  { %9168 = vmatpush3.bf16.msra.mxu0 %v9167_v16 }
 0x9ec   :  { %9170 = vmatprep.subr.bf16.mxu0 %v9169_v10 }
 0x9ef   :  { %9172 = vmatpush3.bf16.msra.mxu0 %v9171_v38 }
 0x9f0   :  { %9174 = vmatprep.subr.bf16.mxu0 %v9173_v1  ;;  %v8133_v1 = vld [vmem:[#allocation23] ss:$0 sm:$0xff] }
 0x9f3   :  { %9176 = vmatpush3.bf16.msra.mxu0 %v9175_v45 }
 0x9f4   :  { %9178 = vmatprep.subr.bf16.mxu0 %v9177_v56 }
 0x9f7   :  { %9180 = vmatpush3.bf16.msra.mxu0 %v9179_v49 }
 0x9f8   :  { %9182 = vmatprep.subr.bf16.mxu0 %v9181_v11 }
 0x9fb   :  { %9184 = vmatpush3.bf16.msra.mxu0 %v9183_v44 }
 0x9fc   :  { %9186 = vmatprep.subr.bf16.mxu0 %v9185_v61 }
 0x9ff   :  { %9188 = vmatpush3.bf16.msra.mxu0 %v9187_v48 }
 0xab6   :  { %v7839_v54 = vpop.f32.mrb[0].mxu1 }
 0xab7   :  { %v9189_v39 = vadd.f32 %v7839_v54, %v14806_v53  ;;  %v7841_v14 = vpop.f32.mrb[1].mxu1 }
 0xab8   :  { %v9190_v25 = vadd.f32 %v7841_v14, %v14808_v60 }
 0xab9   :  { %v7858_v47 = vmul.f32 %v9189_v39, %v7851_v0 }
 0xaba   :  { %v7859_v35 = vmul.f32 %v9190_v25, %v7855_v52 }
 0xabb   :  { %v7872_v26 = vadd.f32 %v7865_v22, %v7858_v47 }
 0xabc   :  { %v7873_v8 = vadd.f32 %v7869_v36, %v7859_v35 }
 0xabd   :  { %v7874_v55 = vmin.f32 %v7872_v26, 20.0  ;;  %vm7892_vm15 = vcmp.gt.f32.partialorder %v7872_v26, 20.0 }
 0xabe   :  { %v7875_v31 = vmin.f32 %v7873_v8, 20.0  ;;  %vm7893_vm3 = vcmp.gt.f32.partialorder %v7873_v8, 20.0 }
 0xabf   :  { %v7876_v21 = vmul.f32 1.442695, %v7874_v55 }
 0xac0   :  { %v7878_v7 = vmul.f32 1.442695, %v7875_v31 }
 0xac1   :  { %9665 = vpow2.f32 %v7876_v21 }
 0xac2   :  { %9667 = vpow2.f32 %v7878_v7 }
 0xacb   :  { %v9666_v46 = vpop.eup %9665 }
 0xacc   :  { %v9668_v2 = vpop.eup %9667  ;;  %v7880_v3 = vadd.f32 2.0, %v9666_v46 }
 0xacd   :  { %v7881_v19 = vadd.f32 2.0, %v9668_v2 }
 0xace   :  { %v7882_v53 = vmul.f32 %v9666_v46, %v7880_v3 }
 0xacf   :  { %v7883_v41 = vmul.f32 %v9668_v2, %v7881_v19 }
 0xad0   :  { %v7886_v28 = vadd.f32 2.0, %v7882_v53  ;;  %v7884_v60 = vmul.f32 %v7882_v53, %v7872_v26 }
 0xad1   :  { %v7887_v37 = vadd.f32 2.0, %v7883_v41  ;;  %v7885_v43 = vmul.f32 %v7883_v41, %v7873_v8 }
 0xad2   :  { %9669 = vrcp.f32 %v7886_v28 }
 0xad3   :  { %9671 = vrcp.f32 %v7887_v37 }
 0xadc   :  { %v9670_v57 = vpop.eup %9669 }
 0xadd   :  { %v9672_v17 = vpop.eup %9671  ;;  %v7890_v13 = vmul.f32 %v9670_v57, %v7884_v60 }
 0xade   :  { %v7891_v16 = vmul.f32 %v9672_v17, %v7885_v43 }
 0xadf   :  { %v7894_v20 = vsel %vm7892_vm15, %v7872_v26, %v7890_v13 }
 0xae0   :  { %v7895_v10 = vsel %vm7893_vm3, %v7873_v8, %v7891_v16 }
 0xae1   :  { %7992 = vmatprep.mubr.f32.mxu0 %v7895_v10 }
 0xae2   :  { %7993 = vmatmul.mubr.f32.vlgmr.msra.gmra.mrb[146].mxu0 %v7894_v20 }
 0xbb5   :  { %v8416_v15 = vpop.f32.mrb[146].mxu0 }
 0xbb6   :  { %v8417_v18 = vpop.f32.mrb[147].mxu0 }
 0xbb7   :  { %v8418_v38 = vadd.f32 %v8417_v18, %v8416_v15 }
 0xbb9   :  { %v8005_v5 = vmul.f32 %v8418_v38, %v8132_v33 }
 0xbbb   :  { %v8013_v40 = vadd.f32 %v8133_v1, %v8005_v5 }
 0xbbd   :  { %v8014_v62 = vmin.f32 %v8013_v40, 20.0  ;;  %vm8023_vm12 = vcmp.gt.f32.partialorder %v8013_v40, 20.0 }
 0xbbf   :  { %v8015_v27 = vmul.f32 1.442695, %v8014_v62 }
 0xbc1   :  { %9673 = vpow2.f32 %v8015_v27 }
 0xbcb   :  { %v9674_v45 = vpop.eup %9673 }
 0xbcc   :  { %v8017_v56 = vadd.f32 2.0, %v9674_v45 }
 0xbce   :  { %v8018_v4 = vmul.f32 %v9674_v45, %v8017_v56 }
 0xbd0   :  { %v8020_v23 = vadd.f32 2.0, %v8018_v4  ;;  %v8019_v42 = vmul.f32 %v8018_v4, %v8013_v40 }
 0xbd2   :  { %9675 = vrcp.f32 %v8020_v23 }
 0xbdc   :  { %v9676_v9 = vpop.eup %9675 }
 0xbdd   :  { %v8022_v49 = vmul.f32 %v9676_v9, %v8019_v42 }
 0xbdf   :  { %v8024_v11 = vsel %vm8023_vm12, %v8013_v40, %v8022_v49 }
 0xbe0   :  { %8026 = vst.msk [vmem:[#allocation24] sm:$0x3] %vm8025_vm11, %v8024_v11 }
 0xbe1   :  { %9986 = shalt.err (!%p9983_p8)
}
 0xbe2   :  { %s9987_s27 = scalar_lea.hbm %s14944_s13, 32 }
 0xbe3   :  { %p9988_p9 = scmp.ne.s32.totalorder %s14944_s13, %s9987_s27  ;;  %p9991_p10 = scmp.lt.u32.totalorder %s9987_s27, %s14944_s13 }
 0xbe5   :  { %p9993_p11 = pnand %p9991_p10, %p9988_p9 }
 0xbe7   :  { %9996 = shalt.err (!%p9993_p11)
}
 0xbe8   :  { %8036 = dma.vmem_to_hbm [thread:$0]  %s8034_s30, 32, %s14944_s13, [#allocation8]  }
 0xbe9   :  { %10009 = dma.done.wait [#allocation8], 32  }
 0xbea   :  { %10010 = vsyncadd [#allocation8], 4294967264 }
 0xbeb   :  { %8040 = vsyncpa [#allocation7], 1 }
 0xbec   :  { %8041 = vsyncpa [#allocation10], 1 }
 0xbed   :  { %8042 = vsyncpa [#allocation13], 1 }
 0xbee   :  { %8043 = vsyncpa [#allocation16], 1 }
 0xbef   :  { %8044 = vsyncpa [#allocation19], 1 }
 0xbf0   :  { %8045 = vsyncpa [#allocation22], 1 }
 0xbf1   :  { %8046 = vsyncpa [#allocation8], 1 }

</bundles_post_ra>
